<compile_context>
chip_gen: v6e
topology: v6e:2x2x1
jax: 0.10.0
libtpu: 0.0.40
codegen_flags: <defaults>
</compile_context>

<pallas_src>
import jax
import jax.numpy as jnp
from jax.experimental import pallas as pl
from jax.experimental.pallas import tpu as pltpu

VMEM = pltpu.MemorySpace.VMEM
# Reference-side matmul precision; the in-kernel f32 matmul is full precision, so pinning
# the pure-JAX reference to HIGHEST keeps the comparison meaningful.
REF_PRECISION = jax.lax.Precision.HIGHEST


# ----------------------------------------------------------------------------
# small spec / sizing helpers
# ----------------------------------------------------------------------------
def _vspec():
    # whole-array block resident in VMEM (grid-less kernel 1 operands are all tiny)
    return pl.BlockSpec(memory_space=VMEM)


def _const_spec(shape):
    # full-array block with a constant block index -> stays VMEM-resident across the grid
    zeros = (0,) * len(shape)
    return pl.BlockSpec(tuple(shape), lambda b, idx_ref: zeros)


def _gather_spec(d2, d3):
    # (1, 1, d2, d3) block whose S-axis block index is the per-batch argmax row taken from
    # the scalar-prefetch SMEM ref -> data-dependent DMA gather, only the selected row moves.
    return pl.BlockSpec((1, 1, d2, d3), lambda b, idx_ref: (b, idx_ref[b], 0, 0))


def _dot(a, b):
    return jnp.dot(a, b, preferred_element_type=jnp.float32)


def _nbytes(x):
    return int(x.size) * x.dtype.itemsize


def _vmem_limit(resident_bytes):
    # Explicit scoped-VMEM budget (perf review): 2x the resident set for double-buffer /
    # relayout headroom + 4 MiB slack, clamped to stay valid from v5e (16 MiB default
    # scoped) through v7x (64 MiB physical).
    return int(min(max(2 * resident_bytes + (4 << 20), 16 << 20), 48 << 20))


# ----------------------------------------------------------------------------
# in-kernel helpers
# ----------------------------------------------------------------------------
def _layernorm(x, gamma, beta, eps):
    mean = jnp.mean(x, axis=-1, keepdims=True)
    var = jnp.mean(jnp.square(x - mean), axis=-1, keepdims=True)
    return (x - mean) * jax.lax.rsqrt(var + eps) * gamma + beta


def _lstm(x_cat, c_prev, w, b, r):
    """Fused LSTMCell: one (B,K)@(K,4R) matmul; PyTorch gate order i,f,g,o.
    Activations are applied per 128-lane-aligned slice (sigmoid on i|f and on o, tanh on g)
    instead of a whole-vreg tanh+sigmoid+select -> ~half the EUP transcendental count."""
    gates = _dot(x_cat, w) + b                                   # (B, 4R)
    i_f = jax.nn.sigmoid(gates[:, :2 * r])
    g = jnp.tanh(gates[:, 2 * r:3 * r])
    o = jax.nn.sigmoid(gates[:, 3 * r:])
    i, f = i_f[:, :r], i_f[:, r:]
    c_new = f * c_prev + i * g
    return o * jnp.tanh(c_new), c_new


def _masked_softmax_attend(logits, mask, feats):
    """softmax -> mask -> renormalize -> weighted sum (matches the PyTorch Attention).
    Both normalizations use the approximate EUP reciprocal (free issue slot); the first
    reciprocal's error cancels in the renormalization, so the net error is one approx-rcp."""
    logits = logits - jnp.max(logits, axis=-1, keepdims=True)
    e = jnp.exp(logits)
    w = e * pl.reciprocal(jnp.sum(e, axis=-1, keepdims=True), approx=True)
    w = w * mask
    w = w * pl.reciprocal(jnp.sum(w, axis=-1, keepdims=True) + 1e-8, approx=True)
    res = jnp.sum(w[:, :, None] * feats, axis=1)
    return res, w


# ----------------------------------------------------------------------------
# kernel 1: attention LSTM + attention-1 + argmax + (tiny) mask gather
# ----------------------------------------------------------------------------
def _attlstm_attn1_kernel(
        xt_ref, fc_ref, att_feats_ref, p_att_ref, mask1_ref,
        pos_masks_ref, sem_masks_ref, h0_ref, c0_ref,
        w_att_lstm_ref, b_att_lstm_ref, w_h2att_ref, b_h2att_ref, w_alpha1_ref,
        h_att_ref, c_att_ref, att1_ref, att_h23_ref, mask2_ref, mask3_ref, idx_ref):
    _, R = fc_ref.shape
    H = w_alpha1_ref.shape[1]
    S = mask1_ref.shape[1]

    xt = xt_ref[...]
    fc = fc_ref[...]
    h_top = h0_ref[1]                                       # state[0][-1]
    h_cell0, c_cell0 = h0_ref[0], c0_ref[0]

    # ---- attention LSTM: single (B, 3R+E) @ (3R+E, 4R) matmul ----
    x_att = jnp.concatenate([h_top, fc, xt, h_cell0], axis=1)
    h_att, c_att = _lstm(x_att, c_cell0, w_att_lstm_ref[...], b_att_lstm_ref[...], R)

    # ---- all three h2att projections in one (B,R)@(R,3H) matmul ----
    att_h_all = _dot(h_att, w_h2att_ref[...]) + b_h2att_ref[...]          # (B, 3H)

    # ---- attention 1 over the original att_feats ----
    mask1 = mask1_ref[...]
    dot1 = jnp.tanh(p_att_ref[...] + att_h_all[:, None, 0:H])             # (B, S, H)
    logits1 = jnp.sum(dot1 * w_alpha1_ref[...][None, :, :], axis=-1)      # (B, S)
    att1, _ = _masked_softmax_attend(logits1, mask1, att_feats_ref[...])

    # ---- argmax on the MASKED LOGITS (monotone-equivalent to argmax(weight1), first
    #      occurrence tie-break like torch.max, and numerically stabler than comparing
    #      the renormalized softmax weights). All-masked rows resolve to index 0. ----
    neg = jnp.float32(-1e30)
    mlog = jnp.where(mask1 > 0, logits1, neg)
    s_iota = jax.lax.broadcasted_iota(jnp.int32, mlog.shape, 1)
    maxv = jnp.max(mlog, axis=-1, keepdims=True)
    idx = jnp.min(jnp.where(mlog == maxv, s_iota, S), axis=-1)            # (B,)

    # ---- the tiny attention-2/3 masks are gathered here with an exact one-hot select, so
    #      kernel 2 only DMA-gathers the big (B,S,S2,R|H) feature tensors. ----
    onehot = (s_iota == idx[:, None]).astype(jnp.float32)                 # (B, S)
    mask2_ref[...] = jnp.sum(pos_masks_ref[...] * onehot[:, :, None], axis=1)
    mask3_ref[...] = jnp.sum(sem_masks_ref[...] * onehot[:, :, None], axis=1)

    h_att_ref[...] = h_att
    c_att_ref[...] = c_att
    att1_ref[...] = att1
    att_h23_ref[...] = att_h_all[:, H:]
    idx_ref[...] = idx[None, :]


# ----------------------------------------------------------------------------
# kernel 2: data-dependent DMA gather + attention-2/3 + gates/LN/att23 + language LSTM
# ----------------------------------------------------------------------------
def _gather_attn23_lang_kernel(
        idx_sm_ref,                                # scalar prefetch (used by index_maps)
        pos_rel_ref, p_pos_rel_ref, sem_rel_ref, p_sem_rel_ref,     # gathered blocks
        xt_ref, h_att_ref, att1_ref, att_h23_ref, mask2_ref, mask3_ref,
        h1_ref, c1_ref,
        w_alpha23_ref, w_gates_ref, b_gates_ref,
        ln_gamma_ref, ln_beta_ref, w_att23_ref,
        w_lang_lstm_ref, b_lang_lstm_ref,
        h_lang_ref, c_lang_ref,
        pos_buf, ppos_buf, sem_buf, psem_buf, g12_buf):
    b = pl.program_id(0)
    _, R = h_att_ref.shape
    H = w_alpha23_ref.shape[1]

    # Step b: the BlockSpec DMA already gathered row idx[b]; stash it in the persistent
    # VMEM accumulators so the last step can run one batched computation (good MXU M=B
    # shapes and lane-dense output stores instead of B M=1 matmuls).
    pos_buf[b] = pos_rel_ref[0, 0]
    ppos_buf[b] = p_pos_rel_ref[0, 0]
    sem_buf[b] = sem_rel_ref[0, 0]
    psem_buf[b] = p_sem_rel_ref[0, 0]

    # Overlap: the gate matmul depends only on resident inputs, so run it on step 0 while
    # the gather DMAs for steps 1..B-1 are still in flight.
    @pl.when(b == 0)
    def _():
        x_gate = jnp.concatenate([xt_ref[...], h_att_ref[...]], axis=1)   # (B, E+R)
        g12_buf[...] = jax.nn.sigmoid(_dot(x_gate, w_gates_ref[...]) + b_gates_ref[...])

    @pl.when(b == pl.num_programs(0) - 1)
    def _():
        h_att = h_att_ref[...]
        att1 = att1_ref[...]
        att_h2 = att_h23_ref[:, :H]
        att_h3 = att_h23_ref[:, H:]
        wa = w_alpha23_ref[...]                                           # (2, H)

        # ---- attention 2 / 3 over the gathered relation rows ----
        dot2 = jnp.tanh(ppos_buf[...] + att_h2[:, None, :])               # (B, S2, H)
        logits2 = jnp.sum(dot2 * wa[0:1, :][None, :, :], axis=-1)         # (B, S2)
        att2, _ = _masked_softmax_attend(logits2, mask2_ref[...], pos_buf[...])

        dot3 = jnp.tanh(psem_buf[...] + att_h3[:, None, :])
        logits3 = jnp.sum(dot3 * wa[1:2, :][None, :, :], axis=-1)
        att3, _ = _masked_softmax_attend(logits3, mask3_ref[...], sem_buf[...])

        # ---- gates (computed on step 0) + LayerNorms + att23 fusion ----
        g12 = g12_buf[...]
        g1, g2 = g12[:, :R], g12[:, R:]
        ln1 = _layernorm(g1 * att2, ln_gamma_ref[0:1, :], ln_beta_ref[0:1, :], 1e-6)
        ln2 = _layernorm((1.0 - g1) * att3, ln_gamma_ref[1:2, :], ln_beta_ref[1:2, :], 1e-6)

        att23 = _dot(jnp.concatenate([ln1, ln2], axis=1), w_att23_ref[...])
        # NOTE: `att = self.fusion_layer_norm(att23 + att1)` in the PyTorch source is
        # immediately overwritten (dead code), so it is intentionally skipped here.
        att = g2 * att1 + (1.0 - g2) * att23

        # ---- language LSTM: single (B, 3R) @ (3R, 4R) matmul ----
        x_lang = jnp.concatenate([att, h_att, h1_ref[...]], axis=1)
        h_lang, c_lang = _lstm(x_lang, c1_ref[...], w_lang_lstm_ref[...],
                               b_lang_lstm_ref[...], R)
        h_lang_ref[...] = h_lang
        c_lang_ref[...] = c_lang


# ----------------------------------------------------------------------------
# weight fusion (pure reshape/concat, done outside the kernels)
# ----------------------------------------------------------------------------
def _fuse_params(p):
    att, lang = p['att_lstm'], p['lang_lstm']
    w_alpha_all = jnp.concatenate([p['attn1']['w_alpha'], p['attn2']['w_alpha'],
                                   p['attn3']['w_alpha']], axis=0)             # (3, H)
    # TODO(synk): on v6e/v7x cast the fused weights to bf16 (keep f32 accumulation) to halve
    # weight HBM traffic / VMEM; kept f32 here for a tight correctness check on all chips.
    return dict(
        w_att_lstm=jnp.concatenate([att['w_ih'], att['w_hh']], axis=0),        # (3R+E, 4R)
        b_att_lstm=att['b'],
        w_lang_lstm=jnp.concatenate([lang['w_ih'], lang['w_hh']], axis=0),     # (3R, 4R)
        b_lang_lstm=lang['b'],
        w_h2att=jnp.concatenate([p['attn1']['w_h2att'], p['attn2']['w_h2att'],
                                 p['attn3']['w_h2att']], axis=1),              # (R, 3H)
        b_h2att=jnp.concatenate([p['attn1']['b_h2att'], p['attn2']['b_h2att'],
                                 p['attn3']['b_h2att']], axis=1),              # (1, 3H)
        w_alpha1=w_alpha_all[0:1],                                             # (1, H)
        w_alpha23=w_alpha_all[1:3],                                            # (2, H)
        # alpha_net bias shifts all logits equally -> softmax-invariant -> dropped.
        w_gates=jnp.concatenate(
            [jnp.concatenate([p['gate1']['wx'], p['gate1']['wh']], axis=0),
             jnp.concatenate([p['gate2']['wx'], p['gate2']['wh']], axis=0)],
            axis=1),                                                           # (E+R, 2R)
        b_gates=jnp.concatenate([p['gate1']['b'], p['gate2']['b']], axis=1),   # (1, 2R)
        ln_gamma=jnp.concatenate([p['ln1']['g'], p['ln2']['g']], axis=0),      # (2, R)
        ln_beta=jnp.concatenate([p['ln1']['b'], p['ln2']['b']], axis=0),       # (2, R)
        w_att23=jnp.concatenate([p['att23']['wa'], p['att23']['wb']], axis=0), # (2R, R)
    )


# ----------------------------------------------------------------------------
# full forward pass: two pallas_calls (the 2nd does the data-dependent DMA gather)
# ----------------------------------------------------------------------------
def updown_core_forward(params, xt, fc_feats, att_feats, p_att_feats, state,
                        att_masks,
                        position_relation_att_feats, p_position_relation_att_feats,
                        position_att_masks,
                        semantic_relation_att_feats, p_semantic_relation_att_feats,
                        semantic_att_masks):
    h_state, c_state = state                   # each (2, B, R)
    B, R = fc_feats.shape
    H = p_att_feats.shape[-1]
    S2 = position_att_masks.shape[2]
    fp = _fuse_params(params)
    # TODO(synk): in a real decode loop, hoist _fuse_params() and keep the fused weights
    # VMEM-resident across timesteps (constant index_map over a T grid axis or cross-call
    # prefetch), and alias (h_state, c_state) with the outputs via input_output_aliases.

    # ----- call 1: att_lstm + attention-1 + argmax + tiny mask gather (grid-less) -----
    k1_inputs = (xt, fc_feats, att_feats, p_att_feats, att_masks,
                 position_att_masks, semantic_att_masks, h_state, c_state,
                 fp['w_att_lstm'], fp['b_att_lstm'],
                 fp['w_h2att'], fp['b_h2att'], fp['w_alpha1'])
    k1_out_bytes = 4 * (3 * B * R + 2 * B * H + 2 * B * S2 + B)
    vmem1 = _vmem_limit(sum(_nbytes(a) for a in k1_inputs) + k1_out_bytes)

    h_att, c_att, att1, att_h23, mask2, mask3, idx2d = pl.pallas_call(
        _attlstm_attn1_kernel,
        out_shape=(jax.ShapeDtypeStruct((B, R), jnp.float32),
                   jax.ShapeDtypeStruct((B, R), jnp.float32),
                   jax.ShapeDtypeStruct((B, R), jnp.float32),
                   jax.ShapeDtypeStruct((B, 2 * H), jnp.float32),
                   jax.ShapeDtypeStruct((B, S2), jnp.float32),
                   jax.ShapeDtypeStruct((B, S2), jnp.float32),
                   jax.ShapeDtypeStruct((1, B), jnp.int32)),
        in_specs=[_vspec()] * len(k1_inputs),
        out_specs=tuple(_vspec() for _ in range(7)),
        compiler_params=pltpu.CompilerParams(vmem_limit_bytes=vmem1),
    )(*k1_inputs)

    idx = idx2d[0]                              # (B,) int32 -> scalar prefetch for call 2

    # ----- call 2: DMA-gather selected relation rows + attention-2/3 + gates + lang LSTM -----
    resident = (xt, h_att, att1, att_h23, mask2, mask3,
                h_state[1], c_state[1],
                fp['w_alpha23'], fp['w_gates'], fp['b_gates'],
                fp['ln_gamma'], fp['ln_beta'], fp['w_att23'],
                fp['w_lang_lstm'], fp['b_lang_lstm'])
    gathered_specs = [_gather_spec(S2, R), _gather_spec(S2, H),
                      _gather_spec(S2, R), _gather_spec(S2, H)]
    resident_specs = [_const_spec(a.shape) for a in resident]

    gathered_block_bytes = 2 * 2 * 4 * (S2 * R + S2 * H)       # pos+sem, double-buffered
    scratch_bytes = 4 * (2 * B * S2 * (R + H) + 2 * B * R)
    vmem2 = _vmem_limit(sum(_nbytes(a) for a in resident)
                        + gathered_block_bytes + scratch_bytes + 2 * 4 * B * R)

    grid_spec = pltpu.PrefetchScalarGridSpec(
        num_scalar_prefetch=1,
        grid=(B,),
        in_specs=gathered_specs + resident_specs,
        out_specs=(_const_spec((B, R)), _const_spec((B, R))),
        scratch_shapes=[pltpu.VMEM((B, S2, R), jnp.float32),
                        pltpu.VMEM((B, S2, H), jnp.float32),
                        pltpu.VMEM((B, S2, R), jnp.float32),
                        pltpu.VMEM((B, S2, H), jnp.float32),
                        pltpu.VMEM((B, 2 * R), jnp.float32)])

    # TODO(synk): on v7x, shard this batch axis across the two TensorCores (outer "parallel"
    # half-batch axis with per-core scratch) for ~2x on the compute-bound part.
    h_lang, c_lang = pl.pallas_call(
        _gather_attn23_lang_kernel,
        out_shape=(jax.ShapeDtypeStruct((B, R), jnp.float32),
                   jax.ShapeDtypeStruct((B, R), jnp.float32)),
        grid_spec=grid_spec,
        compiler_params=pltpu.CompilerParams(
            dimension_semantics=("arbitrary",),
            vmem_limit_bytes=vmem2),
    )(idx,
      position_relation_att_feats, p_position_relation_att_feats,
      semantic_relation_att_feats, p_semantic_relation_att_feats,
      *resident)

    h_new = jnp.stack([h_att, h_lang])
    c_new = jnp.stack([c_att, c_lang])
    # TODO(synk): F.dropout(drop_prob_lm, training=True) omitted; inference-mode identity.
    return h_lang, (h_new, c_new)


# ----------------------------------------------------------------------------
# Pure-JAX reference (for checking the fused kernels)
# ----------------------------------------------------------------------------
def _lstm_ref(x, h, c, w_ih, w_hh, b):
    r = h.shape[1]
    gates = (jnp.dot(x, w_ih, precision=REF_PRECISION)
             + jnp.dot(h, w_hh, precision=REF_PRECISION) + b)
    i = jax.nn.sigmoid(gates[:, :r])
    f = jax.nn.sigmoid(gates[:, r:2 * r])
    g = jnp.tanh(gates[:, 2 * r:3 * r])
    o = jax.nn.sigmoid(gates[:, 3 * r:])
    c_new = f * c + i * g
    return o * jnp.tanh(c_new), c_new


def _attention_ref(h, att_feats, p_att, mask, p):
    att_h = jnp.dot(h, p['w_h2att'], precision=REF_PRECISION) + p['b_h2att']
    dot = jnp.tanh(p_att + att_h[:, None, :])
    logits = jnp.sum(dot * p['w_alpha'][None, :, :], axis=-1) + p['b_alpha']
    w = jax.nn.softmax(logits, axis=1)
    w = w * mask
    w = w / (w.sum(1, keepdims=True) + 1e-8)
    res = jnp.sum(w[:, :, None] * att_feats, axis=1)
    return res, w


def _layernorm_ref(x, gamma, beta, eps):
    mean = jnp.mean(x, axis=-1, keepdims=True)
    var = jnp.mean((x - mean) ** 2, axis=-1, keepdims=True)
    return (x - mean) / jnp.sqrt(var + eps) * gamma + beta


def _forward_ref(params, xt, fc_feats, att_feats, p_att_feats, state, att_masks,
                 pos_rel, p_pos_rel, pos_masks, sem_rel, p_sem_rel, sem_masks):
    h_state, c_state = state
    prev_h = h_state[-1]
    att_lstm_input = jnp.concatenate([prev_h, fc_feats, xt], axis=1)
    pa = params['att_lstm']
    h_att, c_att = _lstm_ref(att_lstm_input, h_state[0], c_state[0],
                             pa['w_ih'], pa['w_hh'], pa['b'])
    att1, weight1 = _attention_ref(h_att, att_feats, p_att_feats, att_masks, params['attn1'])
    idx = jnp.argmax(weight1, axis=1)
    bidx = jnp.arange(att_feats.shape[0])
    att2, _ = _attention_ref(h_att, pos_rel[bidx, idx], p_pos_rel[bidx, idx],
                             pos_masks[bidx, idx], params['attn2'])
    att3, _ = _attention_ref(h_att, sem_rel[bidx, idx], p_sem_rel[bidx, idx],
                             sem_masks[bidx, idx], params['attn3'])
    g1 = jax.nn.sigmoid(jnp.dot(xt, params['gate1']['wx'], precision=REF_PRECISION)
                        + jnp.dot(h_att, params['gate1']['wh'], precision=REF_PRECISION)
                        + params['gate1']['b'])
    g2 = jax.nn.sigmoid(jnp.dot(xt, params['gate2']['wx'], precision=REF_PRECISION)
                        + jnp.dot(h_att, params['gate2']['wh'], precision=REF_PRECISION)
                        + params['gate2']['b'])
    ln1 = _layernorm_ref(g1 * att2, params['ln1']['g'], params['ln1']['b'], 1e-6)
    ln2 = _layernorm_ref((1.0 - g1) * att3, params['ln2']['g'], params['ln2']['b'], 1e-6)
    att23 = (jnp.dot(ln1, params['att23']['wa'], precision=REF_PRECISION)
             + jnp.dot(ln2, params['att23']['wb'], precision=REF_PRECISION))
    att = g2 * att1 + (1.0 - g2) * att23
    lang_lstm_input = jnp.concatenate([att, h_att], axis=1)
    pl_ = params['lang_lstm']
    h_lang, c_lang = _lstm_ref(lang_lstm_input, h_state[1], c_state[1],
                               pl_['w_ih'], pl_['w_hh'], pl_['b'])
    return h_lang, (jnp.stack([h_att, h_lang]), jnp.stack([c_att, c_lang]))


# ----------------------------------------------------------------------------
# Deterministic synthetic parameters
# ----------------------------------------------------------------------------
def init_params(key, E, R, H):
    keys = list(jax.random.split(key, 32))
    it = iter(keys)

    def w(shape, scale=0.1):
        return (scale * jax.random.normal(next(it), shape)).astype(jnp.float32)

    def attn_params():
        return dict(w_h2att=w((R, H)), b_h2att=w((1, H)),
                    w_alpha=w((1, H)), b_alpha=w((1, 1)))

    return {
        'att_lstm': dict(w_ih=w((E + 2 * R, 4 * R)), w_hh=w((R, 4 * R)), b=w((1, 4 * R))),
        'lang_lstm': dict(w_ih=w((2 * R, 4 * R)), w_hh=w((R, 4 * R)), b=w((1, 4 * R))),
        'attn1': attn_params(),
        'attn2': attn_params(),
        'attn3': attn_params(),
        'gate1': dict(wx=w((E, R)), wh=w((R, R)), b=w((1, R))),
        'gate2': dict(wx=w((E, R)), wh=w((R, R)), b=w((1, R))),
        'ln1': dict(g=jnp.ones((1, R), jnp.float32), b=jnp.zeros((1, R), jnp.float32)),
        'ln2': dict(g=jnp.ones((1, R), jnp.float32), b=jnp.zeros((1, R), jnp.float32)),
        'att23': dict(wa=w((R, R)), wb=w((R, R))),
    }


if __name__ == "__main__":
    # Lane/sublane-aligned small shapes (perf review): R = H = E = 128, B = 8, S = S2 = 16.
    B, E, R, H, S, S2 = 8, 128, 128, 128, 16, 16
    key = jax.random.PRNGKey(0)
    k = jax.random.split(key, 16)

    xt = jax.random.normal(k[0], (B, E), jnp.float32)
    fc_feats = jax.random.normal(k[1], (B, R), jnp.float32)
    att_feats = jax.random.normal(k[2], (B, S, R), jnp.float32)
    p_att_feats = jax.random.normal(k[3], (B, S, H), jnp.float32)
    h0 = 0.5 * jax.random.normal(k[4], (2, B, R), jnp.float32)
    c0 = 0.5 * jax.random.normal(k[5], (2, B, R), jnp.float32)
    att_masks = jnp.ones((B, S), jnp.float32).at[:, -2:].set(0.0)

    pos_rel = jax.random.normal(k[6], (B, S, S2, R), jnp.float32)
    p_pos_rel = jax.random.normal(k[7], (B, S, S2, H), jnp.float32)
    pos_masks = jnp.ones((B, S, S2), jnp.float32).at[:, :, -1].set(0.0)
    sem_rel = jax.random.normal(k[8], (B, S, S2, R), jnp.float32)
    p_sem_rel = jax.random.normal(k[9], (B, S, S2, H), jnp.float32)
    sem_masks = jnp.ones((B, S, S2), jnp.float32).at[:, :, -1].set(0.0)

    params = init_params(k[10], E, R, H)

    fwd = jax.jit(updown_core_forward)
    out, (h_new, c_new) = fwd(
        params, xt, fc_feats, att_feats, p_att_feats, (h0, c0), att_masks,
        pos_rel, p_pos_rel, pos_masks, sem_rel, p_sem_rel, sem_masks)
    jax.block_until_ready((out, h_new, c_new))

    out_ref, (h_ref, c_ref) = _forward_ref(
        params, xt, fc_feats, att_feats, p_att_feats, (h0, c0), att_masks,
        pos_rel, p_pos_rel, pos_masks, sem_rel, p_sem_rel, sem_masks)
    jax.block_until_ready((out_ref, h_ref, c_ref))

    # Tolerance covers the approximate EUP reciprocals used in the softmax normalizations
    # (perf-review change; errors mostly cancel in the renorm) plus MXU f32 pass-count
    # differences between the Pallas dot and the XLA reference dot.
    assert jnp.allclose(out, out_ref, atol=1e-2, rtol=1e-2), "output mismatch"
    assert jnp.allclose(h_new, h_ref, atol=1e-2, rtol=1e-2), "h state mismatch"
    assert jnp.allclose(c_new, c_ref, atol=1e-2, rtol=1e-2), "c state mismatch"

    print("KERNEL_OK")
</pallas_src>

<mosaic_0001>
module attributes {stable_mosaic.version = 11 : i64} {
  func.func @_attlstm_attn1_kernel(%arg0: memref<8x128xf32, #tpu.memory_space<vmem>>, %arg1: memref<8x128xf32, #tpu.memory_space<vmem>>, %arg2: memref<8x16x128xf32, #tpu.memory_space<vmem>>, %arg3: memref<8x16x128xf32, #tpu.memory_space<vmem>>, %arg4: memref<8x16xf32, #tpu.memory_space<vmem>>, %arg5: memref<8x16x16xf32, #tpu.memory_space<vmem>>, %arg6: memref<8x16x16xf32, #tpu.memory_space<vmem>>, %arg7: memref<2x8x128xf32, #tpu.memory_space<vmem>>, %arg8: memref<2x8x128xf32, #tpu.memory_space<vmem>>, %arg9: memref<512x512xf32, #tpu.memory_space<vmem>>, %arg10: memref<1x512xf32, #tpu.memory_space<vmem>>, %arg11: memref<128x384xf32, #tpu.memory_space<vmem>>, %arg12: memref<1x384xf32, #tpu.memory_space<vmem>>, %arg13: memref<1x128xf32, #tpu.memory_space<vmem>>, %arg14: memref<8x128xf32, #tpu.memory_space<vmem>>, %arg15: memref<8x128xf32, #tpu.memory_space<vmem>>, %arg16: memref<8x128xf32, #tpu.memory_space<vmem>>, %arg17: memref<8x256xf32, #tpu.memory_space<vmem>>, %arg18: memref<8x16xf32, #tpu.memory_space<vmem>>, %arg19: memref<8x16xf32, #tpu.memory_space<vmem>>, %arg20: memref<1x8xi32, #tpu.memory_space<vmem>>) attributes {dimension_semantics = [], scalar_prefetch = 0 : i64, scratch_operands = 0 : i64, tpu.core_type = #tpu.core_type<tc>} {
    %c0 = arith.constant 0 : index
    %c0_0 = arith.constant 0 : index
    %0 = vector.load %arg0[%c0, %c0_0] : memref<8x128xf32, #tpu.memory_space<vmem>>, vector<8x128xf32>
    %c0_1 = arith.constant 0 : index
    %c0_2 = arith.constant 0 : index
    %1 = vector.load %arg1[%c0_1, %c0_2] : memref<8x128xf32, #tpu.memory_space<vmem>>, vector<8x128xf32>
    %c1 = arith.constant 1 : index
    %c0_3 = arith.constant 0 : index
    %c0_4 = arith.constant 0 : index
    %2 = vector.load %arg7[%c1, %c0_3, %c0_4] : memref<2x8x128xf32, #tpu.memory_space<vmem>>, vector<1x8x128xf32>
    %3 = vector.shape_cast %2 : vector<1x8x128xf32> to vector<8x128xf32>
    %c0_5 = arith.constant 0 : index
    %c0_6 = arith.constant 0 : index
    %c0_7 = arith.constant 0 : index
    %4 = vector.load %arg7[%c0_5, %c0_6, %c0_7] : memref<2x8x128xf32, #tpu.memory_space<vmem>>, vector<1x8x128xf32>
    %5 = vector.shape_cast %4 : vector<1x8x128xf32> to vector<8x128xf32>
    %c0_8 = arith.constant 0 : index
    %c0_9 = arith.constant 0 : index
    %c0_10 = arith.constant 0 : index
    %6 = vector.load %arg8[%c0_8, %c0_9, %c0_10] : memref<2x8x128xf32, #tpu.memory_space<vmem>>, vector<1x8x128xf32>
    %7 = vector.shape_cast %6 : vector<1x8x128xf32> to vector<8x128xf32>
    %8 = tpu.concatenate %3, %1, %0, %5 in 1 : vector<8x128xf32>, vector<8x128xf32>, vector<8x128xf32>, vector<8x128xf32> -> vector<8x512xf32>
    %c0_11 = arith.constant 0 : index
    %c0_12 = arith.constant 0 : index
    %9 = vector.load %arg9[%c0_11, %c0_12] : memref<512x512xf32, #tpu.memory_space<vmem>>, vector<512x512xf32>
    %c0_13 = arith.constant 0 : index
    %c0_14 = arith.constant 0 : index
    %10 = vector.load %arg10[%c0_13, %c0_14] : memref<1x512xf32, #tpu.memory_space<vmem>>, vector<1x512xf32>
    %cst = arith.constant dense<0.000000e+00> : vector<8x512xf32>
    %11 = tpu.matmul %8, %9, %cst {dimension_numbers = #tpu.dot_dimension_numbers<[1], [0], [0], [1], [0, 0, 1, 1], [], []>} : vector<8x512xf32>, vector<512x512xf32>, vector<8x512xf32> -> vector<8x512xf32>
    %12 = vector.broadcast %10 : vector<1x512xf32> to vector<8x512xf32>
    %13 = arith.addf %11, %12 : vector<8x512xf32>
    %14 = vector.extract_strided_slice %13 {offsets = [0, 0], sizes = [8, 256], strides = [1, 1]} : vector<8x512xf32> to vector<8x256xf32>
    %15 = arith.negf %14 : vector<8x256xf32>
    %16 = math.exp %15 : vector<8x256xf32>
    %cst_15 = arith.constant 1.000000e+00 : f32
    %17 = vector.broadcast %cst_15 : f32 to vector<8x256xf32>
    %18 = arith.addf %17, %16 : vector<8x256xf32>
    %19 = arith.divf %17, %18 : vector<8x256xf32>
    %20 = vector.extract_strided_slice %13 {offsets = [0, 256], sizes = [8, 128], strides = [1, 1]} : vector<8x512xf32> to vector<8x128xf32>
    %21 = math.tanh %20 : vector<8x128xf32>
    %22 = vector.extract_strided_slice %13 {offsets = [0, 384], sizes = [8, 128], strides = [1, 1]} : vector<8x512xf32> to vector<8x128xf32>
    %23 = arith.negf %22 : vector<8x128xf32>
    %24 = math.exp %23 : vector<8x128xf32>
    %cst_16 = arith.constant 1.000000e+00 : f32
    %25 = vector.broadcast %cst_16 : f32 to vector<8x128xf32>
    %26 = arith.addf %25, %24 : vector<8x128xf32>
    %27 = arith.divf %25, %26 : vector<8x128xf32>
    %28 = vector.extract_strided_slice %19 {offsets = [0, 0], sizes = [8, 128], strides = [1, 1]} : vector<8x256xf32> to vector<8x128xf32>
    %29 = vector.extract_strided_slice %19 {offsets = [0, 128], sizes = [8, 128], strides = [1, 1]} : vector<8x256xf32> to vector<8x128xf32>
    %30 = arith.mulf %29, %7 : vector<8x128xf32>
    %31 = arith.mulf %28, %21 : vector<8x128xf32>
    %32 = arith.addf %30, %31 : vector<8x128xf32>
    %33 = math.tanh %32 : vector<8x128xf32>
    %34 = arith.mulf %27, %33 : vector<8x128xf32>
    %c0_17 = arith.constant 0 : index
    %c0_18 = arith.constant 0 : index
    %35 = vector.load %arg11[%c0_17, %c0_18] : memref<128x384xf32, #tpu.memory_space<vmem>>, vector<128x384xf32>
    %cst_19 = arith.constant dense<0.000000e+00> : vector<8x384xf32>
    %36 = tpu.matmul %34, %35, %cst_19 {dimension_numbers = #tpu.dot_dimension_numbers<[1], [0], [0], [1], [0, 0, 1, 1], [], []>} : vector<8x128xf32>, vector<128x384xf32>, vector<8x384xf32> -> vector<8x384xf32>
    %c0_20 = arith.constant 0 : index
    %c0_21 = arith.constant 0 : index
    %37 = vector.load %arg12[%c0_20, %c0_21] : memref<1x384xf32, #tpu.memory_space<vmem>>, vector<1x384xf32>
    %38 = vector.broadcast %37 : vector<1x384xf32> to vector<8x384xf32>
    %39 = arith.addf %36, %38 : vector<8x384xf32>
    %c0_22 = arith.constant 0 : index
    %c0_23 = arith.constant 0 : index
    %40 = vector.load %arg4[%c0_22, %c0_23] : memref<8x16xf32, #tpu.memory_space<vmem>>, vector<8x16xf32>
    %c0_24 = arith.constant 0 : index
    %c0_25 = arith.constant 0 : index
    %c0_26 = arith.constant 0 : index
    %41 = vector.load %arg3[%c0_24, %c0_25, %c0_26] : memref<8x16x128xf32, #tpu.memory_space<vmem>>, vector<8x16x128xf32>
    %42 = vector.extract_strided_slice %39 {offsets = [0, 0], sizes = [8, 128], strides = [1, 1]} : vector<8x384xf32> to vector<8x128xf32>
    %43 = vector.shape_cast %42 : vector<8x128xf32> to vector<8x1x128xf32>
    %44 = vector.broadcast %43 : vector<8x1x128xf32> to vector<8x16x128xf32>
    %45 = arith.addf %41, %44 : vector<8x16x128xf32>
    %46 = math.tanh %45 : vector<8x16x128xf32>
    %c0_27 = arith.constant 0 : index
    %c0_28 = arith.constant 0 : index
    %47 = vector.load %arg13[%c0_27, %c0_28] : memref<1x128xf32, #tpu.memory_space<vmem>>, vector<1x128xf32>
    %48 = vector.shape_cast %47 : vector<1x128xf32> to vector<1x1x128xf32>
    %49 = vector.broadcast %48 : vector<1x1x128xf32> to vector<8x16x128xf32>
    %50 = arith.mulf %46, %49 : vector<8x16x128xf32>
    %cst_29 = arith.constant dense<0.000000e+00> : vector<8x16xf32>
    %51 = vector.multi_reduction <add>, %50, %cst_29 [2] : vector<8x16x128xf32> to vector<8x16xf32>
    %c0_30 = arith.constant 0 : index
    %c0_31 = arith.constant 0 : index
    %c0_32 = arith.constant 0 : index
    %52 = vector.load %arg2[%c0_30, %c0_31, %c0_32] : memref<8x16x128xf32, #tpu.memory_space<vmem>>, vector<8x16x128xf32>
    %cst_33 = arith.constant dense<0xFF800000> : vector<8xf32>
    %53 = vector.multi_reduction <maximumf>, %51, %cst_33 [1] : vector<8x16xf32> to vector<8xf32>
    %54 = vector.shape_cast %53 : vector<8xf32> to vector<8x1xf32>
    %55 = vector.broadcast %54 : vector<8x1xf32> to vector<8x16xf32>
    %56 = arith.subf %51, %55 : vector<8x16xf32>
    %57 = math.exp %56 : vector<8x16xf32>
    %cst_34 = arith.constant dense<0.000000e+00> : vector<8xf32>
    %58 = vector.multi_reduction <add>, %57, %cst_34 [1] : vector<8x16xf32> to vector<8xf32>
    %59 = vector.shape_cast %58 : vector<8xf32> to vector<8x1xf32>
    %60 = tpu.reciprocal %59 {approx = true} : vector<8x1xf32> -> vector<8x1xf32>
    %61 = vector.broadcast %60 : vector<8x1xf32> to vector<8x16xf32>
    %62 = arith.mulf %57, %61 : vector<8x16xf32>
    %63 = arith.mulf %62, %40 : vector<8x16xf32>
    %cst_35 = arith.constant dense<0.000000e+00> : vector<8xf32>
    %64 = vector.multi_reduction <add>, %63, %cst_35 [1] : vector<8x16xf32> to vector<8xf32>
    %65 = vector.shape_cast %64 : vector<8xf32> to vector<8x1xf32>
    %cst_36 = arith.constant 9.99999993E-9 : f32
    %66 = vector.broadcast %cst_36 : f32 to vector<8x1xf32>
    %67 = arith.addf %65, %66 : vector<8x1xf32>
    %68 = tpu.reciprocal %67 {approx = true} : vector<8x1xf32> -> vector<8x1xf32>
    %69 = vector.broadcast %68 : vector<8x1xf32> to vector<8x16xf32>
    %70 = arith.mulf %63, %69 : vector<8x16xf32>
    %71 = vector.shape_cast %70 : vector<8x16xf32> to vector<8x16x1xf32>
    %72 = vector.broadcast %71 : vector<8x16x1xf32> to vector<8x16x128xf32>
    %73 = arith.mulf %72, %52 : vector<8x16x128xf32>
    %cst_37 = arith.constant dense<0.000000e+00> : vector<8x128xf32>
    %74 = vector.multi_reduction <add>, %73, %cst_37 [1] : vector<8x16x128xf32> to vector<8x128xf32>
    %cst_38 = arith.constant 0.000000e+00 : f32
    %75 = vector.broadcast %cst_38 : f32 to vector<8x16xf32>
    %76 = arith.cmpf ogt, %40, %75 : vector<8x16xf32>
    %cst_39 = arith.constant -1.000000e+30 : f32
    %77 = vector.broadcast %cst_39 : f32 to vector<8x16xf32>
    %78 = arith.select %76, %51, %77 : vector<8x16xi1>, vector<8x16xf32>
    %79 = tpu.iota {dimensions = array<i32: 1>} : vector<8x16xi32>
    %cst_40 = arith.constant dense<0xFF800000> : vector<8xf32>
    %80 = vector.multi_reduction <maximumf>, %78, %cst_40 [1] : vector<8x16xf32> to vector<8xf32>
    %81 = vector.shape_cast %80 : vector<8xf32> to vector<8x1xf32>
    %82 = vector.broadcast %81 : vector<8x1xf32> to vector<8x16xf32>
    %83 = arith.cmpf oeq, %78, %82 : vector<8x16xf32>
    %c16_i32 = arith.constant 16 : i32
    %84 = vector.broadcast %c16_i32 : i32 to vector<8x16xi32>
    %85 = arith.select %83, %79, %84 : vector<8x16xi1>, vector<8x16xi32>
    %cst_41 = arith.constant dense<2147483647> : vector<8xi32>
    %86 = vector.multi_reduction <minsi>, %85, %cst_41 [1] : vector<8x16xi32> to vector<8xi32>
    %87 = vector.shape_cast %86 : vector<8xi32> to vector<8x1xi32>
    %88 = vector.broadcast %87 : vector<8x1xi32> to vector<8x16xi32>
    %89 = arith.cmpi eq, %79, %88 : vector<8x16xi32>
    %90 = arith.extui %89 : vector<8x16xi1> to vector<8x16xi32>
    %91 = arith.sitofp %90 : vector<8x16xi32> to vector<8x16xf32>
    %c0_42 = arith.constant 0 : index
    %c0_43 = arith.constant 0 : index
    %c0_44 = arith.constant 0 : index
    %92 = vector.load %arg5[%c0_42, %c0_43, %c0_44] : memref<8x16x16xf32, #tpu.memory_space<vmem>>, vector<8x16x16xf32>
    %93 = vector.shape_cast %91 : vector<8x16xf32> to vector<8x16x1xf32>
    %94 = vector.broadcast %93 : vector<8x16x1xf32> to vector<8x16x16xf32>
    %95 = arith.mulf %92, %94 : vector<8x16x16xf32>
    %cst_45 = arith.constant dense<0.000000e+00> : vector<8x16xf32>
    %96 = vector.multi_reduction <add>, %95, %cst_45 [1] : vector<8x16x16xf32> to vector<8x16xf32>
    %c0_46 = arith.constant 0 : index
    %c0_47 = arith.constant 0 : index
    %97 = vector.load %arg18[%c0_46, %c0_47] : memref<8x16xf32, #tpu.memory_space<vmem>>, vector<8x16xf32>
    tpu.vector_store %arg18[%c0_46, %c0_47], %96 {strides = array<i32>} : memref<8x16xf32, #tpu.memory_space<vmem>>, vector<8x16xf32>,
    %c0_48 = arith.constant 0 : index
    %c0_49 = arith.constant 0 : index
    %c0_50 = arith.constant 0 : index
    %98 = vector.load %arg6[%c0_48, %c0_49, %c0_50] : memref<8x16x16xf32, #tpu.memory_space<vmem>>, vector<8x16x16xf32>
    %99 = vector.shape_cast %91 : vector<8x16xf32> to vector<8x16x1xf32>
    %100 = vector.broadcast %99 : vector<8x16x1xf32> to vector<8x16x16xf32>
    %101 = arith.mulf %98, %100 : vector<8x16x16xf32>
    %cst_51 = arith.constant dense<0.000000e+00> : vector<8x16xf32>
    %102 = vector.multi_reduction <add>, %101, %cst_51 [1] : vector<8x16x16xf32> to vector<8x16xf32>
    %c0_52 = arith.constant 0 : index
    %c0_53 = arith.constant 0 : index
    %103 = vector.load %arg19[%c0_52, %c0_53] : memref<8x16xf32, #tpu.memory_space<vmem>>, vector<8x16xf32>
    tpu.vector_store %arg19[%c0_52, %c0_53], %102 {strides = array<i32>} : memref<8x16xf32, #tpu.memory_space<vmem>>, vector<8x16xf32>,
    %c0_54 = arith.constant 0 : index
    %c0_55 = arith.constant 0 : index
    %104 = vector.load %arg14[%c0_54, %c0_55] : memref<8x128xf32, #tpu.memory_space<vmem>>, vector<8x128xf32>
    tpu.vector_store %arg14[%c0_54, %c0_55], %34 {strides = array<i32>} : memref<8x128xf32, #tpu.memory_space<vmem>>, vector<8x128xf32>,
    %c0_56 = arith.constant 0 : index
    %c0_57 = arith.constant 0 : index
    %105 = vector.load %arg15[%c0_56, %c0_57] : memref<8x128xf32, #tpu.memory_space<vmem>>, vector<8x128xf32>
    tpu.vector_store %arg15[%c0_56, %c0_57], %32 {strides = array<i32>} : memref<8x128xf32, #tpu.memory_space<vmem>>, vector<8x128xf32>,
    %c0_58 = arith.constant 0 : index
    %c0_59 = arith.constant 0 : index
    %106 = vector.load %arg16[%c0_58, %c0_59] : memref<8x128xf32, #tpu.memory_space<vmem>>, vector<8x128xf32>
    tpu.vector_store %arg16[%c0_58, %c0_59], %74 {strides = array<i32>} : memref<8x128xf32, #tpu.memory_space<vmem>>, vector<8x128xf32>,
    %107 = vector.extract_strided_slice %39 {offsets = [0, 128], sizes = [8, 256], strides = [1, 1]} : vector<8x384xf32> to vector<8x256xf32>
    %c0_60 = arith.constant 0 : index
    %c0_61 = arith.constant 0 : index
    %108 = vector.load %arg17[%c0_60, %c0_61] : memref<8x256xf32, #tpu.memory_space<vmem>>, vector<8x256xf32>
    tpu.vector_store %arg17[%c0_60, %c0_61], %107 {strides = array<i32>} : memref<8x256xf32, #tpu.memory_space<vmem>>, vector<8x256xf32>,
    %109 = vector.shape_cast %86 : vector<8xi32> to vector<1x8xi32>
    %c0_62 = arith.constant 0 : index
    %c0_63 = arith.constant 0 : index
    %110 = vector.load %arg20[%c0_62, %c0_63] : memref<1x8xi32, #tpu.memory_space<vmem>>, vector<1x8xi32>
    tpu.vector_store %arg20[%c0_62, %c0_63], %109 {strides = array<i32>} : memref<1x8xi32, #tpu.memory_space<vmem>>, vector<1x8xi32>,
    return
  }
}

module attributes {stable_mosaic.version = 11 : i64} {
  func.func @_gather_attn23_lang_kernel(%arg0: i32, %arg1: memref<8xi32, #tpu.memory_space<smem>>, %arg2: memref<1x1x16x128xf32, #tpu.memory_space<vmem>>, %arg3: memref<1x1x16x128xf32, #tpu.memory_space<vmem>>, %arg4: memref<1x1x16x128xf32, #tpu.memory_space<vmem>>, %arg5: memref<1x1x16x128xf32, #tpu.memory_space<vmem>>, %arg6: memref<8x128xf32, #tpu.memory_space<vmem>>, %arg7: memref<8x128xf32, #tpu.memory_space<vmem>>, %arg8: memref<8x128xf32, #tpu.memory_space<vmem>>, %arg9: memref<8x256xf32, #tpu.memory_space<vmem>>, %arg10: memref<8x16xf32, #tpu.memory_space<vmem>>, %arg11: memref<8x16xf32, #tpu.memory_space<vmem>>, %arg12: memref<8x128xf32, #tpu.memory_space<vmem>>, %arg13: memref<8x128xf32, #tpu.memory_space<vmem>>, %arg14: memref<2x128xf32, #tpu.memory_space<vmem>>, %arg15: memref<256x256xf32, #tpu.memory_space<vmem>>, %arg16: memref<1x256xf32, #tpu.memory_space<vmem>>, %arg17: memref<2x128xf32, #tpu.memory_space<vmem>>, %arg18: memref<2x128xf32, #tpu.memory_space<vmem>>, %arg19: memref<256x128xf32, #tpu.memory_space<vmem>>, %arg20: memref<384x512xf32, #tpu.memory_space<vmem>>, %arg21: memref<1x512xf32, #tpu.memory_space<vmem>>, %arg22: memref<8x128xf32, #tpu.memory_space<vmem>>, %arg23: memref<8x128xf32, #tpu.memory_space<vmem>>, %arg24: memref<8x16x128xf32, #tpu.memory_space<vmem>>, %arg25: memref<8x16x128xf32, #tpu.memory_space<vmem>>, %arg26: memref<8x16x128xf32, #tpu.memory_space<vmem>>, %arg27: memref<8x16x128xf32, #tpu.memory_space<vmem>>, %arg28: memref<8x256xf32, #tpu.memory_space<vmem>>) attributes {dimension_semantics = [#tpu.dimension_semantics<arbitrary>], iteration_bounds = array<i64: 8>, scalar_prefetch = 1 : i64, scratch_operands = 5 : i64, tpu.core_type = #tpu.core_type<tc>, window_params = [{transform_indices = @transform_0, window_bounds = array<i64: 1, 1, 16, 128>}, {transform_indices = @transform_1, window_bounds = array<i64: 1, 1, 16, 128>}, {transform_indices = @transform_2, window_bounds = array<i64: 1, 1, 16, 128>}, {transform_indices = @transform_3, window_bounds = array<i64: 1, 1, 16, 128>}, {pipeline_mode = #tpu.pipeline_mode<synchronous>, transform_indices = @transform_4, window_bounds = array<i64: 8, 128>}, {pipeline_mode = #tpu.pipeline_mode<synchronous>, transform_indices = @transform_5, window_bounds = array<i64: 8, 128>}, {pipeline_mode = #tpu.pipeline_mode<synchronous>, transform_indices = @transform_6, window_bounds = array<i64: 8, 128>}, {pipeline_mode = #tpu.pipeline_mode<synchronous>, transform_indices = @transform_7, window_bounds = array<i64: 8, 256>}, {pipeline_mode = #tpu.pipeline_mode<synchronous>, transform_indices = @transform_8, window_bounds = array<i64: 8, 16>}, {pipeline_mode = #tpu.pipeline_mode<synchronous>, transform_indices = @transform_9, window_bounds = array<i64: 8, 16>}, {pipeline_mode = #tpu.pipeline_mode<synchronous>, transform_indices = @transform_10, window_bounds = array<i64: 8, 128>}, {pipeline_mode = #tpu.pipeline_mode<synchronous>, transform_indices = @transform_11, window_bounds = array<i64: 8, 128>}, {pipeline_mode = #tpu.pipeline_mode<synchronous>, transform_indices = @transform_12, window_bounds = array<i64: 2, 128>}, {pipeline_mode = #tpu.pipeline_mode<synchronous>, transform_indices = @transform_13, window_bounds = array<i64: 256, 256>}, {pipeline_mode = #tpu.pipeline_mode<synchronous>, transform_indices = @transform_14, window_bounds = array<i64: 1, 256>}, {pipeline_mode = #tpu.pipeline_mode<synchronous>, transform_indices = @transform_15, window_bounds = array<i64: 2, 128>}, {pipeline_mode = #tpu.pipeline_mode<synchronous>, transform_indices = @transform_16, window_bounds = array<i64: 2, 128>}, {pipeline_mode = #tpu.pipeline_mode<synchronous>, transform_indices = @transform_17, window_bounds = array<i64: 256, 128>}, {pipeline_mode = #tpu.pipeline_mode<synchronous>, transform_indices = @transform_18, window_bounds = array<i64: 384, 512>}, {pipeline_mode = #tpu.pipeline_mode<synchronous>, transform_indices = @transform_19, window_bounds = array<i64: 1, 512>}, {pipeline_mode = #tpu.pipeline_mode<synchronous>, transform_indices = @transform_20, window_bounds = array<i64: 8, 128>}, {pipeline_mode = #tpu.pipeline_mode<synchronous>, transform_indices = @transform_21, window_bounds = array<i64: 8, 128>}]} {
    %c0 = arith.constant 0 : index
    %c0_0 = arith.constant 0 : index
    %c0_1 = arith.constant 0 : index
    %c0_2 = arith.constant 0 : index
    %0 = vector.load %arg2[%c0, %c0_0, %c0_1, %c0_2] : memref<1x1x16x128xf32, #tpu.memory_space<vmem>>, vector<1x1x16x128xf32>
    %1 = vector.shape_cast %0 : vector<1x1x16x128xf32> to vector<16x128xf32>
    %2 = arith.index_cast %arg0 : i32 to index
    %c0_3 = arith.constant 0 : index
    %c0_4 = arith.constant 0 : index
    %3 = vector.load %arg24[%2, %c0_3, %c0_4] : memref<8x16x128xf32, #tpu.memory_space<vmem>>, vector<1x16x128xf32>
    %4 = vector.shape_cast %3 : vector<1x16x128xf32> to vector<16x128xf32>
    %5 = vector.shape_cast %1 : vector<16x128xf32> to vector<1x16x128xf32>
    tpu.vector_store %arg24[%2, %c0_3, %c0_4], %5 {strides = array<i32>} : memref<8x16x128xf32, #tpu.memory_space<vmem>>, vector<1x16x128xf32>,
    %c0_5 = arith.constant 0 : index
    %c0_6 = arith.constant 0 : index
    %c0_7 = arith.constant 0 : index
    %c0_8 = arith.constant 0 : index
    %6 = vector.load %arg3[%c0_5, %c0_6, %c0_7, %c0_8] : memref<1x1x16x128xf32, #tpu.memory_space<vmem>>, vector<1x1x16x128xf32>
    %7 = vector.shape_cast %6 : vector<1x1x16x128xf32> to vector<16x128xf32>
    %8 = arith.index_cast %arg0 : i32 to index
    %c0_9 = arith.constant 0 : index
    %c0_10 = arith.constant 0 : index
    %9 = vector.load %arg25[%8, %c0_9, %c0_10] : memref<8x16x128xf32, #tpu.memory_space<vmem>>, vector<1x16x128xf32>
    %10 = vector.shape_cast %9 : vector<1x16x128xf32> to vector<16x128xf32>
    %11 = vector.shape_cast %7 : vector<16x128xf32> to vector<1x16x128xf32>
    tpu.vector_store %arg25[%8, %c0_9, %c0_10], %11 {strides = array<i32>} : memref<8x16x128xf32, #tpu.memory_space<vmem>>, vector<1x16x128xf32>,
    %c0_11 = arith.constant 0 : index
    %c0_12 = arith.constant 0 : index
    %c0_13 = arith.constant 0 : index
    %c0_14 = arith.constant 0 : index
    %12 = vector.load %arg4[%c0_11, %c0_12, %c0_13, %c0_14] : memref<1x1x16x128xf32, #tpu.memory_space<vmem>>, vector<1x1x16x128xf32>
    %13 = vector.shape_cast %12 : vector<1x1x16x128xf32> to vector<16x128xf32>
    %14 = arith.index_cast %arg0 : i32 to index
    %c0_15 = arith.constant 0 : index
    %c0_16 = arith.constant 0 : index
    %15 = vector.load %arg26[%14, %c0_15, %c0_16] : memref<8x16x128xf32, #tpu.memory_space<vmem>>, vector<1x16x128xf32>
    %16 = vector.shape_cast %15 : vector<1x16x128xf32> to vector<16x128xf32>
    %17 = vector.shape_cast %13 : vector<16x128xf32> to vector<1x16x128xf32>
    tpu.vector_store %arg26[%14, %c0_15, %c0_16], %17 {strides = array<i32>} : memref<8x16x128xf32, #tpu.memory_space<vmem>>, vector<1x16x128xf32>,
    %c0_17 = arith.constant 0 : index
    %c0_18 = arith.constant 0 : index
    %c0_19 = arith.constant 0 : index
    %c0_20 = arith.constant 0 : index
    %18 = vector.load %arg5[%c0_17, %c0_18, %c0_19, %c0_20] : memref<1x1x16x128xf32, #tpu.memory_space<vmem>>, vector<1x1x16x128xf32>
    %19 = vector.shape_cast %18 : vector<1x1x16x128xf32> to vector<16x128xf32>
    %20 = arith.index_cast %arg0 : i32 to index
    %c0_21 = arith.constant 0 : index
    %c0_22 = arith.constant 0 : index
    %21 = vector.load %arg27[%20, %c0_21, %c0_22] : memref<8x16x128xf32, #tpu.memory_space<vmem>>, vector<1x16x128xf32>
    %22 = vector.shape_cast %21 : vector<1x16x128xf32> to vector<16x128xf32>
    %23 = vector.shape_cast %19 : vector<16x128xf32> to vector<1x16x128xf32>
    tpu.vector_store %arg27[%20, %c0_21, %c0_22], %23 {strides = array<i32>} : memref<8x16x128xf32, #tpu.memory_space<vmem>>, vector<1x16x128xf32>,
    %c0_i32 = arith.constant 0 : i32
    %24 = arith.cmpi eq, %arg0, %c0_i32 : i32
    %25 = arith.extui %24 : i1 to i32
    %c0_i32_23 = arith.constant 0 : i32
    %26 = arith.cmpi ne, %25, %c0_i32_23 : i32
    scf.if %26 {
      %c0_25 = arith.constant 0 : index
      %c0_26 = arith.constant 0 : index
      %30 = vector.load %arg6[%c0_25, %c0_26] : memref<8x128xf32, #tpu.memory_space<vmem>>, vector<8x128xf32>
      %c0_27 = arith.constant 0 : index
      %c0_28 = arith.constant 0 : index
      %31 = vector.load %arg7[%c0_27, %c0_28] : memref<8x128xf32, #tpu.memory_space<vmem>>, vector<8x128xf32>
      %32 = tpu.concatenate %30, %31 in 1 : vector<8x128xf32>, vector<8x128xf32> -> vector<8x256xf32>
      %c0_29 = arith.constant 0 : index
      %c0_30 = arith.constant 0 : index
      %33 = vector.load %arg15[%c0_29, %c0_30] : memref<256x256xf32, #tpu.memory_space<vmem>>, vector<256x256xf32>
      %cst = arith.constant dense<0.000000e+00> : vector<8x256xf32>
      %34 = tpu.matmul %32, %33, %cst {dimension_numbers = #tpu.dot_dimension_numbers<[1], [0], [0], [1], [0, 0, 1, 1], [], []>} : vector<8x256xf32>, vector<256x256xf32>, vector<8x256xf32> -> vector<8x256xf32>
      %c0_31 = arith.constant 0 : index
      %c0_32 = arith.constant 0 : index
      %35 = vector.load %arg16[%c0_31, %c0_32] : memref<1x256xf32, #tpu.memory_space<vmem>>, vector<1x256xf32>
      %36 = vector.broadcast %35 : vector<1x256xf32> to vector<8x256xf32>
      %37 = arith.addf %34, %36 : vector<8x256xf32>
      %38 = arith.negf %37 : vector<8x256xf32>
      %39 = math.exp %38 : vector<8x256xf32>
      %cst_33 = arith.constant 1.000000e+00 : f32
      %40 = vector.broadcast %cst_33 : f32 to vector<8x256xf32>
      %41 = arith.addf %40, %39 : vector<8x256xf32>
      %42 = arith.divf %40, %41 : vector<8x256xf32>
      %c0_34 = arith.constant 0 : index
      %c0_35 = arith.constant 0 : index
      %43 = vector.load %arg28[%c0_34, %c0_35] : memref<8x256xf32, #tpu.memory_space<vmem>>, vector<8x256xf32>
      tpu.vector_store %arg28[%c0_34, %c0_35], %42 {strides = array<i32>} : memref<8x256xf32, #tpu.memory_space<vmem>>, vector<8x256xf32>,
    } else {
    }
    %c7_i32 = arith.constant 7 : i32
    %27 = arith.cmpi eq, %arg0, %c7_i32 : i32
    %28 = arith.extui %27 : i1 to i32
    %c0_i32_24 = arith.constant 0 : i32
    %29 = arith.cmpi ne, %28, %c0_i32_24 : i32
    scf.if %29 {
      %c0_25 = arith.constant 0 : index
      %c0_26 = arith.constant 0 : index
      %30 = vector.load %arg7[%c0_25, %c0_26] : memref<8x128xf32, #tpu.memory_space<vmem>>, vector<8x128xf32>
      %c0_27 = arith.constant 0 : index
      %c0_28 = arith.constant 0 : index
      %31 = vector.load %arg8[%c0_27, %c0_28] : memref<8x128xf32, #tpu.memory_space<vmem>>, vector<8x128xf32>
      %c0_29 = arith.constant 0 : index
      %c0_30 = arith.constant 0 : index
      %32 = vector.load %arg9[%c0_29, %c0_30] : memref<8x256xf32, #tpu.memory_space<vmem>>, vector<8x128xf32>
      %c0_31 = arith.constant 0 : index
      %c128 = arith.constant 128 : index
      %33 = vector.load %arg9[%c0_31, %c128] : memref<8x256xf32, #tpu.memory_space<vmem>>, vector<8x128xf32>
      %c0_32 = arith.constant 0 : index
      %c0_33 = arith.constant 0 : index
      %34 = vector.load %arg14[%c0_32, %c0_33] : memref<2x128xf32, #tpu.memory_space<vmem>>, vector<2x128xf32>
      %c0_34 = arith.constant 0 : index
      %c0_35 = arith.constant 0 : index
      %c0_36 = arith.constant 0 : index
      %35 = vector.load %arg25[%c0_34, %c0_35, %c0_36] : memref<8x16x128xf32, #tpu.memory_space<vmem>>, vector<8x16x128xf32>
      %36 = vector.shape_cast %32 : vector<8x128xf32> to vector<8x1x128xf32>
      %37 = vector.broadcast %36 : vector<8x1x128xf32> to vector<8x16x128xf32>
      %38 = arith.addf %35, %37 : vector<8x16x128xf32>
      %39 = math.tanh %38 : vector<8x16x128xf32>
      %40 = vector.extract_strided_slice %34 {offsets = [0, 0], sizes = [1, 128], strides = [1, 1]} : vector<2x128xf32> to vector<1x128xf32>
      %41 = vector.shape_cast %40 : vector<1x128xf32> to vector<1x1x128xf32>
      %42 = vector.broadcast %41 : vector<1x1x128xf32> to vector<8x16x128xf32>
      %43 = arith.mulf %39, %42 : vector<8x16x128xf32>
      %cst = arith.constant dense<0.000000e+00> : vector<8x16xf32>
      %44 = vector.multi_reduction <add>, %43, %cst [2] : vector<8x16x128xf32> to vector<8x16xf32>
      %c0_37 = arith.constant 0 : index
      %c0_38 = arith.constant 0 : index
      %45 = vector.load %arg10[%c0_37, %c0_38] : memref<8x16xf32, #tpu.memory_space<vmem>>, vector<8x16xf32>
      %c0_39 = arith.constant 0 : index
      %c0_40 = arith.constant 0 : index
      %c0_41 = arith.constant 0 : index
      %46 = vector.load %arg24[%c0_39, %c0_40, %c0_41] : memref<8x16x128xf32, #tpu.memory_space<vmem>>, vector<8x16x128xf32>
      %cst_42 = arith.constant dense<0xFF800000> : vector<8xf32>
      %47 = vector.multi_reduction <maximumf>, %44, %cst_42 [1] : vector<8x16xf32> to vector<8xf32>
      %48 = vector.shape_cast %47 : vector<8xf32> to vector<8x1xf32>
      %49 = vector.broadcast %48 : vector<8x1xf32> to vector<8x16xf32>
      %50 = arith.subf %44, %49 : vector<8x16xf32>
      %51 = math.exp %50 : vector<8x16xf32>
      %cst_43 = arith.constant dense<0.000000e+00> : vector<8xf32>
      %52 = vector.multi_reduction <add>, %51, %cst_43 [1] : vector<8x16xf32> to vector<8xf32>
      %53 = vector.shape_cast %52 : vector<8xf32> to vector<8x1xf32>
      %54 = tpu.reciprocal %53 {approx = true} : vector<8x1xf32> -> vector<8x1xf32>
      %55 = vector.broadcast %54 : vector<8x1xf32> to vector<8x16xf32>
      %56 = arith.mulf %51, %55 : vector<8x16xf32>
      %57 = arith.mulf %56, %45 : vector<8x16xf32>
      %cst_44 = arith.constant dense<0.000000e+00> : vector<8xf32>
      %58 = vector.multi_reduction <add>, %57, %cst_44 [1] : vector<8x16xf32> to vector<8xf32>
      %59 = vector.shape_cast %58 : vector<8xf32> to vector<8x1xf32>
      %cst_45 = arith.constant 9.99999993E-9 : f32
      %60 = vector.broadcast %cst_45 : f32 to vector<8x1xf32>
      %61 = arith.addf %59, %60 : vector<8x1xf32>
      %62 = tpu.reciprocal %61 {approx = true} : vector<8x1xf32> -> vector<8x1xf32>
      %63 = vector.broadcast %62 : vector<8x1xf32> to vector<8x16xf32>
      %64 = arith.mulf %57, %63 : vector<8x16xf32>
      %65 = vector.shape_cast %64 : vector<8x16xf32> to vector<8x16x1xf32>
      %66 = vector.broadcast %65 : vector<8x16x1xf32> to vector<8x16x128xf32>
      %67 = arith.mulf %66, %46 : vector<8x16x128xf32>
      %cst_46 = arith.constant dense<0.000000e+00> : vector<8x128xf32>
      %68 = vector.multi_reduction <add>, %67, %cst_46 [1] : vector<8x16x128xf32> to vector<8x128xf32>
      %c0_47 = arith.constant 0 : index
      %c0_48 = arith.constant 0 : index
      %c0_49 = arith.constant 0 : index
      %69 = vector.load %arg27[%c0_47, %c0_48, %c0_49] : memref<8x16x128xf32, #tpu.memory_space<vmem>>, vector<8x16x128xf32>
      %70 = vector.shape_cast %33 : vector<8x128xf32> to vector<8x1x128xf32>
      %71 = vector.broadcast %70 : vector<8x1x128xf32> to vector<8x16x128xf32>
      %72 = arith.addf %69, %71 : vector<8x16x128xf32>
      %73 = math.tanh %72 : vector<8x16x128xf32>
      %74 = vector.extract_strided_slice %34 {offsets = [1, 0], sizes = [1, 128], strides = [1, 1]} : vector<2x128xf32> to vector<1x128xf32>
      %75 = vector.shape_cast %74 : vector<1x128xf32> to vector<1x1x128xf32>
      %76 = vector.broadcast %75 : vector<1x1x128xf32> to vector<8x16x128xf32>
      %77 = arith.mulf %73, %76 : vector<8x16x128xf32>
      %cst_50 = arith.constant dense<0.000000e+00> : vector<8x16xf32>
      %78 = vector.multi_reduction <add>, %77, %cst_50 [2] : vector<8x16x128xf32> to vector<8x16xf32>
      %c0_51 = arith.constant 0 : index
      %c0_52 = arith.constant 0 : index
      %79 = vector.load %arg11[%c0_51, %c0_52] : memref<8x16xf32, #tpu.memory_space<vmem>>, vector<8x16xf32>
      %c0_53 = arith.constant 0 : index
      %c0_54 = arith.constant 0 : index
      %c0_55 = arith.constant 0 : index
      %80 = vector.load %arg26[%c0_53, %c0_54, %c0_55] : memref<8x16x128xf32, #tpu.memory_space<vmem>>, vector<8x16x128xf32>
      %cst_56 = arith.constant dense<0xFF800000> : vector<8xf32>
      %81 = vector.multi_reduction <maximumf>, %78, %cst_56 [1] : vector<8x16xf32> to vector<8xf32>
      %82 = vector.shape_cast %81 : vector<8xf32> to vector<8x1xf32>
      %83 = vector.broadcast %82 : vector<8x1xf32> to vector<8x16xf32>
      %84 = arith.subf %78, %83 : vector<8x16xf32>
      %85 = math.exp %84 : vector<8x16xf32>
      %cst_57 = arith.constant dense<0.000000e+00> : vector<8xf32>
      %86 = vector.multi_reduction <add>, %85, %cst_57 [1] : vector<8x16xf32> to vector<8xf32>
      %87 = vector.shape_cast %86 : vector<8xf32> to vector<8x1xf32>
      %88 = tpu.reciprocal %87 {approx = true} : vector<8x1xf32> -> vector<8x1xf32>
      %89 = vector.broadcast %88 : vector<8x1xf32> to vector<8x16xf32>
      %90 = arith.mulf %85, %89 : vector<8x16xf32>
      %91 = arith.mulf %90, %79 : vector<8x16xf32>
      %cst_58 = arith.constant dense<0.000000e+00> : vector<8xf32>
      %92 = vector.multi_reduction <add>, %91, %cst_58 [1] : vector<8x16xf32> to vector<8xf32>
      %93 = vector.shape_cast %92 : vector<8xf32> to vector<8x1xf32>
      %cst_59 = arith.constant 9.99999993E-9 : f32
      %94 = vector.broadcast %cst_59 : f32 to vector<8x1xf32>
      %95 = arith.addf %93, %94 : vector<8x1xf32>
      %96 = tpu.reciprocal %95 {approx = true} : vector<8x1xf32> -> vector<8x1xf32>
      %97 = vector.broadcast %96 : vector<8x1xf32> to vector<8x16xf32>
      %98 = arith.mulf %91, %97 : vector<8x16xf32>
      %99 = vector.shape_cast %98 : vector<8x16xf32> to vector<8x16x1xf32>
      %100 = vector.broadcast %99 : vector<8x16x1xf32> to vector<8x16x128xf32>
      %101 = arith.mulf %100, %80 : vector<8x16x128xf32>
      %cst_60 = arith.constant dense<0.000000e+00> : vector<8x128xf32>
      %102 = vector.multi_reduction <add>, %101, %cst_60 [1] : vector<8x16x128xf32> to vector<8x128xf32>
      %c0_61 = arith.constant 0 : index
      %c0_62 = arith.constant 0 : index
      %103 = vector.load %arg28[%c0_61, %c0_62] : memref<8x256xf32, #tpu.memory_space<vmem>>, vector<8x256xf32>
      %104 = vector.extract_strided_slice %103 {offsets = [0, 0], sizes = [8, 128], strides = [1, 1]} : vector<8x256xf32> to vector<8x128xf32>
      %105 = vector.extract_strided_slice %103 {offsets = [0, 128], sizes = [8, 128], strides = [1, 1]} : vector<8x256xf32> to vector<8x128xf32>
      %106 = arith.mulf %104, %68 : vector<8x128xf32>
      %c0_63 = arith.constant 0 : index
      %c0_64 = arith.constant 0 : index
      %107 = vector.load %arg17[%c0_63, %c0_64] : memref<2x128xf32, #tpu.memory_space<vmem>>, vector<1x128xf32>
      %c0_65 = arith.constant 0 : index
      %c0_66 = arith.constant 0 : index
      %108 = vector.load %arg18[%c0_65, %c0_66] : memref<2x128xf32, #tpu.memory_space<vmem>>, vector<1x128xf32>
      %cst_67 = arith.constant dense<0.000000e+00> : vector<8xf32>
      %109 = vector.multi_reduction <add>, %106, %cst_67 [1] : vector<8x128xf32> to vector<8xf32>
      %110 = vector.shape_cast %109 : vector<8xf32> to vector<8x1xf32>
      %cst_68 = arith.constant 1.280000e+02 : f32
      %111 = vector.broadcast %cst_68 : f32 to vector<8x1xf32>
      %112 = arith.divf %110, %111 : vector<8x1xf32>
      %113 = vector.broadcast %112 : vector<8x1xf32> to vector<8x128xf32>
      %114 = arith.subf %106, %113 : vector<8x128xf32>
      %115 = arith.mulf %114, %114 : vector<8x128xf32>
      %cst_69 = arith.constant dense<0.000000e+00> : vector<8xf32>
      %116 = vector.multi_reduction <add>, %115, %cst_69 [1] : vector<8x128xf32> to vector<8xf32>
      %117 = vector.shape_cast %116 : vector<8xf32> to vector<8x1xf32>
      %cst_70 = arith.constant 1.280000e+02 : f32
      %118 = vector.broadcast %cst_70 : f32 to vector<8x1xf32>
      %119 = arith.divf %117, %118 : vector<8x1xf32>
      %120 = vector.broadcast %112 : vector<8x1xf32> to vector<8x128xf32>
      %121 = arith.subf %106, %120 : vector<8x128xf32>
      %cst_71 = arith.constant 9.99999997E-7 : f32
      %122 = vector.broadcast %cst_71 : f32 to vector<8x1xf32>
      %123 = arith.addf %119, %122 : vector<8x1xf32>
      %124 = math.rsqrt %123 : vector<8x1xf32>
      %125 = vector.broadcast %124 : vector<8x1xf32> to vector<8x128xf32>
      %126 = arith.mulf %121, %125 : vector<8x128xf32>
      %127 = vector.broadcast %107 : vector<1x128xf32> to vector<8x128xf32>
      %128 = arith.mulf %126, %127 : vector<8x128xf32>
      %129 = vector.broadcast %108 : vector<1x128xf32> to vector<8x128xf32>
      %130 = arith.addf %128, %129 : vector<8x128xf32>
      %cst_72 = arith.constant 1.000000e+00 : f32
      %131 = vector.broadcast %cst_72 : f32 to vector<8x128xf32>
      %132 = arith.subf %131, %104 : vector<8x128xf32>
      %133 = arith.mulf %132, %102 : vector<8x128xf32>
      %c1 = arith.constant 1 : index
      %c0_73 = arith.constant 0 : index
      %134 = vector.load %arg17[%c1, %c0_73] : memref<2x128xf32, #tpu.memory_space<vmem>>, vector<1x128xf32>
      %c1_74 = arith.constant 1 : index
      %c0_75 = arith.constant 0 : index
      %135 = vector.load %arg18[%c1_74, %c0_75] : memref<2x128xf32, #tpu.memory_space<vmem>>, vector<1x128xf32>
      %cst_76 = arith.constant dense<0.000000e+00> : vector<8xf32>
      %136 = vector.multi_reduction <add>, %133, %cst_76 [1] : vector<8x128xf32> to vector<8xf32>
      %137 = vector.shape_cast %136 : vector<8xf32> to vector<8x1xf32>
      %cst_77 = arith.constant 1.280000e+02 : f32
      %138 = vector.broadcast %cst_77 : f32 to vector<8x1xf32>
      %139 = arith.divf %137, %138 : vector<8x1xf32>
      %140 = vector.broadcast %139 : vector<8x1xf32> to vector<8x128xf32>
      %141 = arith.subf %133, %140 : vector<8x128xf32>
      %142 = arith.mulf %141, %141 : vector<8x128xf32>
      %cst_78 = arith.constant dense<0.000000e+00> : vector<8xf32>
      %143 = vector.multi_reduction <add>, %142, %cst_78 [1] : vector<8x128xf32> to vector<8xf32>
      %144 = vector.shape_cast %143 : vector<8xf32> to vector<8x1xf32>
      %cst_79 = arith.constant 1.280000e+02 : f32
      %145 = vector.broadcast %cst_79 : f32 to vector<8x1xf32>
      %146 = arith.divf %144, %145 : vector<8x1xf32>
      %147 = vector.broadcast %139 : vector<8x1xf32> to vector<8x128xf32>
      %148 = arith.subf %133, %147 : vector<8x128xf32>
      %cst_80 = arith.constant 9.99999997E-7 : f32
      %149 = vector.broadcast %cst_80 : f32 to vector<8x1xf32>
      %150 = arith.addf %146, %149 : vector<8x1xf32>
      %151 = math.rsqrt %150 : vector<8x1xf32>
      %152 = vector.broadcast %151 : vector<8x1xf32> to vector<8x128xf32>
      %153 = arith.mulf %148, %152 : vector<8x128xf32>
      %154 = vector.broadcast %134 : vector<1x128xf32> to vector<8x128xf32>
      %155 = arith.mulf %153, %154 : vector<8x128xf32>
      %156 = vector.broadcast %135 : vector<1x128xf32> to vector<8x128xf32>
      %157 = arith.addf %155, %156 : vector<8x128xf32>
      %158 = tpu.concatenate %130, %157 in 1 : vector<8x128xf32>, vector<8x128xf32> -> vector<8x256xf32>
      %c0_81 = arith.constant 0 : index
      %c0_82 = arith.constant 0 : index
      %159 = vector.load %arg19[%c0_81, %c0_82] : memref<256x128xf32, #tpu.memory_space<vmem>>, vector<256x128xf32>
      %cst_83 = arith.constant dense<0.000000e+00> : vector<8x128xf32>
      %160 = tpu.matmul %158, %159, %cst_83 {dimension_numbers = #tpu.dot_dimension_numbers<[1], [0], [0], [1], [0, 0, 1, 1], [], []>} : vector<8x256xf32>, vector<256x128xf32>, vector<8x128xf32> -> vector<8x128xf32>
      %161 = arith.mulf %105, %31 : vector<8x128xf32>
      %cst_84 = arith.constant 1.000000e+00 : f32
      %162 = vector.broadcast %cst_84 : f32 to vector<8x128xf32>
      %163 = arith.subf %162, %105 : vector<8x128xf32>
      %164 = arith.mulf %163, %160 : vector<8x128xf32>
      %165 = arith.addf %161, %164 : vector<8x128xf32>
      %c0_85 = arith.constant 0 : index
      %c0_86 = arith.constant 0 : index
      %166 = vector.load %arg12[%c0_85, %c0_86] : memref<8x128xf32, #tpu.memory_space<vmem>>, vector<8x128xf32>
      %167 = tpu.concatenate %165, %30, %166 in 1 : vector<8x128xf32>, vector<8x128xf32>, vector<8x128xf32> -> vector<8x384xf32>
      %c0_87 = arith.constant 0 : index
      %c0_88 = arith.constant 0 : index
      %168 = vector.load %arg13[%c0_87, %c0_88] : memref<8x128xf32, #tpu.memory_space<vmem>>, vector<8x128xf32>
      %c0_89 = arith.constant 0 : index
      %c0_90 = arith.constant 0 : index
      %169 = vector.load %arg20[%c0_89, %c0_90] : memref<384x512xf32, #tpu.memory_space<vmem>>, vector<384x512xf32>
      %c0_91 = arith.constant 0 : index
      %c0_92 = arith.constant 0 : index
      %170 = vector.load %arg21[%c0_91, %c0_92] : memref<1x512xf32, #tpu.memory_space<vmem>>, vector<1x512xf32>
      %cst_93 = arith.constant dense<0.000000e+00> : vector<8x512xf32>
      %171 = tpu.matmul %167, %169, %cst_93 {dimension_numbers = #tpu.dot_dimension_numbers<[1], [0], [0], [1], [0, 0, 1, 1], [], []>} : vector<8x384xf32>, vector<384x512xf32>, vector<8x512xf32> -> vector<8x512xf32>
      %172 = vector.broadcast %170 : vector<1x512xf32> to vector<8x512xf32>
      %173 = arith.addf %171, %172 : vector<8x512xf32>
      %174 = vector.extract_strided_slice %173 {offsets = [0, 0], sizes = [8, 256], strides = [1, 1]} : vector<8x512xf32> to vector<8x256xf32>
      %175 = arith.negf %174 : vector<8x256xf32>
      %176 = math.exp %175 : vector<8x256xf32>
      %cst_94 = arith.constant 1.000000e+00 : f32
      %177 = vector.broadcast %cst_94 : f32 to vector<8x256xf32>
      %178 = arith.addf %177, %176 : vector<8x256xf32>
      %179 = arith.divf %177, %178 : vector<8x256xf32>
      %180 = vector.extract_strided_slice %173 {offsets = [0, 256], sizes = [8, 128], strides = [1, 1]} : vector<8x512xf32> to vector<8x128xf32>
      %181 = math.tanh %180 : vector<8x128xf32>
      %182 = vector.extract_strided_slice %173 {offsets = [0, 384], sizes = [8, 128], strides = [1, 1]} : vector<8x512xf32> to vector<8x128xf32>
      %183 = arith.negf %182 : vector<8x128xf32>
      %184 = math.exp %183 : vector<8x128xf32>
      %cst_95 = arith.constant 1.000000e+00 : f32
      %185 = vector.broadcast %cst_95 : f32 to vector<8x128xf32>
      %186 = arith.addf %185, %184 : vector<8x128xf32>
      %187 = arith.divf %185, %186 : vector<8x128xf32>
      %188 = vector.extract_strided_slice %179 {offsets = [0, 0], sizes = [8, 128], strides = [1, 1]} : vector<8x256xf32> to vector<8x128xf32>
      %189 = vector.extract_strided_slice %179 {offsets = [0, 128], sizes = [8, 128], strides = [1, 1]} : vector<8x256xf32> to vector<8x128xf32>
      %190 = arith.mulf %189, %168 : vector<8x128xf32>
      %191 = arith.mulf %188, %181 : vector<8x128xf32>
      %192 = arith.addf %190, %191 : vector<8x128xf32>
      %193 = math.tanh %192 : vector<8x128xf32>
      %194 = arith.mulf %187, %193 : vector<8x128xf32>
      %c0_96 = arith.constant 0 : index
      %c0_97 = arith.constant 0 : index
      %195 = vector.load %arg22[%c0_96, %c0_97] : memref<8x128xf32, #tpu.memory_space<vmem>>, vector<8x128xf32>
      tpu.vector_store %arg22[%c0_96, %c0_97], %194 {strides = array<i32>} : memref<8x128xf32, #tpu.memory_space<vmem>>, vector<8x128xf32>,
      %c0_98 = arith.constant 0 : index
      %c0_99 = arith.constant 0 : index
      %196 = vector.load %arg23[%c0_98, %c0_99] : memref<8x128xf32, #tpu.memory_space<vmem>>, vector<8x128xf32>
      tpu.vector_store %arg23[%c0_98, %c0_99], %192 {strides = array<i32>} : memref<8x128xf32, #tpu.memory_space<vmem>>, vector<8x128xf32>,
    } else {
    }
    return
  }
  func.func @transform_0(%arg0: i32, %arg1: memref<8xi32, #tpu.memory_space<smem>>) -> (i32, i32, i32, i32) {
    %0 = arith.index_cast %arg0 : i32 to index
    %1 = memref.load %arg1[%0] : memref<8xi32, #tpu.memory_space<smem>>
    %c0_i32 = arith.constant 0 : i32
    %c0_i32_0 = arith.constant 0 : i32
    %c0_i32_1 = arith.constant 0 : i32
    return %arg0, %1, %c0_i32, %c0_i32_0 : i32, i32, i32, i32
  }
  func.func @transform_1(%arg0: i32, %arg1: memref<8xi32, #tpu.memory_space<smem>>) -> (i32, i32, i32, i32) {
    %0 = arith.index_cast %arg0 : i32 to index
    %1 = memref.load %arg1[%0] : memref<8xi32, #tpu.memory_space<smem>>
    %c0_i32 = arith.constant 0 : i32
    %c0_i32_0 = arith.constant 0 : i32
    %c0_i32_1 = arith.constant 0 : i32
    return %arg0, %1, %c0_i32, %c0_i32_0 : i32, i32, i32, i32
  }
  func.func @transform_2(%arg0: i32, %arg1: memref<8xi32, #tpu.memory_space<smem>>) -> (i32, i32, i32, i32) {
    %0 = arith.index_cast %arg0 : i32 to index
    %1 = memref.load %arg1[%0] : memref<8xi32, #tpu.memory_space<smem>>
    %c0_i32 = arith.constant 0 : i32
    %c0_i32_0 = arith.constant 0 : i32
    %c0_i32_1 = arith.constant 0 : i32
    return %arg0, %1, %c0_i32, %c0_i32_0 : i32, i32, i32, i32
  }
  func.func @transform_3(%arg0: i32, %arg1: memref<8xi32, #tpu.memory_space<smem>>) -> (i32, i32, i32, i32) {
    %0 = arith.index_cast %arg0 : i32 to index
    %1 = memref.load %arg1[%0] : memref<8xi32, #tpu.memory_space<smem>>
    %c0_i32 = arith.constant 0 : i32
    %c0_i32_0 = arith.constant 0 : i32
    %c0_i32_1 = arith.constant 0 : i32
    return %arg0, %1, %c0_i32, %c0_i32_0 : i32, i32, i32, i32
  }
  func.func @transform_4(%arg0: i32, %arg1: memref<8xi32, #tpu.memory_space<smem>>) -> (i32, i32) {
    %c0_i32 = arith.constant 0 : i32
    %c0_i32_0 = arith.constant 0 : i32
    %c0_i32_1 = arith.constant 0 : i32
    return %c0_i32, %c0_i32_0 : i32, i32
  }
  func.func @transform_5(%arg0: i32, %arg1: memref<8xi32, #tpu.memory_space<smem>>) -> (i32, i32) {
    %c0_i32 = arith.constant 0 : i32
    %c0_i32_0 = arith.constant 0 : i32
    %c0_i32_1 = arith.constant 0 : i32
    return %c0_i32, %c0_i32_0 : i32, i32
  }
  func.func @transform_6(%arg0: i32, %arg1: memref<8xi32, #tpu.memory_space<smem>>) -> (i32, i32) {
    %c0_i32 = arith.constant 0 : i32
    %c0_i32_0 = arith.constant 0 : i32
    %c0_i32_1 = arith.constant 0 : i32
    return %c0_i32, %c0_i32_0 : i32, i32
  }
  func.func @transform_7(%arg0: i32, %arg1: memref<8xi32, #tpu.memory_space<smem>>) -> (i32, i32) {
    %c0_i32 = arith.constant 0 : i32
    %c0_i32_0 = arith.constant 0 : i32
    %c0_i32_1 = arith.constant 0 : i32
    return %c0_i32, %c0_i32_0 : i32, i32
  }
  func.func @transform_8(%arg0: i32, %arg1: memref<8xi32, #tpu.memory_space<smem>>) -> (i32, i32) {
    %c0_i32 = arith.constant 0 : i32
    %c0_i32_0 = arith.constant 0 : i32
    %c0_i32_1 = arith.constant 0 : i32
    return %c0_i32, %c0_i32_0 : i32, i32
  }
  func.func @transform_9(%arg0: i32, %arg1: memref<8xi32, #tpu.memory_space<smem>>) -> (i32, i32) {
    %c0_i32 = arith.constant 0 : i32
    %c0_i32_0 = arith.constant 0 : i32
    %c0_i32_1 = arith.constant 0 : i32
    return %c0_i32, %c0_i32_0 : i32, i32
  }
  func.func @transform_10(%arg0: i32, %arg1: memref<8xi32, #tpu.memory_space<smem>>) -> (i32, i32) {
    %c0_i32 = arith.constant 0 : i32
    %c0_i32_0 = arith.constant 0 : i32
    %c0_i32_1 = arith.constant 0 : i32
    return %c0_i32, %c0_i32_0 : i32, i32
  }
  func.func @transform_11(%arg0: i32, %arg1: memref<8xi32, #tpu.memory_space<smem>>) -> (i32, i32) {
    %c0_i32 = arith.constant 0 : i32
    %c0_i32_0 = arith.constant 0 : i32
    %c0_i32_1 = arith.constant 0 : i32
    return %c0_i32, %c0_i32_0 : i32, i32
  }
  func.func @transform_12(%arg0: i32, %arg1: memref<8xi32, #tpu.memory_space<smem>>) -> (i32, i32) {
    %c0_i32 = arith.constant 0 : i32
    %c0_i32_0 = arith.constant 0 : i32
    %c0_i32_1 = arith.constant 0 : i32
    return %c0_i32, %c0_i32_0 : i32, i32
  }
  func.func @transform_13(%arg0: i32, %arg1: memref<8xi32, #tpu.memory_space<smem>>) -> (i32, i32) {
    %c0_i32 = arith.constant 0 : i32
    %c0_i32_0 = arith.constant 0 : i32
    %c0_i32_1 = arith.constant 0 : i32
    return %c0_i32, %c0_i32_0 : i32, i32
  }
  func.func @transform_14(%arg0: i32, %arg1: memref<8xi32, #tpu.memory_space<smem>>) -> (i32, i32) {
    %c0_i32 = arith.constant 0 : i32
    %c0_i32_0 = arith.constant 0 : i32
    %c0_i32_1 = arith.constant 0 : i32
    return %c0_i32, %c0_i32_0 : i32, i32
  }
  func.func @transform_15(%arg0: i32, %arg1: memref<8xi32, #tpu.memory_space<smem>>) -> (i32, i32) {
    %c0_i32 = arith.constant 0 : i32
    %c0_i32_0 = arith.constant 0 : i32
    %c0_i32_1 = arith.constant 0 : i32
    return %c0_i32, %c0_i32_0 : i32, i32
  }
  func.func @transform_16(%arg0: i32, %arg1: memref<8xi32, #tpu.memory_space<smem>>) -> (i32, i32) {
    %c0_i32 = arith.constant 0 : i32
    %c0_i32_0 = arith.constant 0 : i32
    %c0_i32_1 = arith.constant 0 : i32
    return %c0_i32, %c0_i32_0 : i32, i32
  }
  func.func @transform_17(%arg0: i32, %arg1: memref<8xi32, #tpu.memory_space<smem>>) -> (i32, i32) {
    %c0_i32 = arith.constant 0 : i32
    %c0_i32_0 = arith.constant 0 : i32
    %c0_i32_1 = arith.constant 0 : i32
    return %c0_i32, %c0_i32_0 : i32, i32
  }
  func.func @transform_18(%arg0: i32, %arg1: memref<8xi32, #tpu.memory_space<smem>>) -> (i32, i32) {
    %c0_i32 = arith.constant 0 : i32
    %c0_i32_0 = arith.constant 0 : i32
    %c0_i32_1 = arith.constant 0 : i32
    return %c0_i32, %c0_i32_0 : i32, i32
  }
  func.func @transform_19(%arg0: i32, %arg1: memref<8xi32, #tpu.memory_space<smem>>) -> (i32, i32) {
    %c0_i32 = arith.constant 0 : i32
    %c0_i32_0 = arith.constant 0 : i32
    %c0_i32_1 = arith.constant 0 : i32
    return %c0_i32, %c0_i32_0 : i32, i32
  }
  func.func @transform_20(%arg0: i32, %arg1: memref<8xi32, #tpu.memory_space<smem>>) -> (i32, i32) {
    %c0_i32 = arith.constant 0 : i32
    %c0_i32_0 = arith.constant 0 : i32
    %c0_i32_1 = arith.constant 0 : i32
    return %c0_i32, %c0_i32_0 : i32, i32
  }
  func.func @transform_21(%arg0: i32, %arg1: memref<8xi32, #tpu.memory_space<smem>>) -> (i32, i32) {
    %c0_i32 = arith.constant 0 : i32
    %c0_i32_0 = arith.constant 0 : i32
    %c0_i32_1 = arith.constant 0 : i32
    return %c0_i32, %c0_i32_0 : i32, i32
  }
}

</mosaic_0001>

<bundles_post_ra>
// kernel: updown_core_forward.2
= control target key start
LH: loop header
LB: loop body
LE: loop exit
PB: predicated region body
PF: predicated region fallthrough
CT: control target
= control target key end

     0   :  { %vm2505_vm0 = vmmov 0   ;;  %vm1089_vm1 = vcmask 130112   ;;  %vm1154_vm2 = vcmask 1041409   ;;  %vm1156_vm3 = vcmask 1042434   ;;  %s4348_s9 = inlined_call_operand.vmem [shape: f32[512,512], index: 9, kind: input, shape index: {}]   ;;  %s4349_s1 = inlined_call_operand.vmem [shape: f32[8,128], index: 1, kind: input, shape index: {}]   ;;  %s4350_s7 = inlined_call_operand.vmem [shape: f32[2,8,128], index: 7, kind: input, shape index: {}]   ;;  %s4351_s0 = inlined_call_operand.vmem [shape: f32[8,128], index: 0, kind: input, shape index: {}]   ;;  %s4352_s11 = inlined_call_operand.vmem [shape: f32[128,384], index: 11, kind: input, shape index: {}]   ;;  %s4353_s10 = inlined_call_operand.vmem [shape: f32[1,512], index: 10, kind: input, shape index: {}]   ;;  %s4354_s8 = inlined_call_operand.vmem [shape: f32[2,8,128], index: 8, kind: input, shape index: {}]   ;;  %s4355_s15 = inlined_call_operand.vmem [shape: f32[8,128], index: 15, kind: output, shape index: {1}]   ;;  %s4356_s14 = inlined_call_operand.vmem [shape: f32[8,128], index: 14, kind: output, shape index: {0}]   ;;  %s4357_s12 = inlined_call_operand.vmem [shape: f32[1,384], index: 12, kind: input, shape index: {}]   ;;  %s4358_s17 = inlined_call_operand.vmem [shape: f32[8,256], index: 17, kind: output, shape index: {3}]   ;;  %s4359_s3 = inlined_call_operand.vmem [shape: f32[8,16,128], index: 3, kind: input, shape index: {}]   ;;  %s4360_s13 = inlined_call_operand.vmem [shape: f32[1,128], index: 13, kind: input, shape index: {}]   ;;  %s4361_s4 = inlined_call_operand.vmem [shape: f32[8,16], index: 4, kind: input, shape index: {}]   ;;  %s4362_s20 = inlined_call_operand.vmem [shape: s32[1,8], index: 20, kind: output, shape index: {6}]   ;;  %s4363_s5 = inlined_call_operand.vmem [shape: f32[8,16,16], index: 5, kind: input, shape index: {}]   ;;  %s4364_s6 = inlined_call_operand.vmem [shape: f32[8,16,16], index: 6, kind: input, shape index: {}]   ;;  %s4365_s2 = inlined_call_operand.vmem [shape: f32[8,16,128], index: 2, kind: input, shape index: {}]   ;;  %s4366_s16 = inlined_call_operand.vmem [shape: f32[8,128], index: 16, kind: output, shape index: {2}]   ;;  %s4367_s18 = inlined_call_operand.vmem [shape: f32[8,16], index: 18, kind: output, shape index: {4}]   ;;  %s4368_s19 = inlined_call_operand.vmem [shape: f32[8,16], index: 19, kind: output, shape index: {5}]  }
   0x1   :  { %4372 = sst [smem:[#allocation2_spill]] %s4348_s9  ;;  %vm1158_vm4 = vcmask 1043459   ;;  %vm1160_vm5 = vcmask 1044484   ;;  %vm1162_vm6 = vcmask 1045509   ;;  %vm1164_vm7 = vcmask 1046534  }
   0x2   :  { %4373 = sst [smem:[#allocation3_spill]] %s4349_s1  ;;  %vm1166_vm8 = vcmask 1047559   ;;  %vm1169_vm9 = vcmask 130048   ;;  %vm2326_vm13 = vcmask 57344  }
   0x3   :  { %4374 = sst [smem:[#allocation4_spill]] %s4350_s7 }
   0x4   :  { %4375 = sst [smem:[#allocation5_spill]] %s4351_s0 }
   0x5   :  { %4376 = sst [smem:[#allocation6_spill]] %s4352_s11 }
   0x6   :  { %s4377_s23 = sld [smem:[#allocation2_spill]] }
   0x7   :  { %s4378_s25 = sld [smem:[#allocation3_spill]] }
   0x8   :  { %s4379_s11 = sld [smem:[#allocation4_spill]] }
   0x9   :  { %s4381_s27 = sld [smem:[#allocation6_spill]] }
   0xc   :  { %v121_v0 = vld [vmem:[%s4377_s23 + $0x1e8] sm:$0xff]  ;;  %v120_v2 = vld [vmem:[%s4377_s23 + $0x1e0] sm:$0xff] }
   0xd   :  { %v249_v1 = vld [vmem:[%s4377_s23 + $0x5e8] sm:$0xff]  ;;  %338 = vmatprep.subr.mxu0 %v121_v0  ;;  %v248_v3 = vld [vmem:[%s4377_s23 + $0x5e0] sm:$0xff] }
   0xe   :  { %409 = vmatprep.subr.mxu1 %v249_v1  ;;  %v117_v4 = vld [vmem:[%s4377_s23 + $0x1c8] sm:$0xff]  ;;  %339 = vmatpush1.msra.mxu0 %v120_v2  ;;  %v116_v6 = vld [vmem:[%s4377_s23 + $0x1c0] sm:$0xff] }
   0xf   :  { %v245_v5 = vld [vmem:[%s4377_s23 + $0x5c8] sm:$0xff]  ;;  %410 = vmatpush1.msra.mxu1 %v248_v3  ;;  %v244_v7 = vld [vmem:[%s4377_s23 + $0x5c0] sm:$0xff]  ;;  %340 = vmatprep.subr.mxu0 %v117_v4 }
  0x10   :  { %v113_v8 = vld [vmem:[%s4377_s23 + $0x1a8] sm:$0xff]  ;;  %411 = vmatprep.subr.mxu1 %v245_v5  ;;  %v112_v10 = vld [vmem:[%s4377_s23 + $0x1a0] sm:$0xff]  ;;  %341 = vmatpush1.msra.mxu0 %v116_v6 }
  0x11   :  { %v241_v9 = vld [vmem:[%s4377_s23 + $0x5a8] sm:$0xff]  ;;  %v240_v11 = vld [vmem:[%s4377_s23 + $0x5a0] sm:$0xff]  ;;  %412 = vmatpush1.msra.mxu1 %v244_v7  ;;  %342 = vmatprep.subr.mxu0 %v113_v8 }
  0x12   :  { %v109_v12 = vld [vmem:[%s4377_s23 + $0x188] sm:$0xff]  ;;  %413 = vmatprep.subr.mxu1 %v241_v9  ;;  %v108_v14 = vld [vmem:[%s4377_s23 + $0x180] sm:$0xff]  ;;  %343 = vmatpush1.msra.mxu0 %v112_v10 }
  0x13   :  { %v237_v13 = vld [vmem:[%s4377_s23 + $0x588] sm:$0xff]  ;;  %v236_v15 = vld [vmem:[%s4377_s23 + $0x580] sm:$0xff]  ;;  %414 = vmatpush1.msra.mxu1 %v240_v11  ;;  %344 = vmatprep.subr.mxu0 %v109_v12 }
  0x14   :  { %v105_v16 = vld [vmem:[%s4377_s23 + $0x168] sm:$0xff]  ;;  %415 = vmatprep.subr.mxu1 %v237_v13  ;;  %v104_v18 = vld [vmem:[%s4377_s23 + $0x160] sm:$0xff]  ;;  %345 = vmatpush1.msra.mxu0 %v108_v14 }
  0x15   :  { %v233_v17 = vld [vmem:[%s4377_s23 + $0x568] sm:$0xff]  ;;  %v232_v19 = vld [vmem:[%s4377_s23 + $0x560] sm:$0xff]  ;;  %416 = vmatpush1.msra.mxu1 %v236_v15  ;;  %346 = vmatprep.subr.mxu0 %v105_v16 }
  0x16   :  { %v101_v20 = vld [vmem:[%s4377_s23 + $0x148] sm:$0xff]  ;;  %417 = vmatprep.subr.mxu1 %v233_v17  ;;  %v100_v22 = vld [vmem:[%s4377_s23 + $0x140] sm:$0xff]  ;;  %347 = vmatpush1.msra.mxu0 %v104_v18 }
  0x17   :  { %v229_v21 = vld [vmem:[%s4377_s23 + $0x548] sm:$0xff]  ;;  %v228_v23 = vld [vmem:[%s4377_s23 + $0x540] sm:$0xff]  ;;  %418 = vmatpush1.msra.mxu1 %v232_v19  ;;  %348 = vmatprep.subr.mxu0 %v101_v20 }
  0x18   :  { %v97_v24 = vld [vmem:[%s4377_s23 + $0x128] sm:$0xff]  ;;  %419 = vmatprep.subr.mxu1 %v229_v21  ;;  %v96_v26 = vld [vmem:[%s4377_s23 + $0x120] sm:$0xff]  ;;  %349 = vmatpush1.msra.mxu0 %v100_v22 }
  0x19   :  { %v225_v25 = vld [vmem:[%s4377_s23 + $0x528] sm:$0xff]  ;;  %v224_v27 = vld [vmem:[%s4377_s23 + $0x520] sm:$0xff]  ;;  %420 = vmatpush1.msra.mxu1 %v228_v23  ;;  %350 = vmatprep.subr.mxu0 %v97_v24 }
  0x1a   :  { %v93_v28 = vld [vmem:[%s4377_s23 + $0x108] sm:$0xff]  ;;  %421 = vmatprep.subr.mxu1 %v225_v25  ;;  %v92_v30 = vld [vmem:[%s4377_s23 + $0x100] sm:$0xff]  ;;  %351 = vmatpush1.msra.mxu0 %v96_v26 }
  0x1b   :  { %v221_v29 = vld [vmem:[%s4377_s23 + $0x508] sm:$0xff]  ;;  %v220_v31 = vld [vmem:[%s4377_s23 + $0x500] sm:$0xff]  ;;  %422 = vmatpush1.msra.mxu1 %v224_v27  ;;  %352 = vmatprep.subr.mxu0 %v93_v28 }
  0x1c   :  { %v89_v32 = vld [vmem:[%s4377_s23 + $0xe8] sm:$0xff]  ;;  %423 = vmatprep.subr.mxu1 %v221_v29  ;;  %v88_v34 = vld [vmem:[%s4377_s23 + $0xe0] sm:$0xff]  ;;  %353 = vmatpush1.msra.mxu0 %v92_v30 }
  0x1d   :  { %v217_v33 = vld [vmem:[%s4377_s23 + $0x4e8] sm:$0xff]  ;;  %v216_v35 = vld [vmem:[%s4377_s23 + $0x4e0] sm:$0xff]  ;;  %424 = vmatpush1.msra.mxu1 %v220_v31  ;;  %354 = vmatprep.subr.mxu0 %v89_v32 }
  0x1e   :  { %v85_v36 = vld [vmem:[%s4377_s23 + $0xc8] sm:$0xff]  ;;  %425 = vmatprep.subr.mxu1 %v217_v33  ;;  %v84_v38 = vld [vmem:[%s4377_s23 + $0xc0] sm:$0xff]  ;;  %355 = vmatpush1.msra.mxu0 %v88_v34 }
  0x1f   :  { %v213_v37 = vld [vmem:[%s4377_s23 + $0x4c8] sm:$0xff]  ;;  %v212_v39 = vld [vmem:[%s4377_s23 + $0x4c0] sm:$0xff]  ;;  %426 = vmatpush1.msra.mxu1 %v216_v35  ;;  %356 = vmatprep.subr.mxu0 %v85_v36 }
  0x20   :  { %v81_v40 = vld [vmem:[%s4377_s23 + $0xa8] sm:$0xff]  ;;  %427 = vmatprep.subr.mxu1 %v213_v37  ;;  %v80_v42 = vld [vmem:[%s4377_s23 + $0xa0] sm:$0xff]  ;;  %357 = vmatpush1.msra.mxu0 %v84_v38 }
  0x21   :  { %v209_v41 = vld [vmem:[%s4377_s23 + $0x4a8] sm:$0xff]  ;;  %v208_v43 = vld [vmem:[%s4377_s23 + $0x4a0] sm:$0xff]  ;;  %428 = vmatpush1.msra.mxu1 %v212_v39  ;;  %358 = vmatprep.subr.mxu0 %v81_v40 }
  0x22   :  { %v77_v44 = vld [vmem:[%s4377_s23 + $0x88] sm:$0xff]  ;;  %429 = vmatprep.subr.mxu1 %v209_v41  ;;  %v76_v46 = vld [vmem:[%s4377_s23 + $0x80] sm:$0xff]  ;;  %359 = vmatpush1.msra.mxu0 %v80_v42 }
  0x23   :  { %v205_v45 = vld [vmem:[%s4377_s23 + $0x488] sm:$0xff]  ;;  %v204_v47 = vld [vmem:[%s4377_s23 + $0x480] sm:$0xff]  ;;  %430 = vmatpush1.msra.mxu1 %v208_v43  ;;  %360 = vmatprep.subr.mxu0 %v77_v44 }
  0x24   :  { %v73_v48 = vld [vmem:[%s4377_s23 + $0x68] sm:$0xff]  ;;  %431 = vmatprep.subr.mxu1 %v205_v45  ;;  %v72_v50 = vld [vmem:[%s4377_s23 + $0x60] sm:$0xff]  ;;  %361 = vmatpush1.msra.mxu0 %v76_v46 }
  0x25   :  { %v201_v49 = vld [vmem:[%s4377_s23 + $0x468] sm:$0xff]  ;;  %v200_v51 = vld [vmem:[%s4377_s23 + $0x460] sm:$0xff]  ;;  %432 = vmatpush1.msra.mxu1 %v204_v47  ;;  %362 = vmatprep.subr.mxu0 %v73_v48 }
  0x26   :  { %v69_v52 = vld [vmem:[%s4377_s23 + $0x48] sm:$0xff]  ;;  %433 = vmatprep.subr.mxu1 %v201_v49  ;;  %v68_v54 = vld [vmem:[%s4377_s23 + $0x40] sm:$0xff]  ;;  %363 = vmatpush1.msra.mxu0 %v72_v50 }
  0x27   :  { %v197_v53 = vld [vmem:[%s4377_s23 + $0x448] sm:$0xff]  ;;  %v196_v55 = vld [vmem:[%s4377_s23 + $0x440] sm:$0xff]  ;;  %434 = vmatpush1.msra.mxu1 %v200_v51  ;;  %364 = vmatprep.subr.mxu0 %v69_v52 }
  0x28   :  { %v65_v56 = vld [vmem:[%s4377_s23 + $0x28] sm:$0xff]  ;;  %435 = vmatprep.subr.mxu1 %v197_v53  ;;  %v64_v58 = vld [vmem:[%s4377_s23 + $0x20] sm:$0xff]  ;;  %365 = vmatpush1.msra.mxu0 %v68_v54 }
  0x29   :  { %v193_v57 = vld [vmem:[%s4377_s23 + $0x428] sm:$0xff]  ;;  %v192_v59 = vld [vmem:[%s4377_s23 + $0x420] sm:$0xff]  ;;  %436 = vmatpush1.msra.mxu1 %v196_v55  ;;  %366 = vmatprep.subr.mxu0 %v65_v56 }
  0x2a   :  { %v61_v60 = vld [vmem:[%s4377_s23 + $0x8] sm:$0xff]  ;;  %437 = vmatprep.subr.mxu1 %v193_v57  ;;  %v60_v62 = vld [vmem:[%s4377_s23] sm:$0xff]  ;;  %367 = vmatpush1.msra.mxu0 %v64_v58 }
  0x2b   :  { %v189_v61 = vld [vmem:[%s4377_s23 + $0x408] sm:$0xff]  ;;  %v188_v63 = vld [vmem:[%s4377_s23 + $0x400] sm:$0xff]  ;;  %438 = vmatpush1.msra.mxu1 %v192_v59  ;;  %368 = vmatprep.subr.mxu0 %v61_v60 }
  0x2c   :  { %v185_v0 = vld [vmem:[%s4377_s23 + $0x3e8] sm:$0xff]  ;;  %439 = vmatprep.subr.mxu1 %v189_v61  ;;  %v184_v2 = vld [vmem:[%s4377_s23 + $0x3e0] sm:$0xff]  ;;  %369 = vmatpush1.msra.mxu0 %v60_v62 }
  0x2d   :  { %v313_v1 = vld [vmem:[%s4377_s23 + $0x7e8] sm:$0xff]  ;;  %v312_v3 = vld [vmem:[%s4377_s23 + $0x7e0] sm:$0xff]  ;;  %440 = vmatpush1.msra.mxu1 %v188_v63  ;;  %370 = vmatprep.subr.mxu0 %v185_v0 }
  0x2e   :  { %v181_v4 = vld [vmem:[%s4377_s23 + $0x3c8] sm:$0xff]  ;;  %441 = vmatprep.subr.mxu1 %v313_v1  ;;  %v180_v6 = vld [vmem:[%s4377_s23 + $0x3c0] sm:$0xff]  ;;  %371 = vmatpush2.msra.mxu0 %v184_v2 }
  0x2f   :  { %v309_v5 = vld [vmem:[%s4377_s23 + $0x7c8] sm:$0xff]  ;;  %v308_v7 = vld [vmem:[%s4377_s23 + $0x7c0] sm:$0xff]  ;;  %442 = vmatpush2.msra.mxu1 %v312_v3  ;;  %372 = vmatprep.subr.mxu0 %v181_v4  ;;  %v123_v3 = vld [vmem:[%s4377_s23 + $0x1f8] sm:$0xff] }
  0x30   :  { %v177_v8 = vld [vmem:[%s4377_s23 + $0x3a8] sm:$0xff]  ;;  %443 = vmatprep.subr.mxu1 %v309_v5  ;;  %v176_v10 = vld [vmem:[%s4377_s23 + $0x3a0] sm:$0xff]  ;;  %373 = vmatpush2.msra.mxu0 %v180_v6  ;;  %v251_v4 = vld [vmem:[%s4377_s23 + $0x5f8] sm:$0xff] }
  0x31   :  { %v305_v9 = vld [vmem:[%s4377_s23 + $0x7a8] sm:$0xff]  ;;  %v304_v11 = vld [vmem:[%s4377_s23 + $0x7a0] sm:$0xff]  ;;  %444 = vmatpush2.msra.mxu1 %v308_v7  ;;  %374 = vmatprep.subr.mxu0 %v177_v8  ;;  %v122_v6 = vld [vmem:[%s4377_s23 + $0x1f0] sm:$0xff] }
  0x32   :  { %v173_v12 = vld [vmem:[%s4377_s23 + $0x388] sm:$0xff]  ;;  %445 = vmatprep.subr.mxu1 %v305_v9  ;;  %v172_v14 = vld [vmem:[%s4377_s23 + $0x380] sm:$0xff]  ;;  %375 = vmatpush2.msra.mxu0 %v176_v10  ;;  %v250_v7 = vld [vmem:[%s4377_s23 + $0x5f0] sm:$0xff] }
  0x33   :  { %v301_v13 = vld [vmem:[%s4377_s23 + $0x788] sm:$0xff]  ;;  %v300_v15 = vld [vmem:[%s4377_s23 + $0x780] sm:$0xff]  ;;  %446 = vmatpush2.msra.mxu1 %v304_v11  ;;  %376 = vmatprep.subr.mxu0 %v173_v12  ;;  %v119_v8 = vld [vmem:[%s4377_s23 + $0x1d8] sm:$0xff] }
  0x34   :  { %v169_v16 = vld [vmem:[%s4377_s23 + $0x368] sm:$0xff]  ;;  %447 = vmatprep.subr.mxu1 %v301_v13  ;;  %v168_v18 = vld [vmem:[%s4377_s23 + $0x360] sm:$0xff]  ;;  %377 = vmatpush2.msra.mxu0 %v172_v14  ;;  %v247_v9 = vld [vmem:[%s4377_s23 + $0x5d8] sm:$0xff] }
  0x35   :  { %v297_v17 = vld [vmem:[%s4377_s23 + $0x768] sm:$0xff]  ;;  %v296_v19 = vld [vmem:[%s4377_s23 + $0x760] sm:$0xff]  ;;  %448 = vmatpush2.msra.mxu1 %v300_v15  ;;  %378 = vmatprep.subr.mxu0 %v169_v16  ;;  %v118_v10 = vld [vmem:[%s4377_s23 + $0x1d0] sm:$0xff] }
  0x36   :  { %v165_v20 = vld [vmem:[%s4377_s23 + $0x348] sm:$0xff]  ;;  %449 = vmatprep.subr.mxu1 %v297_v17  ;;  %v164_v22 = vld [vmem:[%s4377_s23 + $0x340] sm:$0xff]  ;;  %379 = vmatpush2.msra.mxu0 %v168_v18  ;;  %v246_v11 = vld [vmem:[%s4377_s23 + $0x5d0] sm:$0xff] }
  0x37   :  { %v293_v21 = vld [vmem:[%s4377_s23 + $0x748] sm:$0xff]  ;;  %v292_v23 = vld [vmem:[%s4377_s23 + $0x740] sm:$0xff]  ;;  %450 = vmatpush2.msra.mxu1 %v296_v19  ;;  %380 = vmatprep.subr.mxu0 %v165_v20  ;;  %v115_v12 = vld [vmem:[%s4377_s23 + $0x1b8] sm:$0xff] }
  0x38   :  { %v161_v24 = vld [vmem:[%s4377_s23 + $0x328] sm:$0xff]  ;;  %451 = vmatprep.subr.mxu1 %v293_v21  ;;  %v160_v26 = vld [vmem:[%s4377_s23 + $0x320] sm:$0xff]  ;;  %381 = vmatpush2.msra.mxu0 %v164_v22  ;;  %v243_v13 = vld [vmem:[%s4377_s23 + $0x5b8] sm:$0xff] }
  0x39   :  { %v289_v25 = vld [vmem:[%s4377_s23 + $0x728] sm:$0xff]  ;;  %v288_v27 = vld [vmem:[%s4377_s23 + $0x720] sm:$0xff]  ;;  %452 = vmatpush2.msra.mxu1 %v292_v23  ;;  %382 = vmatprep.subr.mxu0 %v161_v24  ;;  %v114_v14 = vld [vmem:[%s4377_s23 + $0x1b0] sm:$0xff] }
  0x3a   :  { %v157_v28 = vld [vmem:[%s4377_s23 + $0x308] sm:$0xff]  ;;  %453 = vmatprep.subr.mxu1 %v289_v25  ;;  %v156_v30 = vld [vmem:[%s4377_s23 + $0x300] sm:$0xff]  ;;  %383 = vmatpush2.msra.mxu0 %v160_v26  ;;  %v242_v15 = vld [vmem:[%s4377_s23 + $0x5b0] sm:$0xff] }
  0x3b   :  { %v285_v29 = vld [vmem:[%s4377_s23 + $0x708] sm:$0xff]  ;;  %v284_v31 = vld [vmem:[%s4377_s23 + $0x700] sm:$0xff]  ;;  %454 = vmatpush2.msra.mxu1 %v288_v27  ;;  %384 = vmatprep.subr.mxu0 %v157_v28  ;;  %v111_v16 = vld [vmem:[%s4377_s23 + $0x198] sm:$0xff] }
  0x3c   :  { %v153_v32 = vld [vmem:[%s4377_s23 + $0x2e8] sm:$0xff]  ;;  %455 = vmatprep.subr.mxu1 %v285_v29  ;;  %v152_v34 = vld [vmem:[%s4377_s23 + $0x2e0] sm:$0xff]  ;;  %385 = vmatpush2.msra.mxu0 %v156_v30  ;;  %v239_v17 = vld [vmem:[%s4377_s23 + $0x598] sm:$0xff] }
  0x3d   :  { %v281_v33 = vld [vmem:[%s4377_s23 + $0x6e8] sm:$0xff]  ;;  %v280_v35 = vld [vmem:[%s4377_s23 + $0x6e0] sm:$0xff]  ;;  %456 = vmatpush2.msra.mxu1 %v284_v31  ;;  %386 = vmatprep.subr.mxu0 %v153_v32  ;;  %v110_v18 = vld [vmem:[%s4377_s23 + $0x190] sm:$0xff] }
  0x3e   :  { %v149_v36 = vld [vmem:[%s4377_s23 + $0x2c8] sm:$0xff]  ;;  %457 = vmatprep.subr.mxu1 %v281_v33  ;;  %v148_v38 = vld [vmem:[%s4377_s23 + $0x2c0] sm:$0xff]  ;;  %387 = vmatpush2.msra.mxu0 %v152_v34  ;;  %v238_v19 = vld [vmem:[%s4377_s23 + $0x590] sm:$0xff] }
  0x3f   :  { %v277_v37 = vld [vmem:[%s4377_s23 + $0x6c8] sm:$0xff]  ;;  %v276_v39 = vld [vmem:[%s4377_s23 + $0x6c0] sm:$0xff]  ;;  %458 = vmatpush2.msra.mxu1 %v280_v35  ;;  %388 = vmatprep.subr.mxu0 %v149_v36  ;;  %v107_v20 = vld [vmem:[%s4377_s23 + $0x178] sm:$0xff] }
  0x40   :  { %v145_v40 = vld [vmem:[%s4377_s23 + $0x2a8] sm:$0xff]  ;;  %459 = vmatprep.subr.mxu1 %v277_v37  ;;  %v144_v42 = vld [vmem:[%s4377_s23 + $0x2a0] sm:$0xff]  ;;  %389 = vmatpush2.msra.mxu0 %v148_v38  ;;  %v235_v21 = vld [vmem:[%s4377_s23 + $0x578] sm:$0xff] }
  0x41   :  { %v273_v41 = vld [vmem:[%s4377_s23 + $0x6a8] sm:$0xff]  ;;  %v272_v43 = vld [vmem:[%s4377_s23 + $0x6a0] sm:$0xff]  ;;  %460 = vmatpush2.msra.mxu1 %v276_v39  ;;  %390 = vmatprep.subr.mxu0 %v145_v40  ;;  %v106_v22 = vld [vmem:[%s4377_s23 + $0x170] sm:$0xff] }
  0x42   :  { %v141_v44 = vld [vmem:[%s4377_s23 + $0x288] sm:$0xff]  ;;  %461 = vmatprep.subr.mxu1 %v273_v41  ;;  %v140_v46 = vld [vmem:[%s4377_s23 + $0x280] sm:$0xff]  ;;  %391 = vmatpush2.msra.mxu0 %v144_v42  ;;  %v234_v23 = vld [vmem:[%s4377_s23 + $0x570] sm:$0xff] }
  0x43   :  { %v269_v45 = vld [vmem:[%s4377_s23 + $0x688] sm:$0xff]  ;;  %v268_v47 = vld [vmem:[%s4377_s23 + $0x680] sm:$0xff]  ;;  %462 = vmatpush2.msra.mxu1 %v272_v43  ;;  %392 = vmatprep.subr.mxu0 %v141_v44  ;;  %v103_v24 = vld [vmem:[%s4377_s23 + $0x158] sm:$0xff] }
  0x44   :  { %v137_v48 = vld [vmem:[%s4377_s23 + $0x268] sm:$0xff]  ;;  %463 = vmatprep.subr.mxu1 %v269_v45  ;;  %v136_v50 = vld [vmem:[%s4377_s23 + $0x260] sm:$0xff]  ;;  %393 = vmatpush2.msra.mxu0 %v140_v46  ;;  %v231_v25 = vld [vmem:[%s4377_s23 + $0x558] sm:$0xff] }
  0x45   :  { %v265_v49 = vld [vmem:[%s4377_s23 + $0x668] sm:$0xff]  ;;  %v264_v51 = vld [vmem:[%s4377_s23 + $0x660] sm:$0xff]  ;;  %464 = vmatpush2.msra.mxu1 %v268_v47  ;;  %394 = vmatprep.subr.mxu0 %v137_v48  ;;  %v102_v26 = vld [vmem:[%s4377_s23 + $0x150] sm:$0xff] }
  0x46   :  { %v133_v52 = vld [vmem:[%s4377_s23 + $0x248] sm:$0xff]  ;;  %465 = vmatprep.subr.mxu1 %v265_v49  ;;  %v132_v54 = vld [vmem:[%s4377_s23 + $0x240] sm:$0xff]  ;;  %395 = vmatpush2.msra.mxu0 %v136_v50  ;;  %v230_v27 = vld [vmem:[%s4377_s23 + $0x550] sm:$0xff] }
  0x47   :  { %v261_v53 = vld [vmem:[%s4377_s23 + $0x648] sm:$0xff]  ;;  %v260_v55 = vld [vmem:[%s4377_s23 + $0x640] sm:$0xff]  ;;  %466 = vmatpush2.msra.mxu1 %v264_v51  ;;  %396 = vmatprep.subr.mxu0 %v133_v52  ;;  %v99_v28 = vld [vmem:[%s4377_s23 + $0x138] sm:$0xff] }
  0x48   :  { %v129_v56 = vld [vmem:[%s4377_s23 + $0x228] sm:$0xff]  ;;  %467 = vmatprep.subr.mxu1 %v261_v53  ;;  %v128_v58 = vld [vmem:[%s4377_s23 + $0x220] sm:$0xff]  ;;  %397 = vmatpush2.msra.mxu0 %v132_v54  ;;  %v227_v29 = vld [vmem:[%s4377_s23 + $0x538] sm:$0xff] }
  0x49   :  { %v257_v57 = vld [vmem:[%s4377_s23 + $0x628] sm:$0xff]  ;;  %v256_v59 = vld [vmem:[%s4377_s23 + $0x620] sm:$0xff]  ;;  %468 = vmatpush2.msra.mxu1 %v260_v55  ;;  %398 = vmatprep.subr.mxu0 %v129_v56  ;;  %v98_v30 = vld [vmem:[%s4377_s23 + $0x130] sm:$0xff] }
  0x4a   :  { %v125_v60 = vld [vmem:[%s4377_s23 + $0x208] sm:$0xff]  ;;  %469 = vmatprep.subr.mxu1 %v257_v57  ;;  %v124_v62 = vld [vmem:[%s4377_s23 + $0x200] sm:$0xff]  ;;  %399 = vmatpush2.msra.mxu0 %v128_v58  ;;  %v226_v31 = vld [vmem:[%s4377_s23 + $0x530] sm:$0xff] }
  0x4b   :  { %v253_v61 = vld [vmem:[%s4377_s23 + $0x608] sm:$0xff]  ;;  %v2997_v63 = vld [vmem:[%s4378_s25] sm:$0xff]  ;;  %470 = vmatpush2.msra.mxu1 %v256_v59  ;;  %400 = vmatprep.subr.mxu0 %v125_v60  ;;  %s4380_s25 = sld [smem:[#allocation5_spill]]  ;;  %v95_v32 = vld [vmem:[%s4377_s23 + $0x118] sm:$0xff] }
  0x4c   :  { %v252_v0 = vld [vmem:[%s4377_s23 + $0x600] sm:$0xff]  ;;  %v3005_v1 = vld [vmem:[%s4379_s11 + $0x8] sm:$0xff]  ;;  %471 = vmatprep.subr.mxu1 %v253_v61  ;;  %401 = vmatpush2.msra.mxu0 %v124_v62  ;;  %v223_v33 = vld [vmem:[%s4377_s23 + $0x518] sm:$0xff] }
  0x4d   :  { %v3010_v2 = vld [vmem:[%s4379_s11] sm:$0xff]  ;;  %402 = vmatprep.mubr.f32.mxu0 %v2997_v63  ;;  %472 = vmatpush2.msra.mxu1 %v252_v0  ;;  %v94_v34 = vld [vmem:[%s4377_s23 + $0x110] sm:$0xff]  ;;  %v91_v36 = vld [vmem:[%s4377_s23 + $0xf8] sm:$0xff] }
  0x4e   :  { %403 = vmatmul.mubr.f32.vlgmr.msra.gmra.mxu0 %v3005_v1  ;;  %473 = vmatprep.mubr.f32.mxu1 %v3010_v2  ;;  %v222_v35 = vld [vmem:[%s4377_s23 + $0x510] sm:$0xff]  ;;  %v219_v37 = vld [vmem:[%s4377_s23 + $0x4f8] sm:$0xff] }
  0x4f   :  { %480 = vmatprep.subr.mxu0 %v123_v3  ;;  %551 = vmatprep.subr.mxu1 %v251_v4  ;;  %v90_v38 = vld [vmem:[%s4377_s23 + $0xf0] sm:$0xff]  ;;  %v87_v40 = vld [vmem:[%s4377_s23 + $0xd8] sm:$0xff] }
  0x50   :  { %481 = vmatpush1.msra.mxu0 %v122_v6  ;;  %v218_v39 = vld [vmem:[%s4377_s23 + $0x4f0] sm:$0xff]  ;;  %v215_v41 = vld [vmem:[%s4377_s23 + $0x4d8] sm:$0xff]  ;;  %544 = vmatprep.mubr.f32.mxu0 %v2997_v63 }
  0x51   :  { %v3022_v5 = vld [vmem:[%s4380_s25] sm:$0xff]  ;;  %482 = vmatprep.subr.mxu0 %v119_v8  ;;  %v86_v42 = vld [vmem:[%s4377_s23 + $0xd0] sm:$0xff]  ;;  %v83_v44 = vld [vmem:[%s4377_s23 + $0xb8] sm:$0xff] }
  0x52   :  { %474 = vmatmul.mubr.f32.vlgmr.msra.gmra.mxu1 %v3022_v5  ;;  %483 = vmatpush1.msra.mxu0 %v118_v10  ;;  %v214_v43 = vld [vmem:[%s4377_s23 + $0x4d0] sm:$0xff]  ;;  %v211_v45 = vld [vmem:[%s4377_s23 + $0x4b8] sm:$0xff] }
  0x53   :  { %552 = vmatpush1.msra.mxu1 %v250_v7  ;;  %484 = vmatprep.subr.mxu0 %v115_v12  ;;  %v82_v46 = vld [vmem:[%s4377_s23 + $0xb0] sm:$0xff]  ;;  %v79_v48 = vld [vmem:[%s4377_s23 + $0x98] sm:$0xff] }
  0x54   :  { %553 = vmatprep.subr.mxu1 %v247_v9  ;;  %485 = vmatpush1.msra.mxu0 %v114_v14  ;;  %v210_v47 = vld [vmem:[%s4377_s23 + $0x4b0] sm:$0xff]  ;;  %v207_v49 = vld [vmem:[%s4377_s23 + $0x498] sm:$0xff] }
  0x55   :  { %554 = vmatpush1.msra.mxu1 %v246_v11  ;;  %486 = vmatprep.subr.mxu0 %v111_v16  ;;  %v78_v50 = vld [vmem:[%s4377_s23 + $0x90] sm:$0xff]  ;;  %v75_v52 = vld [vmem:[%s4377_s23 + $0x78] sm:$0xff] }
  0x56   :  { %555 = vmatprep.subr.mxu1 %v243_v13  ;;  %487 = vmatpush1.msra.mxu0 %v110_v18  ;;  %v206_v51 = vld [vmem:[%s4377_s23 + $0x490] sm:$0xff]  ;;  %v203_v53 = vld [vmem:[%s4377_s23 + $0x478] sm:$0xff] }
  0x57   :  { %556 = vmatpush1.msra.mxu1 %v242_v15  ;;  %488 = vmatprep.subr.mxu0 %v107_v20  ;;  %v74_v54 = vld [vmem:[%s4377_s23 + $0x70] sm:$0xff]  ;;  %v71_v56 = vld [vmem:[%s4377_s23 + $0x58] sm:$0xff] }
  0x58   :  { %557 = vmatprep.subr.mxu1 %v239_v17  ;;  %489 = vmatpush1.msra.mxu0 %v106_v22  ;;  %v202_v55 = vld [vmem:[%s4377_s23 + $0x470] sm:$0xff]  ;;  %v199_v57 = vld [vmem:[%s4377_s23 + $0x458] sm:$0xff] }
  0x59   :  { %558 = vmatpush1.msra.mxu1 %v238_v19  ;;  %490 = vmatprep.subr.mxu0 %v103_v24  ;;  %v70_v58 = vld [vmem:[%s4377_s23 + $0x50] sm:$0xff]  ;;  %v67_v60 = vld [vmem:[%s4377_s23 + $0x38] sm:$0xff] }
  0x5a   :  { %559 = vmatprep.subr.mxu1 %v235_v21  ;;  %491 = vmatpush1.msra.mxu0 %v102_v26  ;;  %v198_v59 = vld [vmem:[%s4377_s23 + $0x450] sm:$0xff]  ;;  %v195_v61 = vld [vmem:[%s4377_s23 + $0x438] sm:$0xff] }
  0x5b   :  { %560 = vmatpush1.msra.mxu1 %v234_v23  ;;  %492 = vmatprep.subr.mxu0 %v99_v28  ;;  %v66_v62 = vld [vmem:[%s4377_s23 + $0x30] sm:$0xff]  ;;  %v63_v3 = vld [vmem:[%s4377_s23 + $0x18] sm:$0xff] }
  0x5c   :  { %561 = vmatprep.subr.mxu1 %v231_v25  ;;  %493 = vmatpush1.msra.mxu0 %v98_v30  ;;  %v194_v0 = vld [vmem:[%s4377_s23 + $0x430] sm:$0xff]  ;;  %v191_v4 = vld [vmem:[%s4377_s23 + $0x418] sm:$0xff] }
  0x5d   :  { %562 = vmatpush1.msra.mxu1 %v230_v27  ;;  %494 = vmatprep.subr.mxu0 %v95_v32  ;;  %v62_v6 = vld [vmem:[%s4377_s23 + $0x10] sm:$0xff]  ;;  %v187_v8 = vld [vmem:[%s4377_s23 + $0x3f8] sm:$0xff] }
  0x5e   :  { %563 = vmatprep.subr.mxu1 %v227_v29  ;;  %495 = vmatpush1.msra.mxu0 %v94_v34  ;;  %v190_v7 = vld [vmem:[%s4377_s23 + $0x410] sm:$0xff]  ;;  %v315_v9 = vld [vmem:[%s4377_s23 + $0x7f8] sm:$0xff] }
  0x5f   :  { %564 = vmatpush1.msra.mxu1 %v226_v31  ;;  %496 = vmatprep.subr.mxu0 %v91_v36  ;;  %v186_v10 = vld [vmem:[%s4377_s23 + $0x3f0] sm:$0xff]  ;;  %v183_v12 = vld [vmem:[%s4377_s23 + $0x3d8] sm:$0xff] }
  0x60   :  { %565 = vmatprep.subr.mxu1 %v223_v33  ;;  %497 = vmatpush1.msra.mxu0 %v90_v38  ;;  %v314_v11 = vld [vmem:[%s4377_s23 + $0x7f0] sm:$0xff]  ;;  %v311_v13 = vld [vmem:[%s4377_s23 + $0x7d8] sm:$0xff] }
  0x61   :  { %566 = vmatpush1.msra.mxu1 %v222_v35  ;;  %498 = vmatprep.subr.mxu0 %v87_v40  ;;  %v182_v14 = vld [vmem:[%s4377_s23 + $0x3d0] sm:$0xff]  ;;  %v179_v16 = vld [vmem:[%s4377_s23 + $0x3b8] sm:$0xff] }
  0x62   :  { %567 = vmatprep.subr.mxu1 %v219_v37  ;;  %499 = vmatpush1.msra.mxu0 %v86_v42  ;;  %v310_v15 = vld [vmem:[%s4377_s23 + $0x7d0] sm:$0xff]  ;;  %v307_v17 = vld [vmem:[%s4377_s23 + $0x7b8] sm:$0xff] }
  0x63   :  { %568 = vmatpush1.msra.mxu1 %v218_v39  ;;  %500 = vmatprep.subr.mxu0 %v83_v44  ;;  %v178_v18 = vld [vmem:[%s4377_s23 + $0x3b0] sm:$0xff]  ;;  %v175_v20 = vld [vmem:[%s4377_s23 + $0x398] sm:$0xff] }
  0x64   :  { %569 = vmatprep.subr.mxu1 %v215_v41  ;;  %501 = vmatpush1.msra.mxu0 %v82_v46  ;;  %v306_v19 = vld [vmem:[%s4377_s23 + $0x7b0] sm:$0xff]  ;;  %v303_v21 = vld [vmem:[%s4377_s23 + $0x798] sm:$0xff] }
  0x65   :  { %570 = vmatpush1.msra.mxu1 %v214_v43  ;;  %502 = vmatprep.subr.mxu0 %v79_v48  ;;  %v174_v22 = vld [vmem:[%s4377_s23 + $0x390] sm:$0xff]  ;;  %v171_v24 = vld [vmem:[%s4377_s23 + $0x378] sm:$0xff] }
  0x66   :  { %571 = vmatprep.subr.mxu1 %v211_v45  ;;  %503 = vmatpush1.msra.mxu0 %v78_v50  ;;  %v302_v23 = vld [vmem:[%s4377_s23 + $0x790] sm:$0xff]  ;;  %v299_v25 = vld [vmem:[%s4377_s23 + $0x778] sm:$0xff] }
  0x67   :  { %572 = vmatpush1.msra.mxu1 %v210_v47  ;;  %504 = vmatprep.subr.mxu0 %v75_v52  ;;  %v170_v26 = vld [vmem:[%s4377_s23 + $0x370] sm:$0xff]  ;;  %v167_v28 = vld [vmem:[%s4377_s23 + $0x358] sm:$0xff] }
  0x68   :  { %573 = vmatprep.subr.mxu1 %v207_v49  ;;  %505 = vmatpush1.msra.mxu0 %v74_v54  ;;  %v298_v27 = vld [vmem:[%s4377_s23 + $0x770] sm:$0xff]  ;;  %v295_v29 = vld [vmem:[%s4377_s23 + $0x758] sm:$0xff] }
  0x69   :  { %574 = vmatpush1.msra.mxu1 %v206_v51  ;;  %506 = vmatprep.subr.mxu0 %v71_v56  ;;  %v166_v30 = vld [vmem:[%s4377_s23 + $0x350] sm:$0xff]  ;;  %v163_v32 = vld [vmem:[%s4377_s23 + $0x338] sm:$0xff] }
  0x6a   :  { %575 = vmatprep.subr.mxu1 %v203_v53  ;;  %507 = vmatpush1.msra.mxu0 %v70_v58  ;;  %v294_v31 = vld [vmem:[%s4377_s23 + $0x750] sm:$0xff]  ;;  %v291_v33 = vld [vmem:[%s4377_s23 + $0x738] sm:$0xff] }
  0x6b   :  { %576 = vmatpush1.msra.mxu1 %v202_v55  ;;  %508 = vmatprep.subr.mxu0 %v67_v60  ;;  %v162_v34 = vld [vmem:[%s4377_s23 + $0x330] sm:$0xff]  ;;  %v159_v36 = vld [vmem:[%s4377_s23 + $0x318] sm:$0xff] }
  0x6c   :  { %577 = vmatprep.subr.mxu1 %v199_v57  ;;  %509 = vmatpush1.msra.mxu0 %v66_v62  ;;  %v290_v35 = vld [vmem:[%s4377_s23 + $0x730] sm:$0xff]  ;;  %v287_v37 = vld [vmem:[%s4377_s23 + $0x718] sm:$0xff] }
  0x6d   :  { %578 = vmatpush1.msra.mxu1 %v198_v59  ;;  %510 = vmatprep.subr.mxu0 %v63_v3  ;;  %v158_v38 = vld [vmem:[%s4377_s23 + $0x310] sm:$0xff]  ;;  %v155_v40 = vld [vmem:[%s4377_s23 + $0x2f8] sm:$0xff] }
  0x6e   :  { %579 = vmatprep.subr.mxu1 %v195_v61  ;;  %511 = vmatpush1.msra.mxu0 %v62_v6  ;;  %v286_v39 = vld [vmem:[%s4377_s23 + $0x710] sm:$0xff]  ;;  %v283_v41 = vld [vmem:[%s4377_s23 + $0x6f8] sm:$0xff] }
  0x6f   :  { %580 = vmatpush1.msra.mxu1 %v194_v0  ;;  %512 = vmatprep.subr.mxu0 %v187_v8  ;;  %v154_v42 = vld [vmem:[%s4377_s23 + $0x2f0] sm:$0xff]  ;;  %v151_v44 = vld [vmem:[%s4377_s23 + $0x2d8] sm:$0xff] }
  0x70   :  { %581 = vmatprep.subr.mxu1 %v191_v4  ;;  %513 = vmatpush2.msra.mxu0 %v186_v10  ;;  %v282_v43 = vld [vmem:[%s4377_s23 + $0x6f0] sm:$0xff]  ;;  %v279_v45 = vld [vmem:[%s4377_s23 + $0x6d8] sm:$0xff] }
  0x71   :  { %582 = vmatpush1.msra.mxu1 %v190_v7  ;;  %514 = vmatprep.subr.mxu0 %v183_v12  ;;  %v150_v46 = vld [vmem:[%s4377_s23 + $0x2d0] sm:$0xff]  ;;  %v147_v48 = vld [vmem:[%s4377_s23 + $0x2b8] sm:$0xff] }
  0x72   :  { %583 = vmatprep.subr.mxu1 %v315_v9  ;;  %515 = vmatpush2.msra.mxu0 %v182_v14  ;;  %v278_v47 = vld [vmem:[%s4377_s23 + $0x6d0] sm:$0xff]  ;;  %v275_v49 = vld [vmem:[%s4377_s23 + $0x6b8] sm:$0xff]  ;;  %v691_v14 = vld [vmem:[%s4381_s27 + $0x168] sm:$0xff] }
  0x73   :  { %584 = vmatpush2.msra.mxu1 %v314_v11  ;;  %516 = vmatprep.subr.mxu0 %v179_v16  ;;  %v146_v50 = vld [vmem:[%s4377_s23 + $0x2b0] sm:$0xff]  ;;  %v143_v52 = vld [vmem:[%s4377_s23 + $0x298] sm:$0xff] }
  0x74   :  { %585 = vmatprep.subr.mxu1 %v311_v13  ;;  %517 = vmatpush2.msra.mxu0 %v178_v18  ;;  %v274_v51 = vld [vmem:[%s4377_s23 + $0x6b0] sm:$0xff]  ;;  %v271_v53 = vld [vmem:[%s4377_s23 + $0x698] sm:$0xff]  ;;  %v2504_v13 = vmov 0.0   ;;  %v683_v18 = vld [vmem:[%s4381_s27 + $0x128] sm:$0xff] }
  0x75   :  { %586 = vmatpush2.msra.mxu1 %v310_v15  ;;  %518 = vmatprep.subr.mxu0 %v175_v20  ;;  %v142_v54 = vld [vmem:[%s4377_s23 + $0x290] sm:$0xff]  ;;  %v139_v56 = vld [vmem:[%s4377_s23 + $0x278] sm:$0xff]  ;;  %v686_v15 = vld [vmem:[%s4381_s27 + $0x140] sm:$0xff] }
  0x76   :  { %587 = vmatprep.subr.mxu1 %v307_v17  ;;  %519 = vmatpush2.msra.mxu0 %v174_v22  ;;  %v270_v55 = vld [vmem:[%s4377_s23 + $0x690] sm:$0xff]  ;;  %v267_v57 = vld [vmem:[%s4377_s23 + $0x678] sm:$0xff]  ;;  %v687_v17 = vld [vmem:[%s4381_s27 + $0x148] sm:$0xff] }
  0x77   :  { %588 = vmatpush2.msra.mxu1 %v306_v19  ;;  %520 = vmatprep.subr.mxu0 %v171_v24  ;;  %v138_v58 = vld [vmem:[%s4377_s23 + $0x270] sm:$0xff]  ;;  %v135_v60 = vld [vmem:[%s4377_s23 + $0x258] sm:$0xff]  ;;  %v682_v19 = vld [vmem:[%s4381_s27 + $0x120] sm:$0xff] }
  0x78   :  { %589 = vmatprep.subr.mxu1 %v303_v21  ;;  %521 = vmatpush2.msra.mxu0 %v170_v26  ;;  %v266_v59 = vld [vmem:[%s4377_s23 + $0x670] sm:$0xff]  ;;  %v263_v61 = vld [vmem:[%s4377_s23 + $0x658] sm:$0xff]  ;;  %v679_v22 = vld [vmem:[%s4381_s27 + $0x108] sm:$0xff] }
  0x79   :  { %590 = vmatpush2.msra.mxu1 %v302_v23  ;;  %522 = vmatprep.subr.mxu0 %v167_v28  ;;  %v134_v62 = vld [vmem:[%s4377_s23 + $0x250] sm:$0xff]  ;;  %v131_v3 = vld [vmem:[%s4377_s23 + $0x238] sm:$0xff]  ;;  %v678_v26 = vld [vmem:[%s4381_s27 + $0x100] sm:$0xff] }
  0x7a   :  { %591 = vmatprep.subr.mxu1 %v299_v25  ;;  %523 = vmatpush2.msra.mxu0 %v166_v30  ;;  %v262_v0 = vld [vmem:[%s4377_s23 + $0x650] sm:$0xff]  ;;  %v259_v4 = vld [vmem:[%s4377_s23 + $0x638] sm:$0xff]  ;;  %v671_v30 = vld [vmem:[%s4381_s27 + $0xc8] sm:$0xff] }
  0x7b   :  { %592 = vmatpush2.msra.mxu1 %v298_v27  ;;  %524 = vmatprep.subr.mxu0 %v163_v32  ;;  %v130_v6 = vld [vmem:[%s4377_s23 + $0x230] sm:$0xff]  ;;  %v127_v8 = vld [vmem:[%s4377_s23 + $0x218] sm:$0xff]  ;;  %v674_v27 = vld [vmem:[%s4381_s27 + $0xe0] sm:$0xff] }
  0x7c   :  { %593 = vmatprep.subr.mxu1 %v295_v29  ;;  %525 = vmatpush2.msra.mxu0 %v162_v34  ;;  %v258_v7 = vld [vmem:[%s4377_s23 + $0x630] sm:$0xff]  ;;  %v255_v9 = vld [vmem:[%s4377_s23 + $0x618] sm:$0xff]  ;;  %v675_v29 = vld [vmem:[%s4381_s27 + $0xe8] sm:$0xff] }
  0x7d   :  { %594 = vmatpush2.msra.mxu1 %v294_v31  ;;  %526 = vmatprep.subr.mxu0 %v159_v36  ;;  %v126_v10 = vld [vmem:[%s4377_s23 + $0x210] sm:$0xff]  ;;  %v693_v63 = vld [vmem:[%s4381_s27 + $0x178] sm:$0xff]  ;;  %v670_v31 = vld [vmem:[%s4381_s27 + $0xc0] sm:$0xff] }
  0x7e   :  { %595 = vmatprep.subr.mxu1 %v291_v33  ;;  %527 = vmatpush2.msra.mxu0 %v158_v38  ;;  %v254_v11 = vld [vmem:[%s4377_s23 + $0x610] sm:$0xff]  ;;  %v685_v16 = vld [vmem:[%s4381_s27 + $0x138] sm:$0xff]  ;;  %v667_v34 = vld [vmem:[%s4381_s27 + $0xa8] sm:$0xff] }
  0x7f   :  { %596 = vmatpush2.msra.mxu1 %v290_v35  ;;  %528 = vmatprep.subr.mxu0 %v155_v40  ;;  %v692_v12 = vld [vmem:[%s4381_s27 + $0x170] sm:$0xff]  ;;  %v681_v23 = vld [vmem:[%s4381_s27 + $0x118] sm:$0xff]  ;;  %v666_v38 = vld [vmem:[%s4381_s27 + $0xa0] sm:$0xff] }
  0x80   :  { %597 = vmatprep.subr.mxu1 %v287_v37  ;;  %529 = vmatpush2.msra.mxu0 %v154_v42  ;;  %v684_v20 = vld [vmem:[%s4381_s27 + $0x130] sm:$0xff]  ;;  %v677_v24 = vld [vmem:[%s4381_s27 + $0xf8] sm:$0xff]  ;;  %v659_v42 = vld [vmem:[%s4381_s27 + $0x68] sm:$0xff] }
  0x81   :  { %598 = vmatpush2.msra.mxu1 %v286_v39  ;;  %530 = vmatprep.subr.mxu0 %v151_v44  ;;  %v680_v21 = vld [vmem:[%s4381_s27 + $0x110] sm:$0xff]  ;;  %v673_v28 = vld [vmem:[%s4381_s27 + $0xd8] sm:$0xff]  ;;  %v662_v39 = vld [vmem:[%s4381_s27 + $0x80] sm:$0xff] }
  0x82   :  { %599 = vmatprep.subr.mxu1 %v283_v41  ;;  %531 = vmatpush2.msra.mxu0 %v150_v46  ;;  %v676_v25 = vld [vmem:[%s4381_s27 + $0xf0] sm:$0xff]  ;;  %v669_v35 = vld [vmem:[%s4381_s27 + $0xb8] sm:$0xff]  ;;  %v663_v41 = vld [vmem:[%s4381_s27 + $0x88] sm:$0xff] }
  0x83   :  { %600 = vmatpush2.msra.mxu1 %v282_v43  ;;  %532 = vmatprep.subr.mxu0 %v147_v48  ;;  %v672_v32 = vld [vmem:[%s4381_s27 + $0xd0] sm:$0xff]  ;;  %v665_v36 = vld [vmem:[%s4381_s27 + $0x98] sm:$0xff]  ;;  %v658_v43 = vld [vmem:[%s4381_s27 + $0x60] sm:$0xff] }
  0x84   :  { %601 = vmatprep.subr.mxu1 %v279_v45  ;;  %533 = vmatpush2.msra.mxu0 %v146_v50  ;;  %v668_v33 = vld [vmem:[%s4381_s27 + $0xb0] sm:$0xff]  ;;  %v661_v40 = vld [vmem:[%s4381_s27 + $0x78] sm:$0xff]  ;;  %v655_v46 = vld [vmem:[%s4381_s27 + $0x48] sm:$0xff] }
  0x85   :  { %602 = vmatpush2.msra.mxu1 %v278_v47  ;;  %534 = vmatprep.subr.mxu0 %v143_v52  ;;  %v664_v37 = vld [vmem:[%s4381_s27 + $0x90] sm:$0xff]  ;;  %v657_v47 = vld [vmem:[%s4381_s27 + $0x58] sm:$0xff]  ;;  %v654_v50 = vld [vmem:[%s4381_s27 + $0x40] sm:$0xff] }
  0x86   :  { %603 = vmatprep.subr.mxu1 %v275_v49  ;;  %535 = vmatpush2.msra.mxu0 %v142_v54  ;;  %v660_v44 = vld [vmem:[%s4381_s27 + $0x70] sm:$0xff]  ;;  %v653_v48 = vld [vmem:[%s4381_s27 + $0x38] sm:$0xff]  ;;  %v647_v54 = vld [vmem:[%s4381_s27 + $0x8] sm:$0xff] }
  0x87   :  { %604 = vmatpush2.msra.mxu1 %v274_v51  ;;  %536 = vmatprep.subr.mxu0 %v139_v56  ;;  %v656_v45 = vld [vmem:[%s4381_s27 + $0x50] sm:$0xff]  ;;  %v650_v51 = vld [vmem:[%s4381_s27 + $0x20] sm:$0xff]  ;;  %v649_v52 = vld [vmem:[%s4381_s27 + $0x18] sm:$0xff] }
  0x88   :  { %605 = vmatprep.subr.mxu1 %v271_v53  ;;  %537 = vmatpush2.msra.mxu0 %v138_v58  ;;  %v652_v49 = vld [vmem:[%s4381_s27 + $0x30] sm:$0xff]  ;;  %v651_v53 = vld [vmem:[%s4381_s27 + $0x28] sm:$0xff] }
  0x89   :  { %606 = vmatpush2.msra.mxu1 %v270_v55  ;;  %538 = vmatprep.subr.mxu0 %v135_v60  ;;  %v646_v55 = vld [vmem:[%s4381_s27] sm:$0xff]  ;;  %v648_v56 = vld [vmem:[%s4381_s27 + $0x10] sm:$0xff] }
  0x8a   :  { %607 = vmatprep.subr.mxu1 %v267_v57  ;;  %539 = vmatpush2.msra.mxu0 %v134_v62  ;;  %v318_v57 = vlaneseq  ;;  %v316_v60 = vld [vmem:[%s4353_s10] sm:$0xf] }
  0x8b   :  { %608 = vmatpush2.msra.mxu1 %v266_v59  ;;  %540 = vmatprep.subr.mxu0 %v131_v3 }
  0x8c   :  { %609 = vmatprep.subr.mxu1 %v263_v61  ;;  %541 = vmatpush2.msra.mxu0 %v130_v6  ;;  %v3572_v58 = vshrl.u32 %v318_v57, 7 }
  0x8d   :  { %610 = vmatpush2.msra.mxu1 %v262_v0  ;;  %542 = vmatprep.subr.mxu0 %v127_v8 }
  0x8e   :  { %611 = vmatprep.subr.mxu1 %v259_v4  ;;  %543 = vmatpush2.msra.mxu0 %v126_v10  ;;  %v3575_v59 = vsub.s32 1, %v3572_v58  ;;  %v3581_v61 = vsub.s32 0, %v3572_v58 }
  0x8f   :  { %612 = vmatpush2.msra.mxu1 %v258_v7  ;;  %615 = vmatprep.mubr.f32.mxu1 %v3010_v2  ;;  %v688_v2 = vld [vmem:[%s4381_s27 + $0x150] sm:$0xff] }
  0x90   :  { %613 = vmatprep.subr.mxu1 %v255_v9  ;;  %545 = vmatmul.mubr.f32.vlgmr.msra.gmra.mxu0 %v3005_v1  ;;  %v689_v1 = vld [vmem:[%s4381_s27 + $0x158] sm:$0xff]  ;;  %v325_v0 = vrot.slane %v316_v60, %v3575_v59  ;;  %v321_v3 = vrot.slane %v316_v60, %v3581_v61 }
  0x91   :  { %614 = vmatpush2.msra.mxu1 %v254_v11  ;;  %711 = vmatprep.subr.mxu0 %v692_v12 }
  0x92   :  { %616 = vmatmul.mubr.f32.vlgmr.msra.gmra.mxu1 %v3022_v5  ;;  %2379 = vmatprep.subr.mxu1 %v2504_v13  ;;  %v690_v5 = vld [vmem:[%s4381_s27 + $0x160] sm:$0xff] }
  0x93   :  { %712 = vmatpush1.msra.mxu0 %v691_v14  ;;  %2380 = vmatpush3.msra.mxu1 %v693_v63  ;;  %v3586_v63 = vsub.s32 2, %v3572_v58 }
  0x94   :  { %713 = vmatprep.subr.mxu0 %v689_v1  ;;  %2381 = vmatprep.subr.mxu1 %v2504_v13  ;;  %v3589_v1 = vsub.s32 3, %v3572_v58 }
  0x95   :  { %714 = vmatpush1.msra.mxu0 %v688_v2  ;;  %2382 = vmatpush3.msra.mxu1 %v690_v5 }
  0x96   :  { %715 = vmatprep.subr.mxu0 %v686_v15  ;;  %2383 = vmatprep.subr.mxu1 %v2504_v13  ;;  %v329_v15 = vrot.slane %v316_v60, %v3586_v63 }
  0x97   :  { %716 = vmatpush1.msra.mxu0 %v685_v16  ;;  %2384 = vmatpush3.msra.mxu1 %v687_v17  ;;  %v333_v17 = vrot.slane %v316_v60, %v3589_v1 }
  0x98   :  { %717 = vmatprep.subr.mxu0 %v683_v18  ;;  %2385 = vmatprep.subr.mxu1 %v2504_v13 }
  0x99   :  { %718 = vmatpush1.msra.mxu0 %v682_v19  ;;  %2386 = vmatpush3.msra.mxu1 %v684_v20 }
  0x9a   :  { %719 = vmatprep.subr.mxu0 %v680_v21  ;;  %2387 = vmatprep.subr.mxu1 %v2504_v13 }
  0x9b   :  { %720 = vmatpush1.msra.mxu0 %v679_v22  ;;  %2388 = vmatpush3.msra.mxu1 %v681_v23 }
  0x9c   :  { %721 = vmatprep.subr.mxu0 %v677_v24  ;;  %2389 = vmatprep.subr.mxu1 %v2504_v13 }
  0x9d   :  { %722 = vmatpush1.msra.mxu0 %v676_v25  ;;  %2390 = vmatpush3.msra.mxu1 %v678_v26 }
  0x9e   :  { %723 = vmatprep.subr.mxu0 %v674_v27  ;;  %2391 = vmatprep.subr.mxu1 %v2504_v13 }
  0x9f   :  { %724 = vmatpush1.msra.mxu0 %v673_v28  ;;  %2392 = vmatpush3.msra.mxu1 %v675_v29  ;;  %v59_v29 = vld [vmem:[%s4354_s8] sm:$0xff] }
  0xa0   :  { %725 = vmatprep.subr.mxu0 %v671_v30  ;;  %2393 = vmatprep.subr.mxu1 %v2504_v13 }
  0xa1   :  { %726 = vmatpush1.msra.mxu0 %v670_v31  ;;  %2394 = vmatpush3.msra.mxu1 %v672_v32 }
  0xa2   :  { %727 = vmatprep.subr.mxu0 %v668_v33  ;;  %2395 = vmatprep.subr.mxu1 %v2504_v13 }
  0xa3   :  { %728 = vmatpush1.msra.mxu0 %v667_v34  ;;  %2396 = vmatpush3.msra.mxu1 %v669_v35 }
  0xa4   :  { %729 = vmatprep.subr.mxu0 %v665_v36  ;;  %2397 = vmatprep.subr.mxu1 %v2504_v13 }
  0xa5   :  { %730 = vmatpush1.msra.mxu0 %v664_v37  ;;  %2398 = vmatpush3.msra.mxu1 %v666_v38 }
  0xa6   :  { %731 = vmatprep.subr.mxu0 %v662_v39  ;;  %2399 = vmatprep.subr.mxu1 %v2504_v13 }
  0xa7   :  { %732 = vmatpush1.msra.mxu0 %v661_v40  ;;  %2400 = vmatpush3.msra.mxu1 %v663_v41  ;;  %v2506_v40 = vmov 1966171168  }
  0xa8   :  { %733 = vmatprep.subr.mxu0 %v659_v42  ;;  %2401 = vmatprep.subr.mxu1 %v2504_v13  ;;  %v872_v41 = vunpack.c.l.s4 %v2506_v40  ;;  %v694_v42 = vld [vmem:[%s4357_s12] sm:$0x7] }
  0xa9   :  { %734 = vmatpush1.msra.mxu0 %v658_v43  ;;  %2402 = vmatpush3.msra.mxu1 %v660_v44  ;;  %v699_v44 = vrot.slane %v694_v42, %v3581_v61 }
  0xaa   :  { %735 = vmatprep.subr.mxu0 %v656_v45  ;;  %2403 = vmatprep.subr.mxu1 %v2504_v13  ;;  %v873_v43 = vunpack.c.0.s8 %v872_v41  ;;  %v707_v45 = vrot.slane %v694_v42, %v3586_v63 }
  0xab   :  { %736 = vmatpush1.msra.mxu0 %v655_v46  ;;  %2404 = vmatpush3.msra.mxu1 %v657_v47  ;;  %v703_v47 = vrot.slane %v694_v42, %v3575_v59 }
  0xac   :  { %737 = vmatprep.subr.mxu0 %v653_v48  ;;  %2405 = vmatprep.subr.mxu1 %v2504_v13  ;;  %v876_v46 = vsub.s32 %v873_v43, %v3572_v58 }
  0xad   :  { %738 = vmatpush1.msra.mxu0 %v652_v49  ;;  %2406 = vmatpush3.msra.mxu1 %v654_v50 }
  0xae   :  { %739 = vmatprep.subr.mxu0 %v650_v51  ;;  %2407 = vmatprep.subr.mxu1 %v2504_v13 }
  0xaf   :  { %740 = vmatpush1.msra.mxu0 %v649_v52  ;;  %2408 = vmatpush3.msra.mxu1 %v651_v53 }
  0xb0   :  { %741 = vmatprep.subr.mxu0 %v647_v54  ;;  %2409 = vmatprep.subr.mxu1 %v2504_v13 }
  0xb1   :  { %742 = vmatpush1.msra.mxu0 %v646_v55  ;;  %775 = vmatprep.mubr.f32.mxu0 %v2504_v13 }
  0xb2   :  { %2410 = vmatpush3.msra.mxu1 %v648_v56  ;;  %2411 = vmatprep.mubr.msk.f32.mxu1 %vm2505_vm0, %v2504_v13 }
 0x10e   :  { %v404_v62 = vpop.f32.mrf.mxu0 }
 0x10f   :  { %v405_v8 = vadd.f32 %v404_v62, %v321_v3  ;;  %v853_v3 = vld [vmem:[%s4359_s3] sm:$0xff] }
 0x110   :  { %v406_v6 = vpop.f32.mrf.mxu0 }
 0x111   :  { %v407_v7 = vadd.f32 %v406_v6, %v325_v0  ;;  %v854_v6 = vld [vmem:[%s4359_s3 + $0x8] sm:$0xff] }
 0x112   :  { %v475_v4 = vpop.f32.mrf.mxu1 }
 0x113   :  { %v476_v11 = vadd.f32 %v475_v4, %v405_v8 }
 0x114   :  { %v477_v9 = vpop.f32.mrf.mxu1 }
 0x115   :  { %v478_v10 = vadd.f32 %v477_v9, %v407_v7  ;;  %v2357_v14 = vmul.f32 -1.442695, %v476_v11 }
 0x117   :  { %v2358_v12 = vmul.f32 -1.442695, %v478_v10  ;;  %v855_v10 = vld [vmem:[%s4359_s3 + $0x10] sm:$0xff] }
 0x119   :  { %2420 = vpow2.f32 %v2358_v12  ;;  %v856_v12 = vld [vmem:[%s4359_s3 + $0x18] sm:$0xff] }
 0x11a   :  { %2422 = vpow2.f32 %v2357_v14 }
 0x126   :  { %v2421_v2 = vpop.eup %2420 }
 0x127   :  { %v2423_v5 = vpop.eup %2422  ;;  %v629_v16 = vadd.f32 1.0, %v2421_v2 }
 0x128   :  { %v628_v18 = vadd.f32 1.0, %v2423_v5 }
 0x129   :  { %2424 = vrcp.f32 %v629_v16  ;;  %v857_v16 = vld [vmem:[%s4359_s3 + $0x20] sm:$0xff] }
 0x12a   :  { %2426 = vrcp.f32 %v628_v18  ;;  %v858_v18 = vld [vmem:[%s4359_s3 + $0x28] sm:$0xff] }
 0x136   :  { %v2425_v28 = vpop.eup %2424 }
 0x137   :  { %v2427_v30 = vpop.eup %2426  ;;  %v641_v32 = vmul.f32 %v2425_v28, %v59_v29  ;;  %v859_v29 = vld [vmem:[%s4359_s3 + $0x30] sm:$0xff] }
 0x150   :  { %v546_v19 = vpop.f32.mrf.mxu0 }
 0x151   :  { %v547_v21 = vadd.f32 %v546_v19, %v329_v15 }
 0x152   :  { %v617_v20 = vpop.f32.mrf.mxu1  ;;  %v548_v22 = vpop.f32.mrf.mxu0 }
 0x153   :  { %v618_v23 = vadd.f32 %v617_v20, %v547_v21  ;;  %v549_v24 = vadd.f32 %v548_v22, %v333_v17 }
 0x154   :  { %v619_v25 = vpop.f32.mrf.mxu1 }
 0x155   :  { %2428 = vtanh.f32 %v618_v23  ;;  %v620_v26 = vadd.f32 %v619_v25, %v549_v24  ;;  %v861_v23 = vld [vmem:[%s4359_s3 + $0x40] sm:$0xff]  ;;  %v862_v25 = vld [vmem:[%s4359_s3 + $0x48] sm:$0xff] }
 0x157   :  { %v2359_v27 = vmul.f32 -1.442695, %v620_v26 }
 0x159   :  { %2430 = vpow2.f32 %v2359_v27 }
 0x162   :  { %v2429_v31 = vpop.eup %2428 }
 0x163   :  { %v642_v33 = vmul.f32 %v2429_v31, %v2427_v30  ;;  %v860_v31 = vld [vmem:[%s4359_s3 + $0x38] sm:$0xff] }
 0x165   :  { %v643_v34 = vadd.f32 %v642_v33, %v641_v32 }
 0x166   :  { %v2431_v35 = vpop.eup %2430 }
 0x167   :  { %2302 = vst [vmem:[%s4355_s15] sm:$0xff] %v643_v34  ;;  %v638_v36 = vadd.f32 1.0, %v2431_v35  ;;  %2432 = vtanh.f32 %v643_v34  ;;  %v863_v35 = vld [vmem:[%s4359_s3 + $0x50] sm:$0xff] }
 0x169   :  { %2434 = vrcp.f32 %v638_v36  ;;  %v3657_v36 = vld [vmem:[%s4360_s13] ss:$0 sm:$0xff] }
 0x174   :  { %v2433_v37 = vpop.eup %2432 }
 0x176   :  { %v2435_v38 = vpop.eup %2434 }
 0x177   :  { %v645_v39 = vmul.f32 %v2435_v38, %v2433_v37 }
 0x179   :  { %776 = vmatmul.mubr.f32.vlgmr.msra.gmra.mxu0 %v645_v39  ;;  %2301 = vst [vmem:[%s4356_s14] sm:$0xff] %v645_v39  ;;  %2412 = vmatmul.mubr.f32.vlgmr.msra.gmra.mxu1 %v645_v39  ;;  %v864_v39 = vld [vmem:[%s4359_s3 + $0x58] sm:$0xff] }
 0x239   :  { %v777_v48 = vpop.f32.mrf.mxu0  ;;  %v848_v49 = vpop.f32.mrf.mxu1 }
 0x23a   :  { %v778_v50 = vadd.f32 %v777_v48, %v699_v44  ;;  %v849_v51 = vadd.f32 %v848_v49, %v707_v45 }
 0x23b   :  { %v779_v52 = vpop.f32.mrf.mxu0  ;;  %v2413_v53 = vpop.f32.mrf.mxu1 }
 0x23c   :  { %v877_v54 = vrot.slane %v778_v50, %v876_v46  ;;  %2321 = vst [vmem:[%s4358_s17 + $0x8] sm:$0xff] %v849_v51  ;;  %v780_v55 = vadd.f32 %v779_v52, %v703_v47  ;;  %v870_v56 = vcombine.high %v778_v50, %v778_v50  ;;  %v866_v50 = vld [vmem:[%s4359_s3 + $0x68] sm:$0xff] }
 0x23e   :  { %v885_v60 = vcombine.high %v877_v54, %v877_v54  ;;  %v893_v62 = vrot.slane %v877_v54, %v876_v46  ;;  %2320 = vst [vmem:[%s4358_s17] sm:$0xff] %v780_v55  ;;  %v884_v7 = vrot.slane %v870_v56, %v876_v46  ;;  %v867_v55 = vld [vmem:[%s4359_s3 + $0x70] sm:$0xff] }
 0x240   :  { %v907_v0 = vrot.slane %v885_v60, %v876_v46  ;;  %v922_v4 = vrot.slane %v893_v62, %v3581_v61  ;;  %v915_v8 = vcombine.high %v893_v62, %v893_v62  ;;  %v900_v2 = vrot.slane %v884_v7, %v876_v46 }
 0x241   :  { %v886_v19 = vcombine.high %v884_v7, %v884_v7 }
 0x242   :  { %v926_v9 = vrot.slane %v907_v0, %v3581_v61  ;;  %v959_v11 = vadd.f32 %v922_v4, %v853_v3  ;;  %v960_v14 = vadd.f32 %v922_v4, %v854_v6  ;;  %v930_v5 = vrot.slane %v915_v8, %v3581_v61 }
 0x243   :  { %v917_v20 = vcombine.high %v907_v0, %v907_v0  ;;  %v938_v21 = vrot.slane %v900_v2, %v3581_v61  ;;  %v914_v26 = vrot.slane %v886_v19, %v876_v46  ;;  %v916_v32 = vcombine.high %v900_v2, %v900_v2  ;;  %v865_v46 = vld [vmem:[%s4359_s3 + $0x60] sm:$0xff]  ;;  %v868_v0 = vld [vmem:[%s4359_s3 + $0x78] sm:$0xff] }
 0x244   :  { %v961_v15 = vadd.f32 %v926_v9, %v855_v10  ;;  %v962_v17 = vadd.f32 %v926_v9, %v856_v12  ;;  %2436 = vtanh.f32 %v959_v11  ;;  %v963_v22 = vadd.f32 %v930_v5, %v857_v16 }
 0x245   :  { %2438 = vtanh.f32 %v960_v14  ;;  %v964_v24 = vadd.f32 %v930_v5, %v858_v18  ;;  %v934_v27 = vrot.slane %v917_v20, %v3581_v61  ;;  %v967_v28 = vadd.f32 %v938_v21, %v861_v23 }
 0x246   :  { %2440 = vtanh.f32 %v961_v15  ;;  %v968_v30 = vadd.f32 %v938_v21, %v862_v25  ;;  %v942_v33 = vrot.slane %v914_v26, %v3581_v61  ;;  %v918_v40 = vcombine.high %v914_v26, %v914_v26 }
 0x247   :  { %2442 = vtanh.f32 %v962_v17  ;;  %v965_v34 = vadd.f32 %v934_v27, %v859_v29  ;;  %v966_v37 = vadd.f32 %v934_v27, %v860_v31  ;;  %v946_v42 = vrot.slane %v916_v32, %v3581_v61 }
 0x248   :  { %2444 = vtanh.f32 %v963_v22  ;;  %v969_v43 = vadd.f32 %v942_v33, %v863_v35  ;;  %v970_v47 = vadd.f32 %v942_v33, %v864_v39  ;;  %v950_v51 = vrot.slane %v918_v40, %v3581_v61 }
 0x249   :  { %2446 = vtanh.f32 %v964_v24  ;;  %v971_v52 = vadd.f32 %v946_v42, %v865_v46  ;;  %v972_v56 = vadd.f32 %v946_v42, %v866_v50  ;;  %v3705_v33 = vand.u32 127, %v318_v57 }
 0x24a   :  { %2448 = vtanh.f32 %v967_v28  ;;  %v973_v3 = vadd.f32 %v950_v51, %v867_v55  ;;  %v974_v7 = vadd.f32 %v950_v51, %v868_v0 }
 0x24b   :  { %2450 = vtanh.f32 %v968_v30  ;;  %v1084_v35 = vadd.s32 4294967288, %v3705_v33  ;;  %v3721_v40 = vsub.s32 %v3705_v33, %v3572_v58 }
 0x24c   :  { %2452 = vtanh.f32 %v965_v34 }
 0x24d   :  { %2454 = vtanh.f32 %v966_v37 }
 0x24e   :  { %2456 = vtanh.f32 %v969_v43 }
 0x24f   :  { %2458 = vtanh.f32 %v970_v47 }
 0x250   :  { %2460 = vtanh.f32 %v971_v52 }
 0x251   :  { %v2437_v38 = vpop.eup %2436  ;;  %2462 = vtanh.f32 %v972_v56 }
 0x252   :  { %v2439_v41 = vpop.eup %2438  ;;  %v998_v44 = vmul.f32 %v2437_v38, %v3657_v36  ;;  %2464 = vtanh.f32 %v973_v3  ;;  %v3715_v38 = vsub.s32 %v1084_v35, %v3572_v58 }
 0x253   :  { %v2441_v45 = vpop.eup %2440  ;;  %v999_v53 = vmul.f32 %v2439_v41, %v3657_v36  ;;  %2466 = vtanh.f32 %v974_v7 }
 0x254   :  { %1014 = vadd.xlane.f32.xlu0 %v998_v44  ;;  %v1000_v48 = vmul.f32 %v2441_v45, %v3657_v36  ;;  %v2443_v49 = vpop.eup %2442 }
 0x255   :  { %v2445_v54 = vpop.eup %2444  ;;  %v1001_v60 = vmul.f32 %v2443_v49, %v3657_v36 }
 0x256   :  { %1018 = vadd.xlane.f32.xlu1 %v1000_v48  ;;  %v2447_v62 = vpop.eup %2446  ;;  %v1002_v4 = vmul.f32 %v2445_v54, %v3657_v36 }
 0x257   :  { %v2449_v6 = vpop.eup %2448  ;;  %v1003_v8 = vmul.f32 %v2447_v62, %v3657_v36 }
 0x258   :  { %1016 = vadd.xlane.f32.xlu0 %v999_v53  ;;  %v2451_v9 = vpop.eup %2450  ;;  %v1006_v10 = vmul.f32 %v2449_v6, %v3657_v36 }
 0x259   :  { %v2453_v11 = vpop.eup %2452  ;;  %v1007_v12 = vmul.f32 %v2451_v9, %v3657_v36 }
 0x25a   :  { %1020 = vadd.xlane.f32.xlu1 %v1001_v60  ;;  %v2455_v14 = vpop.eup %2454  ;;  %v1004_v2 = vmul.f32 %v2453_v11, %v3657_v36 }
 0x25b   :  { %v2457_v5 = vpop.eup %2456  ;;  %v1005_v15 = vmul.f32 %v2455_v14, %v3657_v36 }
 0x25c   :  { %1022 = vadd.xlane.f32.xlu0 %v1002_v4  ;;  %v2459_v16 = vpop.eup %2458  ;;  %v1008_v17 = vmul.f32 %v2457_v5, %v3657_v36 }
 0x25d   :  { %v2461_v18 = vpop.eup %2460  ;;  %v1009_v19 = vmul.f32 %v2459_v16, %v3657_v36 }
 0x25e   :  { %1024 = vadd.xlane.f32.xlu1 %v1003_v8  ;;  %v2463_v20 = vpop.eup %2462  ;;  %v1010_v21 = vmul.f32 %v2461_v18, %v3657_v36 }
 0x25f   :  { %v2465_v22 = vpop.eup %2464  ;;  %v1011_v23 = vmul.f32 %v2463_v20, %v3657_v36 }
 0x260   :  { %1030 = vadd.xlane.f32.xlu0 %v1006_v10  ;;  %v2467_v24 = vpop.eup %2466  ;;  %v1012_v25 = vmul.f32 %v2465_v22, %v3657_v36 }
 0x261   :  { %v1013_v26 = vmul.f32 %v2467_v24, %v3657_v36 }
 0x262   :  { %1032 = vadd.xlane.f32.xlu1 %v1007_v12 }
 0x264   :  { %1026 = vadd.xlane.f32.xlu0 %v1004_v2 }
 0x266   :  { %1028 = vadd.xlane.f32.xlu1 %v1005_v15 }
 0x268   :  { %1034 = vadd.xlane.f32.xlu0 %v1008_v17 }
 0x26a   :  { %1036 = vadd.xlane.f32.xlu1 %v1009_v19 }
 0x26c   :  { %1038 = vadd.xlane.f32.xlu0 %v1010_v21  ;;  %v2507_v21 = vmov 0  }
 0x26d   :  { %2419 = vset.pattern.permute.xlu0 %v2507_v21  ;;  %2418 = vset.pattern.permute.xlu1 %v2507_v21 }
 0x26e   :  { %1040 = vadd.xlane.f32.xlu1 %v1011_v23 }
 0x270   :  { %1042 = vadd.xlane.f32.xlu0 %v1012_v25  ;;  %v3786_v25 = vsub.s32 5, %v3572_v58 }
 0x272   :  { %1044 = vadd.xlane.f32.xlu1 %v1013_v26 }
 0x2dd   :  { %v3692_v27 = vpop.xlane.xlu0 %1014 }
 0x2de   :  { %v1083_v48 = vrot.slane %v3692_v27, %v3721_v40 }
 0x2df   :  { %v3694_v28 = vpop.xlane.xlu1 %1018 }
 0x2e0   :  { %v1094_v43 = vrot.slane %v3694_v28, %v3721_v40 }
 0x2e1   :  { %v3696_v29 = vpop.xlane.xlu0 %1016 }
 0x2e2   :  { %v1088_v44 = vrot.slane %v3696_v29, %v3715_v38 }
 0x2e3   :  { %v3698_v30 = vpop.xlane.xlu1 %1020 }
 0x2e4   :  { %v1098_v57 = vrot.slane %v3698_v30, %v3715_v38  ;;  %v1090_v53 = vsel %vm1089_vm1, %v1088_v44, %v1083_v48 }
 0x2e5   :  { %v3700_v31 = vpop.xlane.xlu0 %1022 }
 0x2e6   :  { %v1103_v46 = vrot.slane %v3700_v31, %v3721_v40  ;;  %v1099_v49 = vsel %vm1089_vm1, %v1098_v57, %v1094_v43 }
 0x2e7   :  { %v3702_v32 = vpop.xlane.xlu1 %1024  ;;  %v1155_v56 = vsel %vm1154_vm2, %v1099_v49, %v1090_v53 }
 0x2e8   :  { %v1107_v41 = vrot.slane %v3702_v32, %v3715_v38 }
 0x2e9   :  { %v3707_v34 = vpop.xlane.xlu0 %1030 }
 0x2ea   :  { %v1108_v51 = vsel %vm1089_vm1, %v1107_v41, %v1103_v46  ;;  %v1121_v6 = vrot.slane %v3707_v34, %v3721_v40  ;;  %v3792_v41 = vsub.s32 6, %v3572_v58 }
 0x2eb   :  { %v3710_v36 = vpop.xlane.xlu1 %1032  ;;  %v1157_v0 = vsel %vm1156_vm3, %v1108_v51, %v1155_v56 }
 0x2ec   :  { %v1125_v60 = vrot.slane %v3710_v36, %v3715_v38 }
 0x2ed   :  { %v3712_v37 = vpop.xlane.xlu0 %1026 }
 0x2ee   :  { %v1112_v50 = vrot.slane %v3712_v37, %v3721_v40  ;;  %v1126_v11 = vsel %vm1089_vm1, %v1125_v60, %v1121_v6 }
 0x2ef   :  { %v3717_v39 = vpop.xlane.xlu1 %1028 }
 0x2f0   :  { %v1116_v45 = vrot.slane %v3717_v39, %v3715_v38 }
 0x2f1   :  { %v3727_v42 = vpop.xlane.xlu0 %1034 }
 0x2f2   :  { %v1117_v54 = vsel %vm1089_vm1, %v1116_v45, %v1112_v50  ;;  %v1130_v3 = vrot.slane %v3727_v42, %v3721_v40 }
 0x2f3   :  { %v3737_v47 = vpop.xlane.xlu1 %1036  ;;  %v1159_v7 = vsel %vm1158_vm4, %v1117_v54, %v1157_v0 }
 0x2f4   :  { %v1134_v55 = vrot.slane %v3737_v47, %v3715_v38  ;;  %v1161_v15 = vsel %vm1160_vm5, %v1126_v11, %v1159_v7 }
 0x2f5   :  { %v3745_v52 = vpop.xlane.xlu0 %1038 }
 0x2f6   :  { %v1139_v8 = vrot.slane %v3745_v52, %v3721_v40  ;;  %v1135_v10 = vsel %vm1089_vm1, %v1134_v55, %v1130_v3 }
 0x2f7   :  { %v3754_v62 = vpop.xlane.xlu1 %1040  ;;  %v1163_v16 = vsel %vm1162_vm6, %v1135_v10, %v1161_v15 }
 0x2f8   :  { %v1143_v4 = vrot.slane %v3754_v62, %v3715_v38 }
 0x2f9   :  { %v1043_v9 = vpop.xlane.xlu0 %1042 }
 0x2fa   :  { %v1144_v14 = vsel %vm1089_vm1, %v1143_v4, %v1139_v8  ;;  %v1148_v2 = vrot.slane %v1043_v9, %v3721_v40 }
 0x2fb   :  { %v3768_v12 = vpop.xlane.xlu1 %1044  ;;  %v1165_v18 = vsel %vm1164_vm7, %v1144_v14, %v1163_v16 }
 0x2fc   :  { %v1152_v5 = vrot.slane %v3768_v12, %v3715_v38 }
 0x2fe   :  { %v1153_v17 = vsel %vm1089_vm1, %v1152_v5, %v1148_v2 }
 0x2ff   :  { %v3779_v19 = vsel %vm1166_vm8, %v1153_v17, %v1165_v18  ;;  %v3855_v18 = vld [vmem:[%s4361_s4] sm:$0xff] }
 0x300   :  { %v1170_v20 = vsel %vm1169_vm9, %v3779_v19, -inf  ;;  %v1504_v21 = vrot.slane %v3855_v18, %v3589_v1  ;;  %vm1946_vm10 = vcmp.gt.f32.partialorder %v3855_v18, 0.0 }
 0x301   :  { %1171 = vmax.xlane.f32.xlu0 %v1170_v20 }
 0x38a   :  { %v1172_v22 = vpop.xlane.xlu0 %1171 }
 0x38b   :  { %v1177_v23 = vrot.slane %v1172_v22, %v3581_v61  ;;  %v1181_v24 = vrot.slane %v1172_v22, %v3575_v59  ;;  %v3795_v43 = vrot.slane %v1172_v22, %v3786_v25  ;;  %v1185_v46 = vrot.slane %v1172_v22, %v3586_v63 }
 0x38c   :  { %v1189_v55 = vrot.slane %v1172_v22, %v3589_v1 }
 0x38d   :  { %v1214_v26 = vsub.f32 %v3692_v27, %v1177_v23  ;;  %v1215_v35 = vsub.f32 %v3696_v29, %v1177_v23  ;;  %v1216_v57 = vsub.f32 %v3694_v28, %v1181_v24  ;;  %v1217_v48 = vsub.f32 %v3698_v30, %v1181_v24 }
 0x38e   :  { %v3800_v27 = vsub.s32 7, %v3572_v58  ;;  %v3803_v28 = vrot.slane %v1172_v22, %v3792_v41  ;;  %v1224_v29 = vsub.f32 %v3727_v42, %v3795_v43  ;;  %v1218_v50 = vsub.f32 %v3700_v31, %v1185_v46 }
 0x38f   :  { %v1230_v44 = vmul.f32 1.442695, %v1214_v26  ;;  %v1232_v45 = vmul.f32 1.442695, %v1215_v35  ;;  %v1234_v49 = vmul.f32 1.442695, %v1216_v57  ;;  %v1219_v56 = vsub.f32 %v3702_v32, %v1185_v46 }
 0x390   :  { %v1236_v51 = vmul.f32 1.442695, %v1217_v48  ;;  %v3809_v53 = vrot.slane %v1172_v22, %v3800_v27  ;;  %v1226_v30 = vsub.f32 %v3745_v52, %v3803_v28  ;;  %v1250_v54 = vmul.f32 1.442695, %v1224_v29 }
 0x391   :  { %2468 = vpow2.f32 %v1230_v44  ;;  %v1238_v60 = vmul.f32 1.442695, %v1218_v50  ;;  %v3817_v31 = vsub.s32 4, %v3572_v58  ;;  %v1220_v3 = vsub.f32 %v3712_v37, %v1189_v55 }
 0x392   :  { %2470 = vpow2.f32 %v1232_v45  ;;  %v1228_v0 = vsub.f32 %v1043_v9, %v3809_v53  ;;  %v1254_v42 = vmul.f32 1.442695, %v1226_v30  ;;  %v1240_v4 = vmul.f32 1.442695, %v1219_v56 }
 0x393   :  { %2472 = vpow2.f32 %v1234_v49  ;;  %v1193_v32 = vrot.slane %v1172_v22, %v3817_v31  ;;  %v1221_v8 = vsub.f32 %v3717_v39, %v1189_v55  ;;  %v1242_v58 = vmul.f32 1.442695, %v1220_v3 }
 0x394   :  { %2474 = vpow2.f32 %v1236_v51  ;;  %v1258_v7 = vmul.f32 1.442695, %v1228_v0  ;;  %v1227_v20 = vsub.f32 %v3754_v62, %v3803_v28  ;;  %v1229_v23 = vsub.f32 %v3768_v12, %v3809_v53 }
 0x395   :  { %2476 = vpow2.f32 %v1250_v54  ;;  %v1222_v37 = vsub.f32 %v3707_v34, %v1193_v32  ;;  %v1244_v10 = vmul.f32 1.442695, %v1221_v8  ;;  %v1223_v2 = vsub.f32 %v3710_v36, %v1193_v32 }
 0x396   :  { %2478 = vpow2.f32 %v1238_v60  ;;  %v1225_v34 = vsub.f32 %v3737_v47, %v3795_v43  ;;  %v1256_v24 = vmul.f32 1.442695, %v1227_v20  ;;  %v1260_v62 = vmul.f32 1.442695, %v1229_v23 }
 0x397   :  { %2480 = vpow2.f32 %v1254_v42  ;;  %v1246_v39 = vmul.f32 1.442695, %v1222_v37  ;;  %v1248_v16 = vmul.f32 1.442695, %v1223_v2  ;;  %v1515_v35 = vrot.slane %v3855_v18, %v3817_v31 }
 0x398   :  { %2482 = vpow2.f32 %v1240_v4  ;;  %v1252_v47 = vmul.f32 1.442695, %v1225_v34  ;;  %v1526_v43 = vrot.slane %v3855_v18, %v3786_v25  ;;  %v1471_v48 = vrot.slane %v3855_v18, %v3581_v61 }
 0x399   :  { %2484 = vpow2.f32 %v1258_v7  ;;  %v1482_v49 = vrot.slane %v3855_v18, %v3575_v59  ;;  %v1493_v28 = vrot.slane %v3855_v18, %v3586_v63  ;;  %v3897_v29 = vsel %vm1946_vm10, %v3779_v19, -1e+30 }
 0x39a   :  { %2486 = vpow2.f32 %v1242_v58  ;;  %v1948_v50 = vsel %vm1169_vm9, %v3897_v29, -inf  ;;  %v1548_v51 = vrot.slane %v3855_v18, %v3800_v27 }
 0x39b   :  { %2488 = vpow2.f32 %v1244_v10 }
 0x39c   :  { %2490 = vpow2.f32 %v1246_v39 }
 0x39d   :  { %2492 = vpow2.f32 %v1248_v16 }
 0x39e   :  { %v3820_v6 = vpop.eup %2468  ;;  %2494 = vpow2.f32 %v1252_v47 }
 0x39f   :  { %v3822_v52 = vpop.eup %2470  ;;  %1279 = vperm.xlu1 %2418, %v3820_v6   ;;  %2496 = vpow2.f32 %v1256_v24 }
 0x3a0   :  { %1282 = vperm.xlu0 %2419, %v3822_v52   ;;  %v3828_v9 = vpop.eup %2472  ;;  %2498 = vpow2.f32 %v1260_v62 }
 0x3a1   :  { %v3832_v11 = vpop.eup %2474 }
 0x3a2   :  { %v3835_v14 = vpop.eup %2476 }
 0x3a3   :  { %1285 = vperm.xlu1 %2418, %v3828_v9   ;;  %v3839_v5 = vpop.eup %2478 }
 0x3a4   :  { %1309 = vperm.xlu0 %2419, %v3835_v14   ;;  %v3842_v15 = vpop.eup %2480 }
 0x3a5   :  { %v3847_v17 = vpop.eup %2482 }
 0x3a6   :  { %v3850_v36 = vpop.eup %2484 }
 0x3a7   :  { %1288 = vperm.xlu1 %2418, %v3832_v11   ;;  %v3862_v22 = vpop.eup %2486 }
 0x3a8   :  { %1315 = vperm.xlu0 %2419, %v3842_v15   ;;  %v3867_v26 = vpop.eup %2488 }
 0x3a9   :  { %v3872_v57 = vpop.eup %2490 }
 0x3aa   :  { %v3875_v12 = vpop.eup %2492 }
 0x3ab   :  { %1291 = vperm.xlu1 %2418, %v3839_v5   ;;  %v3880_v44 = vpop.eup %2494 }
 0x3ac   :  { %1321 = vperm.xlu0 %2419, %v3850_v36   ;;  %v3883_v45 = vpop.eup %2496 }
 0x3ad   :  { %v3886_v46 = vpop.eup %2498 }
 0x3af   :  { %1294 = vperm.xlu1 %2418, %v3847_v17  }
 0x3b0   :  { %1506 = vbcast.lane.b32.xlu0 %v1504_v21, 256 }
 0x3b3   :  { %1297 = vperm.xlu1 %2418, %v3862_v22  }
 0x3b4   :  { %1510 = vbcast.lane.b32.xlu0 %v1504_v21, 264 }
 0x3b7   :  { %1300 = vperm.xlu1 %2418, %v3867_v26  }
 0x3b8   :  { %1517 = vbcast.lane.b32.xlu0 %v1515_v35, 256 }
 0x3bb   :  { %1303 = vperm.xlu1 %2418, %v3872_v57  }
 0x3bc   :  { %1521 = vbcast.lane.b32.xlu0 %v1515_v35, 264 }
 0x3bf   :  { %1306 = vperm.xlu1 %2418, %v3875_v12  }
 0x3c0   :  { %1532 = vbcast.lane.b32.xlu0 %v1526_v43, 264 }
 0x3c3   :  { %1312 = vperm.xlu1 %2418, %v3880_v44  }
 0x3c7   :  { %1318 = vperm.xlu1 %2418, %v3883_v45  }
 0x3cb   :  { %1324 = vperm.xlu1 %2418, %v3886_v46  }
 0x3cf   :  { %1473 = vbcast.lane.b32.xlu1 %v1471_v48, 256 }
 0x3d3   :  { %1477 = vbcast.lane.b32.xlu1 %v1471_v48, 264 }
 0x3d7   :  { %1484 = vbcast.lane.b32.xlu1 %v1482_v49, 256 }
 0x3db   :  { %1488 = vbcast.lane.b32.xlu1 %v1482_v49, 264 }
 0x3df   :  { %1495 = vbcast.lane.b32.xlu1 %v1493_v28, 256 }
 0x3e3   :  { %1499 = vbcast.lane.b32.xlu1 %v1493_v28, 264 }
 0x407   :  { %1949 = vmax.xlane.f32.xlu1 %v1948_v50 }
 0x418   :  { %1528 = vbcast.lane.b32.xlu1 %v1526_v43, 256 }
 0x41a   :  { %v1280_v53 = vpop.permute.xlu1 %1279 }
 0x41b   :  { %v1283_v0 = vpop.permute.xlu0 %1282  ;;  %v1329_v10 = vrot.slane %v1280_v53, %v3721_v40 }
 0x41c   :  { %1554 = vbcast.lane.b32.xlu1 %v1548_v51, 264  ;;  %v1333_v37 = vrot.slane %v1283_v0, %v3715_v38 }
 0x41e   :  { %v1286_v30 = vpop.permute.xlu1 %1285  ;;  %v1334_v35 = vsel %vm1089_vm1, %v1333_v37, %v1329_v10  ;;  %v1537_v37 = vrot.slane %v3855_v18, %v3792_v41 }
 0x41f   :  { %v1310_v19 = vpop.permute.xlu0 %1309  ;;  %v1338_v2 = vrot.slane %v1286_v30, %v3721_v40 }
 0x420   :  { %v1374_v43 = vrot.slane %v1310_v19, %v3721_v40 }
 0x422   :  { %v1289_v54 = vpop.permute.xlu1 %1288 }
 0x423   :  { %v1342_v7 = vrot.slane %v1289_v54, %v3715_v38  ;;  %v1316_v32 = vpop.permute.xlu0 %1315 }
 0x424   :  { %v1383_v28 = vrot.slane %v1316_v32, %v3721_v40 }
 0x425   :  { %v1343_v20 = vsel %vm1089_vm1, %v1342_v7, %v1338_v2 }
 0x426   :  { %v1292_v55 = vpop.permute.xlu1 %1291  ;;  %v1398_v50 = vsel %vm1154_vm2, %v1343_v20, %v1334_v35 }
 0x427   :  { %v1347_v34 = vrot.slane %v1292_v55, %v3721_v40  ;;  %v1322_v53 = vpop.permute.xlu0 %1321 }
 0x42a   :  { %v1295_v56 = vpop.permute.xlu1 %1294 }
 0x42b   :  { %v1351_v8 = vrot.slane %v1295_v56, %v3715_v38  ;;  %v1507_v10 = vpop.permute.xlu0 %1506 }
 0x42d   :  { %v1352_v23 = vsel %vm1089_vm1, %v1351_v8, %v1347_v34 }
 0x42e   :  { %v1298_v60 = vpop.permute.xlu1 %1297  ;;  %v1399_v54 = vsel %vm1156_vm3, %v1352_v23, %v1398_v50 }
 0x42f   :  { %v1356_v47 = vrot.slane %v1298_v60, %v3721_v40  ;;  %v1511_v2 = vpop.permute.xlu0 %1510 }
 0x432   :  { %v1301_v42 = vpop.permute.xlu1 %1300 }
 0x433   :  { %v1360_v39 = vrot.slane %v1301_v42, %v3715_v38  ;;  %v1392_v42 = vrot.slane %v1322_v53, %v3721_v40 }
 0x435   :  { %v1361_v48 = vsel %vm1089_vm1, %v1360_v39, %v1356_v47  ;;  %v1518_v39 = vpop.permute.xlu0 %1517 }
 0x436   :  { %v1304_v3 = vpop.permute.xlu1 %1303  ;;  %v1400_v56 = vsel %vm1158_vm4, %v1361_v48, %v1399_v54 }
 0x437   :  { %v1365_v24 = vrot.slane %v1304_v3, %v3721_v40 }
 0x439   :  { %v1522_v34 = vpop.permute.xlu0 %1521 }
 0x43a   :  { %v1307_v4 = vpop.permute.xlu1 %1306 }
 0x43b   :  { %v1369_v16 = vrot.slane %v1307_v4, %v3715_v38 }
 0x43d   :  { %v1370_v30 = vsel %vm1089_vm1, %v1369_v16, %v1365_v24  ;;  %v1533_v16 = vpop.permute.xlu0 %1532 }
 0x43e   :  { %v1313_v58 = vpop.permute.xlu1 %1312  ;;  %v1401_v3 = vsel %vm1160_vm5, %v1370_v30, %v1400_v56 }
 0x43f   :  { %v1378_v21 = vrot.slane %v1313_v58, %v3715_v38 }
 0x441   :  { %v1379_v55 = vsel %vm1089_vm1, %v1378_v21, %v1374_v43 }
 0x442   :  { %v1319_v62 = vpop.permute.xlu1 %1318  ;;  %v1402_v4 = vsel %vm1162_vm6, %v1379_v55, %v1401_v3 }
 0x443   :  { %v1387_v49 = vrot.slane %v1319_v62, %v3715_v38 }
 0x445   :  { %v1388_v60 = vsel %vm1089_vm1, %v1387_v49, %v1383_v28 }
 0x446   :  { %v1325_v0 = vpop.permute.xlu1 %1324  ;;  %v1403_v32 = vsel %vm1164_vm7, %v1388_v60, %v1402_v4 }
 0x447   :  { %v1396_v19 = vrot.slane %v1325_v0, %v3715_v38 }
 0x449   :  { %v1397_v7 = vsel %vm1089_vm1, %v1396_v19, %v1392_v42 }
 0x44a   :  { %v1404_v8 = vsel %vm1166_vm8, %v1397_v7, %v1403_v32  ;;  %v1474_v20 = vpop.permute.xlu1 %1473 }
 0x44b   :  { %v1406_v58 = vsel %vm1169_vm9, %v1404_v8, 0.0 }
 0x44c   :  { %1407 = vadd.xlane.f32.xlu0 %v1406_v58 }
 0x44e   :  { %v1478_v21 = vpop.permute.xlu1 %1477 }
 0x452   :  { %v1485_v23 = vpop.permute.xlu1 %1484 }
 0x456   :  { %v1489_v62 = vpop.permute.xlu1 %1488 }
 0x45a   :  { %v1496_v53 = vpop.permute.xlu1 %1495 }
 0x462   :  { %1539 = vbcast.lane.b32.xlu0 %v1537_v37, 256 }
 0x466   :  { %1543 = vbcast.lane.b32.xlu0 %v1537_v37, 264 }
 0x46a   :  { %1550 = vbcast.lane.b32.xlu0 %v1548_v51, 256 }
 0x4d5   :  { %v1408_v47 = vpop.xlane.xlu0 %1407 }
 0x4d6   :  { %2500 = vrcp.f32 %v1408_v47 }
 0x4d9   :  { %v1540_v32 = vpop.permute.xlu0 %1539 }
 0x4e3   :  { %v2501_v24 = vpop.eup %2500 }
 0x4e4   :  { %v1414_v35 = vrot.slane %v2501_v24, %v3581_v61  ;;  %v1418_v43 = vrot.slane %v2501_v24, %v3575_v59  ;;  %v1422_v50 = vrot.slane %v2501_v24, %v3586_v63  ;;  %v1426_v54 = vrot.slane %v2501_v24, %v3589_v1 }
 0x4e6   :  { %v1451_v18 = vmul.f32 %v3820_v6, %v1414_v35  ;;  %v1452_v51 = vmul.f32 %v3822_v52, %v1414_v35  ;;  %v1453_v28 = vmul.f32 %v3828_v9, %v1418_v43  ;;  %v1454_v30 = vmul.f32 %v3832_v11, %v1418_v43  ;;  %v1500_v9 = vpop.permute.xlu1 %1499 }
 0x4e7   :  { %v1455_v55 = vmul.f32 %v3839_v5, %v1422_v50  ;;  %v1456_v56 = vmul.f32 %v3847_v17, %v1422_v50  ;;  %v1430_v11 = vrot.slane %v2501_v24, %v3817_v31  ;;  %v1457_v42 = vmul.f32 %v3862_v22, %v1426_v54 }
 0x4e8   :  { %v3941_v48 = vmul.f32 %v1474_v20, %v1451_v18  ;;  %v3943_v49 = vmul.f32 %v1478_v21, %v1452_v51  ;;  %v3951_v6 = vmul.f32 %v1485_v23, %v1453_v28  ;;  %v3953_v52 = vmul.f32 %v1489_v62, %v1454_v30 }
 0x4e9   :  { %v3960_v60 = vmul.f32 %v1496_v53, %v1455_v55  ;;  %v3962_v0 = vmul.f32 %v1500_v9, %v1456_v56  ;;  %v1458_v3 = vmul.f32 %v3867_v26, %v1426_v54  ;;  %v1434_v5 = vrot.slane %v2501_v24, %v3786_v25 }
 0x4ea   :  { %1605 = vperm.xlu0 %2419, %v3941_v48   ;;  %1608 = vperm.xlu1 %2418, %v3943_v49   ;;  %v3969_v17 = vmul.f32 %v1507_v10, %v1457_v42  ;;  %v1459_v4 = vmul.f32 %v3872_v57, %v1430_v11  ;;  %v1460_v7 = vmul.f32 %v3875_v12, %v1430_v11  ;;  %v1950_v22 = vpop.xlane.xlu1 %1949  ;;  %v1544_v57 = vpop.permute.xlu0 %1543 }
 0x4eb   :  { %v3971_v19 = vmul.f32 %v1511_v2, %v1458_v3  ;;  %v1438_v26 = vrot.slane %v2501_v24, %v3792_v41  ;;  %v1461_v8 = vmul.f32 %v3835_v14, %v1434_v5  ;;  %v1462_v10 = vmul.f32 %v3880_v44, %v1434_v5 }
 0x4ec   :  { %v3979_v58 = vmul.f32 %v1518_v39, %v1459_v4  ;;  %v3981_v37 = vmul.f32 %v1522_v34, %v1460_v7  ;;  %v1442_v2 = vrot.slane %v2501_v24, %v3800_v27  ;;  %vm1951_vm11 = vcmp.eq.f32.partialorder %v3897_v29, %v1950_v22 }
 0x4ed   :  { %v1463_v20 = vmul.f32 %v3842_v15, %v1438_v26  ;;  %v1464_v47 = vmul.f32 %v3883_v45, %v1438_v26  ;;  %v3991_v14 = vmul.f32 %v1533_v16, %v1462_v10 }
 0x4ee   :  { %1611 = vperm.xlu0 %2419, %v3951_v6   ;;  %1614 = vperm.xlu1 %2418, %v3953_v52   ;;  %v1529_v12 = vpop.permute.xlu1 %1528  ;;  %v1465_v34 = vmul.f32 %v3850_v36, %v1442_v2  ;;  %v1466_v23 = vmul.f32 %v3886_v46, %v1442_v2  ;;  %v1551_v24 = vpop.permute.xlu0 %1550  ;;  %v1952_v36 = vsel %vm1951_vm11, %v3705_v33, 16 }
 0x4ef   :  { %v3989_v21 = vmul.f32 %v1529_v12, %v1461_v8  ;;  %v3995_v44 = vmul.f32 %v1540_v32, %v1463_v20  ;;  %v3997_v39 = vmul.f32 %v1544_v57, %v1464_v47  ;;  %v1953_v46 = vsel %vm1169_vm9, %v1952_v36, 2147483647 }
 0x4f0   :  { %v4003_v45 = vmul.f32 %v1551_v24, %v1465_v34  ;;  %v1955_v62 = vshra.s32 %v1953_v46, 16 }
 0x4f2   :  { %1617 = vperm.xlu0 %2419, %v3960_v60   ;;  %1620 = vperm.xlu1 %2418, %v3962_v0   ;;  %v1555_v15 = vpop.permute.xlu1 %1554  ;;  %v1957_v35 = vcvt.s32.f32 %v1955_v62 }
 0x4f3   :  { %v4005_v16 = vmul.f32 %v1555_v15, %v1466_v23 }
 0x4f6   :  { %1623 = vperm.xlu0 %2419, %v3969_v17   ;;  %1626 = vperm.xlu1 %2418, %v3971_v19  }
 0x4fa   :  { %1629 = vperm.xlu0 %2419, %v3979_v58   ;;  %1632 = vperm.xlu1 %2418, %v3981_v37  }
 0x4fe   :  { %1638 = vperm.xlu1 %2418, %v3991_v14   ;;  %1635 = vperm.xlu0 %2419, %v3989_v21  }
 0x502   :  { %1644 = vperm.xlu1 %2418, %v3997_v39   ;;  %1641 = vperm.xlu0 %2419, %v3995_v44  }
 0x506   :  { %1647 = vperm.xlu0 %2419, %v4003_v45   ;;  %1650 = vperm.xlu1 %2418, %v4005_v16  }
 0x525   :  { %1958 = vmin.xlane.f32.xlu0 %v1957_v35 }
 0x565   :  { %v1606_v43 = vpop.permute.xlu0 %1605  ;;  %v1609_v18 = vpop.permute.xlu1 %1608 }
 0x566   :  { %v1655_v4 = vrot.slane %v1606_v43, %v3721_v40  ;;  %v1659_v7 = vrot.slane %v1609_v18, %v3715_v38 }
 0x568   :  { %v1660_v34 = vsel %vm1089_vm1, %v1659_v7, %v1655_v4 }
 0x569   :  { %v1612_v51 = vpop.permute.xlu0 %1611  ;;  %v1615_v28 = vpop.permute.xlu1 %1614 }
 0x56a   :  { %v1664_v9 = vrot.slane %v1612_v51, %v3721_v40  ;;  %v1668_v29 = vrot.slane %v1615_v28, %v3715_v38 }
 0x56c   :  { %v1669_v10 = vsel %vm1089_vm1, %v1668_v29, %v1664_v9 }
 0x56d   :  { %v1618_v50 = vpop.permute.xlu0 %1617  ;;  %v1621_v53 = vpop.permute.xlu1 %1620  ;;  %v1724_v36 = vsel %vm1154_vm2, %v1669_v10, %v1660_v34 }
 0x56e   :  { %v1673_v11 = vrot.slane %v1618_v50, %v3721_v40  ;;  %v1677_v42 = vrot.slane %v1621_v53, %v3715_v38 }
 0x570   :  { %v1678_v2 = vsel %vm1089_vm1, %v1677_v42, %v1673_v11 }
 0x571   :  { %v1624_v30 = vpop.permute.xlu0 %1623  ;;  %v1627_v54 = vpop.permute.xlu1 %1626  ;;  %v1725_v43 = vsel %vm1156_vm3, %v1678_v2, %v1724_v36 }
 0x572   :  { %v1682_v32 = vrot.slane %v1624_v30, %v3721_v40  ;;  %v1686_v22 = vrot.slane %v1627_v54, %v3715_v38 }
 0x574   :  { %v1687_v23 = vsel %vm1089_vm1, %v1686_v22, %v1682_v32 }
 0x575   :  { %v1630_v55 = vpop.permute.xlu0 %1629  ;;  %v1633_v56 = vpop.permute.xlu1 %1632  ;;  %v1726_v51 = vsel %vm1158_vm4, %v1687_v23, %v1725_v43 }
 0x576   :  { %v1691_v26 = vrot.slane %v1630_v55, %v3721_v40  ;;  %v1695_v8 = vrot.slane %v1633_v56, %v3715_v38 }
 0x578   :  { %v1696_v62 = vsel %vm1089_vm1, %v1695_v8, %v1691_v26 }
 0x579   :  { %v1636_v3 = vpop.permute.xlu0 %1635  ;;  %v1639_v5 = vpop.permute.xlu1 %1638  ;;  %v1727_v30 = vsel %vm1160_vm5, %v1696_v62, %v1726_v51 }
 0x57a   :  { %v1700_v57 = vrot.slane %v1636_v3, %v3721_v40  ;;  %v1704_v12 = vrot.slane %v1639_v5, %v3715_v38  ;;  %v1954_v3 = vand.u32 65535, %v1953_v46 }
 0x57c   :  { %v1705_v18 = vsel %vm1089_vm1, %v1704_v12, %v1700_v57  ;;  %v1956_v4 = vcvt.s32.f32 %v1954_v3 }
 0x57d   :  { %v1642_v20 = vpop.permute.xlu0 %1641  ;;  %v1645_v47 = vpop.permute.xlu1 %1644  ;;  %v1728_v56 = vsel %vm1162_vm6, %v1705_v18, %v1727_v30  ;;  %v2181_v30 = vld [vmem:[%s4364_s6 + $0x8] sm:$0xff] }
 0x57e   :  { %v1709_v24 = vrot.slane %v1642_v20, %v3721_v40  ;;  %v1713_v15 = vrot.slane %v1645_v47, %v3715_v38 }
 0x580   :  { %v1714_v28 = vsel %vm1089_vm1, %v1713_v15, %v1709_v24 }
 0x581   :  { %v1648_v50 = vpop.permute.xlu0 %1647  ;;  %v1651_v53 = vpop.permute.xlu1 %1650  ;;  %v1729_v29 = vsel %vm1164_vm7, %v1714_v28, %v1728_v56  ;;  %v1971_v28 = vld [vmem:[%s4363_s5] sm:$0xff] }
 0x582   :  { %v1718_v54 = vrot.slane %v1648_v50, %v3721_v40  ;;  %v1722_v55 = vrot.slane %v1651_v53, %v3715_v38 }
 0x584   :  { %v1723_v9 = vsel %vm1089_vm1, %v1722_v55, %v1718_v54  ;;  %v2180_v54 = vld [vmem:[%s4364_s6] sm:$0xff] }
 0x585   :  { %v1730_v11 = vsel %vm1166_vm8, %v1723_v9, %v1729_v29 }
 0x586   :  { %v1732_v42 = vsel %vm1169_vm9, %v1730_v11, 0.0 }
 0x587   :  { %1733 = vadd.xlane.f32.xlu1 %v1732_v42 }
 0x5ae   :  { %v1959_v5 = vpop.xlane.xlu0 %1958 }
 0x5af   :  { %vm1960_vm12 = vcmp.eq.f32.partialorder %v1957_v35, %v1959_v5  ;;  %v1965_v32 = vcvt.f32.s32 %v1959_v5 }
 0x5b0   :  { %v1961_v7 = vsel %vm1960_vm12, %v1956_v4, inf  ;;  %v1976_v4 = vld [vmem:[%s4363_s5 + $0x28] sm:$0xff] }
 0x5b1   :  { %1962 = vmin.xlane.f32.xlu0 %v1961_v7  ;;  %v1966_v38 = vshll.u32 %v1965_v32, 16  ;;  %v1975_v32 = vld [vmem:[%s4363_s5 + $0x20] sm:$0xff] }
 0x610   :  { %v1734_v35 = vpop.xlane.xlu1 %1733 }
 0x611   :  { %v1735_v12 = vadd.f32 1e-08, %v1734_v35  ;;  %v2185_v35 = vld [vmem:[%s4364_s6 + $0x28] sm:$0xff] }
 0x613   :  { %2502 = vrcp.f32 %v1735_v12  ;;  %v2184_v12 = vld [vmem:[%s4364_s6 + $0x20] sm:$0xff] }
 0x620   :  { %v2503_v47 = vpop.eup %2502 }
 0x621   :  { %v1741_v23 = vrot.slane %v2503_v47, %v3581_v61  ;;  %v1745_v36 = vrot.slane %v2503_v47, %v3575_v59  ;;  %v1749_v18 = vrot.slane %v2503_v47, %v3586_v63 }
 0x623   :  { %v1779_v24 = vmul.f32 %v1741_v23, %v3943_v49  ;;  %v1778_v15 = vmul.f32 %v1741_v23, %v3941_v48  ;;  %v1780_v62 = vmul.f32 %v1745_v36, %v3951_v6  ;;  %v1781_v43 = vmul.f32 %v1745_v36, %v3953_v52 }
 0x624   :  { %v1783_v51 = vmul.f32 %v1749_v18, %v3962_v0  ;;  %v1753_v49 = vrot.slane %v2503_v47, %v3589_v1  ;;  %v1757_v6 = vrot.slane %v2503_v47, %v3817_v31 }
 0x626   :  { %v1785_v48 = vmul.f32 %v1753_v49, %v3971_v19  ;;  %v1787_v52 = vmul.f32 %v1757_v6, %v3981_v37 }
 0x63a   :  { %v1963_v22 = vpop.xlane.xlu0 %1962 }
 0x63b   :  { %v1964_v26 = vcvt.f32.s32 %v1963_v22 }
 0x63d   :  { %v1967_v8 = vadd.s32 %v1966_v38, %v1964_v26 }
 0x63f   :  { %vm1968_vm14 = vcmp.eq.s32.totalorder %v3705_v33, %v1967_v8  ;;  %v2325_v10 = vrot.slane %v1967_v8, %v3721_v40 }
 0x640   :  { %v4047_v57 = vsel %vm1968_vm14, 1.0, %v2504_v13 }
 0x641   :  { %2327 = vst.msk [vmem:[%s4362_s20] sm:$0x1] %vm2326_vm13, %v2325_v10  ;;  %v1990_v46 = vrot.slane %v4047_v57, %v3581_v61  ;;  %v2001_v2 = vrot.slane %v4047_v57, %v3575_v59  ;;  %v2012_v13 = vrot.slane %v4047_v57, %v3586_v63  ;;  %v2023_v33 = vrot.slane %v4047_v57, %v3589_v1 }
 0x642   :  { %v2034_v40 = vrot.slane %v4047_v57, %v3817_v31  ;;  %v2045_v20 = vrot.slane %v4047_v57, %v3786_v25  ;;  %v2056_v34 = vrot.slane %v4047_v57, %v3792_v41  ;;  %v1782_v61 = vmul.f32 %v1749_v18, %v3960_v60 }
 0x643   :  { %1996 = vbcast.lane.b32.xlu0 %v1990_v46, 264  ;;  %1992 = vbcast.lane.b32.xlu1 %v1990_v46, 256  ;;  %v1784_v59 = vmul.f32 %v1753_v49, %v3969_v17  ;;  %v1786_v63 = vmul.f32 %v1757_v6, %v3979_v58  ;;  %v1761_v60 = vrot.slane %v2503_v47, %v3786_v25 }
 0x644   :  { %v1765_v17 = vrot.slane %v2503_v47, %v3792_v41  ;;  %v1769_v58 = vrot.slane %v2503_v47, %v3800_v27 }
 0x645   :  { %v1788_v1 = vmul.f32 %v1761_v60, %v3989_v21  ;;  %v1789_v0 = vmul.f32 %v1761_v60, %v3991_v14  ;;  %v2067_v21 = vrot.slane %v4047_v57, %v3800_v27  ;;  %v2182_v27 = vld [vmem:[%s4364_s6 + $0x10] sm:$0xff] }
 0x646   :  { %v1790_v31 = vmul.f32 %v1765_v17, %v3995_v44  ;;  %v1791_v19 = vmul.f32 %v1765_v17, %v3997_v39  ;;  %v1792_v25 = vmul.f32 %v1769_v58, %v4003_v45  ;;  %v1793_v37 = vmul.f32 %v1769_v58, %v4005_v16  ;;  %v1974_v44 = vld [vmem:[%s4363_s5 + $0x18] sm:$0xff]  ;;  %v1973_v45 = vld [vmem:[%s4363_s5 + $0x10] sm:$0xff]  ;;  %v1972_v16 = vld [vmem:[%s4363_s5 + $0x8] sm:$0xff] }
 0x647   :  { %2007 = vbcast.lane.b32.xlu0 %v2001_v2, 264  ;;  %2003 = vbcast.lane.b32.xlu1 %v2001_v2, 256  ;;  %v2183_v39 = vld [vmem:[%s4364_s6 + $0x18] sm:$0xff] }
 0x648   :  { %v2187_v17 = vld [vmem:[%s4364_s6 + $0x38] sm:$0xff] }
 0x64b   :  { %2018 = vbcast.lane.b32.xlu0 %v2012_v13, 264  ;;  %2014 = vbcast.lane.b32.xlu1 %v2012_v13, 256 }
 0x64f   :  { %2029 = vbcast.lane.b32.xlu0 %v2023_v33, 264  ;;  %2025 = vbcast.lane.b32.xlu1 %v2023_v33, 256 }
 0x653   :  { %2040 = vbcast.lane.b32.xlu0 %v2034_v40, 264  ;;  %2036 = vbcast.lane.b32.xlu1 %v2034_v40, 256 }
 0x657   :  { %2051 = vbcast.lane.b32.xlu0 %v2045_v20, 264  ;;  %2047 = vbcast.lane.b32.xlu1 %v2045_v20, 256 }
 0x65b   :  { %2062 = vbcast.lane.b32.xlu0 %v2056_v34, 264  ;;  %2058 = vbcast.lane.b32.xlu1 %v2056_v34, 256 }
 0x65f   :  { %1801 = vperm.xlu1 %2418, %v1779_v24   ;;  %1796 = vperm.xlu0 %2419, %v1778_v15  }
 0x663   :  { %1806 = vperm.xlu1 %2418, %v1780_v62   ;;  %1811 = vperm.xlu0 %2419, %v1781_v43  }
 0x667   :  { %1816 = vperm.xlu1 %2418, %v1782_v61   ;;  %1821 = vperm.xlu0 %2419, %v1783_v51  }
 0x66b   :  { %1826 = vperm.xlu1 %2418, %v1784_v59   ;;  %1831 = vperm.xlu0 %2419, %v1785_v48  }
 0x66f   :  { %1836 = vperm.xlu1 %2418, %v1786_v63   ;;  %1841 = vperm.xlu0 %2419, %v1787_v52  }
 0x673   :  { %1846 = vperm.xlu1 %2418, %v1788_v1   ;;  %1851 = vperm.xlu0 %2419, %v1789_v0   ;;  %v1978_v0 = vld [vmem:[%s4363_s5 + $0x38] sm:$0xff] }
 0x677   :  { %1856 = vperm.xlu1 %2418, %v1790_v31   ;;  %1861 = vperm.xlu0 %2419, %v1791_v19   ;;  %v1977_v31 = vld [vmem:[%s4363_s5 + $0x30] sm:$0xff] }
 0x67b   :  { %1866 = vperm.xlu1 %2418, %v1792_v25   ;;  %1871 = vperm.xlu0 %2419, %v1793_v37   ;;  %v2186_v37 = vld [vmem:[%s4364_s6 + $0x30] sm:$0xff] }
 0x67f   :  { %2069 = vbcast.lane.b32.xlu1 %v2067_v21, 256  ;;  %2073 = vbcast.lane.b32.xlu0 %v2067_v21, 264 }
 0x6b5   :  { %v1997_v41 = vpop.permute.xlu0 %1996  ;;  %v1993_v14 = vpop.permute.xlu1 %1992 }
 0x6b6   :  { %v2076_v11 = vmul.f32 %v1997_v41, %v1972_v16  ;;  %v2075_v42 = vmul.f32 %v1993_v14, %v1971_v28  ;;  %v2197_v3 = vmul.f32 %v2181_v30, %v1997_v41  ;;  %v2196_v5 = vmul.f32 %v2180_v54, %v1993_v14 }
 0x6b8   :  { %v2092_v57 = vsel %vm1169_vm9, %v2076_v11, 0.0  ;;  %v2091_v46 = vsel %vm1169_vm9, %v2075_v42, 0.0  ;;  %v2213_v2 = vsel %vm1169_vm9, %v2197_v3, 0.0  ;;  %v2212_v13 = vsel %vm1169_vm9, %v2196_v5, 0.0 }
 0x6b9   :  { %v2008_v50 = vpop.permute.xlu0 %2007  ;;  %v2004_v53 = vpop.permute.xlu1 %2003  ;;  %v2093_v34 = vadd.f32 %v2092_v57, %v2091_v46  ;;  %v2214_v15 = vadd.f32 %v2213_v2, %v2212_v13  ;;  %v1980_v57 = vld [vmem:[%s4363_s5 + $0x48] sm:$0xff]  ;;  %v1979_v46 = vld [vmem:[%s4363_s5 + $0x40] sm:$0xff] }
 0x6ba   :  { %v2078_v55 = vmul.f32 %v2008_v50, %v1974_v44  ;;  %v2199_v56 = vmul.f32 %v2183_v39, %v2008_v50  ;;  %v2077_v9 = vmul.f32 %v2004_v53, %v1973_v45  ;;  %v2198_v29 = vmul.f32 %v2182_v27, %v2004_v53  ;;  %v2189_v13 = vld [vmem:[%s4364_s6 + $0x48] sm:$0xff] }
 0x6bb   :  { %v2094_v49 = vrot.slane %v2093_v34, 4  ;;  %v2215_v6 = vrot.slane %v2214_v15, 4 }
 0x6bc   :  { %v2101_v38 = vsel %vm1169_vm9, %v2078_v55, 0.0  ;;  %v2222_v26 = vsel %vm1169_vm9, %v2199_v56, 0.0  ;;  %v2100_v8 = vsel %vm1169_vm9, %v2077_v9, 0.0  ;;  %v2221_v10 = vsel %vm1169_vm9, %v2198_v29, 0.0 }
 0x6bd   :  { %v2019_v7 = vpop.permute.xlu0 %2018  ;;  %v2015_v22 = vpop.permute.xlu1 %2014  ;;  %v2102_v20 = vadd.f32 %v2101_v38, %v2100_v8  ;;  %v2223_v47 = vadd.f32 %v2222_v26, %v2221_v10  ;;  %v2095_v25 = vadd.f32 %v2094_v49, %v2093_v34  ;;  %v2216_v21 = vadd.f32 %v2215_v6, %v2214_v15  ;;  %v1982_v49 = vld [vmem:[%s4363_s5 + $0x58] sm:$0xff] }
 0x6be   :  { %v2080_v33 = vmul.f32 %v2019_v7, %v1976_v4  ;;  %v2079_v40 = vmul.f32 %v2015_v22, %v1975_v32  ;;  %v2201_v23 = vmul.f32 %v2185_v35, %v2019_v7  ;;  %v2200_v24 = vmul.f32 %v2184_v12, %v2015_v22 }
 0x6bf   :  { %v2103_v61 = vrot.slane %v2102_v20, 4  ;;  %v2224_v51 = vrot.slane %v2223_v47, 4  ;;  %v2096_v50 = vrot.slane %v2095_v25, 2  ;;  %v2217_v53 = vrot.slane %v2216_v21, 2 }
 0x6c0   :  { %v2110_v43 = vsel %vm1169_vm9, %v2080_v33, 0.0  ;;  %v2109_v18 = vsel %vm1169_vm9, %v2079_v40, 0.0  ;;  %v2231_v59 = vsel %vm1169_vm9, %v2201_v23, 0.0  ;;  %v2230_v48 = vsel %vm1169_vm9, %v2200_v24, 0.0  ;;  %v2188_v23 = vld [vmem:[%s4364_s6 + $0x40] sm:$0xff] }
 0x6c1   :  { %v2030_v36 = vpop.permute.xlu0 %2029  ;;  %v2026_v62 = vpop.permute.xlu1 %2025  ;;  %v2111_v63 = vadd.f32 %v2110_v43, %v2109_v18  ;;  %v2104_v52 = vadd.f32 %v2103_v61, %v2102_v20  ;;  %v2225_v60 = vadd.f32 %v2224_v51, %v2223_v47  ;;  %v2232_v1 = vadd.f32 %v2231_v59, %v2230_v48 }
 0x6c2   :  { %v2082_v14 = vmul.f32 %v2030_v36, %v1978_v0  ;;  %v2203_v44 = vmul.f32 %v2187_v17, %v2030_v36  ;;  %v2081_v39 = vmul.f32 %v2026_v62, %v1977_v31  ;;  %v2202_v28 = vmul.f32 %v2186_v37, %v2026_v62 }
 0x6c3   :  { %v2112_v41 = vrot.slane %v2111_v63, 4  ;;  %v2105_v45 = vrot.slane %v2104_v52, 2  ;;  %v2226_v27 = vrot.slane %v2225_v60, 2  ;;  %v2233_v16 = vrot.slane %v2232_v1, 4 }
 0x6c4   :  { %v2119_v56 = vsel %vm1169_vm9, %v2082_v14, 0.0  ;;  %v2240_v9 = vsel %vm1169_vm9, %v2203_v44, 0.0  ;;  %v2118_v29 = vsel %vm1169_vm9, %v2081_v39, 0.0  ;;  %v2239_v5 = vsel %vm1169_vm9, %v2202_v28, 0.0  ;;  %v1984_v14 = vld [vmem:[%s4363_s5 + $0x68] sm:$0xff]  ;;  %v1046_v28 = vld [vmem:[%s4365_s2] sm:$0xff] }
 0x6c5   :  { %v2041_v19 = vpop.permute.xlu0 %2040  ;;  %v2037_v58 = vpop.permute.xlu1 %2036  ;;  %v2113_v30 = vadd.f32 %v2112_v41, %v2111_v63  ;;  %v2106_v11 = vadd.f32 %v2105_v45, %v2104_v52  ;;  %v2227_v42 = vadd.f32 %v2226_v27, %v2225_v60  ;;  %v2234_v3 = vadd.f32 %v2233_v16, %v2232_v1  ;;  %v2191_v52 = vld [vmem:[%s4364_s6 + $0x58] sm:$0xff]  ;;  %v1048_v1 = vld [vmem:[%s4365_s2 + $0x10] sm:$0xff]  ;;  %v1983_v16 = vld [vmem:[%s4363_s5 + $0x60] sm:$0xff] }
 0x6c6   :  { %v2097_v4 = vadd.f32 %v2096_v50, %v2095_v25  ;;  %v2218_v7 = vadd.f32 %v2217_v53, %v2216_v21  ;;  %v2120_v22 = vadd.f32 %v2119_v56, %v2118_v29  ;;  %v2241_v38 = vadd.f32 %v2240_v9, %v2239_v5  ;;  %v1049_v60 = vld [vmem:[%s4365_s2 + $0x18] sm:$0xff]  ;;  %v1981_v21 = vld [vmem:[%s4363_s5 + $0x50] sm:$0xff]  ;;  %v1047_v50 = vld [vmem:[%s4365_s2 + $0x8] sm:$0xff] }
 0x6c7   :  { %v2114_v32 = vrot.slane %v2113_v30, 2  ;;  %v2107_v26 = vrot.slane %v2106_v11, 1  ;;  %v2228_v8 = vrot.slane %v2227_v42, 1  ;;  %v2235_v10 = vrot.slane %v2234_v3, 2  ;;  %v2190_v41 = vld [vmem:[%s4364_s6 + $0x50] sm:$0xff] }
 0x6c8   :  { %v2098_v2 = vrot.slane %v2097_v4, 1  ;;  %v2219_v33 = vrot.slane %v2218_v7, 1  ;;  %v2121_v20 = vrot.slane %v2120_v22, 4  ;;  %v2242_v47 = vrot.slane %v2241_v38, 4 }
 0x6c9   :  { %v2052_v54 = vpop.permute.xlu0 %2051  ;;  %v4152_v55 = vpop.permute.xlu1 %2047  ;;  %v2115_v40 = vadd.f32 %v2114_v32, %v2113_v30  ;;  %v2084_v34 = vmul.f32 %v2041_v19, %v1980_v57  ;;  %v2083_v24 = vmul.f32 %v2037_v58, %v1979_v46  ;;  %v2108_v15 = vadd.f32 %v2107_v26, %v2106_v11  ;;  %v1050_v32 = vld [vmem:[%s4365_s2 + $0x20] sm:$0xff] }
 0x6ca   :  { %v2229_v36 = vadd.f32 %v2228_v8, %v2227_v42  ;;  %v4174_v62 = vadd.f32 %v2235_v10, %v2234_v3  ;;  %v2205_v43 = vmul.f32 %v2189_v13, %v2041_v19  ;;  %v2099_v51 = vadd.f32 %v2098_v2, %v2097_v4  ;;  %v2193_v4 = vld [vmem:[%s4364_s6 + $0x68] sm:$0xff] }
 0x6cb   :  { %v2220_v59 = vadd.f32 %v2219_v33, %v2218_v7  ;;  %v2116_v48 = vrot.slane %v2115_v40, 1  ;;  %v2122_v6 = vadd.f32 %v2121_v20, %v2120_v22  ;;  %v2204_v63 = vmul.f32 %v2188_v23, %v2037_v58  ;;  %v2192_v22 = vld [vmem:[%s4364_s6 + $0x60] sm:$0xff]  ;;  %v1053_v23 = vld [vmem:[%s4365_s2 + $0x38] sm:$0xff] }
 0x6cc   :  { %v2243_v0 = vadd.f32 %v2242_v47, %v2241_v38  ;;  %v2128_v17 = vsel %vm1169_vm9, %v2084_v34, 0.0  ;;  %v2127_v31 = vsel %vm1169_vm9, %v2083_v24, 0.0  ;;  %v4191_v19 = vsel %vm1154_vm2, %v2108_v15, %v2099_v51 }
 0x6cd   :  { %v4164_v35 = vpop.permute.xlu0 %2062  ;;  %v4166_v12 = vpop.permute.xlu1 %2058  ;;  %v4194_v58 = vsel %vm1154_vm2, %v2229_v36, %v2220_v59  ;;  %v2237_v25 = vrot.slane %v4174_v62, 1  ;;  %v2249_v37 = vsel %vm1169_vm9, %v2205_v43, 0.0  ;;  %v2086_v45 = vmul.f32 %v2052_v54, %v1982_v49 }
 0x6ce   :  { %v2207_v27 = vmul.f32 %v2191_v52, %v2052_v54  ;;  %v2117_v56 = vadd.f32 %v2116_v48, %v2115_v40  ;;  %v2123_v9 = vrot.slane %v2122_v6, 2  ;;  %v2129_v29 = vadd.f32 %v2128_v17, %v2127_v31  ;;  %v1051_v54 = vld [vmem:[%s4365_s2 + $0x28] sm:$0xff] }
 0x6cf   :  { %v2248_v11 = vsel %vm1169_vm9, %v2204_v63, 0.0  ;;  %v2244_v42 = vrot.slane %v2243_v0, 2  ;;  %v2085_v3 = vmul.f32 %v4152_v55, %v1981_v21  ;;  %v2206_v5 = vmul.f32 %v2190_v41, %v4152_v55  ;;  %v1054_v21 = vld [vmem:[%s4365_s2 + $0x40] sm:$0xff] }
 0x6d0   :  { %v2088_v7 = vmul.f32 %v4164_v35, %v1984_v14  ;;  %v2087_v38 = vmul.f32 %v4166_v12, %v1983_v16  ;;  %v2250_v46 = vadd.f32 %v2249_v37, %v2248_v11  ;;  %v2137_v2 = vsel %vm1169_vm9, %v2086_v45, 0.0  ;;  %v1055_v37 = vld [vmem:[%s4365_s2 + $0x48] sm:$0xff] }
 0x6d1   :  { %v2258_v13 = vsel %vm1169_vm9, %v2207_v27, 0.0  ;;  %v2124_v40 = vadd.f32 %v2123_v9, %v2122_v6  ;;  %v2130_v20 = vrot.slane %v2129_v29, 4  ;;  %v2209_v47 = vmul.f32 %v2193_v4, %v4164_v35 }
 0x6d2   :  { %v2136_v24 = vsel %vm1169_vm9, %v2085_v3, 0.0  ;;  %v2257_v15 = vsel %vm1169_vm9, %v2206_v5, 0.0  ;;  %v2146_v36 = vsel %vm1169_vm9, %v2088_v7, 0.0  ;;  %v2208_v43 = vmul.f32 %v2192_v22, %v4166_v12  ;;  %v1056_v3 = vld [vmem:[%s4365_s2 + $0x50] sm:$0xff] }
 0x6d3   :  { %v4248_v6 = vadd.f32 %v2237_v25, %v4174_v62  ;;  %v2245_v63 = vadd.f32 %v2244_v42, %v2243_v0  ;;  %v2251_v52 = vrot.slane %v2250_v46, 4  ;;  %v2138_v17 = vadd.f32 %v2137_v2, %v2136_v24  ;;  %v1057_v42 = vld [vmem:[%s4365_s2 + $0x58] sm:$0xff] }
 0x6d4   :  { %v2259_v12 = vadd.f32 %v2258_v13, %v2257_v15  ;;  %v2125_v41 = vrot.slane %v2124_v40, 1  ;;  %v2267_v14 = vsel %vm1169_vm9, %v2209_v47, 0.0  ;;  %v2266_v0 = vsel %vm1169_vm9, %v2208_v43, 0.0  ;;  %v1058_v47 = vld [vmem:[%s4365_s2 + $0x60] sm:$0xff] }
 0x6d5   :  { %v2246_v4 = vrot.slane %v2245_v63, 1 }
 0x6d6   :  { %v2260_v11 = vrot.slane %v2259_v12, 4  ;;  %v4268_v5 = vadd.f32 %v2125_v41, %v2124_v40  ;;  %v1059_v40 = vld [vmem:[%s4365_s2 + $0x68] sm:$0xff] }
 0x6da   :  { %v1797_v18 = vpop.permute.xlu0 %1796  ;;  %v1802_v61 = vpop.permute.xlu1 %1801 }
 0x6db   :  { %v1874_v26 = vmul.f32 %v1797_v18, %v1046_v28  ;;  %v1875_v8 = vmul.f32 %v1802_v61, %v1047_v50  ;;  %v1052_v18 = vld [vmem:[%s4365_s2 + $0x30] sm:$0xff]  ;;  %v2145_v61 = vsel %vm1169_vm9, %v2087_v38, 0.0  ;;  %v4260_v28 = vsel %vm1156_vm3, %v2117_v56, %v4191_v19 }
 0x6dc   :  { %v2147_v62 = vadd.f32 %v2146_v36, %v2145_v61  ;;  %v2252_v50 = vadd.f32 %v2251_v52, %v2250_v46  ;;  %v2268_v19 = vadd.f32 %v2267_v14, %v2266_v0  ;;  %v1060_v14 = vld [vmem:[%s4365_s2 + $0x70] sm:$0xff] }
 0x6dd   :  { %v1890_v35 = vadd.f32 %v1875_v8, %v1874_v26 }
 0x6de   :  { %v1812_v44 = vpop.permute.xlu0 %1811  ;;  %v1807_v39 = vpop.permute.xlu1 %1806  ;;  %v2148_v7 = vrot.slane %v2147_v62, 4  ;;  %v2253_v13 = vrot.slane %v2252_v50, 2 }
 0x6df   :  { %v1877_v53 = vmul.f32 %v1812_v44, %v1049_v60  ;;  %v1876_v30 = vmul.f32 %v1807_v39, %v1048_v1  ;;  %v2131_v1 = vadd.f32 %v2130_v20, %v2129_v29  ;;  %v1891_v25 = vrot.slane %v1890_v35, 4 }
 0x6e0   :  { %v2139_v29 = vrot.slane %v2138_v17, 4  ;;  %v2261_v20 = vadd.f32 %v2260_v11, %v2259_v12  ;;  %v2149_v36 = vadd.f32 %v2148_v7, %v2147_v62  ;;  %v1061_v12 = vld [vmem:[%s4365_s2 + $0x78] sm:$0xff]  ;;  %v1985_v7 = vld [vmem:[%s4363_s5 + $0x70] sm:$0xff] }
 0x6e1   :  { %v1897_v10 = vadd.f32 %v1877_v53, %v1876_v30  ;;  %v2132_v9 = vrot.slane %v2131_v1, 2 }
 0x6e2   :  { %v1822_v55 = vpop.permute.xlu0 %1821  ;;  %v1817_v57 = vpop.permute.xlu1 %1816  ;;  %v2150_v62 = vrot.slane %v2149_v36, 2 }
 0x6e3   :  { %v1879_v33 = vmul.f32 %v1822_v55, %v1051_v54  ;;  %v1878_v34 = vmul.f32 %v1817_v57, %v1050_v32  ;;  %v1898_v51 = vrot.slane %v1897_v10, 4  ;;  %v1892_v32 = vadd.f32 %v1891_v25, %v1890_v35 }
 0x6e4   :  { %v4270_v2 = vadd.f32 %v2132_v9, %v2131_v1  ;;  %v4281_v1 = vadd.f32 %v2253_v13, %v2252_v50 }
 0x6e5   :  { %v1904_v49 = vadd.f32 %v1879_v33, %v1878_v34  ;;  %v1899_v44 = vadd.f32 %v1898_v51, %v1897_v10  ;;  %v2140_v33 = vadd.f32 %v2139_v29, %v2138_v17  ;;  %v4278_v34 = vadd.f32 %v2246_v4, %v2245_v63 }
 0x6e6   :  { %v1832_v59 = vpop.permute.xlu0 %1831  ;;  %v1827_v48 = vpop.permute.xlu1 %1826  ;;  %v1893_v43 = vrot.slane %v1892_v32, 2  ;;  %v2262_v63 = vrot.slane %v2261_v20, 2 }
 0x6e7   :  { %v1881_v60 = vmul.f32 %v1832_v59, %v1053_v23  ;;  %v1880_v31 = vmul.f32 %v1827_v48, %v1052_v18  ;;  %v1905_v39 = vrot.slane %v1904_v49, 4  ;;  %v1900_v22 = vrot.slane %v1899_v44, 2 }
 0x6e8   :  { %v2269_v23 = vrot.slane %v2268_v19, 4  ;;  %v2141_v17 = vrot.slane %v2140_v33, 2  ;;  %v1894_v0 = vadd.f32 %v1893_v43, %v1892_v32  ;;  %v4290_v29 = vadd.f32 %v2262_v63, %v2261_v20  ;;  %v2194_v32 = vld [vmem:[%s4364_s6 + $0x70] sm:$0xff] }
 0x6e9   :  { %v1911_v45 = vadd.f32 %v1881_v60, %v1880_v31  ;;  %v1906_v38 = vadd.f32 %v1905_v39, %v1904_v49  ;;  %v1901_v18 = vadd.f32 %v1900_v22, %v1899_v44  ;;  %v2134_v60 = vrot.slane %v4270_v2, 1 }
 0x6ea   :  { %v1842_v27 = vpop.permute.xlu0 %1841  ;;  %v1837_v16 = vpop.permute.xlu1 %1836  ;;  %v2270_v31 = vadd.f32 %v2269_v23, %v2268_v19  ;;  %v2142_v9 = vadd.f32 %v2141_v17, %v2140_v33  ;;  %v2151_v22 = vadd.f32 %v2150_v62, %v2149_v36 }
 0x6eb   :  { %v1883_v53 = vmul.f32 %v1842_v27, %v1055_v37  ;;  %v1882_v30 = vmul.f32 %v1837_v16, %v1054_v21  ;;  %v1912_v54 = vrot.slane %v1911_v45, 4  ;;  %v1907_v61 = vrot.slane %v1906_v38, 2 }
 0x6ec   :  { %v1902_v25 = vrot.slane %v1901_v18, 1 }
 0x6ed   :  { %v1918_v56 = vadd.f32 %v1883_v53, %v1882_v30  ;;  %v1913_v10 = vadd.f32 %v1912_v54, %v1911_v45  ;;  %v1908_v44 = vadd.f32 %v1907_v61, %v1906_v38  ;;  %v2255_v30 = vrot.slane %v4281_v1, 1  ;;  %v1986_v54 = vld [vmem:[%s4363_s5 + $0x78] sm:$0xff] }
 0x6ee   :  { %v1852_v26 = vpop.permute.xlu0 %1851  ;;  %v1847_v8 = vpop.permute.xlu1 %1846  ;;  %v1895_v38 = vrot.slane %v1894_v0, 1 }
 0x6ef   :  { %v1919_v55 = vrot.slane %v1918_v56, 4  ;;  %v1885_v57 = vmul.f32 %v1852_v26, %v1057_v42  ;;  %v1884_v46 = vmul.f32 %v1847_v8, %v1056_v3  ;;  %v1914_v49 = vrot.slane %v1913_v10, 2 }
 0x6f0   :  { %v2271_v42 = vrot.slane %v2270_v31, 2  ;;  %v1903_v26 = vadd.f32 %v1902_v25, %v1901_v18  ;;  %v1896_v63 = vadd.f32 %v1895_v38, %v1894_v0  ;;  %v2264_v25 = vrot.slane %v4290_v29, 1 }
 0x6f1   :  { %v1920_v24 = vadd.f32 %v1919_v55, %v1918_v56  ;;  %v1925_v15 = vadd.f32 %v1885_v57, %v1884_v46  ;;  %v1915_v27 = vadd.f32 %v1914_v49, %v1913_v10  ;;  %v2195_v56 = vld [vmem:[%s4364_s6 + $0x78] sm:$0xff]  ;;  %v1909_v57 = vrot.slane %v1908_v44, 1 }
 0x6f2   :  { %v1862_v35 = vpop.permute.xlu0 %1861  ;;  %v1857_v51 = vpop.permute.xlu1 %1856  ;;  %v2272_v17 = vadd.f32 %v2271_v42, %v2270_v31  ;;  %v2135_v42 = vadd.f32 %v2134_v60, %v4270_v2  ;;  %v2293_v2 = vsel %vm1156_vm3, %v4248_v6, %v4194_v58 }
 0x6f3   :  { %v1926_v59 = vrot.slane %v1925_v15, 4  ;;  %v1887_v48 = vmul.f32 %v1862_v35, %v1059_v40  ;;  %v1886_v52 = vmul.f32 %v1857_v51, %v1058_v47  ;;  %v1921_v37 = vrot.slane %v1920_v24, 2 }
 0x6f4   :  { %v1916_v46 = vrot.slane %v1915_v27, 1  ;;  %v1910_v49 = vadd.f32 %v1909_v57, %v1908_v44  ;;  %v2273_v31 = vrot.slane %v2272_v17, 1 }
 0x6f5   :  { %v1927_v21 = vadd.f32 %v1926_v59, %v1925_v15  ;;  %v1932_v41 = vadd.f32 %v1887_v48, %v1886_v52  ;;  %v1922_v3 = vadd.f32 %v1921_v37, %v1920_v24 }
 0x6f6   :  { %v1872_v39 = vpop.permute.xlu0 %1871  ;;  %v1867_v45 = vpop.permute.xlu1 %1866  ;;  %v2274_v57 = vadd.f32 %v2273_v31, %v2272_v17 }
 0x6f7   :  { %v1928_v16 = vrot.slane %v1927_v21, 2  ;;  %v1933_v50 = vrot.slane %v1932_v41, 4  ;;  %v1889_v53 = vmul.f32 %v1872_v39, %v1061_v12  ;;  %v1888_v11 = vmul.f32 %v1867_v45, %v1060_v14 }
 0x6f8   :  { %v1923_v24 = vrot.slane %v1922_v3, 1  ;;  %v1917_v12 = vadd.f32 %v1916_v46, %v1915_v27  ;;  %v2311_v39 = vsel %vm1154_vm2, %v1903_v26, %v1896_v63  ;;  %v2265_v26 = vadd.f32 %v2264_v25, %v4290_v29 }
 0x6f9   :  { %v1929_v4 = vadd.f32 %v1928_v16, %v1927_v21  ;;  %v1934_v19 = vadd.f32 %v1933_v50, %v1932_v41  ;;  %v1939_v8 = vadd.f32 %v1889_v53, %v1888_v11  ;;  %v2143_v21 = vrot.slane %v2142_v9, 1 }
 0x6fa   :  { %v2074_v10 = vpop.permute.xlu0 %2073  ;;  %v2070_v55 = vpop.permute.xlu1 %2069  ;;  %v1924_v41 = vadd.f32 %v1923_v24, %v1922_v3  ;;  %v2312_v50 = vsel %vm1156_vm3, %v1910_v49, %v2311_v39 }
 0x6fb   :  { %v1935_v13 = vrot.slane %v1934_v19, 2  ;;  %v2090_v33 = vmul.f32 %v2074_v10, %v1986_v54  ;;  %v1940_v20 = vrot.slane %v1939_v8, 4  ;;  %v2211_v40 = vmul.f32 %v2195_v56, %v2074_v10 }
 0x6fc   :  { %v2089_v47 = vmul.f32 %v2070_v55, %v1985_v7  ;;  %v2210_v23 = vmul.f32 %v2194_v32, %v2070_v55  ;;  %v1930_v15 = vrot.slane %v1929_v4, 1  ;;  %v2152_v54 = vrot.slane %v2151_v22, 1 }
 0x6fd   :  { %v1936_v43 = vadd.f32 %v1935_v13, %v1934_v19  ;;  %v2155_v61 = vsel %vm1169_vm9, %v2090_v33, 0.0  ;;  %v1941_v35 = vadd.f32 %v1940_v20, %v1939_v8  ;;  %v2276_v36 = vsel %vm1169_vm9, %v2211_v40, 0.0 }
 0x6fe   :  { %v2154_v18 = vsel %vm1169_vm9, %v2089_v47, 0.0  ;;  %v2275_v51 = vsel %vm1169_vm9, %v2210_v23, 0.0  ;;  %v1931_v45 = vadd.f32 %v1930_v15, %v1929_v4  ;;  %v2313_v0 = vsel %vm1158_vm4, %v1917_v12, %v2312_v50 }
 0x6ff   :  { %v1937_v59 = vrot.slane %v1936_v43, 1  ;;  %v2156_v48 = vadd.f32 %v2155_v61, %v2154_v18  ;;  %v2277_v52 = vadd.f32 %v2276_v36, %v2275_v51  ;;  %v1942_v37 = vrot.slane %v1941_v35, 2 }
 0x700   :  { %v2314_v3 = vsel %vm1160_vm5, %v1924_v41, %v2313_v0  ;;  %v2256_v4 = vadd.f32 %v2255_v30, %v4281_v1  ;;  %v2144_v7 = vadd.f32 %v2143_v21, %v2142_v9  ;;  %v2153_v60 = vadd.f32 %v2152_v54, %v2151_v22 }
 0x701   :  { %v2157_v14 = vrot.slane %v2156_v48, 4  ;;  %v2278_v62 = vrot.slane %v2277_v52, 4  ;;  %v1943_v16 = vadd.f32 %v1942_v37, %v1941_v35  ;;  %v1938_v44 = vadd.f32 %v1937_v59, %v1936_v43 }
 0x702   :  { %v2315_v32 = vsel %vm1162_vm6, %v1931_v45, %v2314_v3  ;;  %v2173_v1 = vsel %vm1158_vm4, %v4268_v5, %v4260_v28  ;;  %v2294_v30 = vsel %vm1158_vm4, %v4278_v34, %v2293_v2 }
 0x703   :  { %v2158_v53 = vadd.f32 %v2157_v14, %v2156_v48  ;;  %v2279_v11 = vadd.f32 %v2278_v62, %v2277_v52  ;;  %v1944_v27 = vrot.slane %v1943_v16, 1  ;;  %v2316_v8 = vsel %vm1164_vm7, %v1938_v44, %v2315_v32 }
 0x704   :  { %v2174_v13 = vsel %vm1160_vm5, %v2135_v42, %v2173_v1  ;;  %v2295_v58 = vsel %vm1160_vm5, %v2256_v4, %v2294_v30 }
 0x705   :  { %v2159_v19 = vrot.slane %v2158_v53, 2  ;;  %v2280_v56 = vrot.slane %v2279_v11, 2  ;;  %v1945_v38 = vadd.f32 %v1944_v27, %v1943_v16  ;;  %v2175_v6 = vsel %vm1162_vm6, %v2144_v7, %v2174_v13 }
 0x706   :  { %v2296_v22 = vsel %vm1162_vm6, %v2265_v26, %v2295_v58  ;;  %v2176_v28 = vsel %vm1164_vm7, %v2153_v60, %v2175_v6 }
 0x707   :  { %v2160_v10 = vadd.f32 %v2159_v19, %v2158_v53  ;;  %v2281_v55 = vadd.f32 %v2280_v56, %v2279_v11  ;;  %v2317_v46 = vsel %vm1166_vm8, %v1945_v38, %v2316_v8  ;;  %v2297_v5 = vsel %vm1164_vm7, %v2274_v57, %v2296_v22 }
 0x708   :  { %2319 = vst [vmem:[%s4366_s16] sm:$0xff] %v2317_v46 }
 0x709   :  { %v2161_v9 = vrot.slane %v2160_v10, 1  ;;  %v2282_v29 = vrot.slane %v2281_v55, 1 }
 0x70b   :  { %v2162_v33 = vadd.f32 %v2161_v9, %v2160_v10  ;;  %v2283_v20 = vadd.f32 %v2282_v29, %v2281_v55 }
 0x70d   :  { %v2177_v34 = vsel %vm1166_vm8, %v2162_v33, %v2176_v28  ;;  %v2298_v40 = vsel %vm1166_vm8, %v2283_v20, %v2297_v5 }
 0x70e   :  { %2179 = vst.msk [vmem:[%s4367_s18] sm:$0xff] %vm1169_vm9, %v2177_v34  ;;  %2300 = vst.msk [vmem:[%s4368_s19] sm:$0xff] %vm1169_vm9, %v2298_v40 }

// kernel: updown_core_forward.3
= control target key start
LH: loop header
LB: loop body
LE: loop exit
PB: predicated region body
PF: predicated region fallthrough
CT: control target
= control target key end

     0   :  { %s6335_s0 = inlined_call_operand.vmem [shape: s32[8], index: 0, kind: input, shape index: {}]   ;;  %s6336_s1 = inlined_call_operand.vmem [shape: f32[8,16,16,128], index: 1, kind: input, shape index: {}]   ;;  %s6337_s2 = inlined_call_operand.vmem [shape: f32[8,16,16,128], index: 2, kind: input, shape index: {}]   ;;  %s6338_s3 = inlined_call_operand.vmem [shape: f32[8,16,16,128], index: 3, kind: input, shape index: {}]   ;;  %s6339_s4 = inlined_call_operand.vmem [shape: f32[8,16,16,128], index: 4, kind: input, shape index: {}]   ;;  %s6340_s5 = inlined_call_operand.vmem [shape: f32[8,128], index: 5, kind: input, shape index: {}]   ;;  %s6341_s6 = inlined_call_operand.vmem [shape: f32[8,128], index: 6, kind: input, shape index: {}]   ;;  %s6342_s7 = inlined_call_operand.vmem [shape: f32[8,128], index: 7, kind: input, shape index: {}]   ;;  %s6343_s8 = inlined_call_operand.vmem [shape: f32[8,256], index: 8, kind: input, shape index: {}]   ;;  %s6344_s9 = inlined_call_operand.vmem [shape: f32[8,16], index: 9, kind: input, shape index: {}]   ;;  %s6345_s10 = inlined_call_operand.vmem [shape: f32[8,16], index: 10, kind: input, shape index: {}]   ;;  %s6346_s11 = inlined_call_operand.vmem [shape: f32[8,128], index: 11, kind: input, shape index: {}]   ;;  %s6347_s12 = inlined_call_operand.vmem [shape: f32[8,128], index: 12, kind: input, shape index: {}]   ;;  %s6348_s13 = inlined_call_operand.vmem [shape: f32[2,128], index: 13, kind: input, shape index: {}]   ;;  %s6349_s14 = inlined_call_operand.vmem [shape: f32[256,256], index: 14, kind: input, shape index: {}]   ;;  %s6350_s15 = inlined_call_operand.vmem [shape: f32[1,256], index: 15, kind: input, shape index: {}]   ;;  %s6351_s16 = inlined_call_operand.vmem [shape: f32[2,128], index: 16, kind: input, shape index: {}]   ;;  %s6352_s17 = inlined_call_operand.vmem [shape: f32[2,128], index: 17, kind: input, shape index: {}]   ;;  %s6353_s18 = inlined_call_operand.vmem [shape: f32[256,128], index: 18, kind: input, shape index: {}]   ;;  %s6354_s19 = inlined_call_operand.vmem [shape: f32[384,512], index: 19, kind: input, shape index: {}]   ;;  %s6355_s20 = inlined_call_operand.vmem [shape: f32[1,512], index: 20, kind: input, shape index: {}]   ;;  %s6356_s21 = inlined_call_operand.vmem [shape: f32[8,128], index: 21, kind: output, shape index: {0}]   ;;  %s6357_s22 = inlined_call_operand.vmem [shape: f32[8,128], index: 22, kind: output, shape index: {1}]  }
   0x1   :  { %6403 = sst [smem:[#allocation35_spill]] %s6335_s0 }
   0x2   :  { %6404 = sst [smem:[#allocation36_spill]] %s6336_s1 }
   0x3   :  { %6405 = sst [smem:[#allocation37_spill]] %s6337_s2 }
   0x4   :  { %6406 = sst [smem:[#allocation38_spill]] %s6338_s3 }
   0x5   :  { %6407 = sst [smem:[#allocation39_spill]] %s6339_s4 }
   0x6   :  { %6408 = sst [smem:[#allocation40_spill]] %s6340_s5 }
   0x7   :  { %6409 = sst [smem:[#allocation41_spill]] %s6341_s6 }
   0x8   :  { %6410 = sst [smem:[#allocation42_spill]] %s6342_s7 }
   0x9   :  { %6411 = sst [smem:[#allocation43_spill]] %s6346_s11 }
   0xa   :  { %6412 = sst [smem:[#allocation44_spill]] %s6347_s12 }
   0xb   :  { %6413 = sst [smem:[#allocation45_spill]] %s6355_s20 }
   0xc   :  { %6414 = sst [smem:[#allocation46_spill]] %s6356_s21 }
   0xd   :  { %6415 = sst [smem:[#allocation47_spill]] %s6357_s22 }
   0xe   :  { %s6416_s29 = sld [smem:[#allocation35_spill]] }
  0x14   :  { %s28_s12 = sshll.u32 %s6416_s29, 4  ;;  %s29_s12 = int_to_ptr.vmem [resolvable:$true] %s28_s12 }
  0x15   :  { %s4233_s30 = scalar_lea.vmem %s29_s12, 16  ;;  %p4238_p1 = scmp.lt.s32.totalorder %s29_s12, %s29_s12 }
  0x16   :  { %p4234_p0 = scmp.ne.s32.totalorder %s29_s12, %s4233_s30  ;;  %p4239_p2 = scmp.lt.s32.totalorder %s4233_s30, %s4233_s30 }
  0x18   :  { %p4240_p3 = por %p4239_p2, %p4238_p1 }
  0x1a   :  { %p4241_p4 = pnand %p4240_p3, %p4234_p0 }
  0x1c   :  { %4244 = shalt.err (!%p4241_p4)  }
  0x1d   :  { %s4255_s4 = smov [#allocation8]  }
  0x1e   :  { %31 = dma.vmem_to_smem %s29_s12, 16, %s4255_s4, [#allocation7] }
  0x1f   :  { %4249 = dma.done.wait [#allocation7], 16 }
  0x20   :  { %4250 = vsyncadd [#allocation7], 4294967280 }
  0x21   :  { %33 = sfence }
  0x22   :  { %s4377_s0 = smov 0  }
  0x23 LB: > { %6417 = sst [smem:[#allocation10_spill]] %s4253_s0  ;;  %s4383_s23 = sadd.s32 4294967295, %s4253_s0   ;;  %s4253_s0 = sphi %s4377_s0, %s39_s0  }
  0x24   : > { %p3991_p5 = scmp.ge.s32.totalorder %s4253_s0, 1  ;;  %p657_p6 = scmp.lt.s32.totalorder %s4253_s0, 9 }
  0x26   : > { %p658_p7 = pnand %p3991_p5, %p657_p6 }
  0x27   : > { %s747_s12 = sld [smem:[#allocation8 + %s4383_s23]] (!%p658_p7)  ;;  %p748_p8 = scmp.lt.s32.totalorder (!%p658_p7), %s4383_s23, 7 }
  0x28   : > { %661 = sbr.rel (%p658_p7) target bundleno = 2432 (0x980), region = 100  ;;  %s4390_s1 = sshll.u32 (!%p658_p7), %s4383_s23, 4 }
  0x29   : > { %s758_s5 = sld [smem:[#allocation8 + %s4383_s23]] (!%p658_p7)  ;;  %p4005_p13 = scmp.ne.s32.totalorder (!%p658_p7), %s4383_s23, 0 }
  0x2a   : > { %s769_s6 = sld [smem:[#allocation8 + %s4383_s23]] (!%p658_p7) }
  0x2b   : > { %s780_s26 = sld [smem:[#allocation8 + %s4383_s23]] (!%p658_p7) }
  0x2c   : > { %s6418_s0 = sld [smem:[#allocation36_spill]] (!%p658_p7) }
  0x2d   : > { %s749_s24 = scalar_select %p748_p8, %s4383_s23, 7 }
  0x2e   : > { %p750_p9 = scmp.lt.s32.totalorder %s747_s12, 15  ;;  %s6419_s7 = sld [smem:[#allocation37_spill]] }
  0x2f   : > { %s4395_s25 = sshll.u32 %s749_s24, 5  ;;  %p761_p10 = scmp.lt.s32.totalorder %s758_s5, 15 }
  0x30   : > { %s6508_s12 = smov (!%p750_p9, %s747_s12), 15  ;;  %p772_p11 = scmp.lt.s32.totalorder %s769_s6, 15 }
  0x31   : > { %s6510_s5 = smov (!%p761_p10, %s758_s5), 15  ;;  %s3992_s2 = sshll.u32 %s6508_s12, 1 }
  0x32   : > { %s754_s27 = sadd.s32 %s4395_s25, %s3992_s2  ;;  %s3995_s3 = sshll.u32 %s6510_s5, 1 }
  0x33   : > { %s3994_s28 = sshll.u32 %s754_s27, 3  ;;  %s765_s29 = sadd.s32 %s3995_s3, %s4395_s25 }
  0x34   : > { %s756_s24 = scalar_lea.vmem %s6418_s0, %s3994_s28  ;;  %s3997_s21 = sshll.u32 %s765_s29, 3 }
  0x35   : > { %v791_v0 = vld [vmem:[%s756_s24] sm:$0xff]  ;;  %v792_v1 = vld [vmem:[%s756_s24 + $0x8] sm:$0xff]  ;;  %s767_s11 = scalar_lea.vmem %s6419_s7, %s3997_s21  ;;  %p783_p12 = scmp.lt.s32.totalorder %s780_s26, 15 }
  0x36   : > { %s794_s12 = scalar_lea.vmem [#allocation2], %s4390_s1  ;;  %v797_v2 = vld [vmem:[%s767_s11] sm:$0xff]  ;;  %v798_v3 = vld [vmem:[%s767_s11 + $0x8] sm:$0xff]  ;;  %s6512_s6 = smov (!%p772_p11, %s769_s6), 15 }
  0x37   : > { %795 = vst [vmem:[%s794_s12] sm:$0xff] %v791_v0  ;;  %796 = vst [vmem:[%s794_s12 + $0x8] sm:$0xff] %v792_v1  ;;  %s799_s5 = scalar_lea.vmem [#allocation3], %s4390_s1  ;;  %s6514_s26 = smov (!%p783_p12, %s780_s26), 15 }
  0x38   : > { %800 = vst [vmem:[%s799_s5] sm:$0xff] %v797_v2  ;;  %801 = vst [vmem:[%s799_s5 + $0x8] sm:$0xff] %v798_v3  ;;  %s3998_s0 = sshll.u32 %s6512_s6, 1  ;;  %s4001_s27 = sshll.u32 %s6514_s26, 1 }
  0x39   : > { %s776_s2 = sadd.s32 %s3998_s0, %s4395_s25  ;;  %s787_s7 = sadd.s32 %s4001_s27, %s4395_s25 }
  0x3a   : > { %s4000_s20 = sshll.u32 %s776_s2, 3  ;;  %s6420_s3 = sld [smem:[#allocation38_spill]] }
  0x3b   : > { %s4003_s29 = sshll.u32 %s787_s7, 3  ;;  %s6421_s4 = sld [smem:[#allocation39_spill]] }
  0x3c   : > { %s804_s12 = scalar_lea.vmem [#allocation4], %s4390_s1  ;;  %s809_s6 = scalar_lea.vmem [#allocation5], %s4390_s1 }
  0x3d   : > { %s6422_s22 = sld [smem:[#allocation41_spill]] (!%p4005_p13) }
  0x3f   : > { %815 = sbr.rel (%p4005_p13) target bundleno = 363 (0x16b), region = 104 }
  0x40   : > { %s778_s28 = scalar_lea.vmem %s6420_s3, %s4000_s20 }
  0x41   : > { %v802_v4 = vld [vmem:[%s778_s28] sm:$0xff]  ;;  %v803_v5 = vld [vmem:[%s778_s28 + $0x8] sm:$0xff]  ;;  %s789_s24 = scalar_lea.vmem %s6421_s4, %s4003_s29  ;;  %s6423_s29 = sld [smem:[#allocation40_spill]] (!%p4005_p13) }
  0x42   : > { %805 = vst [vmem:[%s804_s12] sm:$0xff] %v802_v4  ;;  %806 = vst [vmem:[%s804_s12 + $0x8] sm:$0xff] %v803_v5  ;;  %v807_v6 = vld [vmem:[%s789_s24] sm:$0xff]  ;;  %v808_v7 = vld [vmem:[%s789_s24 + $0x8] sm:$0xff] }
  0x43   : > { %810 = vst [vmem:[%s809_s6] sm:$0xff] %v807_v6  ;;  %811 = vst [vmem:[%s809_s6 + $0x8] sm:$0xff] %v808_v7 }
  0x44   : > { %v849_v8 = vld [vmem:[%s6349_s14 + $0xf8] sm:$0xff]  ;;  %v848_v9 = vld [vmem:[%s6349_s14 + $0xf0] sm:$0xff]  ;;  %v847_v10 = vld [vmem:[%s6349_s14 + $0xe8] sm:$0xff] }
  0x45   : > { %894 = vmatprep.subr.mxu0 %v849_v8  ;;  %v846_v11 = vld [vmem:[%s6349_s14 + $0xe0] sm:$0xff]  ;;  %v845_v12 = vld [vmem:[%s6349_s14 + $0xd8] sm:$0xff]  ;;  %v844_v13 = vld [vmem:[%s6349_s14 + $0xd0] sm:$0xff] }
  0x46   : > { %895 = vmatpush1.msra.mxu0 %v848_v9  ;;  %v843_v14 = vld [vmem:[%s6349_s14 + $0xc8] sm:$0xff]  ;;  %v842_v15 = vld [vmem:[%s6349_s14 + $0xc0] sm:$0xff]  ;;  %v841_v16 = vld [vmem:[%s6349_s14 + $0xb8] sm:$0xff] }
  0x47   : > { %896 = vmatprep.subr.mxu0 %v847_v10  ;;  %v840_v17 = vld [vmem:[%s6349_s14 + $0xb0] sm:$0xff]  ;;  %v839_v18 = vld [vmem:[%s6349_s14 + $0xa8] sm:$0xff]  ;;  %v838_v19 = vld [vmem:[%s6349_s14 + $0xa0] sm:$0xff]  ;;  %v884_v10 = vlaneseq }
  0x48   : > { %897 = vmatpush1.msra.mxu0 %v846_v11  ;;  %v837_v20 = vld [vmem:[%s6349_s14 + $0x98] sm:$0xff]  ;;  %v836_v21 = vld [vmem:[%s6349_s14 + $0x90] sm:$0xff]  ;;  %v835_v22 = vld [vmem:[%s6349_s14 + $0x88] sm:$0xff] }
  0x49   : > { %898 = vmatprep.subr.mxu0 %v845_v12  ;;  %v834_v23 = vld [vmem:[%s6349_s14 + $0x80] sm:$0xff]  ;;  %v833_v24 = vld [vmem:[%s6349_s14 + $0x78] sm:$0xff]  ;;  %v832_v25 = vld [vmem:[%s6349_s14 + $0x70] sm:$0xff]  ;;  %v885_v11 = vshrl.u32 %v884_v10, 7 }
  0x4a   : > { %899 = vmatpush1.msra.mxu0 %v844_v13  ;;  %v831_v26 = vld [vmem:[%s6349_s14 + $0x68] sm:$0xff]  ;;  %v830_v27 = vld [vmem:[%s6349_s14 + $0x60] sm:$0xff]  ;;  %v829_v28 = vld [vmem:[%s6349_s14 + $0x58] sm:$0xff] }
  0x4b   : > { %900 = vmatprep.subr.mxu0 %v843_v14  ;;  %v828_v29 = vld [vmem:[%s6349_s14 + $0x50] sm:$0xff]  ;;  %v827_v30 = vld [vmem:[%s6349_s14 + $0x48] sm:$0xff]  ;;  %v826_v31 = vld [vmem:[%s6349_s14 + $0x40] sm:$0xff]  ;;  %v886_v12 = vsub.s32 0, %v885_v11  ;;  %v890_v14 = vsub.s32 1, %v885_v11 }
  0x4c   : > { %901 = vmatpush1.msra.mxu0 %v842_v15  ;;  %v817_v32 = vld [vmem:[%s6422_s22] sm:$0xff]  ;;  %v825_v33 = vld [vmem:[%s6349_s14 + $0x38] sm:$0xff]  ;;  %v824_v34 = vld [vmem:[%s6349_s14 + $0x30] sm:$0xff] }
  0x4d   : > { %902 = vmatprep.subr.mxu0 %v841_v16  ;;  %958 = vmatprep.mubr.f32.mxu0 %v817_v32  ;;  %v823_v35 = vld [vmem:[%s6349_s14 + $0x28] sm:$0xff]  ;;  %v822_v36 = vld [vmem:[%s6349_s14 + $0x20] sm:$0xff]  ;;  %v821_v37 = vld [vmem:[%s6349_s14 + $0x18] sm:$0xff] }
  0x4e   : > { %903 = vmatpush1.msra.mxu0 %v840_v17  ;;  %v820_v38 = vld [vmem:[%s6349_s14 + $0x10] sm:$0xff]  ;;  %v819_v39 = vld [vmem:[%s6349_s14 + $0x8] sm:$0xff]  ;;  %v818_v40 = vld [vmem:[%s6349_s14] sm:$0xff] }
  0x4f   : > { %904 = vmatprep.subr.mxu0 %v839_v18  ;;  %v881_v41 = vld [vmem:[%s6349_s14 + $0x1f8] sm:$0xff]  ;;  %v880_v42 = vld [vmem:[%s6349_s14 + $0x1f0] sm:$0xff]  ;;  %v879_v43 = vld [vmem:[%s6349_s14 + $0x1e8] sm:$0xff] }
  0x50   : > { %905 = vmatpush1.msra.mxu0 %v838_v19  ;;  %v878_v44 = vld [vmem:[%s6349_s14 + $0x1e0] sm:$0xff]  ;;  %v877_v45 = vld [vmem:[%s6349_s14 + $0x1d8] sm:$0xff]  ;;  %v876_v46 = vld [vmem:[%s6349_s14 + $0x1d0] sm:$0xff] }
  0x51   : > { %906 = vmatprep.subr.mxu0 %v837_v20  ;;  %v875_v47 = vld [vmem:[%s6349_s14 + $0x1c8] sm:$0xff]  ;;  %v874_v48 = vld [vmem:[%s6349_s14 + $0x1c0] sm:$0xff]  ;;  %v873_v49 = vld [vmem:[%s6349_s14 + $0x1b8] sm:$0xff] }
  0x52   : > { %907 = vmatpush1.msra.mxu0 %v836_v21  ;;  %v872_v50 = vld [vmem:[%s6349_s14 + $0x1b0] sm:$0xff]  ;;  %v871_v51 = vld [vmem:[%s6349_s14 + $0x1a8] sm:$0xff]  ;;  %v870_v52 = vld [vmem:[%s6349_s14 + $0x1a0] sm:$0xff] }
  0x53   : > { %908 = vmatprep.subr.mxu0 %v835_v22  ;;  %v869_v53 = vld [vmem:[%s6349_s14 + $0x198] sm:$0xff]  ;;  %v868_v54 = vld [vmem:[%s6349_s14 + $0x190] sm:$0xff]  ;;  %v867_v55 = vld [vmem:[%s6349_s14 + $0x188] sm:$0xff] }
  0x54   : > { %909 = vmatpush1.msra.mxu0 %v834_v23  ;;  %v866_v56 = vld [vmem:[%s6349_s14 + $0x180] sm:$0xff]  ;;  %v865_v57 = vld [vmem:[%s6349_s14 + $0x178] sm:$0xff]  ;;  %v864_v58 = vld [vmem:[%s6349_s14 + $0x170] sm:$0xff] }
  0x55   : > { %910 = vmatprep.subr.mxu0 %v833_v24  ;;  %v863_v59 = vld [vmem:[%s6349_s14 + $0x168] sm:$0xff]  ;;  %v862_v60 = vld [vmem:[%s6349_s14 + $0x160] sm:$0xff]  ;;  %v861_v61 = vld [vmem:[%s6349_s14 + $0x158] sm:$0xff] }
  0x56   : > { %911 = vmatpush1.msra.mxu0 %v832_v25  ;;  %v860_v62 = vld [vmem:[%s6349_s14 + $0x150] sm:$0xff]  ;;  %v859_v63 = vld [vmem:[%s6349_s14 + $0x148] sm:$0xff]  ;;  %v858_v0 = vld [vmem:[%s6349_s14 + $0x140] sm:$0xff] }
  0x57   : > { %912 = vmatprep.subr.mxu0 %v831_v26  ;;  %v857_v1 = vld [vmem:[%s6349_s14 + $0x138] sm:$0xff]  ;;  %v856_v2 = vld [vmem:[%s6349_s14 + $0x130] sm:$0xff]  ;;  %v855_v3 = vld [vmem:[%s6349_s14 + $0x128] sm:$0xff] }
  0x58   : > { %913 = vmatpush1.msra.mxu0 %v830_v27  ;;  %v854_v4 = vld [vmem:[%s6349_s14 + $0x120] sm:$0xff]  ;;  %v853_v5 = vld [vmem:[%s6349_s14 + $0x118] sm:$0xff]  ;;  %v852_v6 = vld [vmem:[%s6349_s14 + $0x110] sm:$0xff] }
  0x59   : > { %914 = vmatprep.subr.mxu0 %v829_v28  ;;  %v851_v7 = vld [vmem:[%s6349_s14 + $0x108] sm:$0xff]  ;;  %v850_v8 = vld [vmem:[%s6349_s14 + $0x100] sm:$0xff] }
  0x5a   : > { %915 = vmatpush1.msra.mxu0 %v828_v29  ;;  %v816_v9 = vld [vmem:[%s6423_s29] sm:$0xff] }
  0x5b   : > { %916 = vmatprep.subr.mxu0 %v827_v30  ;;  %v882_v13 = vld [vmem:[%s6350_s15] sm:$0x3] }
  0x5c   : > { %917 = vmatpush1.msra.mxu0 %v826_v31  ;;  %v887_v15 = vrot.slane %v882_v13, %v886_v12  ;;  %v891_v16 = vrot.slane %v882_v13, %v890_v14 }
  0x5d   : > { %918 = vmatprep.subr.mxu0 %v825_v33 }
  0x5e   : > { %919 = vmatpush1.msra.mxu0 %v824_v34 }
  0x5f   : > { %920 = vmatprep.subr.mxu0 %v823_v35 }
  0x60   : > { %921 = vmatpush1.msra.mxu0 %v822_v36 }
  0x61   : > { %922 = vmatprep.subr.mxu0 %v821_v37 }
  0x62   : > { %923 = vmatpush1.msra.mxu0 %v820_v38 }
  0x63   : > { %924 = vmatprep.subr.mxu0 %v819_v39 }
  0x64   : > { %925 = vmatpush1.msra.mxu0 %v818_v40 }
  0x65   : > { %926 = vmatprep.subr.mxu0 %v881_v41 }
  0x66   : > { %927 = vmatpush2.msra.mxu0 %v880_v42 }
  0x67   : > { %928 = vmatprep.subr.mxu0 %v879_v43 }
  0x68   : > { %929 = vmatpush2.msra.mxu0 %v878_v44 }
  0x69   : > { %930 = vmatprep.subr.mxu0 %v877_v45 }
  0x6a   : > { %931 = vmatpush2.msra.mxu0 %v876_v46 }
  0x6b   : > { %932 = vmatprep.subr.mxu0 %v875_v47 }
  0x6c   : > { %933 = vmatpush2.msra.mxu0 %v874_v48 }
  0x6d   : > { %934 = vmatprep.subr.mxu0 %v873_v49 }
  0x6e   : > { %935 = vmatpush2.msra.mxu0 %v872_v50 }
  0x6f   : > { %936 = vmatprep.subr.mxu0 %v871_v51 }
  0x70   : > { %937 = vmatpush2.msra.mxu0 %v870_v52 }
  0x71   : > { %938 = vmatprep.subr.mxu0 %v869_v53 }
  0x72   : > { %939 = vmatpush2.msra.mxu0 %v868_v54 }
  0x73   : > { %940 = vmatprep.subr.mxu0 %v867_v55 }
  0x74   : > { %941 = vmatpush2.msra.mxu0 %v866_v56 }
  0x75   : > { %942 = vmatprep.subr.mxu0 %v865_v57 }
  0x76   : > { %943 = vmatpush2.msra.mxu0 %v864_v58 }
  0x77   : > { %944 = vmatprep.subr.mxu0 %v863_v59 }
  0x78   : > { %945 = vmatpush2.msra.mxu0 %v862_v60 }
  0x79   : > { %946 = vmatprep.subr.mxu0 %v861_v61 }
  0x7a   : > { %947 = vmatpush2.msra.mxu0 %v860_v62 }
  0x7b   : > { %948 = vmatprep.subr.mxu0 %v859_v63 }
  0x7c   : > { %949 = vmatpush2.msra.mxu0 %v858_v0 }
  0x7d   : > { %950 = vmatprep.subr.mxu0 %v857_v1 }
  0x7e   : > { %951 = vmatpush2.msra.mxu0 %v856_v2 }
  0x7f   : > { %952 = vmatprep.subr.mxu0 %v855_v3 }
  0x80   : > { %953 = vmatpush2.msra.mxu0 %v854_v4 }
  0x81   : > { %954 = vmatprep.subr.mxu0 %v853_v5 }
  0x82   : > { %955 = vmatpush2.msra.mxu0 %v852_v6 }
  0x83   : > { %956 = vmatprep.subr.mxu0 %v851_v7 }
  0x84   : > { %957 = vmatpush2.msra.mxu0 %v850_v8 }
  0x85   : > { %959 = vmatmul.mubr.f32.vlgmr.msra.gmra.mxu0 %v816_v9 }
 0x145   : > { %v960_v17 = vpop.f32.mrf.mxu0 }
 0x146   : > { %v961_v18 = vadd.f32 %v960_v17, %v887_v15 }
 0x147   : > { %v962_v19 = vpop.f32.mrf.mxu0 }
 0x148   : > { %v4006_v20 = vmul.f32 -1.442695, %v961_v18  ;;  %v963_v21 = vadd.f32 %v962_v19, %v891_v16 }
 0x14a   : > { %4065 = vpow2.f32 %v4006_v20  ;;  %v4007_v22 = vmul.f32 -1.442695, %v963_v21 }
 0x14c   : > { %4067 = vpow2.f32 %v4007_v22 }
 0x157   : > { %v4066_v23 = vpop.eup %4065 }
 0x158   : > { %v971_v24 = vadd.f32 1.0, %v4066_v23 }
 0x159   : > { %v4068_v25 = vpop.eup %4067 }
 0x15a   : > { %4069 = vrcp.f32 %v971_v24  ;;  %v972_v26 = vadd.f32 1.0, %v4068_v25 }
 0x15c   : > { %4071 = vrcp.f32 %v972_v26 }
 0x167   : > { %v4070_v27 = vpop.eup %4069 }
 0x168   : > { %977 = vst [vmem:[#allocation6] sm:$0xff] %v4070_v27 }
 0x169   : > { %v4072_v28 = vpop.eup %4071 }
 0x16a   : > { %978 = vst [vmem:[#allocation6 + $0x8] sm:$0xff] %v4072_v28 }
 0x16b PF: > { %p4008_p0 = scmp.ne.s32.totalorder %s4383_s23, 7 }
 0x16d   : > { %982 = sbr.rel (%p4008_p0) target bundleno = 2432 (0x980), region = 108 }
 0x172   : > { %v1009_v29 = vlaneseq  ;;  %v4256_v30 = vmov 1966171168   ;;  %v986_v32 = vld [vmem:[%s6343_s8 + $0x8] sm:$0xff]  ;;  %v4631_v36 = vld [vmem:[%s6343_s8] sm:$0xff]  ;;  %v2081_v58 = vld [vmem:[#allocation5 + $0x10] sm:$0xff]  ;;  %vm1222_vm0 = vcmask 130112  }
 0x173   : > { %v1007_v31 = vunpack.c.l.s4 %v4256_v30  ;;  %v2096_v35 = vcombine.high %v986_v32, %v986_v32  ;;  %v2079_v46 = vld [vmem:[#allocation5] sm:$0xff]  ;;  %v989_v47 = vld [vmem:[#allocation3 + $0x8] sm:$0xff]  ;;  %v2082_v2 = vld [vmem:[#allocation5 + $0x18] sm:$0xff]  ;;  %v1005_v19 = vcombine.high %v4631_v36, %v4631_v36  ;;  %vm1287_vm1 = vcmask 1041409   ;;  %s6499_s27 = sld [smem:[#allocation43_spill]] }
 0x174   : > { %v4626_v33 = vshrl.u32 %v1009_v29, 7  ;;  %v2080_v48 = vld [vmem:[#allocation5 + $0x8] sm:$0xff]  ;;  %v988_v59 = vld [vmem:[#allocation3] sm:$0xff]  ;;  %v990_v7 = vld [vmem:[#allocation3 + $0x10] sm:$0xff]  ;;  %vm1289_vm2 = vcmask 1042434   ;;  %vm1291_vm3 = vcmask 1043459  }
 0x175   : > { %v1008_v34 = vunpack.c.0.s8 %v1007_v31  ;;  %v2088_v52 = vld [vmem:[#allocation5 + $0x48] sm:$0xff]  ;;  %v2087_v1 = vld [vmem:[#allocation5 + $0x40] sm:$0xff]  ;;  %v991_v9 = vld [vmem:[#allocation3 + $0x18] sm:$0xff]  ;;  %vm1293_vm4 = vcmask 1044484   ;;  %vm1295_vm5 = vcmask 1045509   ;;  %vm1297_vm6 = vcmask 1046534  }
 0x176   : > { %v4637_v38 = vsub.s32 0, %v4626_v33  ;;  %v4663_v8 = vsub.s32 1, %v4626_v33  ;;  %v987_v10 = vld [vmem:[%s6348_s13] sm:$0x3]  ;;  %v2084_v17 = vld [vmem:[#allocation5 + $0x28] sm:$0xff]  ;;  %vm1299_vm7 = vcmask 1047559  }
 0x177   : > { %v4634_v37 = vsub.s32 %v1008_v34, %v4626_v33  ;;  %v2083_v15 = vld [vmem:[#allocation5 + $0x20] sm:$0xff]  ;;  %v993_v28 = vld [vmem:[#allocation3 + $0x28] sm:$0xff]  ;;  %vm1302_vm8 = vcmask 130048   ;;  %s6500_s1 = sld [smem:[#allocation41_spill]] }
 0x178   : > { %v4670_v16 = vrot.slane %v987_v10, %v4663_v8  ;;  %v4673_v18 = vrot.slane %v987_v10, %v4637_v38  ;;  %v992_v22 = vld [vmem:[#allocation3 + $0x20] sm:$0xff]  ;;  %s6501_s7 = sld [smem:[#allocation42_spill]] }
 0x179   : > { %v2103_v39 = vrot.slane %v986_v32, %v4634_v37  ;;  %v1012_v40 = vrot.slane %v4631_v36, %v4634_v37  ;;  %v4643_v41 = vrot.slane %v2096_v35, %v4634_v37  ;;  %v1019_v34 = vrot.slane %v1005_v19, %v4634_v37  ;;  %s6502_s22 = sld [smem:[#allocation45_spill]] }
 0x17a   : > { %s6503_s29 = sld [smem:[#allocation44_spill]] }
 0x17b   : > { %v2119_v42 = vrot.slane %v2103_v39, %v4634_v37  ;;  %v1028_v43 = vrot.slane %v1012_v40, %v4634_v37  ;;  %v4649_v44 = vrot.slane %v4643_v41, %v4634_v37  ;;  %v2111_v45 = vcombine.high %v2103_v39, %v2103_v39  ;;  %s6504_s4 = sld [smem:[#allocation47_spill]] }
 0x17c   : > { %v1020_v49 = vcombine.high %v1012_v40, %v1012_v40  ;;  %s6505_s6 = sld [smem:[#allocation46_spill]] }
 0x17d   : > { %v2148_v50 = vrot.slane %v2119_v42, %v4637_v38  ;;  %v1057_v51 = vrot.slane %v1028_v43, %v4637_v38  ;;  %v2164_v53 = vrot.slane %v4649_v44, %v4637_v38  ;;  %v2133_v54 = vrot.slane %v2111_v45, %v4634_v37 }
 0x17e   : > { %v4658_v62 = vrot.slane %v1020_v49, %v4634_v37  ;;  %v2141_v5 = vcombine.high %v2119_v42, %v2119_v42  ;;  %v1050_v11 = vcombine.high %v1028_v43, %v1028_v43  ;;  %v4687_v49 = vrot.slane %v1019_v34, %v4634_v37 }
 0x17f   : > { %v2185_v55 = vadd.f32 %v2148_v50, %v2079_v46  ;;  %v1095_v56 = vadd.f32 %v1057_v51, %v989_v47  ;;  %v2186_v57 = vadd.f32 %v2148_v50, %v2080_v48  ;;  %v2194_v60 = vadd.f32 %v2164_v53, %v2088_v52  ;;  %v2085_v46 = vld [vmem:[#allocation5 + $0x30] sm:$0xff]  ;;  %v2086_v48 = vld [vmem:[#allocation5 + $0x38] sm:$0xff] }
 0x180   : > { %v2152_v61 = vrot.slane %v2133_v54, %v4637_v38  ;;  %v1094_v0 = vadd.f32 %v1057_v51, %v988_v59  ;;  %v2193_v3 = vadd.f32 %v2164_v53, %v2087_v1  ;;  %v1061_v4 = vrot.slane %v4658_v62, %v4637_v38  ;;  %v995_v59 = vld [vmem:[#allocation3 + $0x38] sm:$0xff] }
 0x181   : > { %4077 = vtanh.f32 %v2185_v55  ;;  %v2156_v13 = vrot.slane %v2141_v5, %v4637_v38  ;;  %v1065_v20 = vrot.slane %v1050_v11, %v4637_v38  ;;  %v2143_v23 = vcombine.high %v2133_v54, %v2133_v54  ;;  %v997_v5 = vld [vmem:[#allocation3 + $0x48] sm:$0xff] }
 0x182   : > { %4079 = vtanh.f32 %v1095_v56  ;;  %v2187_v63 = vadd.f32 %v2152_v61, %v2081_v58  ;;  %v2188_v6 = vadd.f32 %v2152_v61, %v2082_v2  ;;  %v1096_v12 = vadd.f32 %v1061_v4, %v990_v7 }
 0x183   : > { %4081 = vtanh.f32 %v2186_v57  ;;  %v1097_v14 = vadd.f32 %v1061_v4, %v991_v9  ;;  %v2189_v21 = vadd.f32 %v2156_v13, %v2083_v15  ;;  %v2190_v25 = vadd.f32 %v2156_v13, %v2084_v17  ;;  %v994_v57 = vld [vmem:[#allocation3 + $0x30] sm:$0xff]  ;;  %v2090_v17 = vld [vmem:[#allocation5 + $0x58] sm:$0xff] }
 0x184   : > { %4083 = vtanh.f32 %v2194_v60  ;;  %v1098_v32 = vadd.f32 %v1065_v20, %v992_v22  ;;  %v2160_v39 = vrot.slane %v2143_v23, %v4637_v38  ;;  %v1052_v40 = vcombine.high %v4658_v62, %v4658_v62 }
 0x185   : > { %4085 = vtanh.f32 %v2187_v63  ;;  %v1099_v45 = vadd.f32 %v1065_v20, %v993_v28  ;;  %v2112_v50 = vcombine.high %v4643_v41, %v4643_v41  ;;  %v1073_v60 = vrot.slane %v4687_v49, %v4637_v38  ;;  %v996_v63 = vld [vmem:[#allocation3 + $0x40] sm:$0xff] }
 0x186   : > { %4087 = vtanh.f32 %v1094_v0  ;;  %v2191_v52 = vadd.f32 %v2160_v39, %v2085_v46  ;;  %v1069_v53 = vrot.slane %v1052_v40, %v4637_v38  ;;  %v2192_v56 = vadd.f32 %v2160_v39, %v2086_v48  ;;  %v2092_v40 = vld [vmem:[#allocation5 + $0x68] sm:$0xff] }
 0x187   : > { %4089 = vtanh.f32 %v2193_v3  ;;  %v1021_v41 = vcombine.high %v1019_v34, %v1019_v34  ;;  %v4698_v0 = vrot.slane %v2112_v50, %v4634_v37  ;;  %v1103_v13 = vadd.f32 %v1073_v60, %v997_v5  ;;  %v1000_v50 = vld [vmem:[#allocation3 + $0x60] sm:$0xff] }
 0x188   : > { %4091 = vtanh.f32 %v2188_v6  ;;  %v1100_v62 = vadd.f32 %v1069_v53, %v994_v57  ;;  %v1101_v3 = vadd.f32 %v1069_v53, %v995_v59  ;;  %v1102_v6 = vadd.f32 %v1073_v60, %v996_v63  ;;  %v2093_v60 = vld [vmem:[#allocation5 + $0x70] sm:$0xff] }
 0x189   : > { %4093 = vtanh.f32 %v1096_v12  ;;  %v2168_v9 = vrot.slane %v4698_v0, %v4637_v38  ;;  %v4705_v10 = vrot.slane %v1021_v41, %v4634_v37  ;;  %v2142_v19 = vcombine.high %v4649_v44, %v4649_v44 }
 0x18a   : > { %4095 = vtanh.f32 %v1097_v14  ;;  %v2089_v14 = vld [vmem:[#allocation5 + $0x50] sm:$0xff]  ;;  %v1051_v44 = vcombine.high %v4687_v49, %v4687_v49 }
 0x18b   : > { %4097 = vtanh.f32 %v2189_v21  ;;  %v2195_v21 = vadd.f32 %v2168_v9, %v2089_v14  ;;  %v1077_v37 = vrot.slane %v4705_v10, %v4637_v38 }
 0x18c   : > { %4099 = vtanh.f32 %v2190_v25  ;;  %v998_v25 = vld [vmem:[#allocation3 + $0x50] sm:$0xff]  ;;  %v1081_v46 = vrot.slane %v1051_v44, %v4637_v38 }
 0x18d   : > { %4101 = vtanh.f32 %v1098_v32 }
 0x18e   : > { %v4078_v24 = vpop.eup %4077  ;;  %4103 = vtanh.f32 %v1099_v45 }
 0x18f   : > { %v4080_v26 = vpop.eup %4079  ;;  %v2221_v27 = vmul.f32 %v4078_v24, %v4670_v16  ;;  %4105 = vtanh.f32 %v2191_v52  ;;  %v2196_v24 = vadd.f32 %v2168_v9, %v2090_v17  ;;  %v1001_v52 = vld [vmem:[#allocation3 + $0x68] sm:$0xff] }
 0x190   : > { %v4082_v30 = vpop.eup %4081  ;;  %v1131_v31 = vmul.f32 %v4080_v26, %v4673_v18  ;;  %4107 = vtanh.f32 %v2192_v56  ;;  %v1053_v56 = vcombine.high %v4705_v10, %v4705_v10  ;;  %v1107_v59 = vadd.f32 %v1081_v46, %v1001_v52 }
 0x191   : > { %v4084_v35 = vpop.eup %4083  ;;  %2237 = vadd.xlane.f32.xlu0 %v2221_v27  ;;  %v2222_v36 = vmul.f32 %v4082_v30, %v4670_v16  ;;  %4109 = vtanh.f32 %v1100_v62  ;;  %v999_v27 = vld [vmem:[#allocation3 + $0x58] sm:$0xff]  ;;  %v1104_v30 = vadd.f32 %v1077_v37, %v998_v25 }
 0x192   : > { %v4086_v42 = vpop.eup %4085  ;;  %1148 = vadd.xlane.f32.xlu1 %v1131_v31  ;;  %v2230_v43 = vmul.f32 %v4084_v35, %v4670_v16  ;;  %4111 = vtanh.f32 %v1101_v3  ;;  %v2172_v31 = vrot.slane %v2142_v19, %v4637_v38  ;;  %v1105_v35 = vadd.f32 %v1077_v37, %v999_v27 }
 0x193   : > { %v4088_v47 = vpop.eup %4087  ;;  %v2223_v55 = vmul.f32 %v4086_v42, %v4670_v16  ;;  %4113 = vtanh.f32 %v1102_v6  ;;  %v2144_v42 = vcombine.high %v4698_v0, %v4698_v0  ;;  %v1085_v0 = vrot.slane %v1053_v56, %v4637_v38  ;;  %v1003_v6 = vld [vmem:[#allocation3 + $0x78] sm:$0xff] }
 0x194   : > { %v1130_v51 = vmul.f32 %v4088_v47, %v4673_v18  ;;  %v4090_v54 = vpop.eup %4089  ;;  %4115 = vtanh.f32 %v1103_v13  ;;  %v2198_v49 = vadd.f32 %v2172_v31, %v2092_v40 }
 0x195   : > { %2239 = vadd.xlane.f32.xlu0 %v2222_v36  ;;  %v4092_v58 = vpop.eup %4091  ;;  %v2229_v61 = vmul.f32 %v4090_v54, %v4670_v16  ;;  %4117 = vtanh.f32 %v2195_v21  ;;  %v2091_v36 = vld [vmem:[#allocation5 + $0x60] sm:$0xff]  ;;  %v2176_v53 = vrot.slane %v2144_v42, %v4637_v38 }
 0x196   : > { %2255 = vadd.xlane.f32.xlu1 %v2230_v43  ;;  %v4094_v1 = vpop.eup %4093  ;;  %v2224_v2 = vmul.f32 %v4092_v58, %v4670_v16  ;;  %4119 = vtanh.f32 %v2196_v24  ;;  %v2197_v45 = vadd.f32 %v2172_v31, %v2091_v36 }
 0x197   : > { %v4096_v4 = vpop.eup %4095  ;;  %v1132_v7 = vmul.f32 %v4094_v1, %v4673_v18  ;;  %4121 = vtanh.f32 %v1104_v30  ;;  %v2199_v63 = vadd.f32 %v2176_v53, %v2093_v60 }
 0x198   : > { %v4098_v11 = vpop.eup %4097  ;;  %v1133_v12 = vmul.f32 %v4096_v4, %v4673_v18  ;;  %4123 = vtanh.f32 %v1105_v35  ;;  %v1002_v4 = vld [vmem:[#allocation3 + $0x70] sm:$0xff] }
 0x199   : > { %1146 = vadd.xlane.f32.xlu0 %v1130_v51  ;;  %v4100_v15 = vpop.eup %4099  ;;  %v2225_v20 = vmul.f32 %v4098_v11, %v4670_v16  ;;  %4125 = vtanh.f32 %v2197_v45  ;;  %v1108_v9 = vadd.f32 %v1085_v0, %v1002_v4 }
 0x19a   : > { %2241 = vadd.xlane.f32.xlu1 %v2223_v55  ;;  %v4102_v22 = vpop.eup %4101  ;;  %v2226_v23 = vmul.f32 %v4100_v15, %v4670_v16  ;;  %v1106_v55 = vadd.f32 %v1081_v46, %v1000_v50  ;;  %4127 = vtanh.f32 %v2198_v49 }
 0x19b   : > { %v4104_v26 = vpop.eup %4103  ;;  %v1134_v28 = vmul.f32 %v4102_v22, %v4673_v18 }
 0x19c   : > { %v4106_v32 = vpop.eup %4105  ;;  %v1135_v34 = vmul.f32 %v4104_v26, %v4673_v18  ;;  %4129 = vtanh.f32 %v1106_v55 }
 0x19d   : > { %2253 = vadd.xlane.f32.xlu0 %v2229_v61  ;;  %v4108_v39 = vpop.eup %4107  ;;  %v2227_v43 = vmul.f32 %v4106_v32, %v4670_v16  ;;  %v2094_v61 = vld [vmem:[#allocation5 + $0x78] sm:$0xff]  ;;  %4131 = vtanh.f32 %v1107_v59  ;;  %v1212_v59 = vand.u32 127, %v1009_v29 }
 0x19e   : > { %2243 = vadd.xlane.f32.xlu1 %v2224_v2  ;;  %v4110_v47 = vpop.eup %4109  ;;  %v2228_v48 = vmul.f32 %v4108_v39, %v4670_v16  ;;  %v2200_v3 = vadd.f32 %v2176_v53, %v2094_v61  ;;  %4133 = vtanh.f32 %v2199_v63 }
 0x19f   : > { %v4112_v51 = vpop.eup %4111  ;;  %v1136_v54 = vmul.f32 %v4110_v47, %v4673_v18  ;;  %v1217_v61 = vadd.s32 4294967288, %v1212_v59 }
 0x1a0   : > { %v4114_v57 = vpop.eup %4113  ;;  %v1137_v58 = vmul.f32 %v4112_v51, %v4673_v18  ;;  %4135 = vtanh.f32 %v2200_v3 }
 0x1a1   : > { %1150 = vadd.xlane.f32.xlu0 %v1132_v7  ;;  %v4116_v41 = vpop.eup %4115  ;;  %v1138_v62 = vmul.f32 %v4114_v57, %v4673_v18  ;;  %4137 = vtanh.f32 %v1108_v9 }
 0x1a2   : > { %1152 = vadd.xlane.f32.xlu1 %v1133_v12  ;;  %v4118_v1 = vpop.eup %4117  ;;  %v1139_v2 = vmul.f32 %v4116_v41, %v4673_v18  ;;  %v1109_v12 = vadd.f32 %v1085_v0, %v1003_v6  ;;  %v4815_v0 = vsub.s32 %v1212_v59, %v4626_v33 }
 0x1a3   : > { %v4120_v5 = vpop.eup %4119  ;;  %v2231_v7 = vmul.f32 %v4118_v1, %v4670_v16  ;;  %v4818_v1 = vsub.s32 %v1217_v61, %v4626_v33 }
 0x1a4   : > { %v4122_v10 = vpop.eup %4121  ;;  %v2232_v11 = vmul.f32 %v4120_v5, %v4670_v16  ;;  %4139 = vtanh.f32 %v1109_v12 }
 0x1a5   : > { %2245 = vadd.xlane.f32.xlu0 %v2225_v20  ;;  %v4124_v13 = vpop.eup %4123  ;;  %v1140_v14 = vmul.f32 %v4122_v10, %v4673_v18 }
 0x1a6   : > { %2247 = vadd.xlane.f32.xlu1 %v2226_v23  ;;  %v4126_v15 = vpop.eup %4125  ;;  %v1141_v17 = vmul.f32 %v4124_v13, %v4673_v18 }
 0x1a7   : > { %v4128_v19 = vpop.eup %4127  ;;  %v2233_v20 = vmul.f32 %v4126_v15, %v4670_v16 }
 0x1a8   : > { %v2234_v37 = vmul.f32 %v4128_v19, %v4670_v16 }
 0x1a9   : > { %1154 = vadd.xlane.f32.xlu0 %v1134_v28  ;;  %v4130_v21 = vpop.eup %4129 }
 0x1aa   : > { %1156 = vadd.xlane.f32.xlu1 %v1135_v34  ;;  %v4132_v22 = vpop.eup %4131  ;;  %v1142_v23 = vmul.f32 %v4130_v21, %v4673_v18  ;;  %v4747_v34 = vld [vmem:[%s6345_s10] sm:$0xff] }
 0x1ab   : > { %v4134_v24 = vpop.eup %4133  ;;  %v1143_v25 = vmul.f32 %v4132_v22, %v4673_v18  ;;  %6424 = vst [vmem:[#allocation11_spill] sm:$0xff] %v4747_v34  ;;  %v4751_v35 = vrot.slane %v4747_v34, %v4637_v38 }
 0x1ac   : > { %v2235_v27 = vmul.f32 %v4134_v24, %v4670_v16 }
 0x1ad   : > { %2249 = vadd.xlane.f32.xlu0 %v2227_v43  ;;  %v4136_v26 = vpop.eup %4135 }
 0x1ae   : > { %2251 = vadd.xlane.f32.xlu1 %v2228_v48  ;;  %v4138_v44 = vpop.eup %4137  ;;  %v2236_v28 = vmul.f32 %v4136_v26, %v4670_v16  ;;  %v4756_v16 = vrot.slane %v4747_v34, %v4663_v8 }
 0x1af   : > { %v1144_v31 = vmul.f32 %v4138_v44, %v4673_v18 }
 0x1b1   : > { %1158 = vadd.xlane.f32.xlu0 %v1136_v54  ;;  %v4140_v30 = vpop.eup %4139 }
 0x1b2   : > { %1160 = vadd.xlane.f32.xlu1 %v1137_v58  ;;  %v1145_v32 = vmul.f32 %v4140_v30, %v4673_v18  ;;  %v4761_v18 = vld [vmem:[%s6344_s9] sm:$0xff] }
 0x1b3   : > { %6425 = vst [vmem:[#allocation12_spill] sm:$0xff] %v4761_v18  ;;  %v4766_v36 = vrot.slane %v4761_v18, %v4637_v38 }
 0x1b5   : > { %1162 = vadd.xlane.f32.xlu0 %v1138_v62 }
 0x1b6   : > { %1164 = vadd.xlane.f32.xlu1 %v1139_v2 }
 0x1b9   : > { %2257 = vadd.xlane.f32.xlu0 %v2231_v7 }
 0x1ba   : > { %2259 = vadd.xlane.f32.xlu1 %v2232_v11 }
 0x1bd   : > { %1166 = vadd.xlane.f32.xlu0 %v1140_v14 }
 0x1be   : > { %1168 = vadd.xlane.f32.xlu1 %v1141_v17 }
 0x1c1   : > { %2261 = vadd.xlane.f32.xlu0 %v2233_v20 }
 0x1c2   : > { %2263 = vadd.xlane.f32.xlu1 %v2234_v37 }
 0x1c5   : > { %1170 = vadd.xlane.f32.xlu0 %v1142_v23 }
 0x1c6   : > { %1172 = vadd.xlane.f32.xlu1 %v1143_v25 }
 0x1c9   : > { %2265 = vadd.xlane.f32.xlu0 %v2235_v27 }
 0x1ca   : > { %2267 = vadd.xlane.f32.xlu1 %v2236_v28 }
 0x1cd   : > { %1174 = vadd.xlane.f32.xlu0 %v1144_v31 }
 0x1ce   : > { %1176 = vadd.xlane.f32.xlu1 %v1145_v32 }
 0x1df   : > { %2689 = vbcast.lane.b32.xlu1 %v4751_v35, 264 }
 0x1e3   : > { %2696 = vbcast.lane.b32.xlu1 %v4756_v16, 256 }
 0x1e7   : > { %1606 = vbcast.lane.b32.xlu1 %v4766_v36, 256 }
 0x21a   : > { %v4769_v39 = vpop.xlane.xlu0 %2237 }
 0x21b   : > { %v4771_v40 = vpop.xlane.xlu1 %1148  ;;  %v2305_v7 = vrot.slane %v4769_v39, %v4815_v0 }
 0x21c   : > { %v1221_v13 = vrot.slane %v4771_v40, %v4818_v1 }
 0x21e   : > { %v4773_v42 = vpop.xlane.xlu0 %2239 }
 0x21f   : > { %v4775_v43 = vpop.xlane.xlu1 %2255  ;;  %v2309_v29 = vrot.slane %v4773_v42, %v4818_v1 }
 0x220   : > { %v2345_v17 = vrot.slane %v4775_v43, %v4818_v1 }
 0x221   : > { %v2310_v15 = vsel %vm1222_vm0, %v2309_v29, %v2305_v7 }
 0x222   : > { %v4777_v45 = vpop.xlane.xlu0 %1146 }
 0x223   : > { %v4779_v46 = vpop.xlane.xlu1 %2241  ;;  %v1216_v28 = vrot.slane %v4777_v45, %v4815_v0 }
 0x224   : > { %v2314_v9 = vrot.slane %v4779_v46, %v4815_v0 }
 0x226   : > { %v4781_v47 = vpop.xlane.xlu0 %2253 }
 0x227   : > { %v4783_v48 = vpop.xlane.xlu1 %2243  ;;  %v2341_v20 = vrot.slane %v4781_v47, %v4815_v0 }
 0x228   : > { %v2318_v4 = vrot.slane %v4783_v48, %v4818_v1 }
 0x229   : > { %v2346_v61 = vsel %vm1222_vm0, %v2345_v17, %v2341_v20 }
 0x22a   : > { %v4785_v49 = vpop.xlane.xlu0 %1150  ;;  %v2319_v19 = vsel %vm1222_vm0, %v2318_v4, %v2314_v9 }
 0x22b   : > { %v4787_v50 = vpop.xlane.xlu1 %1152  ;;  %v1227_v37 = vrot.slane %v4785_v49, %v4815_v0  ;;  %v2374_v30 = vsel %vm1287_vm1, %v2319_v19, %v2310_v15 }
 0x22c   : > { %v1231_v21 = vrot.slane %v4787_v50, %v4818_v1 }
 0x22e   : > { %v4789_v51 = vpop.xlane.xlu0 %2245 }
 0x22f   : > { %v4791_v52 = vpop.xlane.xlu1 %2247  ;;  %v2323_v6 = vrot.slane %v4789_v51, %v4815_v0 }
 0x230   : > { %v2327_v5 = vrot.slane %v4791_v52, %v4818_v1 }
 0x232   : > { %v4793_v53 = vpop.xlane.xlu0 %1154  ;;  %v2328_v22 = vsel %vm1222_vm0, %v2327_v5, %v2323_v6  ;;  %v1232_v6 = vsel %vm1222_vm0, %v1231_v21, %v1227_v37 }
 0x233   : > { %v4795_v54 = vpop.xlane.xlu1 %1156  ;;  %v1236_v23 = vrot.slane %v4793_v53, %v4815_v0  ;;  %v2375_v29 = vsel %vm1289_vm2, %v2328_v22, %v2374_v30 }
 0x234   : > { %v1240_v24 = vrot.slane %v4795_v54, %v4818_v1 }
 0x236   : > { %v4797_v55 = vpop.xlane.xlu0 %2249 }
 0x237   : > { %v4799_v56 = vpop.xlane.xlu1 %2251  ;;  %v2332_v11 = vrot.slane %v4797_v55, %v4815_v0 }
 0x238   : > { %v2336_v10 = vrot.slane %v4799_v56, %v4818_v1 }
 0x23a   : > { %v4801_v57 = vpop.xlane.xlu0 %1158  ;;  %v2337_v25 = vsel %vm1222_vm0, %v2336_v10, %v2332_v11  ;;  %v1241_v11 = vsel %vm1222_vm0, %v1240_v24, %v1236_v23 }
 0x23b   : > { %v4803_v58 = vpop.xlane.xlu1 %1160  ;;  %v1245_v5 = vrot.slane %v4801_v57, %v4815_v0  ;;  %v2376_v7 = vsel %vm1291_vm3, %v2337_v25, %v2375_v29  ;;  %v1223_v25 = vsel %vm1222_vm0, %v1221_v13, %v1216_v28 }
 0x23c   : > { %v1249_v4 = vrot.slane %v4803_v58, %v4818_v1  ;;  %v2377_v30 = vsel %vm1293_vm4, %v2346_v61, %v2376_v7  ;;  %v1288_v29 = vsel %vm1287_vm1, %v1232_v6, %v1223_v25 }
 0x23e   : > { %v4806_v60 = vpop.xlane.xlu0 %1162 }
 0x23f   : > { %v4808_v41 = vpop.xlane.xlu1 %1164  ;;  %v1254_v10 = vrot.slane %v4806_v60, %v4815_v0 }
 0x240   : > { %v1258_v9 = vrot.slane %v4808_v41, %v4818_v1 }
 0x242   : > { %v4810_v62 = vpop.xlane.xlu0 %2257  ;;  %v1259_v34 = vsel %vm1222_vm0, %v1258_v9, %v1254_v10 }
 0x243   : > { %v4812_v63 = vpop.xlane.xlu1 %2259  ;;  %v2350_v27 = vrot.slane %v4810_v62, %v4815_v0 }
 0x244   : > { %v2354_v26 = vrot.slane %v4812_v63, %v4818_v1 }
 0x246   : > { %v4820_v2 = vpop.xlane.xlu0 %1166  ;;  %v2355_v15 = vsel %vm1222_vm0, %v2354_v26, %v2350_v27  ;;  %v1250_v26 = vsel %vm1222_vm0, %v1249_v4, %v1245_v5 }
 0x247   : > { %v4822_v3 = vpop.xlane.xlu1 %1168  ;;  %v1263_v19 = vrot.slane %v4820_v2, %v4815_v0  ;;  %v2378_v18 = vsel %vm1295_vm5, %v2355_v15, %v2377_v30 }
 0x248   : > { %v1267_v17 = vrot.slane %v4822_v3, %v4818_v1 }
 0x24a   : > { %v4840_v12 = vpop.xlane.xlu0 %2261 }
 0x24b   : > { %v4844_v14 = vpop.xlane.xlu1 %2263  ;;  %v2359_v32 = vrot.slane %v4840_v12, %v4815_v0 }
 0x24c   : > { %v2363_v31 = vrot.slane %v4844_v14, %v4818_v1 }
 0x24e   : > { %v4866_v44 = vpop.xlane.xlu0 %1170  ;;  %v2364_v24 = vsel %vm1222_vm0, %v2363_v31, %v2359_v32  ;;  %v1268_v31 = vsel %vm1222_vm0, %v1267_v17, %v1263_v19 }
 0x24f   : > { %v4875_v59 = vpop.xlane.xlu1 %1172  ;;  %v1272_v37 = vrot.slane %v4866_v44, %v4815_v0  ;;  %v2379_v28 = vsel %vm1297_vm6, %v2364_v24, %v2378_v18 }
 0x250   : > { %v1276_v21 = vrot.slane %v4875_v59, %v4818_v1 }
 0x252   : > { %v4895_v20 = vpop.xlane.xlu0 %2265  ;;  %v1277_v7 = vsel %vm1222_vm0, %v1276_v21, %v1272_v37  ;;  %v4257_v21 = vmov 0   ;;  %v4942_v37 = vsub.s32 2, %v4626_v33 }
 0x253   : > { %6426 = vst [vmem:[#allocation13_spill] sm:$0xff] %v4895_v20  ;;  %v4901_v22 = vpop.xlane.xlu1 %2267  ;;  %v2368_v23 = vrot.slane %v4895_v20, %v4815_v0  ;;  %v1290_v20 = vsel %vm1289_vm2, %v1241_v11, %v1288_v29  ;;  %4074 = vset.pattern.permute.xlu1 %v4257_v21  ;;  %4073 = vset.pattern.permute.xlu0 %v4257_v21 }
 0x254   : > { %v2372_v27 = vrot.slane %v4901_v22, %v4818_v1  ;;  %v1292_v4 = vsel %vm1291_vm3, %v1250_v26, %v1290_v20 }
 0x255   : > { %v1294_v11 = vsel %vm1293_vm4, %v1259_v34, %v1292_v4 }
 0x256   : > { %v4916_v32 = vpop.xlane.xlu0 %1174  ;;  %v2373_v13 = vsel %vm1222_vm0, %v2372_v27, %v2368_v23  ;;  %v1296_v18 = vsel %vm1295_vm5, %v1268_v31, %v1294_v11 }
 0x257   : > { %v4921_v61 = vpop.xlane.xlu1 %1176  ;;  %v1281_v5 = vrot.slane %v4916_v32, %v4815_v0  ;;  %v2380_v6 = vsel %vm1299_vm7, %v2373_v13, %v2379_v28  ;;  %v1298_v17 = vsel %vm1297_vm6, %v1277_v7, %v1296_v18 }
 0x258   : > { %v1285_v9 = vrot.slane %v4921_v61, %v4818_v1  ;;  %v2382_v10 = vsel %vm1302_vm8, %v2380_v6, -inf }
 0x259   : > { %2383 = vmax.xlane.f32.xlu0 %v2382_v10 }
 0x25a   : > { %v1286_v15 = vsel %vm1222_vm0, %v1285_v9, %v1281_v5 }
 0x25b   : > { %v1300_v19 = vsel %vm1299_vm7, %v1286_v15, %v1298_v17  ;;  %v4939_v34 = vpop.permute.xlu1 %2689 }
 0x25c   : > { %v1303_v20 = vsel %vm1302_vm8, %v1300_v19, -inf }
 0x25d   : > { %1304 = vmax.xlane.f32.xlu1 %v1303_v20 }
 0x25f   : > { %v4944_v23 = vpop.permute.xlu1 %2696 }
 0x263   : > { %v4957_v30 = vpop.permute.xlu1 %1606 }
 0x26f   : > { %2685 = vbcast.lane.b32.xlu0 %v4751_v35, 256 }
 0x273   : > { %2700 = vbcast.lane.b32.xlu0 %v4756_v16, 264 }
 0x277   : > { %1610 = vbcast.lane.b32.xlu0 %v4766_v36, 264 }
 0x2e2   : > { %v4946_v24 = vpop.xlane.xlu0 %2383 }
 0x2e3   : > { %v2389_v25 = vrot.slane %v4946_v24, %v4637_v38  ;;  %v2393_v35 = vrot.slane %v4946_v24, %v4663_v8  ;;  %v2397_v16 = vrot.slane %v4946_v24, %v4942_v37 }
 0x2e5   : > { %v2426_v36 = vsub.f32 %v4769_v39, %v2389_v25  ;;  %v2427_v26 = vsub.f32 %v4773_v42, %v2389_v25  ;;  %v2428_v27 = vsub.f32 %v4779_v46, %v2393_v35  ;;  %v2431_v29 = vsub.f32 %v4791_v52, %v2397_v16 }
 0x2e6   : > { %v2429_v4 = vsub.f32 %v4783_v48, %v2393_v35  ;;  %v4961_v6 = vpop.xlane.xlu1 %1304  ;;  %v4967_v52 = vsub.s32 3, %v4626_v33 }
 0x2e7   : > { %v2442_v31 = vmul.f32 1.442695, %v2426_v36  ;;  %v2444_v13 = vmul.f32 1.442695, %v2427_v26  ;;  %v2446_v28 = vmul.f32 1.442695, %v2428_v27  ;;  %v1310_v39 = vrot.slane %v4961_v6, %v4637_v38 }
 0x2e8   : > { %v2452_v5 = vmul.f32 1.442695, %v2431_v29  ;;  %v2448_v42 = vmul.f32 1.442695, %v2429_v4  ;;  %v1318_v7 = vrot.slane %v4961_v6, %v4942_v37  ;;  %v1314_v48 = vrot.slane %v4961_v6, %v4663_v8 }
 0x2e9   : > { %4141 = vpow2.f32 %v2442_v31  ;;  %v1347_v46 = vsub.f32 %v4777_v45, %v1310_v39  ;;  %v1348_v9 = vsub.f32 %v4771_v40, %v1310_v39  ;;  %v2401_v18 = vrot.slane %v4946_v24, %v4967_v52 }
 0x2ea   : > { %4143 = vpow2.f32 %v2444_v13  ;;  %v1352_v45 = vsub.f32 %v4795_v54, %v1318_v7  ;;  %v1349_v17 = vsub.f32 %v4785_v49, %v1314_v48  ;;  %v4987_v40 = vsub.s32 4, %v4626_v33 }
 0x2eb   : > { %4145 = vpow2.f32 %v2446_v28  ;;  %v1363_v10 = vmul.f32 1.442695, %v1347_v46  ;;  %v1365_v19 = vmul.f32 1.442695, %v1348_v9  ;;  %v2433_v21 = vsub.f32 %v4799_v56, %v2401_v18 }
 0x2ec   : > { %4147 = vpow2.f32 %v2452_v5  ;;  %6427 = vst [vmem:[#allocation14_spill] sm:$0xff] %v4987_v40  ;;  %v1322_v54 = vrot.slane %v4961_v6, %v4967_v52  ;;  %v1373_v25 = vmul.f32 1.442695, %v1352_v45  ;;  %v1350_v49 = vsub.f32 %v4787_v50, %v1314_v48 }
 0x2ed   : > { %4149 = vpow2.f32 %v2448_v42  ;;  %v1367_v36 = vmul.f32 1.442695, %v1349_v17  ;;  %v2405_v26 = vrot.slane %v4946_v24, %v4987_v40  ;;  %v2456_v27 = vmul.f32 1.442695, %v2433_v21 }
 0x2ee   : > { %4151 = vpow2.f32 %v1363_v10  ;;  %v1354_v56 = vsub.f32 %v4803_v58, %v1322_v54  ;;  %v5004_v31 = vsub.s32 5, %v4626_v33  ;;  %v2430_v13 = vsub.f32 %v4789_v51, %v2397_v16 }
 0x2ef   : > { %4153 = vpow2.f32 %v1365_v19  ;;  %v1369_v50 = vmul.f32 1.442695, %v1350_v49  ;;  %v2435_v28 = vsub.f32 %v4775_v43, %v2405_v26  ;;  %v1326_v4 = vrot.slane %v4961_v6, %v4987_v40 }
 0x2f0   : > { %4155 = vpow2.f32 %v1373_v25  ;;  %6428 = vst [vmem:[#allocation15_spill] sm:$0xff] %v5004_v31  ;;  %v1377_v5 = vmul.f32 1.442695, %v1354_v56  ;;  %v2450_v58 = vmul.f32 1.442695, %v2430_v13  ;;  %v1351_v39 = vsub.f32 %v4793_v53, %v1318_v7 }
 0x2f1   : > { %4157 = vpow2.f32 %v1367_v36  ;;  %v2409_v46 = vrot.slane %v4946_v24, %v5004_v31  ;;  %v2460_v48 = vmul.f32 1.442695, %v2435_v28  ;;  %v1356_v51 = vsub.f32 %v4808_v41, %v1326_v4 }
 0x2f2   : > { %4159 = vpow2.f32 %v2456_v27  ;;  %v5018_v43 = vsub.s32 6, %v4626_v33  ;;  %v2432_v16 = vsub.f32 %v4797_v55, %v2401_v18  ;;  %v1371_v9 = vmul.f32 1.442695, %v1351_v39 }
 0x2f3   : > { %4161 = vpow2.f32 %v1369_v50  ;;  %v2437_v7 = vsub.f32 %v4812_v63, %v2409_v46  ;;  %v1330_v10 = vrot.slane %v4961_v6, %v5004_v31  ;;  %v1381_v45 = vmul.f32 1.442695, %v1356_v51 }
 0x2f4   : > { %4163 = vpow2.f32 %v1377_v5  ;;  %6429 = vst [vmem:[#allocation16_spill] sm:$0xff] %v5018_v43  ;;  %v2454_v17 = vmul.f32 1.442695, %v2432_v16  ;;  %v1353_v55 = vsub.f32 %v4801_v57, %v1322_v54  ;;  %v2413_v63 = vrot.slane %v4946_v24, %v5018_v43 }
 0x2f5   : > { %4165 = vpow2.f32 %v2450_v58  ;;  %v2464_v19 = vmul.f32 1.442695, %v2437_v7  ;;  %v1358_v21 = vsub.f32 %v4822_v3, %v1330_v10  ;;  %v5041_v49 = vsub.s32 7, %v4626_v33 }
 0x2f6   : > { %v4974_v11 = vpop.eup %4141  ;;  %4167 = vpow2.f32 %v2460_v48  ;;  %v2434_v57 = vsub.f32 %v4781_v47, %v2405_v26  ;;  %v1375_v54 = vmul.f32 1.442695, %v1353_v55  ;;  %v2439_v27 = vsub.f32 %v4844_v14, %v2413_v63 }
 0x2f7   : > { %v4979_v15 = vpop.eup %4143  ;;  %2491 = vperm.xlu0 %4073, %v4974_v11   ;;  %4169 = vpow2.f32 %v1371_v9  ;;  %6431 = vst [vmem:[#allocation18_spill] sm:$0xff] %v5041_v49  ;;  %v1334_v3 = vrot.slane %v4961_v6, %v5018_v43  ;;  %v1385_v56 = vmul.f32 1.442695, %v1358_v21  ;;  %v1355_v47 = vsub.f32 %v4806_v60, %v1326_v4 }
 0x2f8   : > { %2494 = vperm.xlu1 %4074, %v4979_v15   ;;  %v4984_v20 = vpop.eup %4145  ;;  %4171 = vpow2.f32 %v1381_v45  ;;  %v2458_v33 = vmul.f32 1.442695, %v2434_v57  ;;  %v2417_v14 = vrot.slane %v4946_v24, %v5041_v49  ;;  %v2468_v50 = vmul.f32 1.442695, %v2439_v27 }
 0x2f9   : > { %v4992_v35 = vpop.eup %4147  ;;  %4173 = vpow2.f32 %v2454_v17  ;;  %v1360_v28 = vsub.f32 %v4875_v59, %v1334_v3  ;;  %v2436_v58 = vsub.f32 %v4810_v62, %v2409_v46  ;;  %v1379_v60 = vmul.f32 1.442695, %v1355_v47 }
 0x2fa   : > { %v5000_v29 = vpop.eup %4149  ;;  %4175 = vpow2.f32 %v2464_v19  ;;  %v2441_v39 = vsub.f32 %v4901_v22, %v2417_v14  ;;  %v1338_v24 = vrot.slane %v4961_v6, %v5041_v49  ;;  %v1357_v62 = vsub.f32 %v4820_v2, %v1330_v10 }
 0x2fb   : > { %2506 = vperm.xlu0 %4073, %v4992_v35   ;;  %v5011_v42 = vpop.eup %4151  ;;  %4177 = vpow2.f32 %v1375_v54  ;;  %v1389_v59 = vmul.f32 1.442695, %v1360_v28  ;;  %v2462_v51 = vmul.f32 1.442695, %v2436_v58  ;;  %v2438_v6 = vsub.f32 %v4840_v12, %v2413_v63  ;;  %v6441_v63 = vld [vmem:[#allocation13_spill] sm:$0xff] }
 0x2fc   : > { %2497 = vperm.xlu1 %4074, %v4984_v20   ;;  %v5021_v53 = vpop.eup %4153  ;;  %4179 = vpow2.f32 %v1385_v56  ;;  %v2472_v16 = vmul.f32 1.442695, %v2441_v39  ;;  %v1362_v22 = vsub.f32 %v4921_v61, %v1338_v24  ;;  %v1383_v7 = vmul.f32 1.442695, %v1357_v62 }
 0x2fd   : > { %v5026_v41 = vpop.eup %4155  ;;  %4181 = vpow2.f32 %v2458_v33  ;;  %v2466_v61 = vmul.f32 1.442695, %v2438_v6  ;;  %v1359_v17 = vsub.f32 %v4866_v44, %v1334_v3  ;;  %v2440_v19 = vsub.f32 %v6441_v63, %v2417_v14  ;;  %v5149_v63 = vpop.permute.xlu0 %2685 }
 0x2fe   : > { %v5031_v18 = vpop.eup %4157  ;;  %4183 = vpow2.f32 %v2468_v50  ;;  %v1393_v2 = vmul.f32 1.442695, %v1362_v22  ;;  %v1361_v27 = vsub.f32 %v4916_v32, %v1338_v24  ;;  %v6449_v50 = vld [vmem:[#allocation12_spill] sm:$0xff] }
 0x2ff   : > { %1427 = vperm.xlu0 %4073, %v5026_v41   ;;  %v5036_v25 = vpop.eup %4159  ;;  %4185 = vpow2.f32 %v1379_v60  ;;  %v1387_v21 = vmul.f32 1.442695, %v1359_v17  ;;  %v2470_v44 = vmul.f32 1.442695, %v2440_v19  ;;  %v1615_v28 = vrot.slane %v6449_v50, %v4663_v8  ;;  %v6451_v60 = vld [vmem:[#allocation11_spill] sm:$0xff] }
 0x300   : > { %2500 = vperm.xlu1 %4074, %v5000_v29   ;;  %6430 = vst [vmem:[#allocation17_spill] sm:$0xff] %v5036_v25  ;;  %v5044_v36 = vpop.eup %4161  ;;  %4187 = vpow2.f32 %v1389_v59  ;;  %v1391_v33 = vmul.f32 1.442695, %v1361_v27  ;;  %v2705_v39 = vrot.slane %v6451_v60, %v4942_v37  ;;  %v1626_v59 = vrot.slane %v6449_v50, %v4942_v37 }
 0x301   : > { %v5049_v13 = vpop.eup %4163  ;;  %4189 = vpow2.f32 %v2462_v51  ;;  %v2716_v62 = vrot.slane %v6451_v60, %v4967_v52  ;;  %v2727_v22 = vrot.slane %v6451_v60, %v4987_v40  ;;  %v1648_v6 = vrot.slane %v6449_v50, %v4987_v40  ;;  %v5151_v19 = vpop.permute.xlu0 %2700 }
 0x302   : > { %6432 = vst [vmem:[#allocation19_spill] sm:$0xff] %v5049_v13  ;;  %v5054_v26 = vpop.eup %4165  ;;  %4191 = vpow2.f32 %v2472_v16  ;;  %v1637_v16 = vrot.slane %v6449_v50, %v4967_v52  ;;  %v1670_v17 = vrot.slane %v6449_v50, %v5018_v43 }
 0x303   : > { %2512 = vperm.xlu0 %4073, %v5036_v25   ;;  %v5059_v5 = vpop.eup %4167  ;;  %4193 = vpow2.f32 %v1383_v7  ;;  %v2738_v7 = vrot.slane %v6451_v60, %v5004_v31 }
 0x304   : > { %1412 = vperm.xlu1 %4074, %v5011_v42   ;;  %6433 = vst [vmem:[#allocation20_spill] sm:$0xff] %v5059_v5  ;;  %v5064_v4 = vpop.eup %4169  ;;  %4195 = vpow2.f32 %v1393_v2  ;;  %v1659_v2 = vrot.slane %v6449_v50, %v5004_v31 }
 0x305   : > { %v5069_v48 = vpop.eup %4171  ;;  %4197 = vpow2.f32 %v2466_v61  ;;  %v2749_v61 = vrot.slane %v6451_v60, %v5018_v43  ;;  %v5158_v27 = vpop.permute.xlu0 %1610 }
 0x306   : > { %6434 = vst [vmem:[#allocation21_spill] sm:$0xff] %v5069_v48  ;;  %v5074_v46 = vpop.eup %4173  ;;  %4199 = vpow2.f32 %v1387_v21  ;;  %v5155_v21 = vrot.slane %v6451_v60, %v5041_v49 }
 0x307   : > { %1433 = vperm.xlu0 %4073, %v5049_v13   ;;  %6435 = vst [vmem:[#allocation22_spill] sm:$0xff] %v5074_v46  ;;  %v5077_v9 = vpop.eup %4175  ;;  %4201 = vpow2.f32 %v2470_v44 }
 0x308   : > { %1415 = vperm.xlu1 %4074, %v5021_v53   ;;  %6436 = vst [vmem:[#allocation23_spill] sm:$0xff] %v5077_v9  ;;  %v5082_v45 = vpop.eup %4177  ;;  %4203 = vpow2.f32 %v1391_v33 }
 0x309   : > { %6437 = vst [vmem:[#allocation24_spill] sm:$0xff] %v5082_v45  ;;  %v5084_v10 = vpop.eup %4179 }
 0x30a   : > { %6438 = vst [vmem:[#allocation25_spill] sm:$0xff] %v5084_v10  ;;  %v5089_v55 = vpop.eup %4181 }
 0x30b   : > { %2518 = vperm.xlu0 %4073, %v5059_v5   ;;  %6439 = vst [vmem:[#allocation26_spill] sm:$0xff] %v5089_v55  ;;  %v5091_v12 = vpop.eup %4183 }
 0x30c   : > { %1418 = vperm.xlu1 %4074, %v5031_v18   ;;  %6440 = vst [vmem:[#allocation27_spill] sm:$0xff] %v5091_v12  ;;  %v5096_v57 = vpop.eup %4185 }
 0x30d   : > { %6442 = vst [vmem:[#allocation13_spill] sm:$0xff] %v5096_v57  ;;  %v5098_v54 = vpop.eup %4187 }
 0x30e   : > { %6443 = vst [vmem:[#allocation28_spill] sm:$0xff] %v5098_v54  ;;  %v5103_v3 = vpop.eup %4189 }
 0x30f   : > { %1439 = vperm.xlu0 %4073, %v5069_v48   ;;  %6444 = vst [vmem:[#allocation29_spill] sm:$0xff] %v5103_v3  ;;  %v5105_v56 = vpop.eup %4191 }
 0x310   : > { %1421 = vperm.xlu1 %4074, %v5044_v36   ;;  %6445 = vst [vmem:[#allocation30_spill] sm:$0xff] %v5105_v56  ;;  %v5109_v47 = vpop.eup %4193 }
 0x311   : > { %6446 = vst [vmem:[#allocation31_spill] sm:$0xff] %v5109_v47  ;;  %v5111_v14 = vpop.eup %4195 }
 0x312   : > { %6447 = vst [vmem:[#allocation32_spill] sm:$0xff] %v5111_v14  ;;  %v5115_v32 = vpop.eup %4197 }
 0x313   : > { %2524 = vperm.xlu0 %4073, %v5077_v9   ;;  %6448 = vst [vmem:[#allocation33_spill] sm:$0xff] %v5115_v32  ;;  %v5120_v58 = vpop.eup %4199 }
 0x314   : > { %2503 = vperm.xlu1 %4074, %v5054_v26   ;;  %6450 = vst [vmem:[#allocation12_spill] sm:$0xff] %v5120_v58  ;;  %v5125_v24 = vpop.eup %4201 }
 0x315   : > { %v5130_v51 = vpop.eup %4203 }
 0x316   : > { %6452 = vst [vmem:[#allocation11_spill] sm:$0xff] %v5130_v51 }
 0x317   : > { %1445 = vperm.xlu0 %4073, %v5084_v10  }
 0x318   : > { %1424 = vperm.xlu1 %4074, %v5064_v4  }
 0x31b   : > { %2530 = vperm.xlu0 %4073, %v5091_v12  }
 0x31c   : > { %2509 = vperm.xlu1 %4074, %v5074_v46  }
 0x31f   : > { %1451 = vperm.xlu0 %4073, %v5098_v54  }
 0x320   : > { %1430 = vperm.xlu1 %4074, %v5082_v45  }
 0x323   : > { %2536 = vperm.xlu0 %4073, %v5105_v56  }
 0x324   : > { %2515 = vperm.xlu1 %4074, %v5089_v55  }
 0x327   : > { %1457 = vperm.xlu0 %4073, %v5111_v14  }
 0x328   : > { %1436 = vperm.xlu1 %4074, %v5096_v57  }
 0x32b   : > { %1621 = vbcast.lane.b32.xlu0 %v1615_v28, 264 }
 0x32c   : > { %2521 = vperm.xlu1 %4074, %v5103_v3  }
 0x32f   : > { %2711 = vbcast.lane.b32.xlu0 %v2705_v39, 264 }
 0x330   : > { %1442 = vperm.xlu1 %4074, %v5109_v47  }
 0x333   : > { %1632 = vbcast.lane.b32.xlu0 %v1626_v59, 264 }
 0x334   : > { %2527 = vperm.xlu1 %4074, %v5115_v32  }
 0x337   : > { %2722 = vbcast.lane.b32.xlu0 %v2716_v62, 264 }
 0x338   : > { %1448 = vperm.xlu1 %4074, %v5120_v58  }
 0x33b   : > { %1643 = vbcast.lane.b32.xlu0 %v1637_v16, 264 }
 0x33c   : > { %2533 = vperm.xlu1 %4074, %v5125_v24  }
 0x33f   : > { %2733 = vbcast.lane.b32.xlu0 %v2727_v22, 264 }
 0x340   : > { %1454 = vperm.xlu1 %4074, %v5130_v51  }
 0x343   : > { %1654 = vbcast.lane.b32.xlu0 %v1648_v6, 264 }
 0x344   : > { %1617 = vbcast.lane.b32.xlu1 %v1615_v28, 256 }
 0x347   : > { %2744 = vbcast.lane.b32.xlu0 %v2738_v7, 264 }
 0x348   : > { %2707 = vbcast.lane.b32.xlu1 %v2705_v39, 256 }
 0x34b   : > { %1665 = vbcast.lane.b32.xlu0 %v1659_v2, 264 }
 0x34c   : > { %1628 = vbcast.lane.b32.xlu1 %v1626_v59, 256 }
 0x34f   : > { %2755 = vbcast.lane.b32.xlu0 %v2749_v61, 264 }
 0x350   : > { %2718 = vbcast.lane.b32.xlu1 %v2716_v62, 256 }
 0x353   : > { %1676 = vbcast.lane.b32.xlu0 %v1670_v17, 264 }
 0x354   : > { %1639 = vbcast.lane.b32.xlu1 %v1637_v16, 256 }
 0x358   : > { %2729 = vbcast.lane.b32.xlu1 %v2727_v22, 256 }
 0x35c   : > { %1650 = vbcast.lane.b32.xlu1 %v1648_v6, 256 }
 0x360   : > { %2740 = vbcast.lane.b32.xlu1 %v2738_v7, 256 }
 0x364   : > { %1661 = vbcast.lane.b32.xlu1 %v1659_v2, 256 }
 0x368   : > { %2751 = vbcast.lane.b32.xlu1 %v2749_v61, 256 }
 0x36c   : > { %1672 = vbcast.lane.b32.xlu1 %v1670_v17, 256 }
 0x370   : > { %2762 = vbcast.lane.b32.xlu1 %v5155_v21, 256 }
 0x372   : > { %v2492_v28 = vpop.permute.xlu0 %2491 }
 0x373   : > { %v2495_v44 = vpop.permute.xlu1 %2494  ;;  %v2541_v57 = vrot.slane %v2492_v28, %v4815_v0 }
 0x374   : > { %v2545_v9 = vrot.slane %v2495_v44, %v4818_v1 }
 0x376   : > { %v2507_v59 = vpop.permute.xlu0 %2506  ;;  %v2546_v13 = vsel %vm1222_vm0, %v2545_v9, %v2541_v57 }
 0x377   : > { %v2498_v33 = vpop.permute.xlu1 %2497  ;;  %v2563_v25 = vrot.slane %v2507_v59, %v4818_v1 }
 0x378   : > { %v2550_v48 = vrot.slane %v2498_v33, %v4815_v0 }
 0x37a   : > { %v1428_v22 = vpop.permute.xlu0 %1427 }
 0x37b   : > { %v2501_v39 = vpop.permute.xlu1 %2500  ;;  %v1484_v33 = vrot.slane %v1428_v22, %v4818_v1 }
 0x37c   : > { %v2554_v3 = vrot.slane %v2501_v39, %v4818_v1 }
 0x37e   : > { %v2513_v7 = vpop.permute.xlu0 %2512  ;;  %v2555_v55 = vsel %vm1222_vm0, %v2554_v3, %v2550_v48 }
 0x37f   : > { %v1413_v62 = vpop.permute.xlu1 %1412  ;;  %v2610_v39 = vsel %vm1287_vm1, %v2555_v55, %v2546_v13  ;;  %v2572_v9 = vrot.slane %v2513_v7, %v4818_v1 }
 0x380   : > { %v1462_v48 = vrot.slane %v1413_v62, %v4815_v0 }
 0x382   : > { %v1434_v61 = vpop.permute.xlu0 %1433 }
 0x383   : > { %v1416_v16 = vpop.permute.xlu1 %1415 }
 0x384   : > { %v1466_v40 = vrot.slane %v1416_v16, %v4818_v1 }
 0x386   : > { %v2519_v14 = vpop.permute.xlu0 %2518  ;;  %v1467_v55 = vsel %vm1222_vm0, %v1466_v40, %v1462_v48 }
 0x387   : > { %v1419_v6 = vpop.permute.xlu1 %1418  ;;  %v2581_v16 = vrot.slane %v2519_v14, %v4818_v1 }
 0x388   : > { %v1471_v3 = vrot.slane %v1419_v6, %v4815_v0 }
 0x38a   : > { %v5160_v51 = vpop.permute.xlu0 %1439 }
 0x38b   : > { %v1422_v2 = vpop.permute.xlu1 %1421 }
 0x38c   : > { %v1475_v44 = vrot.slane %v1422_v2, %v4818_v1 }
 0x38e   : > { %v2525_v58 = vpop.permute.xlu0 %2524 }
 0x38f   : > { %v2504_v17 = vpop.permute.xlu1 %2503  ;;  %v2590_v7 = vrot.slane %v2525_v58, %v4818_v1 }
 0x390   : > { %v2559_v45 = vrot.slane %v2504_v17, %v4815_v0 }
 0x392   : > { %v1446_v12 = vpop.permute.xlu0 %1445  ;;  %v2564_v57 = vsel %vm1222_vm0, %v2563_v25, %v2559_v45 }
 0x393   : > { %v1425_v60 = vpop.permute.xlu1 %1424 }
 0x394   : > { %v1480_v59 = vrot.slane %v1425_v60, %v4815_v0 }
 0x396   : > { %v2531_v10 = vpop.permute.xlu0 %2530 }
 0x397   : > { %v2510_v56 = vpop.permute.xlu1 %2509  ;;  %v2599_v40 = vrot.slane %v2531_v10, %v4818_v1 }
 0x398   : > { %v2568_v28 = vrot.slane %v2510_v56, %v4815_v0  ;;  %v1493_v56 = vrot.slane %v1434_v61, %v4818_v1  ;;  %v1485_v61 = vsel %vm1222_vm0, %v1484_v33, %v1480_v59 }
 0x39a   : > { %v1452_v5 = vpop.permute.xlu0 %1451  ;;  %v2573_v25 = vsel %vm1222_vm0, %v2572_v9, %v2568_v28 }
 0x39b   : > { %v1431_v54 = vpop.permute.xlu1 %1430 }
 0x39c   : > { %v1489_v45 = vrot.slane %v1431_v54, %v4815_v0 }
 0x39e   : > { %v2537_v22 = vpop.permute.xlu0 %2536 }
 0x39f   : > { %v2516_v32 = vpop.permute.xlu1 %2515 }
 0x3a0   : > { %v2577_v17 = vrot.slane %v2516_v32, %v4815_v0  ;;  %v1476_v32 = vsel %vm1222_vm0, %v1475_v44, %v1471_v3  ;;  %v1511_v44 = vrot.slane %v1446_v12, %v4818_v1 }
 0x3a1   : > { %v1531_v3 = vsel %vm1287_vm1, %v1476_v32, %v1467_v55 }
 0x3a2   : > { %v2582_v2 = vsel %vm1222_vm0, %v2581_v16, %v2577_v17  ;;  %v1458_v17 = vpop.permute.xlu0 %1457 }
 0x3a3   : > { %v1437_v47 = vpop.permute.xlu1 %1436 }
 0x3a4   : > { %v1498_v14 = vrot.slane %v1437_v47, %v4815_v0  ;;  %v1494_v47 = vsel %vm1222_vm0, %v1493_v56, %v1489_v45 }
 0x3a7   : > { %v2522_v43 = vpop.permute.xlu1 %2521 }
 0x3a8   : > { %v2586_v13 = vrot.slane %v2522_v43, %v4815_v0  ;;  %v2611_v43 = vsel %vm1289_vm2, %v2564_v57, %v2610_v39  ;;  %v1532_v57 = vsel %vm1289_vm2, %v1485_v61, %v1531_v3 }
 0x3a9   : > { %v2612_v54 = vsel %vm1291_vm3, %v2573_v25, %v2611_v43  ;;  %v1533_v16 = vsel %vm1291_vm3, %v1494_v47, %v1532_v57 }
 0x3aa   : > { %v2591_v60 = vsel %vm1222_vm0, %v2590_v7, %v2586_v13  ;;  %v2613_v48 = vsel %vm1293_vm4, %v2582_v2, %v2612_v54 }
 0x3ab   : > { %v1443_v31 = vpop.permute.xlu1 %1442  ;;  %v2614_v9 = vsel %vm1295_vm5, %v2591_v60, %v2613_v48  ;;  %v1622_v60 = vpop.permute.xlu0 %1621 }
 0x3ac   : > { %v1507_v58 = vrot.slane %v1443_v31, %v4815_v0  ;;  %v1520_v31 = vrot.slane %v1452_v5, %v4818_v1 }
 0x3ae   : > { %v1512_v59 = vsel %vm1222_vm0, %v1511_v44, %v1507_v58 }
 0x3af   : > { %v2528_v46 = vpop.permute.xlu1 %2527  ;;  %v2712_v44 = vpop.permute.xlu0 %2711 }
 0x3b0   : > { %v2595_v62 = vrot.slane %v2528_v46, %v4815_v0  ;;  %v1502_v46 = vrot.slane %v5160_v51, %v4818_v1  ;;  %v2608_v51 = vrot.slane %v2537_v22, %v4818_v1 }
 0x3b2   : > { %v2600_v39 = vsel %vm1222_vm0, %v2599_v40, %v2595_v62  ;;  %v1503_v12 = vsel %vm1222_vm0, %v1502_v46, %v1498_v14  ;;  %v1529_v62 = vrot.slane %v1458_v17, %v4818_v1  ;;  %v1681_v14 = vrot.slane %v6449_v50, %v5041_v49 }
 0x3b3   : > { %v1449_v6 = vpop.permute.xlu1 %1448  ;;  %v2615_v56 = vsel %vm1297_vm6, %v2600_v39, %v2614_v9  ;;  %v1534_v7 = vsel %vm1293_vm4, %v1503_v12, %v1533_v16  ;;  %v5236_v39 = vpop.permute.xlu0 %1632 }
 0x3b4   : > { %v1516_v10 = vrot.slane %v1449_v6, %v4815_v0  ;;  %v1535_v25 = vsel %vm1295_vm5, %v1512_v59, %v1534_v7 }
 0x3b6   : > { %v1521_v5 = vsel %vm1222_vm0, %v1520_v31, %v1516_v10 }
 0x3b7   : > { %v2534_v28 = vpop.permute.xlu1 %2533  ;;  %v1536_v43 = vsel %vm1297_vm6, %v1521_v5, %v1535_v25 }
 0x3b8   : > { %v2604_v33 = vrot.slane %v2534_v28, %v4815_v0  ;;  %v5240_v28 = vpop.permute.xlu0 %2722 }
 0x3ba   : > { %v2609_v13 = vsel %vm1222_vm0, %v2608_v51, %v2604_v33 }
 0x3bb   : > { %v1455_v22 = vpop.permute.xlu1 %1454  ;;  %v2616_v55 = vsel %vm1299_vm7, %v2609_v13, %v2615_v56 }
 0x3bc   : > { %v1525_v6 = vrot.slane %v1455_v22, %v4815_v0  ;;  %v2618_v32 = vsel %vm1302_vm8, %v2616_v55, 0.0  ;;  %v5244_v47 = vpop.permute.xlu0 %1643 }
 0x3bd   : > { %2619 = vadd.xlane.f32.xlu1 %v2618_v32 }
 0x3be   : > { %v1530_v45 = vsel %vm1222_vm0, %v1529_v62, %v1525_v6 }
 0x3bf   : > { %v1537_v40 = vsel %vm1299_vm7, %v1530_v45, %v1536_v43  ;;  %v1618_v46 = vpop.permute.xlu1 %1617 }
 0x3c0   : > { %v1539_v2 = vsel %vm1302_vm8, %v1537_v40, 0.0  ;;  %v5248_v48 = vpop.permute.xlu0 %2733 }
 0x3c1   : > { %1540 = vadd.xlane.f32.xlu0 %v1539_v2 }
 0x3c3   : > { %v5230_v61 = vpop.permute.xlu1 %2707 }
 0x3c4   : > { %v5252_v33 = vpop.permute.xlu0 %1654 }
 0x3c7   : > { %v5232_v58 = vpop.permute.xlu1 %1628 }
 0x3c8   : > { %v5256_v31 = vpop.permute.xlu0 %2744 }
 0x3cb   : > { %v5234_v54 = vpop.permute.xlu1 %2718 }
 0x3cc   : > { %v5260_v17 = vpop.permute.xlu0 %1665 }
 0x3ce   : > { %1683 = vbcast.lane.b32.xlu1 %v1681_v14, 256 }
 0x3cf   : > { %v5238_v10 = vpop.permute.xlu1 %1639 }
 0x3d0   : > { %v5264_v57 = vpop.permute.xlu0 %2755 }
 0x3d3   : > { %v5242_v50 = vpop.permute.xlu1 %2729 }
 0x3d4   : > { %v5266_v13 = vpop.permute.xlu0 %1676 }
 0x3d7   : > { %2766 = vbcast.lane.b32.xlu0 %v5155_v21, 264  ;;  %v5246_v21 = vpop.permute.xlu1 %1650 }
 0x3db   : > { %1687 = vbcast.lane.b32.xlu0 %v1681_v14, 264  ;;  %v5250_v51 = vpop.permute.xlu1 %2740 }
 0x3df   : > { %v5254_v3 = vpop.permute.xlu1 %1661 }
 0x3e3   : > { %v5258_v12 = vpop.permute.xlu1 %2751 }
 0x3e7   : > { %v5262_v9 = vpop.permute.xlu1 %1672 }
 0x3eb   : > { %v2763_v59 = vpop.permute.xlu1 %2762 }
 0x446   : > { %v2620_v56 = vpop.xlane.xlu1 %2619 }
 0x447   : > { %4205 = vrcp.f32 %v2620_v56 }
 0x44a   : > { %v1541_v16 = vpop.xlane.xlu0 %1540 }
 0x44b   : > { %4207 = vrcp.f32 %v1541_v16 }
 0x454   : > { %v5268_v22 = vpop.eup %4205 }
 0x455   : > { %v2626_v55 = vrot.slane %v5268_v22, %v4637_v38  ;;  %v2630_v5 = vrot.slane %v5268_v22, %v4663_v8 }
 0x457   : > { %v2663_v62 = vmul.f32 %v4974_v11, %v2626_v55  ;;  %v2664_v6 = vmul.f32 %v4979_v15, %v2626_v55  ;;  %v2665_v7 = vmul.f32 %v4984_v20, %v2630_v5  ;;  %v2666_v43 = vmul.f32 %v5000_v29, %v2630_v5 }
 0x458   : > { %v5276_v32 = vpop.eup %4207 }
 0x459   : > { %v5280_v25 = vmul.f32 %v5149_v63, %v2663_v62  ;;  %v5283_v45 = vmul.f32 %v4939_v34, %v2664_v6  ;;  %v1547_v40 = vrot.slane %v5276_v32, %v4637_v38  ;;  %v5291_v11 = vmul.f32 %v4944_v23, %v2665_v7 }
 0x45a   : > { %v5294_v15 = vmul.f32 %v5151_v19, %v2666_v43  ;;  %v1551_v29 = vrot.slane %v5276_v32, %v4663_v8  ;;  %v5304_v63 = vrot.slane %v5268_v22, %v5041_v49  ;;  %v2634_v23 = vrot.slane %v5268_v22, %v4942_v37 }
 0x45b   : > { %2817 = vperm.xlu1 %4074, %v5280_v25   ;;  %2820 = vperm.xlu0 %4073, %v5283_v45   ;;  %v1585_v20 = vmul.f32 %v5021_v53, %v1547_v40  ;;  %v1584_v34 = vmul.f32 %v5011_v42, %v1547_v40  ;;  %v6458_v40 = vld [vmem:[#allocation24_spill] sm:$0xff] }
 0x45c   : > { %v1587_v42 = vmul.f32 %v5044_v36, %v1551_v29  ;;  %v1586_v2 = vmul.f32 %v5031_v18, %v1551_v29  ;;  %v2677_v14 = vmul.f32 %v5125_v24, %v5304_v63  ;;  %v2668_v56 = vmul.f32 %v4992_v35, %v2634_v23 }
 0x45d   : > { %v5309_v19 = vmul.f32 %v5158_v27, %v1585_v20  ;;  %v5312_v53 = vmul.f32 %v4957_v30, %v1584_v34  ;;  %v2667_v30 = vmul.f32 %v5054_v26, %v2634_v23  ;;  %v1555_v36 = vrot.slane %v5276_v32, %v4942_v37  ;;  %v6459_v34 = vld [vmem:[#allocation20_spill] sm:$0xff] }
 0x45e   : > { %v5321_v16 = vmul.f32 %v1622_v60, %v1587_v42  ;;  %v5323_v27 = vmul.f32 %v1618_v46, %v1586_v2  ;;  %v2638_v18 = vrot.slane %v5268_v22, %v4967_v52  ;;  %v5332_v55 = vmul.f32 %v2763_v59, %v2677_v14  ;;  %v6454_v60 = vld [vmem:[#allocation17_spill] sm:$0xff]  ;;  %v6461_v14 = vld [vmem:[#allocation15_spill] sm:$0xff] }
 0x45f   : > { %2823 = vperm.xlu1 %4074, %v5291_v11   ;;  %2826 = vperm.xlu0 %4073, %v5294_v15   ;;  %v5334_v24 = vmul.f32 %v2712_v44, %v2668_v56  ;;  %v5337_v35 = vmul.f32 %v5230_v61, %v2667_v30  ;;  %v1589_v46 = vmul.f32 %v5026_v41, %v1555_v36  ;;  %v6455_v44 = vld [vmem:[#allocation22_spill] sm:$0xff] }
 0x460   : > { %6453 = vst [vmem:[#allocation34_spill] sm:$0xff] %v5332_v55  ;;  %v1588_v26 = vmul.f32 %v5064_v4, %v1555_v36  ;;  %v2670_v5 = vmul.f32 %v6454_v60, %v2638_v18  ;;  %v2669_v6 = vmul.f32 %v6455_v44, %v2638_v18  ;;  %v1559_v61 = vrot.slane %v5276_v32, %v4967_v52  ;;  %v6456_v41 = vld [vmem:[#allocation14_spill] sm:$0xff]  ;;  %v6463_v18 = vld [vmem:[#allocation13_spill] sm:$0xff] }
 0x461   : > { %v5345_v62 = vmul.f32 %v5236_v39, %v1589_v46  ;;  %v2642_v4 = vrot.slane %v5268_v22, %v6456_v41  ;;  %v2646_v56 = vrot.slane %v5268_v22, %v6461_v14 }
 0x462   : > { %v5348_v59 = vmul.f32 %v5232_v58, %v1588_v26  ;;  %v5358_v7 = vmul.f32 %v5240_v28, %v2670_v5  ;;  %v5361_v39 = vmul.f32 %v5234_v54, %v2669_v6  ;;  %v6457_v58 = vld [vmem:[#allocation19_spill] sm:$0xff]  ;;  %v1590_v20 = vmul.f32 %v6458_v40, %v1559_v61  ;;  %v6460_v28 = vld [vmem:[#allocation26_spill] sm:$0xff] }
 0x463   : > { %1741 = vperm.xlu0 %4073, %v5309_v19   ;;  %1738 = vperm.xlu1 %4074, %v5312_v53   ;;  %v1591_v43 = vmul.f32 %v6457_v58, %v1559_v61  ;;  %v2672_v29 = vmul.f32 %v6459_v34, %v2642_v4  ;;  %v2671_v2 = vmul.f32 %v6460_v28, %v2642_v4  ;;  %v6464_v26 = vld [vmem:[#allocation23_spill] sm:$0xff]  ;;  %v6466_v61 = vld [vmem:[#allocation16_spill] sm:$0xff] }
 0x464   : > { %v5372_v42 = vmul.f32 %v5238_v10, %v1590_v20  ;;  %v1563_v54 = vrot.slane %v5276_v32, %v6456_v41  ;;  %v6462_v10 = vld [vmem:[#allocation21_spill] sm:$0xff]  ;;  %v2674_v60 = vmul.f32 %v6464_v26, %v2646_v56  ;;  %v2650_v4 = vrot.slane %v5268_v22, %v6466_v61  ;;  %v6469_v40 = vld [vmem:[#allocation31_spill] sm:$0xff] }
 0x465   : > { %v5369_v23 = vmul.f32 %v5244_v47, %v1591_v43  ;;  %v5382_v30 = vmul.f32 %v5248_v48, %v2672_v29  ;;  %v5385_v47 = vmul.f32 %v5242_v50, %v2671_v2  ;;  %v6465_v48 = vld [vmem:[#allocation29_spill] sm:$0xff]  ;;  %v1567_v50 = vrot.slane %v5276_v32, %v6461_v14  ;;  %v6470_v34 = vld [vmem:[#allocation27_spill] sm:$0xff] }
 0x466   : > { %v1593_v36 = vmul.f32 %v6462_v10, %v1563_v54  ;;  %v1592_v46 = vmul.f32 %v6463_v18, %v1563_v54  ;;  %v2673_v6 = vmul.f32 %v6465_v48, %v2646_v56  ;;  %v5406_v58 = vmul.f32 %v5256_v31, %v2674_v60  ;;  %v6473_v31 = vld [vmem:[#allocation33_spill] sm:$0xff]  ;;  %v2767_v18 = vpop.permute.xlu0 %2766 }
 0x467   : > { %1747 = vperm.xlu0 %4073, %v5321_v16   ;;  %1744 = vperm.xlu1 %4074, %v5323_v27   ;;  %v1594_v20 = vmul.f32 %v6469_v40, %v1567_v50  ;;  %v2676_v29 = vmul.f32 %v6470_v34, %v2650_v4  ;;  %v2675_v2 = vmul.f32 %v6473_v31, %v2650_v4  ;;  %v6483_v4 = vld [vmem:[#allocation32_spill] sm:$0xff] }
 0x468   : > { %v5393_v5 = vmul.f32 %v5252_v33, %v1593_v36  ;;  %v5396_v44 = vmul.f32 %v5246_v21, %v1592_v46  ;;  %v5409_v33 = vmul.f32 %v5250_v51, %v2673_v6  ;;  %v6468_v21 = vld [vmem:[#allocation25_spill] sm:$0xff]  ;;  %v1571_v51 = vrot.slane %v5276_v32, %v6466_v61  ;;  %v6477_v36 = vld [vmem:[#allocation12_spill] sm:$0xff]  ;;  %v6478_v46 = vld [vmem:[#allocation30_spill] sm:$0xff] }
 0x469   : > { %v1595_v43 = vmul.f32 %v6468_v21, %v1567_v50  ;;  %v5420_v22 = vmul.f32 %v5254_v3, %v1594_v20  ;;  %v5428_v54 = vmul.f32 %v5264_v57, %v2676_v29  ;;  %v5431_v56 = vmul.f32 %v5258_v12, %v2675_v2  ;;  %v6482_v6 = vld [vmem:[#allocation11_spill] sm:$0xff] }
 0x46a   : > { %6467 = vst [vmem:[#allocation17_spill] sm:$0xff] %v5409_v33  ;;  %v1596_v3 = vmul.f32 %v6477_v36, %v1571_v51  ;;  %v2678_v26 = vmul.f32 %v6478_v46, %v5304_v63  ;;  %v1575_v60 = vrot.slane %v5276_v32, %v5041_v49  ;;  %v1684_v63 = vpop.permute.xlu1 %1683 }
 0x46b   : > { %2832 = vperm.xlu0 %4073, %v5334_v24   ;;  %2829 = vperm.xlu1 %4074, %v5337_v35   ;;  %v5417_v28 = vmul.f32 %v5260_v17, %v1595_v43  ;;  %6472 = vst [vmem:[#allocation14_spill] sm:$0xff] %v5420_v22  ;;  %6474 = vst [vmem:[#allocation19_spill] sm:$0xff] %v5428_v54  ;;  %v6476_v17 = vld [vmem:[#allocation28_spill] sm:$0xff]  ;;  %v1688_v43 = vpop.permute.xlu0 %1687 }
 0x46c   : > { %6475 = vst [vmem:[#allocation24_spill] sm:$0xff] %v5431_v56  ;;  %v1597_v10 = vmul.f32 %v6476_v17, %v1571_v51  ;;  %v5445_v12 = vmul.f32 %v5262_v9, %v1596_v3  ;;  %v5449_v48 = vmul.f32 %v2767_v18, %v2678_v26  ;;  %v1598_v50 = vmul.f32 %v6482_v6, %v1575_v60 }
 0x46d   : > { %6471 = vst [vmem:[#allocation22_spill] sm:$0xff] %v5417_v28  ;;  %v1599_v21 = vmul.f32 %v6483_v4, %v1575_v60 }
 0x46e   : > { %v5442_v57 = vmul.f32 %v5266_v13, %v1597_v10  ;;  %6480 = vst [vmem:[#allocation26_spill] sm:$0xff] %v5445_v12  ;;  %6481 = vst [vmem:[#allocation15_spill] sm:$0xff] %v5449_v48  ;;  %v5455_v13 = vmul.f32 %v1684_v63, %v1598_v50 }
 0x46f   : > { %1753 = vperm.xlu0 %4073, %v5345_v62   ;;  %1750 = vperm.xlu1 %4074, %v5348_v59   ;;  %v5457_v9 = vmul.f32 %v1688_v43, %v1599_v21 }
 0x470   : > { %6479 = vst [vmem:[#allocation20_spill] sm:$0xff] %v5442_v57  ;;  %6484 = vst [vmem:[#allocation21_spill] sm:$0xff] %v5455_v13 }
 0x471   : > { %6485 = vst [vmem:[#allocation13_spill] sm:$0xff] %v5457_v9 }
 0x473   : > { %2838 = vperm.xlu0 %4073, %v5358_v7   ;;  %2835 = vperm.xlu1 %4074, %v5361_v39  }
 0x477   : > { %1759 = vperm.xlu0 %4073, %v5369_v23   ;;  %1756 = vperm.xlu1 %4074, %v5372_v42  }
 0x47b   : > { %2844 = vperm.xlu0 %4073, %v5382_v30   ;;  %2841 = vperm.xlu1 %4074, %v5385_v47  }
 0x47f   : > { %1765 = vperm.xlu0 %4073, %v5393_v5   ;;  %1762 = vperm.xlu1 %4074, %v5396_v44  }
 0x483   : > { %2850 = vperm.xlu0 %4073, %v5406_v58   ;;  %2847 = vperm.xlu1 %4074, %v5409_v33  }
 0x487   : > { %1771 = vperm.xlu0 %4073, %v5417_v28   ;;  %1768 = vperm.xlu1 %4074, %v5420_v22  }
 0x48b   : > { %2856 = vperm.xlu0 %4073, %v5428_v54   ;;  %2853 = vperm.xlu1 %4074, %v5431_v56  }
 0x48f   : > { %1777 = vperm.xlu0 %4073, %v5442_v57   ;;  %1774 = vperm.xlu1 %4074, %v5445_v12  }
 0x493   : > { %2859 = vperm.xlu1 %4074, %v5332_v55   ;;  %2862 = vperm.xlu0 %4073, %v5449_v48  }
 0x497   : > { %1780 = vperm.xlu1 %4074, %v5455_v13   ;;  %1783 = vperm.xlu0 %4073, %v5457_v9  }
 0x4d6   : > { %v2818_v32 = vpop.permute.xlu1 %2817  ;;  %v2821_v40 = vpop.permute.xlu0 %2820 }
 0x4d7   : > { %v2867_v49 = vrot.slane %v2818_v32, %v4815_v0  ;;  %v2871_v12 = vrot.slane %v2821_v40, %v4818_v1 }
 0x4da   : > { %v2824_v20 = vpop.permute.xlu1 %2823  ;;  %v2827_v34 = vpop.permute.xlu0 %2826 }
 0x4db   : > { %v2876_v13 = vrot.slane %v2824_v20, %v4815_v0  ;;  %v2880_v9 = vrot.slane %v2827_v34, %v4818_v1 }
 0x4dd   : > { %v2881_v54 = vsel %vm1222_vm0, %v2880_v9, %v2876_v13 }
 0x4de   : > { %v1739_v29 = vpop.permute.xlu1 %1738  ;;  %v1742_v31 = vpop.permute.xlu0 %1741 }
 0x4df   : > { %v1788_v61 = vrot.slane %v1739_v29, %v4815_v0  ;;  %v1792_v22 = vrot.slane %v1742_v31, %v4818_v1 }
 0x4e2   : > { %v1745_v2 = vpop.permute.xlu1 %1744  ;;  %v1748_v51 = vpop.permute.xlu0 %1747 }
 0x4e3   : > { %v1797_v34 = vrot.slane %v1745_v2, %v4815_v0  ;;  %v1801_v33 = vrot.slane %v1748_v51, %v4818_v1 }
 0x4e6   : > { %v2830_v17 = vpop.permute.xlu1 %2829  ;;  %v2833_v10 = vpop.permute.xlu0 %2832 }
 0x4e7   : > { %v2885_v57 = vrot.slane %v2830_v17, %v4815_v0  ;;  %v2889_v56 = vrot.slane %v2833_v10, %v4818_v1  ;;  %v2872_v17 = vsel %vm1222_vm0, %v2871_v12, %v2867_v49 }
 0x4e9   : > { %v2890_v10 = vsel %vm1222_vm0, %v2889_v56, %v2885_v57 }
 0x4ea   : > { %v1751_v36 = vpop.permute.xlu1 %1750  ;;  %v1754_v3 = vpop.permute.xlu0 %1753 }
 0x4eb   : > { %v1806_v29 = vrot.slane %v1751_v36, %v4815_v0  ;;  %v1810_v31 = vrot.slane %v1754_v3, %v4818_v1 }
 0x4ee   : > { %v2836_v18 = vpop.permute.xlu1 %2835  ;;  %v2839_v46 = vpop.permute.xlu0 %2838 }
 0x4ef   : > { %v2894_v32 = vrot.slane %v2836_v18, %v4815_v0  ;;  %v2898_v40 = vrot.slane %v2839_v46, %v4818_v1  ;;  %v2936_v18 = vsel %vm1287_vm1, %v2881_v54, %v2872_v17  ;;  %v1793_v46 = vsel %vm1222_vm0, %v1792_v22, %v1788_v61 }
 0x4f0   : > { %v1811_v22 = vsel %vm1222_vm0, %v1810_v31, %v1806_v29 }
 0x4f1   : > { %v2899_v36 = vsel %vm1222_vm0, %v2898_v40, %v2894_v32 }
 0x4f2   : > { %v1757_v26 = vpop.permute.xlu1 %1756  ;;  %v1760_v60 = vpop.permute.xlu0 %1759 }
 0x4f3   : > { %v1815_v3 = vrot.slane %v1757_v26, %v4815_v0 }
 0x4f6   : > { %v2842_v6 = vpop.permute.xlu1 %2841  ;;  %v2845_v50 = vpop.permute.xlu0 %2844 }
 0x4f7   : > { %v2903_v13 = vrot.slane %v2842_v6, %v4815_v0  ;;  %v2907_v9 = vrot.slane %v2845_v50, %v4818_v1  ;;  %v1802_v6 = vsel %vm1222_vm0, %v1801_v33, %v1797_v34  ;;  %v1819_v50 = vrot.slane %v1760_v60, %v4818_v1 }
 0x4f9   : > { %v2908_v54 = vsel %vm1222_vm0, %v2907_v9, %v2903_v13 }
 0x4fa   : > { %v1763_v4 = vpop.permute.xlu1 %1762  ;;  %v1766_v21 = vpop.permute.xlu0 %1765 }
 0x4fb   : > { %v1824_v61 = vrot.slane %v1763_v4, %v4815_v0 }
 0x4fe   : > { %v2848_v63 = vpop.permute.xlu1 %2847  ;;  %v2851_v43 = vpop.permute.xlu0 %2850 }
 0x4ff   : > { %v2912_v2 = vrot.slane %v2848_v63, %v4815_v0  ;;  %v2916_v51 = vrot.slane %v2851_v43, %v4818_v1  ;;  %v2937_v63 = vsel %vm1289_vm2, %v2890_v10, %v2936_v18 }
 0x500   : > { %v2938_v26 = vsel %vm1291_vm3, %v2899_v36, %v2937_v63 }
 0x501   : > { %v2917_v43 = vsel %vm1222_vm0, %v2916_v51, %v2912_v2  ;;  %v2939_v17 = vsel %vm1293_vm4, %v2908_v54, %v2938_v26 }
 0x502   : > { %v1769_v55 = vpop.permute.xlu1 %1768  ;;  %v1772_v48 = vpop.permute.xlu0 %1771  ;;  %v2940_v9 = vsel %vm1295_vm5, %v2917_v43, %v2939_v17 }
 0x503   : > { %v1833_v33 = vrot.slane %v1769_v55, %v4815_v0 }
 0x506   : > { %v2854_v28 = vpop.permute.xlu1 %2853  ;;  %v2857_v20 = vpop.permute.xlu0 %2856 }
 0x507   : > { %v2921_v49 = vrot.slane %v2854_v28, %v4815_v0  ;;  %v2925_v56 = vrot.slane %v2857_v20, %v4818_v1  ;;  %v1828_v28 = vrot.slane %v1766_v21, %v4818_v1  ;;  %v1837_v20 = vrot.slane %v1772_v48, %v4818_v1 }
 0x508   : > { %v1820_v21 = vsel %vm1222_vm0, %v1819_v50, %v1815_v3  ;;  %v1857_v48 = vsel %vm1287_vm1, %v1802_v6, %v1793_v46 }
 0x509   : > { %v2926_v60 = vsel %vm1222_vm0, %v2925_v56, %v2921_v49  ;;  %v1829_v13 = vsel %vm1222_vm0, %v1828_v28, %v1824_v61  ;;  %v1858_v29 = vsel %vm1289_vm2, %v1811_v22, %v1857_v48  ;;  %v1838_v31 = vsel %vm1222_vm0, %v1837_v20, %v1833_v33 }
 0x50a   : > { %v1775_v57 = vpop.permute.xlu1 %1774  ;;  %v1778_v12 = vpop.permute.xlu0 %1777  ;;  %v2941_v51 = vsel %vm1297_vm6, %v2926_v60, %v2940_v9  ;;  %v1859_v18 = vsel %vm1291_vm3, %v1820_v21, %v1858_v29 }
 0x50b   : > { %v1842_v34 = vrot.slane %v1775_v57, %v4815_v0  ;;  %v1846_v32 = vrot.slane %v1778_v12, %v4818_v1  ;;  %v1860_v12 = vsel %vm1293_vm4, %v1829_v13, %v1859_v18 }
 0x50c   : > { %v1861_v50 = vsel %vm1295_vm5, %v1838_v31, %v1860_v12  ;;  %v6491_v12 = vld [vmem:[#allocation24_spill] sm:$0xff] }
 0x50d   : > { %v1847_v49 = vsel %vm1222_vm0, %v1846_v32, %v1842_v34 }
 0x50e   : > { %v2860_v40 = vpop.permute.xlu1 %2859  ;;  %v2863_v4 = vpop.permute.xlu0 %2862  ;;  %v1862_v54 = vsel %vm1297_vm6, %v1847_v49, %v1861_v50  ;;  %v6488_v49 = vld [vmem:[#allocation14_spill] sm:$0xff] }
 0x50f   : > { %v2930_v10 = vrot.slane %v2860_v40, %v4815_v0  ;;  %v2934_v55 = vrot.slane %v2863_v4, %v4818_v1 }
 0x511   : > { %v2935_v2 = vsel %vm1222_vm0, %v2934_v55, %v2930_v10 }
 0x512   : > { %v1781_v56 = vpop.permute.xlu1 %1780  ;;  %v1784_v57 = vpop.permute.xlu0 %1783  ;;  %v2942_v46 = vsel %vm1299_vm7, %v2935_v2, %v2941_v51  ;;  %v6486_v51 = vld [vmem:[#allocation17_spill] sm:$0xff] }
 0x513   : > { %v1851_v6 = vrot.slane %v1781_v56, %v4815_v0  ;;  %v1855_v36 = vrot.slane %v1784_v57, %v4818_v1  ;;  %v2944_v3 = vsel %vm1302_vm8, %v2942_v46, 0.0  ;;  %v6489_v56 = vld [vmem:[#allocation16_spill] sm:$0xff]  ;;  %v6490_v57 = vld [vmem:[#allocation19_spill] sm:$0xff] }
 0x514   : > { %2945 = vadd.xlane.f32.xlu1 %v2944_v3  ;;  %v6493_v3 = vld [vmem:[#allocation26_spill] sm:$0xff] }
 0x515   : > { %v1856_v63 = vsel %vm1222_vm0, %v1855_v36, %v1851_v6 }
 0x516   : > { %v1863_v61 = vsel %vm1299_vm7, %v1856_v63, %v1862_v54  ;;  %v6494_v63 = vld [vmem:[#allocation18_spill] sm:$0xff] }
 0x517   : > { %v1865_v28 = vsel %vm1302_vm8, %v1863_v61, 0.0  ;;  %v6495_v61 = vld [vmem:[#allocation15_spill] sm:$0xff] }
 0x518   : > { %1866 = vadd.xlane.f32.xlu0 %v1865_v28 }
 0x59d   : > { %v2946_v22 = vpop.xlane.xlu1 %2945 }
 0x59e   : > { %v2947_v43 = vadd.f32 1e-08, %v2946_v22  ;;  %v6496_v22 = vld [vmem:[#allocation34_spill] sm:$0xff] }
 0x5a0   : > { %4209 = vrcp.f32 %v2947_v43 }
 0x5a1   : > { %v1867_v0 = vpop.xlane.xlu0 %1866 }
 0x5a2   : > { %v1868_v33 = vadd.f32 1e-08, %v1867_v0 }
 0x5a4   : > { %4211 = vrcp.f32 %v1868_v33  ;;  %v6497_v33 = vld [vmem:[#allocation13_spill] sm:$0xff] }
 0x5ad   : > { %v5525_v1 = vpop.eup %4209 }
 0x5ae   : > { %v2953_v20 = vrot.slane %v5525_v1, %v4637_v38  ;;  %v2957_v34 = vrot.slane %v5525_v1, %v4663_v8  ;;  %v2981_v54 = vrot.slane %v5525_v1, %v6494_v63 }
 0x5b0   : > { %v2991_v26 = vmul.f32 %v2953_v20, %v5283_v45  ;;  %v2990_v60 = vmul.f32 %v2953_v20, %v5280_v25  ;;  %v2992_v40 = vmul.f32 %v2957_v34, %v5291_v11  ;;  %v2993_v4 = vmul.f32 %v2957_v34, %v5294_v15 }
 0x5b1   : > { %v5533_v32 = vpop.eup %4211  ;;  %v2961_v15 = vrot.slane %v5525_v1, %v4942_v37  ;;  %v3005_v28 = vmul.f32 %v2981_v54, %v6495_v61  ;;  %v3004_v43 = vmul.f32 %v2981_v54, %v6496_v22  ;;  %v1185_v22 = vld [vmem:[#allocation2 + $0x30] sm:$0xff] }
 0x5b2   : > { %3013 = vperm.xlu1 %4074, %v2991_v26   ;;  %3008 = vperm.xlu0 %4073, %v2990_v60   ;;  %v1874_v21 = vrot.slane %v5533_v32, %v4637_v38  ;;  %v1878_v17 = vrot.slane %v5533_v32, %v4663_v8  ;;  %v1898_v6 = vrot.slane %v5533_v32, %v6489_v56  ;;  %v6498_v26 = vld [vmem:[#allocation21_spill] sm:$0xff] }
 0x5b3   : > { %v2995_v55 = vmul.f32 %v2961_v15, %v5334_v24  ;;  %v1902_v0 = vrot.slane %v5533_v32, %v6494_v63 }
 0x5b4   : > { %v1912_v45 = vmul.f32 %v1874_v21, %v5309_v19  ;;  %v1911_v25 = vmul.f32 %v1874_v21, %v5312_v53  ;;  %v1914_v10 = vmul.f32 %v1878_v17, %v5321_v16  ;;  %v1913_v11 = vmul.f32 %v1878_v17, %v5323_v27 }
 0x5b5   : > { %v2994_v19 = vmul.f32 %v2961_v15, %v5337_v35  ;;  %v1882_v53 = vrot.slane %v5533_v32, %v4942_v37  ;;  %v2965_v27 = vrot.slane %v5525_v1, %v4967_v52  ;;  %v1886_v35 = vrot.slane %v5533_v32, %v4967_v52  ;;  %v2271_v15 = vld [vmem:[#allocation4 + $0x8] sm:$0xff] }
 0x5b6   : > { %3018 = vperm.xlu1 %4074, %v2992_v40   ;;  %3023 = vperm.xlu0 %4073, %v2993_v4   ;;  %v1923_v50 = vmul.f32 %v1898_v6, %v6493_v3  ;;  %v1926_v20 = vmul.f32 %v1902_v0, %v6497_v33  ;;  %v1925_v60 = vmul.f32 %v1902_v0, %v6498_v26 }
 0x5b7   : > { %v1916_v48 = vmul.f32 %v1882_v53, %v5345_v62  ;;  %v1915_v16 = vmul.f32 %v1882_v53, %v5348_v59  ;;  %v2997_v13 = vmul.f32 %v2965_v27, %v5358_v7  ;;  %v2996_v24 = vmul.f32 %v2965_v27, %v5361_v39  ;;  %v2272_v53 = vld [vmem:[#allocation4 + $0x10] sm:$0xff] }
 0x5b8   : > { %v1918_v9 = vmul.f32 %v1886_v35, %v5369_v23  ;;  %v1917_v62 = vmul.f32 %v1886_v35, %v5372_v42  ;;  %v2969_v59 = vrot.slane %v5525_v1, %v6456_v41  ;;  %v1890_v39 = vrot.slane %v5533_v32, %v6456_v41  ;;  %v6487_v41 = vld [vmem:[#allocation22_spill] sm:$0xff] }
 0x5b9   : > { %v2973_v42 = vrot.slane %v5525_v1, %v6461_v14 }
 0x5ba   : > { %1934 = vperm.xlu0 %4073, %v1912_v45   ;;  %1929 = vperm.xlu1 %4074, %v1911_v25   ;;  %v2999_v29 = vmul.f32 %v2969_v59, %v5382_v30  ;;  %v2998_v7 = vmul.f32 %v2969_v59, %v5385_v47  ;;  %v1920_v31 = vmul.f32 %v1890_v39, %v5393_v5 }
 0x5bb   : > { %v1919_v23 = vmul.f32 %v1890_v39, %v5396_v44  ;;  %v3001_v2 = vmul.f32 %v2973_v42, %v5406_v58  ;;  %v3000_v30 = vmul.f32 %v2973_v42, %v6486_v51  ;;  %v1894_v47 = vrot.slane %v5533_v32, %v6461_v14  ;;  %v6492_v14 = vld [vmem:[#allocation20_spill] sm:$0xff]  ;;  %v2270_v32 = vld [vmem:[#allocation4] sm:$0xff] }
 0x5bc   : > { %v2977_v44 = vrot.slane %v5525_v1, %v6489_v56  ;;  %v1924_v36 = vmul.f32 %v1898_v6, %v6492_v14  ;;  %v2274_v39 = vld [vmem:[#allocation4 + $0x20] sm:$0xff]  ;;  %v2279_v14 = vld [vmem:[#allocation4 + $0x48] sm:$0xff] }
 0x5bd   : > { %v1922_v18 = vmul.f32 %v1894_v47, %v6487_v41  ;;  %v1921_v5 = vmul.f32 %v1894_v47, %v6488_v49  ;;  %v1179_v42 = vld [vmem:[#allocation2] sm:$0xff]  ;;  %v1181_v49 = vld [vmem:[#allocation2 + $0x10] sm:$0xff] }
 0x5be   : > { %1944 = vperm.xlu0 %4073, %v1914_v10   ;;  %1939 = vperm.xlu1 %4074, %v1913_v11   ;;  %v3003_v46 = vmul.f32 %v2977_v44, %v6490_v57  ;;  %v3002_v58 = vmul.f32 %v2977_v44, %v6491_v12  ;;  %v2277_v12 = vld [vmem:[#allocation4 + $0x38] sm:$0xff]  ;;  %v2278_v6 = vld [vmem:[#allocation4 + $0x40] sm:$0xff] }
 0x5c2   : > { %3033 = vperm.xlu0 %4073, %v2995_v55   ;;  %3028 = vperm.xlu1 %4074, %v2994_v19  }
 0x5c6   : > { %1954 = vperm.xlu0 %4073, %v1916_v48   ;;  %1949 = vperm.xlu1 %4074, %v1915_v16   ;;  %v2273_v48 = vld [vmem:[#allocation4 + $0x18] sm:$0xff] }
 0x5ca   : > { %3043 = vperm.xlu0 %4073, %v2997_v13   ;;  %3038 = vperm.xlu1 %4074, %v2996_v24  }
 0x5ce   : > { %1964 = vperm.xlu0 %4073, %v1918_v9   ;;  %1959 = vperm.xlu1 %4074, %v1917_v62  }
 0x5d2   : > { %3053 = vperm.xlu0 %4073, %v2999_v29   ;;  %3048 = vperm.xlu1 %4074, %v2998_v7  }
 0x5d6   : > { %1974 = vperm.xlu0 %4073, %v1920_v31   ;;  %1969 = vperm.xlu1 %4074, %v1919_v23   ;;  %v2275_v31 = vld [vmem:[#allocation4 + $0x28] sm:$0xff] }
 0x5da   : > { %3063 = vperm.xlu0 %4073, %v3001_v2   ;;  %3058 = vperm.xlu1 %4074, %v3000_v30   ;;  %v1180_v2 = vld [vmem:[#allocation2 + $0x8] sm:$0xff] }
 0x5de   : > { %1984 = vperm.xlu0 %4073, %v1922_v18   ;;  %1979 = vperm.xlu1 %4074, %v1921_v5   ;;  %v1182_v5 = vld [vmem:[#allocation2 + $0x18] sm:$0xff] }
 0x5e2   : > { %3073 = vperm.xlu0 %4073, %v3003_v46   ;;  %3068 = vperm.xlu1 %4074, %v3002_v58   ;;  %v2276_v46 = vld [vmem:[#allocation4 + $0x30] sm:$0xff]  ;;  %v1183_v58 = vld [vmem:[#allocation2 + $0x20] sm:$0xff] }
 0x5e6   : > { %1994 = vperm.xlu0 %4073, %v1924_v36   ;;  %1989 = vperm.xlu1 %4074, %v1923_v50  }
 0x5ea   : > { %3083 = vperm.xlu0 %4073, %v3005_v28   ;;  %3078 = vperm.xlu1 %4074, %v3004_v43   ;;  %v1184_v28 = vld [vmem:[#allocation2 + $0x28] sm:$0xff]  ;;  %v1186_v43 = vld [vmem:[#allocation2 + $0x38] sm:$0xff] }
 0x5ee   : > { %2004 = vperm.xlu0 %4073, %v1926_v20   ;;  %1999 = vperm.xlu1 %4074, %v1925_v60   ;;  %v2280_v20 = vld [vmem:[#allocation4 + $0x50] sm:$0xff] }
 0x62d   : > { %v3014_v34 = vpop.permute.xlu1 %3013  ;;  %v3009_v40 = vpop.permute.xlu0 %3008 }
 0x62e   : > { %v3087_v16 = vmul.f32 %v3014_v34, %v2271_v15  ;;  %v3086_v27 = vmul.f32 %v3009_v40, %v2270_v32 }
 0x630   : > { %v3102_v62 = vadd.f32 %v3087_v16, %v3086_v27 }
 0x631   : > { %v3019_v1 = vpop.permute.xlu1 %3018  ;;  %v3024_v4 = vpop.permute.xlu0 %3023 }
 0x632   : > { %v3088_v35 = vmul.f32 %v3019_v1, %v2272_v53  ;;  %v3089_v9 = vmul.f32 %v3024_v4, %v2273_v48  ;;  %v3103_v23 = vrot.slane %v3102_v62, 4  ;;  %v1187_v1 = vld [vmem:[#allocation2 + $0x40] sm:$0xff]  ;;  %v1188_v4 = vld [vmem:[#allocation2 + $0x48] sm:$0xff] }
 0x634   : > { %v3109_v7 = vadd.f32 %v3089_v9, %v3088_v35  ;;  %v3104_v56 = vadd.f32 %v3103_v23, %v3102_v62  ;;  %v1189_v9 = vld [vmem:[#allocation2 + $0x50] sm:$0xff]  ;;  %v1190_v62 = vld [vmem:[#allocation2 + $0x58] sm:$0xff] }
 0x635   : > { %v1930_v21 = vpop.permute.xlu1 %1929  ;;  %v1935_v45 = vpop.permute.xlu0 %1934 }
 0x636   : > { %v3110_v47 = vrot.slane %v3109_v7, 4  ;;  %v2007_v44 = vmul.f32 %v1930_v21, %v1179_v42  ;;  %v2008_v57 = vmul.f32 %v1935_v45, %v1180_v2  ;;  %v3105_v26 = vrot.slane %v3104_v56, 2  ;;  %v2281_v21 = vld [vmem:[#allocation4 + $0x58] sm:$0xff] }
 0x638   : > { %v3111_v50 = vadd.f32 %v3110_v47, %v3109_v7  ;;  %v2023_v60 = vadd.f32 %v2008_v57, %v2007_v44  ;;  %v3106_v7 = vadd.f32 %v3105_v26, %v3104_v56 }
 0x639   : > { %v1940_v25 = vpop.permute.xlu1 %1939  ;;  %v1945_v17 = vpop.permute.xlu0 %1944 }
 0x63a   : > { %v2009_v63 = vmul.f32 %v1940_v25, %v1181_v49  ;;  %v2010_v54 = vmul.f32 %v1945_v17, %v1182_v5  ;;  %v3112_v32 = vrot.slane %v3111_v50, 2  ;;  %v2282_v49 = vld [vmem:[#allocation4 + $0x60] sm:$0xff]  ;;  %v2283_v5 = vld [vmem:[#allocation4 + $0x68] sm:$0xff]  ;;  %v3107_v44 = vrot.slane %v3106_v7, 1 }
 0x63c   : > { %v2030_v53 = vadd.f32 %v2010_v54, %v2009_v63  ;;  %v3113_v42 = vadd.f32 %v3112_v32, %v3111_v50 }
 0x63d   : > { %v3029_v10 = vpop.permute.xlu1 %3028  ;;  %v3034_v11 = vpop.permute.xlu0 %3033 }
 0x63e   : > { %v3090_v41 = vmul.f32 %v3029_v10, %v2274_v39  ;;  %v3091_v18 = vmul.f32 %v3034_v11, %v2275_v31  ;;  %v2024_v31 = vrot.slane %v2023_v60, 4 }
 0x640   : > { %v3116_v61 = vadd.f32 %v3091_v18, %v3090_v41  ;;  %v2025_v56 = vadd.f32 %v2024_v31, %v2023_v60 }
 0x641   : > { %v1950_v55 = vpop.permute.xlu1 %1949  ;;  %v1955_v19 = vpop.permute.xlu0 %1954 }
 0x642   : > { %v2011_v45 = vmul.f32 %v1950_v55, %v1183_v58  ;;  %v2012_v10 = vmul.f32 %v1955_v19, %v1184_v28  ;;  %v3117_v48 = vrot.slane %v3116_v61, 4 }
 0x644   : > { %v2037_v23 = vadd.f32 %v2012_v10, %v2011_v45  ;;  %v3118_v47 = vadd.f32 %v3117_v48, %v3116_v61 }
 0x645   : > { %v3039_v13 = vpop.permute.xlu1 %3038  ;;  %v3044_v24 = vpop.permute.xlu0 %3043 }
 0x646   : > { %v3092_v0 = vmul.f32 %v3039_v13, %v2276_v46  ;;  %v3093_v33 = vmul.f32 %v3044_v24, %v2277_v12  ;;  %v2038_v12 = vrot.slane %v2037_v23, 4  ;;  %v3119_v28 = vrot.slane %v3118_v47, 2 }
 0x648   : > { %v3123_v27 = vadd.f32 %v3093_v33, %v3092_v0  ;;  %v1192_v0 = vld [vmem:[#allocation2 + $0x68] sm:$0xff]  ;;  %v3108_v33 = vadd.f32 %v3107_v44, %v3106_v7  ;;  %v2039_v60 = vadd.f32 %v2038_v12, %v2037_v23  ;;  %v3120_v32 = vadd.f32 %v3119_v28, %v3118_v47 }
 0x649   : > { %v1960_v59 = vpop.permute.xlu1 %1959  ;;  %v1965_v29 = vpop.permute.xlu0 %1964 }
 0x64a   : > { %v2013_v11 = vmul.f32 %v1960_v59, %v1185_v22  ;;  %v2014_v15 = vmul.f32 %v1965_v29, %v1186_v43  ;;  %v3124_v41 = vrot.slane %v3123_v27, 4  ;;  %v1191_v43 = vld [vmem:[#allocation2 + $0x60] sm:$0xff]  ;;  %v2040_v7 = vrot.slane %v2039_v60, 2 }
 0x64c   : > { %v2044_v55 = vadd.f32 %v2014_v15, %v2013_v11  ;;  %v3125_v22 = vadd.f32 %v3124_v41, %v3123_v27  ;;  %v1193_v41 = vld [vmem:[#allocation2 + $0x70] sm:$0xff] }
 0x64d   : > { %v3049_v51 = vpop.permute.xlu1 %3048  ;;  %v3054_v30 = vpop.permute.xlu0 %3053 }
 0x64e   : > { %v3094_v34 = vmul.f32 %v3049_v51, %v2278_v6  ;;  %v3095_v40 = vmul.f32 %v3054_v30, %v2279_v14  ;;  %v2031_v30 = vrot.slane %v2030_v53, 4  ;;  %v2045_v58 = vrot.slane %v2044_v55, 4 }
 0x650   : > { %v3130_v39 = vadd.f32 %v3095_v40, %v3094_v34  ;;  %v2032_v54 = vadd.f32 %v2031_v30, %v2030_v53  ;;  %v2026_v40 = vrot.slane %v2025_v56, 2  ;;  %v3126_v53 = vrot.slane %v3125_v22, 2 }
 0x651   : > { %v1970_v36 = vpop.permute.xlu1 %1969  ;;  %v1975_v3 = vpop.permute.xlu0 %1974 }
 0x652   : > { %v2015_v13 = vmul.f32 %v1970_v36, %v1187_v1  ;;  %v2016_v24 = vmul.f32 %v1975_v3, %v1188_v4  ;;  %v3131_v57 = vrot.slane %v3130_v39, 4  ;;  %v3114_v3 = vrot.slane %v3113_v42, 1 }
 0x653   : > { %v2046_v1 = vadd.f32 %v2045_v58, %v2044_v55 }
 0x654   : > { %v2051_v18 = vadd.f32 %v2016_v24, %v2015_v13  ;;  %v3115_v10 = vadd.f32 %v3114_v3, %v3113_v42 }
 0x655   : > { %v3059_v25 = vpop.permute.xlu1 %3058  ;;  %v3064_v17 = vpop.permute.xlu0 %3063 }
 0x656   : > { %v3096_v16 = vmul.f32 %v3059_v25, %v2280_v20  ;;  %v3097_v35 = vmul.f32 %v3064_v17, %v2281_v21  ;;  %v2052_v61 = vrot.slane %v2051_v18, 4  ;;  %v3132_v20 = vadd.f32 %v3131_v57, %v3130_v39 }
 0x657   : > { %v2033_v17 = vrot.slane %v2032_v54, 2  ;;  %v2047_v39 = vrot.slane %v2046_v1, 2 }
 0x658   : > { %v3137_v19 = vadd.f32 %v3097_v35, %v3096_v16  ;;  %v2053_v48 = vadd.f32 %v2052_v61, %v2051_v18  ;;  %v2284_v16 = vld [vmem:[#allocation4 + $0x70] sm:$0xff]  ;;  %v3133_v27 = vrot.slane %v3132_v20, 2  ;;  %v1194_v18 = vld [vmem:[#allocation2 + $0x78] sm:$0xff] }
 0x659   : > { %v1980_v59 = vpop.permute.xlu1 %1979  ;;  %v1985_v29 = vpop.permute.xlu0 %1984 }
 0x65a   : > { %v2017_v2 = vmul.f32 %v1980_v59, %v1189_v9  ;;  %v2018_v51 = vmul.f32 %v1985_v29, %v1190_v62  ;;  %v3138_v6 = vrot.slane %v3137_v19, 4  ;;  %v2285_v9 = vld [vmem:[#allocation4 + $0x78] sm:$0xff]  ;;  %v2027_v62 = vadd.f32 %v2026_v40, %v2025_v56 }
 0x65b   : > { %v2054_v30 = vrot.slane %v2053_v48, 2  ;;  %v2048_v56 = vadd.f32 %v2047_v39, %v2046_v1 }
 0x65c   : > { %v2058_v46 = vadd.f32 %v2018_v51, %v2017_v2  ;;  %v3139_v4 = vadd.f32 %v3138_v6, %v3137_v19  ;;  %v3210_v19 = vsel %vm1287_vm1, %v3115_v10, %v3108_v33  ;;  %v2034_v2 = vadd.f32 %v2033_v17, %v2032_v54 }
 0x65d   : > { %v3069_v14 = vpop.permute.xlu1 %3068  ;;  %v3074_v36 = vpop.permute.xlu0 %3073  ;;  %v3127_v51 = vadd.f32 %v3126_v53, %v3125_v22  ;;  %v2028_v54 = vrot.slane %v2027_v62, 1  ;;  %v2055_v22 = vadd.f32 %v2054_v30, %v2053_v48 }
 0x65e   : > { %v3098_v63 = vmul.f32 %v3069_v14, %v2282_v49  ;;  %v3099_v50 = vmul.f32 %v3074_v36, %v2283_v5  ;;  %v2059_v26 = vrot.slane %v2058_v46, 4  ;;  %v3140_v31 = vrot.slane %v3139_v4, 2 }
 0x65f   : > { %v3121_v49 = vrot.slane %v3120_v32, 1  ;;  %v3134_v5 = vadd.f32 %v3133_v27, %v3132_v20  ;;  %v3128_v28 = vrot.slane %v3127_v51, 1  ;;  %v2029_v10 = vadd.f32 %v2028_v54, %v2027_v62  ;;  %v3158_v27 = vld [vmem:[#allocation6] sm:$0xff] }
 0x660   : > { %v3144_v34 = vadd.f32 %v3099_v50, %v3098_v63  ;;  %v2060_v13 = vadd.f32 %v2059_v26, %v2058_v46  ;;  %v2041_v46 = vadd.f32 %v2040_v7, %v2039_v60  ;;  %v3141_v12 = vadd.f32 %v3140_v31, %v3139_v4 }
 0x661   : > { %v1990_v21 = vpop.permute.xlu1 %1989  ;;  %v1995_v45 = vpop.permute.xlu0 %1994  ;;  %v3122_v1 = vadd.f32 %v3121_v49, %v3120_v32  ;;  %v2049_v4 = vrot.slane %v2048_v56, 1 }
 0x662   : > { %v3145_v11 = vrot.slane %v3144_v34, 4  ;;  %v2019_v15 = vmul.f32 %v1990_v21, %v1191_v43  ;;  %v2020_v25 = vmul.f32 %v1995_v45, %v1192_v0  ;;  %v2061_v44 = vrot.slane %v2060_v13, 2 }
 0x663   : > { %v2035_v43 = vrot.slane %v2034_v2, 1  ;;  %v3135_v0 = vrot.slane %v3134_v5, 1  ;;  %v2042_v26 = vrot.slane %v2041_v46, 1  ;;  %v3211_v7 = vsel %vm1289_vm2, %v3122_v1, %v3210_v19  ;;  %v3269_v1 = vld [vmem:[%s6353_s18 + $0xd8] sm:$0xff] }
 0x664   : > { %v3146_v24 = vadd.f32 %v3145_v11, %v3144_v34  ;;  %v2065_v35 = vadd.f32 %v2020_v25, %v2019_v15  ;;  %v2062_v33 = vadd.f32 %v2061_v44, %v2060_v13  ;;  %v3142_v34 = vrot.slane %v3141_v12, 1 }
 0x665   : > { %v3079_v23 = vpop.permute.xlu1 %3078  ;;  %v3084_v55 = vpop.permute.xlu0 %3083  ;;  %v3129_v11 = vadd.f32 %v3128_v28, %v3127_v51  ;;  %v2056_v15 = vrot.slane %v2055_v22, 1  ;;  %v2036_v17 = vadd.f32 %v2035_v43, %v2034_v2  ;;  %v3136_v53 = vadd.f32 %v3135_v0, %v3134_v5 }
 0x666   : > { %v3147_v59 = vrot.slane %v3146_v24, 2  ;;  %v2066_v29 = vrot.slane %v2065_v35, 4  ;;  %v3100_v42 = vmul.f32 %v3079_v23, %v2284_v16  ;;  %v3101_v47 = vmul.f32 %v3084_v55, %v2285_v9 }
 0x667   : > { %v2063_v48 = vrot.slane %v2062_v33, 1  ;;  %v3143_v13 = vadd.f32 %v3142_v34, %v3141_v12  ;;  %v2050_v39 = vadd.f32 %v2049_v4, %v2048_v56  ;;  %v3212_v23 = vsel %vm1291_vm3, %v3129_v11, %v3211_v7  ;;  %v3255_v34 = vld [vmem:[%s6353_s18 + $0x68] sm:$0xff]  ;;  %v3253_v4 = vld [vmem:[%s6353_s18 + $0x58] sm:$0xff] }
 0x668   : > { %v2067_v57 = vadd.f32 %v2066_v29, %v2065_v35  ;;  %v3151_v58 = vadd.f32 %v3101_v47, %v3100_v42  ;;  %v3148_v36 = vadd.f32 %v3147_v59, %v3146_v24  ;;  %v2043_v24 = vadd.f32 %v2042_v26, %v2041_v46  ;;  %v3271_v26 = vld [vmem:[%s6353_s18 + $0xe8] sm:$0xff]  ;;  %v3245_v7 = vld [vmem:[%s6353_s18 + $0x18] sm:$0xff] }
 0x669   : > { %v2000_v6 = vpop.permute.xlu1 %1999  ;;  %v2005_v14 = vpop.permute.xlu0 %2004  ;;  %v2057_v62 = vadd.f32 %v2056_v15, %v2055_v22  ;;  %v3201_v59 = vsub.f32 1.0, %v3158_v27  ;;  %v3168_v29 = vsel %vm1287_vm1, %v2036_v17, %v2029_v10  ;;  %v2064_v42 = vadd.f32 %v2063_v48, %v2062_v33  ;;  %v3267_v10 = vld [vmem:[%s6353_s18 + $0xc8] sm:$0xff]  ;;  %v3266_v15 = vld [vmem:[%s6353_s18 + $0xc0] sm:$0xff]  ;;  %v3265_v17 = vld [vmem:[%s6353_s18 + $0xb8] sm:$0xff] }
 0x66a   : > { %v2068_v3 = vrot.slane %v2067_v57, 2  ;;  %v2021_v63 = vmul.f32 %v2000_v6, %v1193_v41  ;;  %v2022_v50 = vmul.f32 %v2005_v14, %v1194_v18  ;;  %v3152_v61 = vrot.slane %v3151_v58, 4  ;;  %v3251_v11 = vld [vmem:[%s6353_s18 + $0x48] sm:$0xff]  ;;  %v3264_v48 = vld [vmem:[%s6353_s18 + $0xb0] sm:$0xff] }
 0x66b   : > { %v3149_v21 = vrot.slane %v3148_v36, 1  ;;  %v3213_v51 = vsel %vm1293_vm4, %v3136_v53, %v3212_v23  ;;  %v3169_v30 = vsel %vm1289_vm2, %v2043_v24, %v3168_v29  ;;  %v3249_v53 = vld [vmem:[%s6353_s18 + $0x38] sm:$0xff]  ;;  %v3247_v24 = vld [vmem:[%s6353_s18 + $0x28] sm:$0xff] }
 0x66c   : > { %v2072_v20 = vadd.f32 %v2022_v50, %v2021_v63  ;;  %v2069_v40 = vadd.f32 %v2068_v3, %v2067_v57  ;;  %v3153_v60 = vadd.f32 %v3152_v61, %v3151_v58  ;;  %v3214_v19 = vsel %vm1295_vm5, %v3143_v13, %v3213_v51  ;;  %v3257_v3 = vld [vmem:[%s6353_s18 + $0x78] sm:$0xff]  ;;  %v3272_v63 = vld [vmem:[%s6353_s18 + $0xf0] sm:$0xff]  ;;  %v3262_v13 = vld [vmem:[%s6353_s18 + $0xa0] sm:$0xff] }
 0x66d   : > { %v3150_v32 = vadd.f32 %v3149_v21, %v3148_v36  ;;  %v3170_v18 = vsel %vm1291_vm3, %v2050_v39, %v3169_v30  ;;  %v3273_v36 = vld [vmem:[%s6353_s18 + $0xf8] sm:$0xff]  ;;  %v3256_v50 = vld [vmem:[%s6353_s18 + $0x70] sm:$0xff]  ;;  %v3243_v23 = vld [vmem:[%s6353_s18 + $0x8] sm:$0xff] }
 0x66e   : > { %v2073_v45 = vrot.slane %v2072_v20, 4  ;;  %v3154_v25 = vrot.slane %v3153_v60, 2  ;;  %v2070_v35 = vrot.slane %v2069_v40, 1  ;;  %v3171_v57 = vsel %vm1293_vm4, %v2057_v62, %v3170_v18  ;;  %4018 = vmatprep.subr.mxu0 %v3273_v36  ;;  %v3268_v21 = vld [vmem:[%s6353_s18 + $0xd0] sm:$0xff]  ;;  %v3258_v62 = vld [vmem:[%s6353_s18 + $0x80] sm:$0xff]  ;;  %v3411_v29 = vld [vmem:[%s6354_s19 + $0x1e8] sm:$0xff] }
 0x66f   : > { %v3215_v5 = vsel %vm1297_vm6, %v3150_v32, %v3214_v19  ;;  %v3172_v12 = vsel %vm1295_vm5, %v2064_v42, %v3171_v57  ;;  %4019 = vmatpush3.msra.mxu0 %v3257_v3  ;;  %v3260_v39 = vld [vmem:[%s6353_s18 + $0x90] sm:$0xff]  ;;  %3564 = vmatprep.subr.mxu1 %v3411_v29  ;;  %v3410_v42 = vld [vmem:[%s6354_s19 + $0x1e0] sm:$0xff]  ;;  %v3403_v30 = vld [vmem:[%s6354_s19 + $0x1a8] sm:$0xff] }
 0x670   : > { %v2074_v16 = vadd.f32 %v2073_v45, %v2072_v20  ;;  %v3155_v9 = vadd.f32 %v3154_v25, %v3153_v60  ;;  %v2071_v47 = vadd.f32 %v2070_v35, %v2069_v40  ;;  %4020 = vmatprep.subr.mxu0 %v3272_v63  ;;  %v3270_v40 = vld [vmem:[%s6353_s18 + $0xe0] sm:$0xff]  ;;  %v3252_v45 = vld [vmem:[%s6353_s18 + $0x50] sm:$0xff]  ;;  %3565 = vmatpush1.msra.mxu1 %v3410_v42  ;;  %v3395_v18 = vld [vmem:[%s6354_s19 + $0x168] sm:$0xff] }
 0x671   : > { %4021 = vmatpush3.msra.mxu0 %v3256_v50  ;;  %v3254_v60 = vld [vmem:[%s6353_s18 + $0x60] sm:$0xff]  ;;  %v3244_v32 = vld [vmem:[%s6353_s18 + $0x10] sm:$0xff]  ;;  %v3387_v57 = vld [vmem:[%s6354_s19 + $0x128] sm:$0xff] }
 0x672   : > { %v2075_v31 = vrot.slane %v2074_v16, 2  ;;  %v3156_v55 = vrot.slane %v3155_v9, 1  ;;  %v3173_v58 = vsel %vm1297_vm6, %v2071_v47, %v3172_v12  ;;  %4022 = vmatprep.subr.mxu0 %v3271_v26  ;;  %v3250_v25 = vld [vmem:[%s6353_s18 + $0x40] sm:$0xff]  ;;  %v3371_v3 = vld [vmem:[%s6354_s19 + $0xa8] sm:$0xff] }
 0x673   : > { %4023 = vmatpush3.msra.mxu0 %v3255_v34  ;;  %v3246_v35 = vld [vmem:[%s6353_s18 + $0x20] sm:$0xff]  ;;  %v3367_v50 = vld [vmem:[%s6354_s19 + $0x88] sm:$0xff] }
 0x674   : > { %v2076_v2 = vadd.f32 %v2075_v31, %v2074_v16  ;;  %v3157_v41 = vadd.f32 %v3156_v55, %v3155_v9  ;;  %4024 = vmatprep.subr.mxu0 %v3270_v40  ;;  %v3248_v16 = vld [vmem:[%s6353_s18 + $0x30] sm:$0xff]  ;;  %v3261_v9 = vld [vmem:[%s6353_s18 + $0x98] sm:$0xff]  ;;  %v3259_v31 = vld [vmem:[%s6353_s18 + $0x88] sm:$0xff] }
 0x675   : > { %4025 = vmatpush3.msra.mxu0 %v3254_v60  ;;  %v3242_v55 = vld [vmem:[%s6353_s18] sm:$0xff]  ;;  %v3351_v34 = vld [vmem:[%s6354_s19 + $0x8] sm:$0xff] }
 0x676   : > { %v2077_v49 = vrot.slane %v2076_v2, 1  ;;  %v3216_v44 = vsel %vm1299_vm7, %v3157_v41, %v3215_v5  ;;  %4026 = vmatprep.subr.mxu0 %v3269_v1  ;;  %v3406_v51 = vld [vmem:[%s6354_s19 + $0x1c0] sm:$0xff]  ;;  %v3399_v41 = vld [vmem:[%s6354_s19 + $0x188] sm:$0xff] }
 0x677   : > { %v3218_v56 = vmul.f32 %v3216_v44, %v3201_v59  ;;  %4027 = vmatpush3.msra.mxu0 %v3253_v4  ;;  %v3539_v59 = vld [vmem:[%s6354_s19 + $0x5e8] sm:$0xff]  ;;  %v3402_v47 = vld [vmem:[%s6354_s19 + $0x1a0] sm:$0xff] }
 0x678   : > { %v2078_v46 = vadd.f32 %v2077_v49, %v2076_v2  ;;  %4028 = vmatprep.subr.mxu0 %v3268_v21  ;;  %v3407_v2 = vld [vmem:[%s6354_s19 + $0x1c8] sm:$0xff]  ;;  %v3398_v19 = vld [vmem:[%s6354_s19 + $0x180] sm:$0xff] }
 0x679   : > { %3221 = vadd.xlane.f32.xlu1 %v3218_v56  ;;  %4029 = vmatpush3.msra.mxu0 %v3252_v45  ;;  %v3394_v49 = vld [vmem:[%s6354_s19 + $0x160] sm:$0xff]  ;;  %v3391_v5 = vld [vmem:[%s6354_s19 + $0x148] sm:$0xff] }
 0x67a   : > { %v3174_v6 = vsel %vm1299_vm7, %v2078_v46, %v3173_v58  ;;  %4030 = vmatprep.subr.mxu0 %v3267_v10  ;;  %3566 = vmatprep.subr.mxu1 %v3407_v2  ;;  %v3390_v44 = vld [vmem:[%s6354_s19 + $0x140] sm:$0xff]  ;;  %v3379_v58 = vld [vmem:[%s6354_s19 + $0xe8] sm:$0xff] }
 0x67b   : > { %v3176_v14 = vmul.f32 %v3174_v6, %v3158_v27  ;;  %4031 = vmatpush3.msra.mxu0 %v3251_v11  ;;  %v3263_v27 = vld [vmem:[%s6353_s18 + $0xa8] sm:$0xff]  ;;  %3567 = vmatpush1.msra.mxu1 %v3406_v51  ;;  %v3386_v46 = vld [vmem:[%s6354_s19 + $0x120] sm:$0xff] }
 0x67c   : > { %4032 = vmatprep.subr.mxu0 %v3266_v15  ;;  %3568 = vmatprep.subr.mxu1 %v3403_v30  ;;  %v3382_v12 = vld [vmem:[%s6354_s19 + $0x100] sm:$0xff]  ;;  %v3475_v60 = vld [vmem:[%s6354_s19 + $0x3e8] sm:$0xff] }
 0x67d   : > { %3179 = vadd.xlane.f32.xlu0 %v3176_v14  ;;  %4033 = vmatpush3.msra.mxu0 %v3250_v25  ;;  %v3378_v6 = vld [vmem:[%s6354_s19 + $0xe0] sm:$0xff]  ;;  %v3471_v4 = vld [vmem:[%s6354_s19 + $0x3c8] sm:$0xff] }
 0x67e   : > { %4034 = vmatprep.subr.mxu0 %v3265_v17  ;;  %3569 = vmatpush1.msra.mxu1 %v3402_v47  ;;  %v3374_v36 = vld [vmem:[%s6354_s19 + $0xc0] sm:$0xff]  ;;  %v3467_v45 = vld [vmem:[%s6354_s19 + $0x3a8] sm:$0xff] }
 0x67f   : > { %4035 = vmatpush3.msra.mxu0 %v3249_v53  ;;  %3570 = vmatprep.subr.mxu1 %v3399_v41  ;;  %v3370_v63 = vld [vmem:[%s6354_s19 + $0xa0] sm:$0xff]  ;;  %v3463_v11 = vld [vmem:[%s6354_s19 + $0x388] sm:$0xff] }
 0x680   : > { %4036 = vmatprep.subr.mxu0 %v3264_v48  ;;  %3571 = vmatpush1.msra.mxu1 %v3398_v19  ;;  %v3354_v26 = vld [vmem:[%s6354_s19 + $0x20] sm:$0xff]  ;;  %v3459_v25 = vld [vmem:[%s6354_s19 + $0x368] sm:$0xff] }
 0x681   : > { %4037 = vmatpush3.msra.mxu0 %v3248_v16  ;;  %3572 = vmatprep.subr.mxu1 %v3395_v18  ;;  %v3350_v40 = vld [vmem:[%s6354_s19] sm:$0xff]  ;;  %v3455_v53 = vld [vmem:[%s6354_s19 + $0x348] sm:$0xff] }
 0x682   : > { %4038 = vmatprep.subr.mxu0 %v3263_v27  ;;  %3573 = vmatpush1.msra.mxu1 %v3394_v49  ;;  %v3474_v1 = vld [vmem:[%s6354_s19 + $0x3e0] sm:$0xff]  ;;  %v3451_v16 = vld [vmem:[%s6354_s19 + $0x328] sm:$0xff] }
 0x683   : > { %4039 = vmatpush3.msra.mxu0 %v3247_v24  ;;  %3574 = vmatprep.subr.mxu1 %v3391_v5  ;;  %v3470_v21 = vld [vmem:[%s6354_s19 + $0x3c0] sm:$0xff]  ;;  %v3447_v24 = vld [vmem:[%s6354_s19 + $0x308] sm:$0xff] }
 0x684   : > { %4040 = vmatprep.subr.mxu0 %v3262_v13  ;;  %3575 = vmatpush1.msra.mxu1 %v3390_v44  ;;  %v3466_v10 = vld [vmem:[%s6354_s19 + $0x3a0] sm:$0xff] }
 0x685   : > { %4041 = vmatpush3.msra.mxu0 %v3246_v35  ;;  %3576 = vmatprep.subr.mxu1 %v3387_v57  ;;  %v3462_v15 = vld [vmem:[%s6354_s19 + $0x380] sm:$0xff]  ;;  %v3443_v35 = vld [vmem:[%s6354_s19 + $0x2e8] sm:$0xff] }
 0x686   : > { %4042 = vmatprep.subr.mxu0 %v3261_v9  ;;  %3577 = vmatpush1.msra.mxu1 %v3386_v46  ;;  %v3458_v17 = vld [vmem:[%s6354_s19 + $0x360] sm:$0xff] }
 0x687   : > { %4043 = vmatpush3.msra.mxu0 %v3245_v7  ;;  %v3454_v48 = vld [vmem:[%s6354_s19 + $0x340] sm:$0xff]  ;;  %v3439_v7 = vld [vmem:[%s6354_s19 + $0x2c8] sm:$0xff] }
 0x688   : > { %4044 = vmatprep.subr.mxu0 %v3260_v39  ;;  %v3450_v27 = vld [vmem:[%s6354_s19 + $0x320] sm:$0xff] }
 0x689   : > { %4045 = vmatpush3.msra.mxu0 %v3244_v32  ;;  %v3446_v13 = vld [vmem:[%s6354_s19 + $0x300] sm:$0xff]  ;;  %v3435_v32 = vld [vmem:[%s6354_s19 + $0x2a8] sm:$0xff] }
 0x68a   : > { %4046 = vmatprep.subr.mxu0 %v3259_v31  ;;  %v3442_v9 = vld [vmem:[%s6354_s19 + $0x2e0] sm:$0xff] }
 0x68b   : > { %4047 = vmatpush3.msra.mxu0 %v3243_v23  ;;  %v3438_v39 = vld [vmem:[%s6354_s19 + $0x2c0] sm:$0xff]  ;;  %v3431_v23 = vld [vmem:[%s6354_s19 + $0x288] sm:$0xff] }
 0x68c   : > { %4048 = vmatprep.subr.mxu0 %v3258_v62  ;;  %v3434_v31 = vld [vmem:[%s6354_s19 + $0x2a0] sm:$0xff] }
 0x68d   : > { %4049 = vmatpush3.msra.mxu0 %v3242_v55  ;;  %v3430_v62 = vld [vmem:[%s6354_s19 + $0x280] sm:$0xff] }
 0x68e   : > { %3635 = vmatprep.subr.mxu0 %v3539_v59  ;;  %v4011_v47 = vld [vmem:[%s6351_s16 + $0x1] ss:$0 sm:$0xff]  ;;  %v4009_v5 = vld [vmem:[%s6351_s16] ss:$0 sm:$0xff] }
 0x68f   : > { %v4012_v19 = vld [vmem:[%s6352_s17 + $0x1] ss:$0 sm:$0xff]  ;;  %v4010_v46 = vld [vmem:[%s6352_s17] ss:$0 sm:$0xff] }
 0x702   : > { %v3222_v54 = vpop.xlane.xlu1 %3221 }
 0x703   : > { %v3223_v28 = vmul.f32 0.0078125, %v3222_v54  ;;  %v3366_v54 = vld [vmem:[%s6354_s19 + $0x80] sm:$0xff] }
 0x705   : > { %v5619_v22 = vsub.f32 %v3218_v56, %v3223_v28  ;;  %v3383_v56 = vld [vmem:[%s6354_s19 + $0x108] sm:$0xff] }
 0x706   : > { %v3180_v61 = vpop.xlane.xlu0 %3179  ;;  %3578 = vmatprep.subr.mxu1 %v3383_v56  ;;  %v3363_v28 = vld [vmem:[%s6354_s19 + $0x68] sm:$0xff] }
 0x707   : > { %v3182_v43 = vmul.f32 0.0078125, %v3180_v61  ;;  %v3225_v0 = vmul.f32 %v5619_v22, %v5619_v22  ;;  %3579 = vmatpush1.msra.mxu1 %v3382_v12  ;;  %v3362_v61 = vld [vmem:[%s6354_s19 + $0x60] sm:$0xff] }
 0x708   : > { %3580 = vmatprep.subr.mxu1 %v3379_v58  ;;  %v3538_v12 = vld [vmem:[%s6354_s19 + $0x5e0] sm:$0xff]  ;;  %v3535_v58 = vld [vmem:[%s6354_s19 + $0x5c8] sm:$0xff] }
 0x709   : > { %v5623_v33 = vsub.f32 %v3176_v14, %v3182_v43  ;;  %3226 = vadd.xlane.f32.xlu0 %v3225_v0  ;;  %3581 = vmatpush1.msra.mxu1 %v3378_v6  ;;  %v3375_v14 = vld [vmem:[%s6354_s19 + $0xc8] sm:$0xff]  ;;  %v3358_v0 = vld [vmem:[%s6354_s19 + $0x40] sm:$0xff] }
 0x70a   : > { %3582 = vmatprep.subr.mxu1 %v3375_v14  ;;  %v3359_v43 = vld [vmem:[%s6354_s19 + $0x48] sm:$0xff]  ;;  %v4258_v14 = vmov 0.0  }
 0x70b   : > { %v3184_v20 = vmul.f32 %v5623_v33, %v5623_v33  ;;  %3583 = vmatpush1.msra.mxu1 %v3374_v36  ;;  %v3531_v6 = vld [vmem:[%s6354_s19 + $0x5a8] sm:$0xff]  ;;  %v3530_v36 = vld [vmem:[%s6354_s19 + $0x5a0] sm:$0xff] }
 0x70c   : > { %3584 = vmatprep.subr.mxu1 %v3371_v3  ;;  %v3527_v3 = vld [vmem:[%s6354_s19 + $0x588] sm:$0xff] }
 0x70d   : > { %3185 = vadd.xlane.f32.xlu1 %v3184_v20  ;;  %3585 = vmatpush1.msra.mxu1 %v3370_v63  ;;  %v3355_v20 = vld [vmem:[%s6354_s19 + $0x28] sm:$0xff]  ;;  %v3526_v63 = vld [vmem:[%s6354_s19 + $0x580] sm:$0xff] }
 0x70e   : > { %3586 = vmatprep.subr.mxu1 %v3367_v50  ;;  %v3523_v50 = vld [vmem:[%s6354_s19 + $0x568] sm:$0xff] }
 0x70f   : > { %3587 = vmatpush1.msra.mxu1 %v3366_v54  ;;  %v3522_v54 = vld [vmem:[%s6354_s19 + $0x560] sm:$0xff] }
 0x710   : > { %3588 = vmatprep.subr.mxu1 %v3363_v28  ;;  %v3519_v28 = vld [vmem:[%s6354_s19 + $0x548] sm:$0xff] }
 0x711   : > { %3589 = vmatpush1.msra.mxu1 %v3362_v61  ;;  %v3518_v61 = vld [vmem:[%s6354_s19 + $0x540] sm:$0xff] }
 0x712   : > { %3590 = vmatprep.subr.mxu1 %v3359_v43  ;;  %v3515_v43 = vld [vmem:[%s6354_s19 + $0x528] sm:$0xff] }
 0x713   : > { %3591 = vmatpush1.msra.mxu1 %v3358_v0  ;;  %v3514_v0 = vld [vmem:[%s6354_s19 + $0x520] sm:$0xff] }
 0x714   : > { %3592 = vmatprep.subr.mxu1 %v3355_v20  ;;  %v3511_v20 = vld [vmem:[%s6354_s19 + $0x508] sm:$0xff] }
 0x715   : > { %3593 = vmatpush1.msra.mxu1 %v3354_v26  ;;  %v3510_v26 = vld [vmem:[%s6354_s19 + $0x500] sm:$0xff] }
 0x716   : > { %3594 = vmatprep.subr.mxu1 %v3351_v34  ;;  %v3507_v34 = vld [vmem:[%s6354_s19 + $0x4e8] sm:$0xff] }
 0x717   : > { %3595 = vmatpush1.msra.mxu1 %v3350_v40  ;;  %v3506_v40 = vld [vmem:[%s6354_s19 + $0x4e0] sm:$0xff] }
 0x718   : > { %3596 = vmatprep.subr.mxu1 %v3475_v60  ;;  %v3503_v60 = vld [vmem:[%s6354_s19 + $0x4c8] sm:$0xff] }
 0x719   : > { %3597 = vmatpush2.msra.mxu1 %v3474_v1  ;;  %v3502_v1 = vld [vmem:[%s6354_s19 + $0x4c0] sm:$0xff] }
 0x71a   : > { %3598 = vmatprep.subr.mxu1 %v3471_v4  ;;  %v3499_v4 = vld [vmem:[%s6354_s19 + $0x4a8] sm:$0xff] }
 0x71b   : > { %3599 = vmatpush2.msra.mxu1 %v3470_v21  ;;  %v3498_v21 = vld [vmem:[%s6354_s19 + $0x4a0] sm:$0xff] }
 0x71c   : > { %3600 = vmatprep.subr.mxu1 %v3467_v45  ;;  %v3495_v45 = vld [vmem:[%s6354_s19 + $0x488] sm:$0xff] }
 0x71d   : > { %3601 = vmatpush2.msra.mxu1 %v3466_v10  ;;  %v3494_v10 = vld [vmem:[%s6354_s19 + $0x480] sm:$0xff] }
 0x71e   : > { %3602 = vmatprep.subr.mxu1 %v3463_v11  ;;  %v3491_v11 = vld [vmem:[%s6354_s19 + $0x468] sm:$0xff] }
 0x71f   : > { %3603 = vmatpush2.msra.mxu1 %v3462_v15  ;;  %v3490_v15 = vld [vmem:[%s6354_s19 + $0x460] sm:$0xff] }
 0x720   : > { %3604 = vmatprep.subr.mxu1 %v3459_v25  ;;  %v3487_v25 = vld [vmem:[%s6354_s19 + $0x448] sm:$0xff] }
 0x721   : > { %3605 = vmatpush2.msra.mxu1 %v3458_v17  ;;  %v3486_v17 = vld [vmem:[%s6354_s19 + $0x440] sm:$0xff] }
 0x722   : > { %3606 = vmatprep.subr.mxu1 %v3455_v53  ;;  %v3483_v53 = vld [vmem:[%s6354_s19 + $0x428] sm:$0xff] }
 0x723   : > { %3607 = vmatpush2.msra.mxu1 %v3454_v48  ;;  %v3482_v48 = vld [vmem:[%s6354_s19 + $0x420] sm:$0xff] }
 0x724   : > { %3608 = vmatprep.subr.mxu1 %v3451_v16  ;;  %v3479_v16 = vld [vmem:[%s6354_s19 + $0x408] sm:$0xff] }
 0x725   : > { %3609 = vmatpush2.msra.mxu1 %v3450_v27  ;;  %v3478_v27 = vld [vmem:[%s6354_s19 + $0x400] sm:$0xff] }
 0x726   : > { %3610 = vmatprep.subr.mxu1 %v3447_v24  ;;  %v3413_v24 = vld [vmem:[%s6354_s19 + $0x1f8] sm:$0xff] }
 0x727   : > { %3611 = vmatpush2.msra.mxu1 %v3446_v13  ;;  %v5996_v13 = vld [vmem:[%s6499_s27] sm:$0xff] }
 0x728   : > { %3612 = vmatprep.subr.mxu1 %v3443_v35  ;;  %v3412_v35 = vld [vmem:[%s6354_s19 + $0x1f0] sm:$0xff] }
 0x729   : > { %3613 = vmatpush2.msra.mxu1 %v3442_v9  ;;  %v3409_v9 = vld [vmem:[%s6354_s19 + $0x1d8] sm:$0xff] }
 0x72a   : > { %3614 = vmatprep.subr.mxu1 %v3439_v7  ;;  %v3408_v7 = vld [vmem:[%s6354_s19 + $0x1d0] sm:$0xff] }
 0x72b   : > { %3615 = vmatpush2.msra.mxu1 %v3438_v39  ;;  %v3405_v39 = vld [vmem:[%s6354_s19 + $0x1b8] sm:$0xff] }
 0x72c   : > { %3616 = vmatprep.subr.mxu1 %v3435_v32  ;;  %v3404_v32 = vld [vmem:[%s6354_s19 + $0x1b0] sm:$0xff] }
 0x72d   : > { %3617 = vmatpush2.msra.mxu1 %v3434_v31  ;;  %v3401_v31 = vld [vmem:[%s6354_s19 + $0x198] sm:$0xff] }
 0x72e   : > { %3618 = vmatprep.subr.mxu1 %v3431_v23  ;;  %v3400_v23 = vld [vmem:[%s6354_s19 + $0x190] sm:$0xff] }
 0x72f   : > { %3619 = vmatpush2.msra.mxu1 %v3430_v62  ;;  %v3397_v62 = vld [vmem:[%s6354_s19 + $0x178] sm:$0xff] }
 0x792   : > { %v3227_v55 = vpop.xlane.xlu0 %3226 }
 0x793   : > { %v3228_v59 = vmul.f32 0.0078125, %v3227_v55  ;;  %v3396_v55 = vld [vmem:[%s6354_s19 + $0x170] sm:$0xff] }
 0x795   : > { %v3229_v29 = vadd.f32 1e-06, %v3228_v59  ;;  %v3393_v59 = vld [vmem:[%s6354_s19 + $0x158] sm:$0xff] }
 0x796   : > { %v3186_v42 = vpop.xlane.xlu1 %3185 }
 0x797   : > { %v3187_v2 = vmul.f32 0.0078125, %v3186_v42  ;;  %4213 = vrsqrt.f32 %v3229_v29  ;;  %v3392_v29 = vld [vmem:[%s6354_s19 + $0x150] sm:$0xff]  ;;  %v3389_v42 = vld [vmem:[%s6354_s19 + $0x138] sm:$0xff] }
 0x799   : > { %v3188_v51 = vadd.f32 1e-06, %v3187_v2  ;;  %v3388_v2 = vld [vmem:[%s6354_s19 + $0x130] sm:$0xff] }
 0x79b   : > { %4215 = vrsqrt.f32 %v3188_v51  ;;  %v3385_v51 = vld [vmem:[%s6354_s19 + $0x118] sm:$0xff] }
 0x7a4   : > { %v4214_v30 = vpop.eup %4213 }
 0x7a5   : > { %v3231_v41 = vmul.f32 %v4214_v30, %v5619_v22  ;;  %v3384_v30 = vld [vmem:[%s6354_s19 + $0x110] sm:$0xff] }
 0x7a7   : > { %v3236_v49 = vmul.f32 %v4011_v47, %v3231_v41  ;;  %v3381_v47 = vld [vmem:[%s6354_s19 + $0xf8] sm:$0xff]  ;;  %v3380_v41 = vld [vmem:[%s6354_s19 + $0xf0] sm:$0xff] }
 0x7a8   : > { %v4216_v18 = vpop.eup %4215 }
 0x7a9   : > { %v3190_v44 = vmul.f32 %v4216_v18, %v5623_v33  ;;  %v3241_v57 = vadd.f32 %v4012_v19, %v3236_v49  ;;  %v3534_v33 = vld [vmem:[%s6354_s19 + $0x5c0] sm:$0xff]  ;;  %v3377_v19 = vld [vmem:[%s6354_s19 + $0xd8] sm:$0xff]  ;;  %v3376_v18 = vld [vmem:[%s6354_s19 + $0xd0] sm:$0xff] }
 0x7aa   : > { %v3373_v49 = vld [vmem:[%s6354_s19 + $0xb8] sm:$0xff] }
 0x7ab   : > { %v3195_v56 = vmul.f32 %v4009_v5, %v3190_v44  ;;  %3338 = vmatprep.mubr.f32.mxu0 %v3241_v57  ;;  %v3372_v5 = vld [vmem:[%s6354_s19 + $0xb0] sm:$0xff]  ;;  %v3369_v44 = vld [vmem:[%s6354_s19 + $0x98] sm:$0xff] }
 0x7ac   : > { %v3368_v57 = vld [vmem:[%s6354_s19 + $0x90] sm:$0xff] }
 0x7ad   : > { %v3200_v22 = vadd.f32 %v4010_v46, %v3195_v56  ;;  %v3365_v46 = vld [vmem:[%s6354_s19 + $0x78] sm:$0xff]  ;;  %v3364_v56 = vld [vmem:[%s6354_s19 + $0x70] sm:$0xff] }
 0x7af   : > { %3339 = vmatmul.mubr.f32.vlgmr.msra.gmra.mxu0 %v3200_v22  ;;  %v3361_v22 = vld [vmem:[%s6354_s19 + $0x58] sm:$0xff] }
 0x7b0   : > { %3636 = vmatpush1.msra.mxu0 %v3538_v12  ;;  %3699 = vmatprep.mubr.f32.mxu0 %v4258_v14  ;;  %v3360_v12 = vld [vmem:[%s6354_s19 + $0x50] sm:$0xff] }
 0x7b1   : > { %3637 = vmatprep.subr.mxu0 %v3535_v58  ;;  %v3357_v58 = vld [vmem:[%s6354_s19 + $0x38] sm:$0xff] }
 0x7b2   : > { %3638 = vmatpush1.msra.mxu0 %v3534_v33  ;;  %v3356_v33 = vld [vmem:[%s6354_s19 + $0x30] sm:$0xff] }
 0x7b3   : > { %3639 = vmatprep.subr.mxu0 %v3531_v6  ;;  %v3353_v6 = vld [vmem:[%s6354_s19 + $0x18] sm:$0xff] }
 0x7b4   : > { %3640 = vmatpush1.msra.mxu0 %v3530_v36  ;;  %v3352_v36 = vld [vmem:[%s6354_s19 + $0x10] sm:$0xff] }
 0x7b5   : > { %3641 = vmatprep.subr.mxu0 %v3527_v3  ;;  %v3477_v3 = vld [vmem:[%s6354_s19 + $0x3f8] sm:$0xff] }
 0x7b6   : > { %3642 = vmatpush1.msra.mxu0 %v3526_v63  ;;  %v3476_v63 = vld [vmem:[%s6354_s19 + $0x3f0] sm:$0xff] }
 0x7b7   : > { %3643 = vmatprep.subr.mxu0 %v3523_v50  ;;  %v3473_v50 = vld [vmem:[%s6354_s19 + $0x3d8] sm:$0xff] }
 0x7b8   : > { %3644 = vmatpush1.msra.mxu0 %v3522_v54  ;;  %v3472_v54 = vld [vmem:[%s6354_s19 + $0x3d0] sm:$0xff] }
 0x7b9   : > { %3645 = vmatprep.subr.mxu0 %v3519_v28  ;;  %v3427_v28 = vld [vmem:[%s6354_s19 + $0x268] sm:$0xff] }
 0x7ba   : > { %3646 = vmatpush1.msra.mxu0 %v3518_v61  ;;  %v3426_v61 = vld [vmem:[%s6354_s19 + $0x260] sm:$0xff]  ;;  %3620 = vmatprep.subr.mxu1 %v3427_v28  ;;  %v3516_v28 = vld [vmem:[%s6354_s19 + $0x530] sm:$0xff] }
 0x7bb   : > { %3647 = vmatprep.subr.mxu0 %v3515_v43  ;;  %v3469_v43 = vld [vmem:[%s6354_s19 + $0x3b8] sm:$0xff]  ;;  %3621 = vmatpush2.msra.mxu1 %v3426_v61 }
 0x7bc   : > { %3648 = vmatpush1.msra.mxu0 %v3514_v0  ;;  %v3468_v0 = vld [vmem:[%s6354_s19 + $0x3b0] sm:$0xff]  ;;  %v3513_v61 = vld [vmem:[%s6354_s19 + $0x518] sm:$0xff] }
 0x7bd   : > { %3649 = vmatprep.subr.mxu0 %v3511_v20  ;;  %v3465_v20 = vld [vmem:[%s6354_s19 + $0x398] sm:$0xff] }
 0x7be   : > { %3650 = vmatpush1.msra.mxu0 %v3510_v26  ;;  %v3464_v26 = vld [vmem:[%s6354_s19 + $0x390] sm:$0xff] }
 0x7bf   : > { %3651 = vmatprep.subr.mxu0 %v3507_v34  ;;  %v3461_v34 = vld [vmem:[%s6354_s19 + $0x378] sm:$0xff] }
 0x7c0   : > { %3652 = vmatpush1.msra.mxu0 %v3506_v40  ;;  %v3423_v40 = vld [vmem:[%s6354_s19 + $0x248] sm:$0xff] }
 0x7c1   : > { %3653 = vmatprep.subr.mxu0 %v3503_v60  ;;  %v3422_v60 = vld [vmem:[%s6354_s19 + $0x240] sm:$0xff]  ;;  %3622 = vmatprep.subr.mxu1 %v3423_v40  ;;  %v3501_v40 = vld [vmem:[%s6354_s19 + $0x4b8] sm:$0xff] }
 0x7c2   : > { %3654 = vmatpush1.msra.mxu0 %v3502_v1  ;;  %v3460_v1 = vld [vmem:[%s6354_s19 + $0x370] sm:$0xff]  ;;  %3623 = vmatpush2.msra.mxu1 %v3422_v60 }
 0x7c3   : > { %3655 = vmatprep.subr.mxu0 %v3499_v4  ;;  %v3419_v4 = vld [vmem:[%s6354_s19 + $0x228] sm:$0xff]  ;;  %v3500_v60 = vld [vmem:[%s6354_s19 + $0x4b0] sm:$0xff] }
 0x7c4   : > { %3656 = vmatpush1.msra.mxu0 %v3498_v21  ;;  %v3457_v21 = vld [vmem:[%s6354_s19 + $0x358] sm:$0xff]  ;;  %3624 = vmatprep.subr.mxu1 %v3419_v4  ;;  %v3496_v4 = vld [vmem:[%s6354_s19 + $0x490] sm:$0xff] }
 0x7c5   : > { %3657 = vmatprep.subr.mxu0 %v3495_v45  ;;  %v3418_v45 = vld [vmem:[%s6354_s19 + $0x220] sm:$0xff] }
 0x7c6   : > { %3658 = vmatpush1.msra.mxu0 %v3494_v10  ;;  %v3415_v10 = vld [vmem:[%s6354_s19 + $0x208] sm:$0xff]  ;;  %3625 = vmatpush2.msra.mxu1 %v3418_v45  ;;  %v3492_v45 = vld [vmem:[%s6354_s19 + $0x470] sm:$0xff] }
 0x7c7   : > { %3659 = vmatprep.subr.mxu0 %v3491_v11  ;;  %v3456_v11 = vld [vmem:[%s6354_s19 + $0x350] sm:$0xff]  ;;  %3626 = vmatprep.subr.mxu1 %v3415_v10  ;;  %v3489_v10 = vld [vmem:[%s6354_s19 + $0x458] sm:$0xff] }
 0x7c8   : > { %3660 = vmatpush1.msra.mxu0 %v3490_v15  ;;  %v3414_v15 = vld [vmem:[%s6354_s19 + $0x200] sm:$0xff] }
 0x7c9   : > { %3661 = vmatprep.subr.mxu0 %v3487_v25  ;;  %v3453_v25 = vld [vmem:[%s6354_s19 + $0x338] sm:$0xff]  ;;  %3627 = vmatpush2.msra.mxu1 %v3414_v15 }
 0x7ca   : > { %3662 = vmatpush1.msra.mxu0 %v3486_v17  ;;  %v983_v17 = vld [vmem:[%s6500_s1] sm:$0xff]  ;;  %v3485_v15 = vld [vmem:[%s6354_s19 + $0x438] sm:$0xff] }
 0x7cb   : > { %3663 = vmatprep.subr.mxu0 %v3483_v53  ;;  %v3452_v53 = vld [vmem:[%s6354_s19 + $0x330] sm:$0xff]  ;;  %3628 = vmatprep.mubr.f32.mxu1 %v983_v17 }
 0x7cc   : > { %3664 = vmatpush1.msra.mxu0 %v3482_v48  ;;  %v3449_v48 = vld [vmem:[%s6354_s19 + $0x318] sm:$0xff] }
 0x7cd   : > { %3665 = vmatprep.subr.mxu0 %v3479_v16  ;;  %v3541_v16 = vld [vmem:[%s6354_s19 + $0x5f8] sm:$0xff] }
 0x7ce   : > { %3666 = vmatpush1.msra.mxu0 %v3478_v27  ;;  %v3448_v27 = vld [vmem:[%s6354_s19 + $0x310] sm:$0xff]  ;;  %3777 = vmatprep.subr.mxu1 %v3541_v16 }
 0x7cf   : > { %3706 = vmatprep.subr.mxu0 %v3413_v24  ;;  %3700 = vmatmul.mubr.f32.vlgmr.msra.gmra.mxu0 %v5996_v13  ;;  %v3445_v24 = vld [vmem:[%s6354_s19 + $0x2f8] sm:$0xff] }
 0x7d0   : > { %3707 = vmatpush1.msra.mxu0 %v3412_v35  ;;  %3770 = vmatprep.mubr.f32.mxu0 %v983_v17  ;;  %v3444_v35 = vld [vmem:[%s6354_s19 + $0x2f0] sm:$0xff]  ;;  %v3481_v17 = vld [vmem:[%s6354_s19 + $0x418] sm:$0xff] }
 0x7d1   : > { %3708 = vmatprep.subr.mxu0 %v3409_v9  ;;  %v3441_v9 = vld [vmem:[%s6354_s19 + $0x2d8] sm:$0xff] }
 0x7d2   : > { %3709 = vmatpush1.msra.mxu0 %v3408_v7  ;;  %v3440_v7 = vld [vmem:[%s6354_s19 + $0x2d0] sm:$0xff] }
 0x7d3   : > { %3710 = vmatprep.subr.mxu0 %v3405_v39  ;;  %v3437_v39 = vld [vmem:[%s6354_s19 + $0x2b8] sm:$0xff] }
 0x7d4   : > { %3711 = vmatpush1.msra.mxu0 %v3404_v32  ;;  %v3436_v32 = vld [vmem:[%s6354_s19 + $0x2b0] sm:$0xff] }
 0x7d5   : > { %3712 = vmatprep.subr.mxu0 %v3401_v31  ;;  %v3433_v31 = vld [vmem:[%s6354_s19 + $0x298] sm:$0xff] }
 0x7d6   : > { %3713 = vmatpush1.msra.mxu0 %v3400_v23  ;;  %v3432_v23 = vld [vmem:[%s6354_s19 + $0x290] sm:$0xff] }
 0x7d7   : > { %3714 = vmatprep.subr.mxu0 %v3397_v62  ;;  %v3429_v62 = vld [vmem:[%s6354_s19 + $0x278] sm:$0xff] }
 0x7d8   : > { %3715 = vmatpush1.msra.mxu0 %v3396_v55  ;;  %v3428_v55 = vld [vmem:[%s6354_s19 + $0x270] sm:$0xff] }
 0x7d9   : > { %3716 = vmatprep.subr.mxu0 %v3393_v59  ;;  %v3425_v59 = vld [vmem:[%s6354_s19 + $0x258] sm:$0xff] }
 0x7da   : > { %3717 = vmatpush1.msra.mxu0 %v3392_v29  ;;  %v3424_v29 = vld [vmem:[%s6354_s19 + $0x250] sm:$0xff] }
 0x7db   : > { %3718 = vmatprep.subr.mxu0 %v3389_v42  ;;  %v3421_v42 = vld [vmem:[%s6354_s19 + $0x238] sm:$0xff] }
 0x7dc   : > { %3719 = vmatpush1.msra.mxu0 %v3388_v2  ;;  %v3420_v2 = vld [vmem:[%s6354_s19 + $0x230] sm:$0xff] }
 0x7dd   : > { %3720 = vmatprep.subr.mxu0 %v3385_v51  ;;  %v3417_v51 = vld [vmem:[%s6354_s19 + $0x218] sm:$0xff] }
 0x7de   : > { %3721 = vmatpush1.msra.mxu0 %v3384_v30  ;;  %v3416_v30 = vld [vmem:[%s6354_s19 + $0x210] sm:$0xff] }
 0x7df   : > { %3722 = vmatprep.subr.mxu0 %v3381_v47  ;;  %v3159_v47 = vld [vmem:[#allocation6 + $0x8] sm:$0xff] }
 0x7e0   : > { %3723 = vmatpush1.msra.mxu0 %v3380_v41 }
 0x7e1   : > { %3724 = vmatprep.subr.mxu0 %v3377_v19  ;;  %v984_v19 = vld [vmem:[%s6501_s7] sm:$0xff] }
 0x7e2   : > { %3725 = vmatpush1.msra.mxu0 %v3376_v18  ;;  %v3345_v18 = vsub.f32 1.0, %v3159_v47 }
 0x7e3   : > { %3726 = vmatprep.subr.mxu0 %v3373_v49 }
 0x7e4   : > { %3727 = vmatpush1.msra.mxu0 %v3372_v5 }
 0x7e5   : > { %3728 = vmatprep.subr.mxu0 %v3369_v44  ;;  %v3344_v44 = vmul.f32 %v3159_v47, %v984_v19 }
 0x7e6   : > { %3729 = vmatpush1.msra.mxu0 %v3368_v57 }
 0x7e7   : > { %3730 = vmatprep.subr.mxu0 %v3365_v46 }
 0x7e8   : > { %3731 = vmatpush1.msra.mxu0 %v3364_v56  ;;  %v3540_v56 = vld [vmem:[%s6354_s19 + $0x5f0] sm:$0xff] }
 0x7e9   : > { %3732 = vmatprep.subr.mxu0 %v3361_v22  ;;  %v3537_v22 = vld [vmem:[%s6354_s19 + $0x5d8] sm:$0xff] }
 0x7ea   : > { %3733 = vmatpush1.msra.mxu0 %v3360_v12  ;;  %v3536_v12 = vld [vmem:[%s6354_s19 + $0x5d0] sm:$0xff] }
 0x7eb   : > { %3734 = vmatprep.subr.mxu0 %v3357_v58  ;;  %v3533_v58 = vld [vmem:[%s6354_s19 + $0x5b8] sm:$0xff] }
 0x7ec   : > { %3735 = vmatpush1.msra.mxu0 %v3356_v33  ;;  %v3532_v33 = vld [vmem:[%s6354_s19 + $0x5b0] sm:$0xff] }
 0x7ed   : > { %3736 = vmatprep.subr.mxu0 %v3353_v6  ;;  %v3529_v6 = vld [vmem:[%s6354_s19 + $0x598] sm:$0xff] }
 0x7ee   : > { %3737 = vmatpush1.msra.mxu0 %v3352_v36  ;;  %v3528_v36 = vld [vmem:[%s6354_s19 + $0x590] sm:$0xff] }
 0x7ef   : > { %3738 = vmatprep.subr.mxu0 %v3477_v3  ;;  %v3524_v3 = vld [vmem:[%s6354_s19 + $0x570] sm:$0xff] }
 0x7f0   : > { %3739 = vmatpush2.msra.mxu0 %v3476_v63  ;;  %v3521_v63 = vld [vmem:[%s6354_s19 + $0x558] sm:$0xff] }
 0x7f1   : > { %3740 = vmatprep.subr.mxu0 %v3473_v50  ;;  %v3520_v50 = vld [vmem:[%s6354_s19 + $0x550] sm:$0xff] }
 0x7f2   : > { %3741 = vmatpush2.msra.mxu0 %v3472_v54  ;;  %v3517_v54 = vld [vmem:[%s6354_s19 + $0x538] sm:$0xff] }
 0x7f3   : > { %3742 = vmatprep.subr.mxu0 %v3469_v43  ;;  %v3512_v43 = vld [vmem:[%s6354_s19 + $0x510] sm:$0xff] }
 0x7f4   : > { %3743 = vmatpush2.msra.mxu0 %v3468_v0  ;;  %v3509_v0 = vld [vmem:[%s6354_s19 + $0x4f8] sm:$0xff] }
 0x7f5   : > { %3744 = vmatprep.subr.mxu0 %v3465_v20  ;;  %v3508_v20 = vld [vmem:[%s6354_s19 + $0x4f0] sm:$0xff] }
 0x7f6   : > { %3745 = vmatpush2.msra.mxu0 %v3464_v26  ;;  %v3505_v26 = vld [vmem:[%s6354_s19 + $0x4d8] sm:$0xff] }
 0x7f7   : > { %3746 = vmatprep.subr.mxu0 %v3461_v34  ;;  %v3504_v34 = vld [vmem:[%s6354_s19 + $0x4d0] sm:$0xff] }
 0x7f8   : > { %3747 = vmatpush2.msra.mxu0 %v3460_v1  ;;  %v3497_v1 = vld [vmem:[%s6354_s19 + $0x498] sm:$0xff] }
 0x7f9   : > { %3748 = vmatprep.subr.mxu0 %v3457_v21  ;;  %v3493_v21 = vld [vmem:[%s6354_s19 + $0x478] sm:$0xff] }
 0x7fa   : > { %3749 = vmatpush2.msra.mxu0 %v3456_v11  ;;  %v3488_v11 = vld [vmem:[%s6354_s19 + $0x450] sm:$0xff] }
 0x7fb   : > { %3750 = vmatprep.subr.mxu0 %v3453_v25  ;;  %v3484_v25 = vld [vmem:[%s6354_s19 + $0x430] sm:$0xff] }
 0x7fc   : > { %3751 = vmatpush2.msra.mxu0 %v3452_v53  ;;  %v3480_v53 = vld [vmem:[%s6354_s19 + $0x410] sm:$0xff] }
 0x7fd   : > { %3752 = vmatprep.subr.mxu0 %v3449_v48  ;;  %v3542_v48 = vld [vmem:[%s6502_s22] sm:$0xf] }
 0x7fe   : > { %3753 = vmatpush2.msra.mxu0 %v3448_v27  ;;  %v3547_v16 = vrot.slane %v3542_v48, %v4637_v38  ;;  %v3551_v27 = vrot.slane %v3542_v48, %v4663_v8  ;;  %v3559_v8 = vrot.slane %v3542_v48, %v4967_v52 }
 0x7ff   : > { %3754 = vmatprep.subr.mxu0 %v3445_v24 }
 0x800   : > { %3755 = vmatpush2.msra.mxu0 %v3444_v35 }
 0x801   : > { %3756 = vmatprep.subr.mxu0 %v3441_v9 }
 0x802   : > { %3757 = vmatpush2.msra.mxu0 %v3440_v7 }
 0x803   : > { %3758 = vmatprep.subr.mxu0 %v3437_v39 }
 0x804   : > { %3759 = vmatpush2.msra.mxu0 %v3436_v32 }
 0x805   : > { %3760 = vmatprep.subr.mxu0 %v3433_v31 }
 0x806   : > { %3761 = vmatpush2.msra.mxu0 %v3432_v23 }
 0x807   : > { %3762 = vmatprep.subr.mxu0 %v3429_v62 }
 0x808   : > { %3763 = vmatpush2.msra.mxu0 %v3428_v55 }
 0x809   : > { %3764 = vmatprep.subr.mxu0 %v3425_v59 }
 0x80a   : > { %3765 = vmatpush2.msra.mxu0 %v3424_v29 }
 0x80b   : > { %3766 = vmatprep.subr.mxu0 %v3421_v42  ;;  %v3555_v42 = vrot.slane %v3542_v48, %v4942_v37  ;;  %v3349_v37 = vld [vmem:[%s6503_s29] sm:$0xff] }
 0x80c   : > { %3767 = vmatpush2.msra.mxu0 %v3420_v2 }
 0x80d   : > { %3768 = vmatprep.subr.mxu0 %v3417_v51 }
 0x80e   : > { %3769 = vmatpush2.msra.mxu0 %v3416_v30 }
 0x86f   : > { %v4050_v41 = vpop.f32.mrf.mxu0 }
 0x871   : > { %v4051_v49 = vpop.f32.mrf.mxu0 }
 0x872   : > { %v4052_v5 = vadd.f32 %v4051_v49, %v4050_v41 }
 0x874   : > { %v3346_v57 = vmul.f32 %v4052_v5, %v3345_v18 }
 0x876   : > { %v3347_v46 = vadd.f32 %v3346_v57, %v3344_v44 }
 0x878   : > { %3629 = vmatmul.mubr.f32.vlgmr.msra.gmra.mxu1 %v3347_v46  ;;  %3771 = vmatmul.mubr.f32.vlgmr.msra.gmra.mxu0 %v3347_v46 }
 0x879   : > { %3778 = vmatpush1.msra.mxu1 %v3540_v56  ;;  %3841 = vmatprep.mubr.f32.mxu1 %v4258_v14  ;;  %v3525_v14 = vld [vmem:[%s6354_s19 + $0x578] sm:$0xff] }
 0x87a   : > { %3779 = vmatprep.subr.mxu1 %v3537_v22 }
 0x87b   : > { %3780 = vmatpush1.msra.mxu1 %v3536_v12 }
 0x87c   : > { %3781 = vmatprep.subr.mxu1 %v3533_v58 }
 0x87d   : > { %3782 = vmatpush1.msra.mxu1 %v3532_v33 }
 0x87e   : > { %3783 = vmatprep.subr.mxu1 %v3529_v6 }
 0x87f   : > { %3784 = vmatpush1.msra.mxu1 %v3528_v36 }
 0x880   : > { %3785 = vmatprep.subr.mxu1 %v3525_v14 }
 0x881   : > { %3786 = vmatpush1.msra.mxu1 %v3524_v3 }
 0x882   : > { %3787 = vmatprep.subr.mxu1 %v3521_v63 }
 0x883   : > { %3788 = vmatpush1.msra.mxu1 %v3520_v50 }
 0x884   : > { %3789 = vmatprep.subr.mxu1 %v3517_v54 }
 0x885   : > { %3790 = vmatpush1.msra.mxu1 %v3516_v28 }
 0x886   : > { %3791 = vmatprep.subr.mxu1 %v3513_v61 }
 0x887   : > { %3792 = vmatpush1.msra.mxu1 %v3512_v43 }
 0x888   : > { %3793 = vmatprep.subr.mxu1 %v3509_v0 }
 0x889   : > { %3794 = vmatpush1.msra.mxu1 %v3508_v20 }
 0x88a   : > { %3795 = vmatprep.subr.mxu1 %v3505_v26 }
 0x88b   : > { %3796 = vmatpush1.msra.mxu1 %v3504_v34 }
 0x88c   : > { %3797 = vmatprep.subr.mxu1 %v3501_v40 }
 0x88d   : > { %3798 = vmatpush1.msra.mxu1 %v3500_v60 }
 0x88e   : > { %3799 = vmatprep.subr.mxu1 %v3497_v1 }
 0x88f   : > { %3800 = vmatpush1.msra.mxu1 %v3496_v4  ;;  %v3701_v24 = vpop.f32.mrf.mxu0 }
 0x890   : > { %3801 = vmatprep.subr.mxu1 %v3493_v21 }
 0x891   : > { %3802 = vmatpush1.msra.mxu1 %v3492_v45  ;;  %v3703_v32 = vpop.f32.mrf.mxu0 }
 0x892   : > { %3803 = vmatprep.subr.mxu1 %v3489_v10 }
 0x893   : > { %3804 = vmatpush1.msra.mxu1 %v3488_v11 }
 0x894   : > { %3805 = vmatprep.subr.mxu1 %v3485_v15 }
 0x895   : > { %3806 = vmatpush1.msra.mxu1 %v3484_v25 }
 0x896   : > { %3807 = vmatprep.subr.mxu1 %v3481_v17 }
 0x897   : > { %3808 = vmatpush1.msra.mxu1 %v3480_v53 }
 0x898   : > { %3842 = vmatmul.mubr.f32.vlgmr.msra.gmra.mxu1 %v5996_v13 }
 0x938   : > { %v3630_v35 = vpop.f32.mrf.mxu1  ;;  %v3772_v59 = vpop.f32.mrf.mxu0 }
 0x939   : > { %v3631_v9 = vadd.f32 %v3630_v35, %v3547_v16  ;;  %v3773_v30 = vadd.f32 %v3772_v59, %v3555_v42 }
 0x93a   : > { %v3632_v7 = vpop.f32.mrf.mxu1  ;;  %v3774_v51 = vpop.f32.mrf.mxu0 }
 0x93b   : > { %v3633_v39 = vadd.f32 %v3632_v7, %v3551_v27  ;;  %v3702_v23 = vadd.f32 %v3701_v24, %v3631_v9  ;;  %v3775_v41 = vadd.f32 %v3774_v51, %v3559_v8 }
 0x93d   : > { %v3704_v31 = vadd.f32 %v3703_v32, %v3633_v39  ;;  %v4013_v55 = vmul.f32 -1.442695, %v3702_v23 }
 0x93f   : > { %v4014_v62 = vmul.f32 -1.442695, %v3704_v31 }
 0x941   : > { %4217 = vpow2.f32 %v4014_v62 }
 0x942   : > { %4219 = vpow2.f32 %v4013_v55 }
 0x94e   : > { %v4218_v13 = vpop.eup %4217 }
 0x94f   : > { %v4220_v29 = vpop.eup %4219  ;;  %v3855_v38 = vadd.f32 1.0, %v4218_v13 }
 0x950   : > { %v3854_v2 = vadd.f32 1.0, %v4220_v29 }
 0x951   : > { %4221 = vrcp.f32 %v3855_v38 }
 0x952   : > { %4223 = vrcp.f32 %v3854_v2 }
 0x958   : > { %v3843_v47 = vpop.f32.mrf.mxu1 }
 0x959   : > { %v3844_v19 = vadd.f32 %v3843_v47, %v3773_v30 }
 0x95a   : > { %v3845_v18 = vpop.f32.mrf.mxu1 }
 0x95b   : > { %4225 = vtanh.f32 %v3844_v19  ;;  %v3846_v49 = vadd.f32 %v3845_v18, %v3775_v41 }
 0x95d   : > { %v4015_v5 = vmul.f32 -1.442695, %v3846_v49 }
 0x95e   : > { %v4222_v44 = vpop.eup %4221 }
 0x95f   : > { %4227 = vpow2.f32 %v4015_v5  ;;  %v4224_v57 = vpop.eup %4223  ;;  %v3867_v46 = vmul.f32 %v4222_v44, %v3349_v37 }
 0x968   : > { %v4226_v52 = vpop.eup %4225 }
 0x969   : > { %v3868_v56 = vmul.f32 %v4226_v52, %v4224_v57 }
 0x96b   : > { %v3869_v22 = vadd.f32 %v3868_v56, %v3867_v46 }
 0x96c   : > { %v4228_v12 = vpop.eup %4227 }
 0x96d   : > { %3873 = vst [vmem:[%s6504_s4] sm:$0xff] %v3869_v22  ;;  %v3864_v58 = vadd.f32 1.0, %v4228_v12  ;;  %4229 = vtanh.f32 %v3869_v22 }
 0x96f   : > { %4231 = vrcp.f32 %v3864_v58 }
 0x97a   : > { %v4230_v33 = vpop.eup %4229 }
 0x97c   : > { %v4232_v6 = vpop.eup %4231 }
 0x97d   : > { %v3871_v36 = vmul.f32 %v4232_v6, %v4230_v33 }
 0x97f   : > { %3872 = vst [vmem:[%s6505_s6] sm:$0xff] %v3871_v36 }
 0x980 PF: > { %s6506_s23 = sld [smem:[#allocation10_spill]] }
 0x986   : > { %s39_s0 = sadd.s32 1, %s6506_s23  }
 0x987   : > { %p36_p1 = scmp.ge.s32.totalorder %s39_s0, 10  }
 0x989   :  { %38 = sbr.rel (!%p36_p1) target bundleno = 35 (0x23), region = 155 }

</bundles_post_ra>
